<compile_context>
chip_gen: v5e
topology: v5e:2x2
jax: 0.10.0
libtpu: 0.0.40
codegen_flags: <defaults>
</compile_context>

<pallas_src>
import numpy as np
import jax
import jax.numpy as jnp
from jax.experimental import pallas as pl
from jax.experimental.pallas import tpu as pltpu

LAYER_DIMS = [784, 1000, 500, 250, 100, 50]   # l1..l5
NUM_CLASSES = 10
ATT_HIDDEN = 50
WEIGHT_DTYPE = jnp.bfloat16                   # big Linear weights travel as bf16


def _linear(h, w_ref, b_ref):
    """y = h @ W + b with f32 accumulation; h is cast to the weight dtype."""
    w = w_ref[...]
    return (jnp.dot(h.astype(w.dtype), w, preferred_element_type=jnp.float32)
            + b_ref[...].astype(jnp.float32))


def iadm_kernel(x_ref,
                w1, b1, w2_hbm, b2, w3_hbm, b3, w4_hbm, b4, w5_hbm, b5,   # llist
                fw1, fb1, fw2, fb2, fw3, fb3, fw4, fb4, fw5, fb5,         # flist
                aw1, ab1, aw2, ab2, aw3, ab3,                             # AttentionNet
                ens_ref, att_ref,
                w2_v, w3_v, w4_v, w5_v, sems):
    # Stage later-layer weights from HBM while layer 1 computes.  Each weight
    # is consumed exactly once, so a single staging buffer per layer suffices
    # (no double buffering needed).
    cp2 = pltpu.make_async_copy(w2_hbm, w2_v, sems.at[0])
    cp3 = pltpu.make_async_copy(w3_hbm, w3_v, sems.at[1])
    cp4 = pltpu.make_async_copy(w4_hbm, w4_v, sems.at[2])
    cp5 = pltpu.make_async_copy(w5_hbm, w5_v, sems.at[3])
    cp2.start(); cp3.start(); cp4.start(); cp5.start()

    def attention(o):                                            # o: (rows, 10)
        h = jnp.maximum(_linear(o, aw1, ab1), 0.0)
        h = jnp.maximum(_linear(h, aw2, ab2), 0.0)
        return _linear(h, aw3, ab3)                              # (rows, 1)

    x = x_ref[...].astype(jnp.float32)

    temp = jnp.maximum(_linear(x, w1, b1), 0.0)
    o1 = _linear(temp, fw1, fb1)
    cp2.wait()
    temp = jnp.maximum(_linear(temp, w2_v, b2), 0.0)
    o2 = _linear(temp, fw2, fb2)
    cp3.wait()
    temp = jnp.maximum(_linear(temp, w3_v, b3), 0.0)
    o3 = _linear(temp, fw3, fb3)
    cp4.wait()
    temp = jnp.maximum(_linear(temp, w4_v, b4), 0.0)
    o4 = _linear(temp, fw4, fb4)
    cp5.wait()
    temp = jnp.maximum(_linear(temp, w5_v, b5), 0.0)
    o5 = _linear(temp, fw5, fb5)

    # Batched attention: one (5, 10) pass instead of five (1, 10) passes.
    o_stack = jnp.concatenate([o1, o2, o3, o4, o5], axis=0)      # (5, 10)
    alphas = attention(o_stack)                                  # (5, 1) column

    # sklearn MinMaxScaler.fit_transform over the (5, 1) column of scalars:
    # (x - min) / range, with zero range replaced by 1.
    amin = jnp.min(alphas, axis=0, keepdims=True)
    amax = jnp.max(alphas, axis=0, keepdims=True)
    rng = amax - amin
    rng = jnp.where(rng == 0.0, 1.0, rng)
    scaled = (alphas - amin) / rng

    # softmax over the 5 attention weights
    scaled = scaled - jnp.max(scaled, axis=0, keepdims=True)
    e = jnp.exp(scaled)
    w = e / jnp.sum(e, axis=0, keepdims=True)                    # (5, 1)

    att_ref[...] = w
    # Ensemble: fused multiply + sublane reduce over the stacked o tensor
    # (equivalent to the (1,5) @ (5,10) combine).
    ens_ref[...] = jnp.sum(w * o_stack, axis=0, keepdims=True)   # (1, 10)


def init_params(key):
    """PyTorch nn.Linear default init: U(-1/sqrt(fan_in), +1/sqrt(fan_in))."""
    def linear(k, fan_in, fan_out):
        kw, kb = jax.random.split(k)
        bound = 1.0 / np.sqrt(fan_in)
        w = jax.random.uniform(kw, (fan_in, fan_out), jnp.float32, -bound, bound)
        b = jax.random.uniform(kb, (1, fan_out), jnp.float32, -bound, bound)
        return w, b

    keys = jax.random.split(key, 13)
    params = {"l": [], "f": [], "att": []}
    for i in range(5):                                   # l1..l5
        params["l"].append(linear(keys[i], LAYER_DIMS[i], LAYER_DIMS[i + 1]))
    for i in range(5):                                   # f1..f5
        params["f"].append(linear(keys[5 + i], LAYER_DIMS[i + 1], NUM_CLASSES))
    params["att"].append(linear(keys[10], NUM_CLASSES, ATT_HIDDEN))
    params["att"].append(linear(keys[11], ATT_HIDDEN, ATT_HIDDEN))
    params["att"].append(linear(keys[12], ATT_HIDDEN, 1))
    return params


def prepare_params(params):
    """Cast the large l/f Linear weights to bf16 (halves HBM->VMEM traffic).
    Biases and the tiny AttentionNet stay f32 for accuracy; it costs nothing."""
    prepped = {"l": [], "f": [], "att": []}
    for w, b in params["l"]:
        prepped["l"].append((w.astype(WEIGHT_DTYPE), b))
    for w, b in params["f"]:
        prepped["f"].append((w.astype(WEIGHT_DTYPE), b))
    for w, b in params["att"]:
        prepped["att"].append((w, b))
    return prepped


def iadm_forward(x, params):
    xf = x.reshape(-1, 784).astype(jnp.float32)          # x.view(-1, 784)
    assert xf.shape[0] == 1, "IADM_NET forward is only well-defined for batch == 1"

    args = [xf]
    for group in ("l", "f", "att"):
        for w, b in params[group]:
            args.extend([w, b])

    vmem = pl.BlockSpec(memory_space=pltpu.MemorySpace.VMEM)
    hbm = pl.BlockSpec(memory_space=pl.ANY)
    in_specs = [vmem] * len(args)
    # w2, w3, w4, w5 stay in HBM; the kernel stages them itself so those DMAs
    # overlap layer-1 compute instead of being exposed before the body starts.
    for pos in (3, 5, 7, 9):
        in_specs[pos] = hbm

    flops = 2 * sum(LAYER_DIMS[i] * LAYER_DIMS[i + 1] for i in range(5))
    flops += 2 * sum(LAYER_DIMS[i + 1] * NUM_CLASSES for i in range(5))
    flops += 2 * 5 * (NUM_CLASSES * ATT_HIDDEN + ATT_HIDDEN * ATT_HIDDEN + ATT_HIDDEN)
    bytes_accessed = sum(int(np.prod(a.shape)) * a.dtype.itemsize for a in args)

    ens, att = pl.pallas_call(
        iadm_kernel,
        out_shape=(jax.ShapeDtypeStruct((1, NUM_CLASSES), jnp.float32),
                   jax.ShapeDtypeStruct((5, 1), jnp.float32)),
        in_specs=in_specs,
        out_specs=(vmem, vmem),
        scratch_shapes=[
            pltpu.VMEM((LAYER_DIMS[1], LAYER_DIMS[2]), WEIGHT_DTYPE),   # w2
            pltpu.VMEM((LAYER_DIMS[2], LAYER_DIMS[3]), WEIGHT_DTYPE),   # w3
            pltpu.VMEM((LAYER_DIMS[3], LAYER_DIMS[4]), WEIGHT_DTYPE),   # w4
            pltpu.VMEM((LAYER_DIMS[4], LAYER_DIMS[5]), WEIGHT_DTYPE),   # w5
            pltpu.SemaphoreType.DMA((4,)),
        ],
        compiler_params=pltpu.CompilerParams(vmem_limit_bytes=32 << 20),
        cost_estimate=pl.CostEstimate(flops=flops, transcendentals=5,
                                      bytes_accessed=bytes_accessed),
    )(*args)
    return ens, att.reshape(-1)                           # Ensemble_prob (1,10), Att_weight (5,)


def iadm_reference(x, params):
    """Pure-JAX reference of the same forward pass (same bf16-at-dot math)."""
    xf = x.reshape(-1, 784).astype(jnp.float32)

    def lin(h, wb):
        w, b = wb
        return (jnp.dot(h.astype(w.dtype), w, preferred_element_type=jnp.float32)
                + b.astype(jnp.float32))

    def att_net(o):
        h = jax.nn.relu(lin(o, params["att"][0]))
        h = jax.nn.relu(lin(h, params["att"][1]))
        return lin(h, params["att"][2])

    temp = xf
    outputs, alphas = [], []
    for i in range(5):
        temp = jax.nn.relu(lin(temp, params["l"][i]))
        o = lin(temp, params["f"][i])
        outputs.append(o)
        alphas.append(att_net(o)[0, 0])
    a = jnp.stack(alphas)
    rng = jnp.where(a.max() - a.min() == 0.0, 1.0, a.max() - a.min())
    scaled = (a - a.min()) / rng
    w = jax.nn.softmax(scaled)
    ens = sum(w[i] * outputs[i] for i in range(5))
    return ens, w


if __name__ == "__main__":
    key = jax.random.PRNGKey(0)
    pkey, xkey = jax.random.split(key)
    params = prepare_params(init_params(pkey))

    # One MNIST-like image, NCHW, flattened inside the wrapper (batch must be 1).
    x = jax.random.uniform(xkey, (1, 1, 28, 28), jnp.float32)

    ens, att = iadm_forward(x, params)
    jax.block_until_ready((ens, att))

    ens_ref, att_ref = iadm_reference(x, params)
    np.testing.assert_allclose(np.asarray(ens), np.asarray(ens_ref), rtol=1e-2, atol=1e-2)
    np.testing.assert_allclose(np.asarray(att), np.asarray(att_ref), rtol=1e-2, atol=1e-2)

    print("KERNEL_OK")
</pallas_src>

<mosaic_0001>
module attributes {stable_mosaic.version = 11 : i64} {
  func.func @iadm_kernel(%arg0: memref<1x784xf32, #tpu.memory_space<vmem>>, %arg1: memref<784x1000xbf16, #tpu.memory_space<vmem>>, %arg2: memref<1x1000xf32, #tpu.memory_space<vmem>>, %arg3: memref<1000x500xbf16, #tpu.memory_space<any>>, %arg4: memref<1x500xf32, #tpu.memory_space<vmem>>, %arg5: memref<500x250xbf16, #tpu.memory_space<any>>, %arg6: memref<1x250xf32, #tpu.memory_space<vmem>>, %arg7: memref<250x100xbf16, #tpu.memory_space<any>>, %arg8: memref<1x100xf32, #tpu.memory_space<vmem>>, %arg9: memref<100x50xbf16, #tpu.memory_space<any>>, %arg10: memref<1x50xf32, #tpu.memory_space<vmem>>, %arg11: memref<1000x10xbf16, #tpu.memory_space<vmem>>, %arg12: memref<1x10xf32, #tpu.memory_space<vmem>>, %arg13: memref<500x10xbf16, #tpu.memory_space<vmem>>, %arg14: memref<1x10xf32, #tpu.memory_space<vmem>>, %arg15: memref<250x10xbf16, #tpu.memory_space<vmem>>, %arg16: memref<1x10xf32, #tpu.memory_space<vmem>>, %arg17: memref<100x10xbf16, #tpu.memory_space<vmem>>, %arg18: memref<1x10xf32, #tpu.memory_space<vmem>>, %arg19: memref<50x10xbf16, #tpu.memory_space<vmem>>, %arg20: memref<1x10xf32, #tpu.memory_space<vmem>>, %arg21: memref<10x50xf32, #tpu.memory_space<vmem>>, %arg22: memref<1x50xf32, #tpu.memory_space<vmem>>, %arg23: memref<50x50xf32, #tpu.memory_space<vmem>>, %arg24: memref<1x50xf32, #tpu.memory_space<vmem>>, %arg25: memref<50x1xf32, #tpu.memory_space<vmem>>, %arg26: memref<1x1xf32, #tpu.memory_space<vmem>>, %arg27: memref<1x10xf32, #tpu.memory_space<vmem>>, %arg28: memref<5x1xf32, #tpu.memory_space<vmem>>, %arg29: memref<1000x500xbf16, #tpu.memory_space<vmem>>, %arg30: memref<500x250xbf16, #tpu.memory_space<vmem>>, %arg31: memref<250x100xbf16, #tpu.memory_space<vmem>>, %arg32: memref<100x50xbf16, #tpu.memory_space<vmem>>, %arg33: memref<4x!tpu.dma_semaphore, #tpu.memory_space<semaphore_mem>>) attributes {dimension_semantics = [], scalar_prefetch = 0 : i64, scratch_operands = 5 : i64, tpu.core_type = #tpu.core_type<tc>} {
    %c0_i32 = arith.constant 0 : i32
    %0 = tpu.memref_slice %arg33[%c0_i32] : memref<4x!tpu.dma_semaphore, #tpu.memory_space<semaphore_mem>> -> memref<1x!tpu.dma_semaphore, #tpu.memory_space<semaphore_mem>>
    %1 = tpu.memref_squeeze %0 : memref<1x!tpu.dma_semaphore, #tpu.memory_space<semaphore_mem>> -> memref<!tpu.dma_semaphore, #tpu.memory_space<semaphore_mem>>
    tpu.enqueue_dma source(%arg3 : memref<1000x500xbf16, #tpu.memory_space<any>>) target(%arg29 : memref<1000x500xbf16, #tpu.memory_space<vmem>>) target_semaphore(%1 : memref<!tpu.dma_semaphore, #tpu.memory_space<semaphore_mem>>)
    %c1_i32 = arith.constant 1 : i32
    %2 = tpu.memref_slice %arg33[%c1_i32] : memref<4x!tpu.dma_semaphore, #tpu.memory_space<semaphore_mem>> -> memref<1x!tpu.dma_semaphore, #tpu.memory_space<semaphore_mem>>
    %3 = tpu.memref_squeeze %2 : memref<1x!tpu.dma_semaphore, #tpu.memory_space<semaphore_mem>> -> memref<!tpu.dma_semaphore, #tpu.memory_space<semaphore_mem>>
    tpu.enqueue_dma source(%arg5 : memref<500x250xbf16, #tpu.memory_space<any>>) target(%arg30 : memref<500x250xbf16, #tpu.memory_space<vmem>>) target_semaphore(%3 : memref<!tpu.dma_semaphore, #tpu.memory_space<semaphore_mem>>)
    %c2_i32 = arith.constant 2 : i32
    %4 = tpu.memref_slice %arg33[%c2_i32] : memref<4x!tpu.dma_semaphore, #tpu.memory_space<semaphore_mem>> -> memref<1x!tpu.dma_semaphore, #tpu.memory_space<semaphore_mem>>
    %5 = tpu.memref_squeeze %4 : memref<1x!tpu.dma_semaphore, #tpu.memory_space<semaphore_mem>> -> memref<!tpu.dma_semaphore, #tpu.memory_space<semaphore_mem>>
    tpu.enqueue_dma source(%arg7 : memref<250x100xbf16, #tpu.memory_space<any>>) target(%arg31 : memref<250x100xbf16, #tpu.memory_space<vmem>>) target_semaphore(%5 : memref<!tpu.dma_semaphore, #tpu.memory_space<semaphore_mem>>)
    %c3_i32 = arith.constant 3 : i32
    %6 = tpu.memref_slice %arg33[%c3_i32] : memref<4x!tpu.dma_semaphore, #tpu.memory_space<semaphore_mem>> -> memref<1x!tpu.dma_semaphore, #tpu.memory_space<semaphore_mem>>
    %7 = tpu.memref_squeeze %6 : memref<1x!tpu.dma_semaphore, #tpu.memory_space<semaphore_mem>> -> memref<!tpu.dma_semaphore, #tpu.memory_space<semaphore_mem>>
    tpu.enqueue_dma source(%arg9 : memref<100x50xbf16, #tpu.memory_space<any>>) target(%arg32 : memref<100x50xbf16, #tpu.memory_space<vmem>>) target_semaphore(%7 : memref<!tpu.dma_semaphore, #tpu.memory_space<semaphore_mem>>)
    %c0 = arith.constant 0 : index
    %c0_0 = arith.constant 0 : index
    %8 = vector.load %arg0[%c0, %c0_0] : memref<1x784xf32, #tpu.memory_space<vmem>>, vector<1x784xf32>
    %c0_1 = arith.constant 0 : index
    %c0_2 = arith.constant 0 : index
    %9 = vector.load %arg1[%c0_1, %c0_2] : memref<784x1000xbf16, #tpu.memory_space<vmem>>, vector<784x1000xbf16>
    %10 = arith.truncf %8 : vector<1x784xf32> to vector<1x784xbf16>
    %cst = arith.constant dense<0.000000e+00> : vector<1x1000xf32>
    %11 = tpu.matmul %10, %9, %cst {dimension_numbers = #tpu.dot_dimension_numbers<[1], [0], [0], [1], [0, 0, 1, 1], [], []>} : vector<1x784xbf16>, vector<784x1000xbf16>, vector<1x1000xf32> -> vector<1x1000xf32>
    %c0_3 = arith.constant 0 : index
    %c0_4 = arith.constant 0 : index
    %12 = vector.load %arg2[%c0_3, %c0_4] : memref<1x1000xf32, #tpu.memory_space<vmem>>, vector<1x1000xf32>
    %13 = arith.addf %11, %12 : vector<1x1000xf32>
    %cst_5 = arith.constant 0.000000e+00 : f32
    %14 = vector.broadcast %cst_5 : f32 to vector<1x1000xf32>
    %15 = arith.maximumf %13, %14 : vector<1x1000xf32>
    %c0_6 = arith.constant 0 : index
    %c0_7 = arith.constant 0 : index
    %16 = vector.load %arg11[%c0_6, %c0_7] : memref<1000x10xbf16, #tpu.memory_space<vmem>>, vector<1000x10xbf16>
    %17 = arith.truncf %15 : vector<1x1000xf32> to vector<1x1000xbf16>
    %cst_8 = arith.constant dense<0.000000e+00> : vector<1x10xf32>
    %18 = tpu.matmul %17, %16, %cst_8 {dimension_numbers = #tpu.dot_dimension_numbers<[1], [0], [0], [1], [0, 0, 1, 1], [], []>} : vector<1x1000xbf16>, vector<1000x10xbf16>, vector<1x10xf32> -> vector<1x10xf32>
    %c0_9 = arith.constant 0 : index
    %c0_10 = arith.constant 0 : index
    %19 = vector.load %arg12[%c0_9, %c0_10] : memref<1x10xf32, #tpu.memory_space<vmem>>, vector<1x10xf32>
    %20 = arith.addf %18, %19 : vector<1x10xf32>
    %c0_i32_11 = arith.constant 0 : i32
    %21 = tpu.memref_slice %arg33[%c0_i32_11] : memref<4x!tpu.dma_semaphore, #tpu.memory_space<semaphore_mem>> -> memref<1x!tpu.dma_semaphore, #tpu.memory_space<semaphore_mem>>
    %22 = tpu.memref_squeeze %21 : memref<1x!tpu.dma_semaphore, #tpu.memory_space<semaphore_mem>> -> memref<!tpu.dma_semaphore, #tpu.memory_space<semaphore_mem>>
    tpu.wait_dma2 semaphore(%22 : memref<!tpu.dma_semaphore, #tpu.memory_space<semaphore_mem>>) src(%arg3 : memref<1000x500xbf16, #tpu.memory_space<any>>) dst(%arg29 : memref<1000x500xbf16, #tpu.memory_space<vmem>>)
    %c0_12 = arith.constant 0 : index
    %c0_13 = arith.constant 0 : index
    %23 = vector.load %arg29[%c0_12, %c0_13] : memref<1000x500xbf16, #tpu.memory_space<vmem>>, vector<1000x500xbf16>
    %24 = arith.truncf %15 : vector<1x1000xf32> to vector<1x1000xbf16>
    %cst_14 = arith.constant dense<0.000000e+00> : vector<1x500xf32>
    %25 = tpu.matmul %24, %23, %cst_14 {dimension_numbers = #tpu.dot_dimension_numbers<[1], [0], [0], [1], [0, 0, 1, 1], [], []>} : vector<1x1000xbf16>, vector<1000x500xbf16>, vector<1x500xf32> -> vector<1x500xf32>
    %c0_15 = arith.constant 0 : index
    %c0_16 = arith.constant 0 : index
    %26 = vector.load %arg4[%c0_15, %c0_16] : memref<1x500xf32, #tpu.memory_space<vmem>>, vector<1x500xf32>
    %27 = arith.addf %25, %26 : vector<1x500xf32>
    %cst_17 = arith.constant 0.000000e+00 : f32
    %28 = vector.broadcast %cst_17 : f32 to vector<1x500xf32>
    %29 = arith.maximumf %27, %28 : vector<1x500xf32>
    %c0_18 = arith.constant 0 : index
    %c0_19 = arith.constant 0 : index
    %30 = vector.load %arg13[%c0_18, %c0_19] : memref<500x10xbf16, #tpu.memory_space<vmem>>, vector<500x10xbf16>
    %31 = arith.truncf %29 : vector<1x500xf32> to vector<1x500xbf16>
    %cst_20 = arith.constant dense<0.000000e+00> : vector<1x10xf32>
    %32 = tpu.matmul %31, %30, %cst_20 {dimension_numbers = #tpu.dot_dimension_numbers<[1], [0], [0], [1], [0, 0, 1, 1], [], []>} : vector<1x500xbf16>, vector<500x10xbf16>, vector<1x10xf32> -> vector<1x10xf32>
    %c0_21 = arith.constant 0 : index
    %c0_22 = arith.constant 0 : index
    %33 = vector.load %arg14[%c0_21, %c0_22] : memref<1x10xf32, #tpu.memory_space<vmem>>, vector<1x10xf32>
    %34 = arith.addf %32, %33 : vector<1x10xf32>
    %c1_i32_23 = arith.constant 1 : i32
    %35 = tpu.memref_slice %arg33[%c1_i32_23] : memref<4x!tpu.dma_semaphore, #tpu.memory_space<semaphore_mem>> -> memref<1x!tpu.dma_semaphore, #tpu.memory_space<semaphore_mem>>
    %36 = tpu.memref_squeeze %35 : memref<1x!tpu.dma_semaphore, #tpu.memory_space<semaphore_mem>> -> memref<!tpu.dma_semaphore, #tpu.memory_space<semaphore_mem>>
    tpu.wait_dma2 semaphore(%36 : memref<!tpu.dma_semaphore, #tpu.memory_space<semaphore_mem>>) src(%arg5 : memref<500x250xbf16, #tpu.memory_space<any>>) dst(%arg30 : memref<500x250xbf16, #tpu.memory_space<vmem>>)
    %c0_24 = arith.constant 0 : index
    %c0_25 = arith.constant 0 : index
    %37 = vector.load %arg30[%c0_24, %c0_25] : memref<500x250xbf16, #tpu.memory_space<vmem>>, vector<500x250xbf16>
    %38 = arith.truncf %29 : vector<1x500xf32> to vector<1x500xbf16>
    %cst_26 = arith.constant dense<0.000000e+00> : vector<1x250xf32>
    %39 = tpu.matmul %38, %37, %cst_26 {dimension_numbers = #tpu.dot_dimension_numbers<[1], [0], [0], [1], [0, 0, 1, 1], [], []>} : vector<1x500xbf16>, vector<500x250xbf16>, vector<1x250xf32> -> vector<1x250xf32>
    %c0_27 = arith.constant 0 : index
    %c0_28 = arith.constant 0 : index
    %40 = vector.load %arg6[%c0_27, %c0_28] : memref<1x250xf32, #tpu.memory_space<vmem>>, vector<1x250xf32>
    %41 = arith.addf %39, %40 : vector<1x250xf32>
    %cst_29 = arith.constant 0.000000e+00 : f32
    %42 = vector.broadcast %cst_29 : f32 to vector<1x250xf32>
    %43 = arith.maximumf %41, %42 : vector<1x250xf32>
    %c0_30 = arith.constant 0 : index
    %c0_31 = arith.constant 0 : index
    %44 = vector.load %arg15[%c0_30, %c0_31] : memref<250x10xbf16, #tpu.memory_space<vmem>>, vector<250x10xbf16>
    %45 = arith.truncf %43 : vector<1x250xf32> to vector<1x250xbf16>
    %cst_32 = arith.constant dense<0.000000e+00> : vector<1x10xf32>
    %46 = tpu.matmul %45, %44, %cst_32 {dimension_numbers = #tpu.dot_dimension_numbers<[1], [0], [0], [1], [0, 0, 1, 1], [], []>} : vector<1x250xbf16>, vector<250x10xbf16>, vector<1x10xf32> -> vector<1x10xf32>
    %c0_33 = arith.constant 0 : index
    %c0_34 = arith.constant 0 : index
    %47 = vector.load %arg16[%c0_33, %c0_34] : memref<1x10xf32, #tpu.memory_space<vmem>>, vector<1x10xf32>
    %48 = arith.addf %46, %47 : vector<1x10xf32>
    %c2_i32_35 = arith.constant 2 : i32
    %49 = tpu.memref_slice %arg33[%c2_i32_35] : memref<4x!tpu.dma_semaphore, #tpu.memory_space<semaphore_mem>> -> memref<1x!tpu.dma_semaphore, #tpu.memory_space<semaphore_mem>>
    %50 = tpu.memref_squeeze %49 : memref<1x!tpu.dma_semaphore, #tpu.memory_space<semaphore_mem>> -> memref<!tpu.dma_semaphore, #tpu.memory_space<semaphore_mem>>
    tpu.wait_dma2 semaphore(%50 : memref<!tpu.dma_semaphore, #tpu.memory_space<semaphore_mem>>) src(%arg7 : memref<250x100xbf16, #tpu.memory_space<any>>) dst(%arg31 : memref<250x100xbf16, #tpu.memory_space<vmem>>)
    %c0_36 = arith.constant 0 : index
    %c0_37 = arith.constant 0 : index
    %51 = vector.load %arg31[%c0_36, %c0_37] : memref<250x100xbf16, #tpu.memory_space<vmem>>, vector<250x100xbf16>
    %52 = arith.truncf %43 : vector<1x250xf32> to vector<1x250xbf16>
    %cst_38 = arith.constant dense<0.000000e+00> : vector<1x100xf32>
    %53 = tpu.matmul %52, %51, %cst_38 {dimension_numbers = #tpu.dot_dimension_numbers<[1], [0], [0], [1], [0, 0, 1, 1], [], []>} : vector<1x250xbf16>, vector<250x100xbf16>, vector<1x100xf32> -> vector<1x100xf32>
    %c0_39 = arith.constant 0 : index
    %c0_40 = arith.constant 0 : index
    %54 = vector.load %arg8[%c0_39, %c0_40] : memref<1x100xf32, #tpu.memory_space<vmem>>, vector<1x100xf32>
    %55 = arith.addf %53, %54 : vector<1x100xf32>
    %cst_41 = arith.constant 0.000000e+00 : f32
    %56 = vector.broadcast %cst_41 : f32 to vector<1x100xf32>
    %57 = arith.maximumf %55, %56 : vector<1x100xf32>
    %c0_42 = arith.constant 0 : index
    %c0_43 = arith.constant 0 : index
    %58 = vector.load %arg17[%c0_42, %c0_43] : memref<100x10xbf16, #tpu.memory_space<vmem>>, vector<100x10xbf16>
    %59 = arith.truncf %57 : vector<1x100xf32> to vector<1x100xbf16>
    %cst_44 = arith.constant dense<0.000000e+00> : vector<1x10xf32>
    %60 = tpu.matmul %59, %58, %cst_44 {dimension_numbers = #tpu.dot_dimension_numbers<[1], [0], [0], [1], [0, 0, 1, 1], [], []>} : vector<1x100xbf16>, vector<100x10xbf16>, vector<1x10xf32> -> vector<1x10xf32>
    %c0_45 = arith.constant 0 : index
    %c0_46 = arith.constant 0 : index
    %61 = vector.load %arg18[%c0_45, %c0_46] : memref<1x10xf32, #tpu.memory_space<vmem>>, vector<1x10xf32>
    %62 = arith.addf %60, %61 : vector<1x10xf32>
    %c3_i32_47 = arith.constant 3 : i32
    %63 = tpu.memref_slice %arg33[%c3_i32_47] : memref<4x!tpu.dma_semaphore, #tpu.memory_space<semaphore_mem>> -> memref<1x!tpu.dma_semaphore, #tpu.memory_space<semaphore_mem>>
    %64 = tpu.memref_squeeze %63 : memref<1x!tpu.dma_semaphore, #tpu.memory_space<semaphore_mem>> -> memref<!tpu.dma_semaphore, #tpu.memory_space<semaphore_mem>>
    tpu.wait_dma2 semaphore(%64 : memref<!tpu.dma_semaphore, #tpu.memory_space<semaphore_mem>>) src(%arg9 : memref<100x50xbf16, #tpu.memory_space<any>>) dst(%arg32 : memref<100x50xbf16, #tpu.memory_space<vmem>>)
    %c0_48 = arith.constant 0 : index
    %c0_49 = arith.constant 0 : index
    %65 = vector.load %arg32[%c0_48, %c0_49] : memref<100x50xbf16, #tpu.memory_space<vmem>>, vector<100x50xbf16>
    %66 = arith.truncf %57 : vector<1x100xf32> to vector<1x100xbf16>
    %cst_50 = arith.constant dense<0.000000e+00> : vector<1x50xf32>
    %67 = tpu.matmul %66, %65, %cst_50 {dimension_numbers = #tpu.dot_dimension_numbers<[1], [0], [0], [1], [0, 0, 1, 1], [], []>} : vector<1x100xbf16>, vector<100x50xbf16>, vector<1x50xf32> -> vector<1x50xf32>
    %c0_51 = arith.constant 0 : index
    %c0_52 = arith.constant 0 : index
    %68 = vector.load %arg10[%c0_51, %c0_52] : memref<1x50xf32, #tpu.memory_space<vmem>>, vector<1x50xf32>
    %69 = arith.addf %67, %68 : vector<1x50xf32>
    %cst_53 = arith.constant 0.000000e+00 : f32
    %70 = vector.broadcast %cst_53 : f32 to vector<1x50xf32>
    %71 = arith.maximumf %69, %70 : vector<1x50xf32>
    %c0_54 = arith.constant 0 : index
    %c0_55 = arith.constant 0 : index
    %72 = vector.load %arg19[%c0_54, %c0_55] : memref<50x10xbf16, #tpu.memory_space<vmem>>, vector<50x10xbf16>
    %73 = arith.truncf %71 : vector<1x50xf32> to vector<1x50xbf16>
    %cst_56 = arith.constant dense<0.000000e+00> : vector<1x10xf32>
    %74 = tpu.matmul %73, %72, %cst_56 {dimension_numbers = #tpu.dot_dimension_numbers<[1], [0], [0], [1], [0, 0, 1, 1], [], []>} : vector<1x50xbf16>, vector<50x10xbf16>, vector<1x10xf32> -> vector<1x10xf32>
    %c0_57 = arith.constant 0 : index
    %c0_58 = arith.constant 0 : index
    %75 = vector.load %arg20[%c0_57, %c0_58] : memref<1x10xf32, #tpu.memory_space<vmem>>, vector<1x10xf32>
    %76 = arith.addf %74, %75 : vector<1x10xf32>
    %77 = tpu.concatenate %20, %34, %48, %62, %76 in 0 : vector<1x10xf32>, vector<1x10xf32>, vector<1x10xf32>, vector<1x10xf32>, vector<1x10xf32> -> vector<5x10xf32>
    %c0_59 = arith.constant 0 : index
    %c0_60 = arith.constant 0 : index
    %78 = vector.load %arg21[%c0_59, %c0_60] : memref<10x50xf32, #tpu.memory_space<vmem>>, vector<10x50xf32>
    %cst_61 = arith.constant dense<0.000000e+00> : vector<5x50xf32>
    %79 = tpu.matmul %77, %78, %cst_61 {dimension_numbers = #tpu.dot_dimension_numbers<[1], [0], [0], [1], [0, 0, 1, 1], [], []>} : vector<5x10xf32>, vector<10x50xf32>, vector<5x50xf32> -> vector<5x50xf32>
    %c0_62 = arith.constant 0 : index
    %c0_63 = arith.constant 0 : index
    %80 = vector.load %arg22[%c0_62, %c0_63] : memref<1x50xf32, #tpu.memory_space<vmem>>, vector<1x50xf32>
    %81 = vector.broadcast %80 : vector<1x50xf32> to vector<5x50xf32>
    %82 = arith.addf %79, %81 : vector<5x50xf32>
    %cst_64 = arith.constant 0.000000e+00 : f32
    %83 = vector.broadcast %cst_64 : f32 to vector<5x50xf32>
    %84 = arith.maximumf %82, %83 : vector<5x50xf32>
    %c0_65 = arith.constant 0 : index
    %c0_66 = arith.constant 0 : index
    %85 = vector.load %arg23[%c0_65, %c0_66] : memref<50x50xf32, #tpu.memory_space<vmem>>, vector<50x50xf32>
    %cst_67 = arith.constant dense<0.000000e+00> : vector<5x50xf32>
    %86 = tpu.matmul %84, %85, %cst_67 {dimension_numbers = #tpu.dot_dimension_numbers<[1], [0], [0], [1], [0, 0, 1, 1], [], []>} : vector<5x50xf32>, vector<50x50xf32>, vector<5x50xf32> -> vector<5x50xf32>
    %c0_68 = arith.constant 0 : index
    %c0_69 = arith.constant 0 : index
    %87 = vector.load %arg24[%c0_68, %c0_69] : memref<1x50xf32, #tpu.memory_space<vmem>>, vector<1x50xf32>
    %88 = vector.broadcast %87 : vector<1x50xf32> to vector<5x50xf32>
    %89 = arith.addf %86, %88 : vector<5x50xf32>
    %cst_70 = arith.constant 0.000000e+00 : f32
    %90 = vector.broadcast %cst_70 : f32 to vector<5x50xf32>
    %91 = arith.maximumf %89, %90 : vector<5x50xf32>
    %c0_71 = arith.constant 0 : index
    %c0_72 = arith.constant 0 : index
    %92 = vector.load %arg25[%c0_71, %c0_72] : memref<50x1xf32, #tpu.memory_space<vmem>>, vector<50x1xf32>
    %cst_73 = arith.constant dense<0.000000e+00> : vector<5x1xf32>
    %93 = tpu.matmul %91, %92, %cst_73 {dimension_numbers = #tpu.dot_dimension_numbers<[1], [0], [0], [1], [0, 0, 1, 1], [], []>} : vector<5x50xf32>, vector<50x1xf32>, vector<5x1xf32> -> vector<5x1xf32>
    %c0_74 = arith.constant 0 : index
    %c0_75 = arith.constant 0 : index
    %94 = vector.load %arg26[%c0_74, %c0_75] : memref<1x1xf32, #tpu.memory_space<vmem>>, vector<1x1xf32>
    %95 = vector.broadcast %94 : vector<1x1xf32> to vector<5x1xf32>
    %96 = arith.addf %93, %95 : vector<5x1xf32>
    %cst_76 = arith.constant dense<0x7F800000> : vector<1xf32>
    %97 = vector.multi_reduction <minimumf>, %96, %cst_76 [0] : vector<5x1xf32> to vector<1xf32>
    %98 = vector.shape_cast %97 : vector<1xf32> to vector<1x1xf32>
    %cst_77 = arith.constant dense<0xFF800000> : vector<1xf32>
    %99 = vector.multi_reduction <maximumf>, %96, %cst_77 [0] : vector<5x1xf32> to vector<1xf32>
    %100 = vector.shape_cast %99 : vector<1xf32> to vector<1x1xf32>
    %101 = arith.subf %100, %98 : vector<1x1xf32>
    %cst_78 = arith.constant 0.000000e+00 : f32
    %102 = vector.broadcast %cst_78 : f32 to vector<1x1xf32>
    %103 = arith.cmpf oeq, %101, %102 : vector<1x1xf32>
    %cst_79 = arith.constant 1.000000e+00 : f32
    %104 = vector.broadcast %cst_79 : f32 to vector<1x1xf32>
    %105 = arith.select %103, %104, %101 : vector<1x1xi1>, vector<1x1xf32>
    %106 = vector.broadcast %98 : vector<1x1xf32> to vector<5x1xf32>
    %107 = arith.subf %96, %106 : vector<5x1xf32>
    %108 = vector.broadcast %105 : vector<1x1xf32> to vector<5x1xf32>
    %109 = arith.divf %107, %108 : vector<5x1xf32>
    %cst_80 = arith.constant dense<0xFF800000> : vector<1xf32>
    %110 = vector.multi_reduction <maximumf>, %109, %cst_80 [0] : vector<5x1xf32> to vector<1xf32>
    %111 = vector.shape_cast %110 : vector<1xf32> to vector<1x1xf32>
    %112 = vector.broadcast %111 : vector<1x1xf32> to vector<5x1xf32>
    %113 = arith.subf %109, %112 : vector<5x1xf32>
    %114 = math.exp %113 : vector<5x1xf32>
    %cst_81 = arith.constant dense<0.000000e+00> : vector<1xf32>
    %115 = vector.multi_reduction <add>, %114, %cst_81 [0] : vector<5x1xf32> to vector<1xf32>
    %116 = vector.shape_cast %115 : vector<1xf32> to vector<1x1xf32>
    %117 = vector.broadcast %116 : vector<1x1xf32> to vector<5x1xf32>
    %118 = arith.divf %114, %117 : vector<5x1xf32>
    %c0_82 = arith.constant 0 : index
    %c0_83 = arith.constant 0 : index
    %119 = vector.load %arg28[%c0_82, %c0_83] : memref<5x1xf32, #tpu.memory_space<vmem>>, vector<5x1xf32>
    tpu.vector_store %arg28[%c0_82, %c0_83], %118 {strides = array<i32>} : memref<5x1xf32, #tpu.memory_space<vmem>>, vector<5x1xf32>,
    %120 = vector.broadcast %118 : vector<5x1xf32> to vector<5x10xf32>
    %121 = arith.mulf %120, %77 : vector<5x10xf32>
    %cst_84 = arith.constant dense<0.000000e+00> : vector<10xf32>
    %122 = vector.multi_reduction <add>, %121, %cst_84 [0] : vector<5x10xf32> to vector<10xf32>
    %123 = vector.shape_cast %122 : vector<10xf32> to vector<1x10xf32>
    %c0_85 = arith.constant 0 : index
    %c0_86 = arith.constant 0 : index
    %124 = vector.load %arg27[%c0_85, %c0_86] : memref<1x10xf32, #tpu.memory_space<vmem>>, vector<1x10xf32>
    tpu.vector_store %arg27[%c0_85, %c0_86], %123 {strides = array<i32>} : memref<1x10xf32, #tpu.memory_space<vmem>>, vector<1x10xf32>,
    return
  }
}

</mosaic_0001>

<bundles_post_ra>
// kernel: tpu_custom_call.1
= control target key start
LH: loop header
LB: loop body
LE: loop exit
PB: predicated region body
PF: predicated region fallthrough
CT: control target
= control target key end

     0   :  { %s13506_s0 = inlined_call_operand.hbm [shape: f32[1,784], index: 0, kind: input, shape index: {}]   ;;  %s13507_s1 = inlined_call_operand.hbm [shape: bf16[784,1000], index: 1, kind: input, shape index: {}]   ;;  %s13508_s2 = inlined_call_operand.hbm [shape: f32[1,1000], index: 2, kind: input, shape index: {}]   ;;  %s13509_s3 = inlined_call_operand.hbm [shape: bf16[1000,500], index: 3, kind: input, shape index: {}]   ;;  %s13510_s4 = inlined_call_operand.hbm [shape: f32[1,500], index: 4, kind: input, shape index: {}]   ;;  %s13511_s5 = inlined_call_operand.hbm [shape: bf16[500,250], index: 5, kind: input, shape index: {}]   ;;  %s13512_s6 = inlined_call_operand.hbm [shape: f32[1,250], index: 6, kind: input, shape index: {}]   ;;  %s13513_s7 = inlined_call_operand.vmem [shape: bf16[250,100], index: 7, kind: input, shape index: {}]   ;;  %s13514_s8 = inlined_call_operand.hbm [shape: f32[1,100], index: 8, kind: input, shape index: {}]   ;;  %s13515_s9 = inlined_call_operand.vmem [shape: bf16[100,50], index: 9, kind: input, shape index: {}]   ;;  %s13516_s10 = inlined_call_operand.hbm [shape: f32[1,50], index: 10, kind: input, shape index: {}]   ;;  %s13517_s11 = inlined_call_operand.vmem [shape: bf16[1000,10], index: 11, kind: input, shape index: {}]   ;;  %s13518_s12 = inlined_call_operand.hbm [shape: f32[1,10], index: 12, kind: input, shape index: {}]   ;;  %s13519_s13 = inlined_call_operand.vmem [shape: bf16[500,10], index: 13, kind: input, shape index: {}]   ;;  %s13520_s14 = inlined_call_operand.hbm [shape: f32[1,10], index: 14, kind: input, shape index: {}]   ;;  %s13521_s15 = inlined_call_operand.vmem [shape: bf16[250,10], index: 15, kind: input, shape index: {}]   ;;  %s13522_s16 = inlined_call_operand.hbm [shape: f32[1,10], index: 16, kind: input, shape index: {}]   ;;  %s13523_s17 = inlined_call_operand.vmem [shape: bf16[100,10], index: 17, kind: input, shape index: {}]   ;;  %s13524_s18 = inlined_call_operand.hbm [shape: f32[1,10], index: 18, kind: input, shape index: {}]   ;;  %s13525_s19 = inlined_call_operand.vmem [shape: bf16[50,10], index: 19, kind: input, shape index: {}]   ;;  %s13526_s20 = inlined_call_operand.hbm [shape: f32[1,10], index: 20, kind: input, shape index: {}]   ;;  %s13527_s21 = inlined_call_operand.hbm [shape: f32[10,50], index: 21, kind: input, shape index: {}]   ;;  %s13528_s22 = inlined_call_operand.hbm [shape: f32[1,50], index: 22, kind: input, shape index: {}]   ;;  %s13529_s23 = inlined_call_operand.hbm [shape: f32[50,50], index: 23, kind: input, shape index: {}]   ;;  %s13530_s24 = inlined_call_operand.hbm [shape: f32[1,50], index: 24, kind: input, shape index: {}]   ;;  %s13531_s25 = inlined_call_operand.vmem [shape: f32[50,1], index: 25, kind: input, shape index: {}]   ;;  %s13532_s26 = inlined_call_operand.<no memory space> [shape: f32[1,1], index: 26, kind: input, shape index: {}]   ;;  %s13533_s27 = inlined_call_operand.hbm [shape: f32[1,10], index: 27, kind: output, shape index: {0}]   ;;  %s13534_s28 = inlined_call_operand.vmem [shape: f32[5,1], index: 28, kind: output, shape index: {1}]  }
   0x1   :  { %13539 = sst [smem:[#allocation57_spill]] %s13506_s0  ;;  %v34_v0 = vstv %s13532_s26 }
   0x2   :  { %13540 = sst [smem:[#allocation58_spill]] %s13507_s1  ;;  %35 = vst [vmem:[#allocation7] sm:$0x1] %v34_v0 }
   0x3   :  { %13541 = sst [smem:[#allocation59_spill]] %s13508_s2 }
   0x4   :  { %13542 = sst [smem:[#allocation60_spill]] %s13509_s3 }
   0x5   :  { %13543 = sst [smem:[#allocation61_spill]] %s13510_s4 }
   0x6   :  { %13544 = sst [smem:[#allocation62_spill]] %s13511_s5 }
   0x7   :  { %13545 = sst [smem:[#allocation63_spill]] %s13512_s6 }
   0x8   :  { %13546 = sst [smem:[#allocation64_spill]] %s13513_s7 }
   0x9   :  { %13547 = sst [smem:[#allocation65_spill]] %s13514_s8 }
   0xa   :  { %13548 = sst [smem:[#allocation66_spill]] %s13515_s9 }
   0xb   :  { %13549 = sst [smem:[#allocation67_spill]] %s13516_s10 }
   0xc   :  { %13550 = sst [smem:[#allocation68_spill]] %s13517_s11 }
   0xd   :  { %13551 = sst [smem:[#allocation69_spill]] %s13518_s12 }
   0xe   :  { %13552 = sst [smem:[#allocation70_spill]] %s13531_s25 }
   0xf   :  { %13553 = sst [smem:[#allocation71_spill]] %s13533_s27 }
  0x10   :  { %13554 = sst [smem:[#allocation72_spill]] %s13534_s28 }
  0x11   :  { %36 = vsyncpa [#allocation9], 0 }
  0x12   :  { %37 = vsyncpa [#allocation12], 0 }
  0x13   :  { %38 = vsyncpa [#allocation15], 0 }
  0x14   :  { %39 = vsyncpa [#allocation18], 0 }
  0x15   :  { %40 = vsyncpa [#allocation21], 0 }
  0x16   :  { %41 = vsyncpa [#allocation24], 0 }
  0x17   :  { %42 = vsyncpa [#allocation27], 0 }
  0x18   :  { %43 = vsyncpa [#allocation30], 0 }
  0x19   :  { %44 = vsyncpa [#allocation33], 0  ;;  %s13555_s3 = sld [smem:[#allocation58_spill]] }
  0x1f   :  { %s61_s6 = sshll.u32 %s13555_s3, 4  ;;  %s62_s6 = int_to_ptr.hbm [resolvable:$true] %s61_s6 }
  0x20   :  { %45 = vsyncpa [#allocation10], 0  ;;  %s12505_s10 = smov [#allocation11]   ;;  %s13556_s29 = sld [smem:[#allocation61_spill]] }
  0x21   :  { %s63_s0 = sshll.u32 %s12505_s10, 4  ;;  %s12506_s7 = smov 512   ;;  %s64_s0 = int_to_ptr.vmem [resolvable:$true] %s63_s0 }
  0x22   :  { %s12507_s12 = smov 32   ;;  %s12508_s1 = smov [#allocation14]  }
  0x23   :  { %69 = dma.hbm_to_vmem [thread:$0]  %s62_s6, 50176, %s64_s0, [#allocation12], %s12506_s7, %s12506_s7, %s12507_s12  }
  0x24   :  { %s88_s4 = sshll.u32 %s12508_s1, 4  ;;  %s13557_s27 = sld [smem:[#allocation65_spill]]  ;;  %s89_s4 = int_to_ptr.vmem [resolvable:$true] %s88_s4 }
  0x25   :  { %s13558_s10 = sld [smem:[#allocation69_spill]]  ;;  %s12509_s25 = smov [#allocation17]  }
  0x26   :  { %s86_s2 = sshll.u32 %s13556_s29, 4  ;;  %s110_s26 = sshll.u32 %s12509_s25, 4  ;;  %s87_s2 = int_to_ptr.hbm [resolvable:$true] %s86_s2  ;;  %s111_s26 = int_to_ptr.vmem [resolvable:$true] %s110_s26 }
  0x27   :  { %91 = dma.hbm_to_vmem [thread:$0]  %s87_s2, 64, %s89_s4, [#allocation15]  }
  0x28   :  { %s12510_s6 = smov [#allocation20]   ;;  %s158_s7 = sshll.u32 %s13522_s16, 4  ;;  %s159_s7 = int_to_ptr.hbm [resolvable:$true] %s158_s7 }
  0x29   :  { %s134_s0 = sshll.u32 %s12510_s6, 4  ;;  %s184_s12 = sshll.u32 %s13526_s20, 4  ;;  %s135_s0 = int_to_ptr.vmem [resolvable:$true] %s134_s0  ;;  %s185_s12 = int_to_ptr.hbm [resolvable:$true] %s184_s12 }
  0x2a   :  { %s108_s9 = sshll.u32 %s13557_s27, 4  ;;  %s12511_s1 = smov [#allocation23]   ;;  %s109_s9 = int_to_ptr.hbm [resolvable:$true] %s108_s9 }
  0x2b   :  { %s132_s28 = sshll.u32 %s13558_s10, 4  ;;  %s160_s4 = sshll.u32 %s12511_s1, 4  ;;  %s133_s28 = int_to_ptr.hbm [resolvable:$true] %s132_s28  ;;  %s161_s4 = int_to_ptr.vmem [resolvable:$true] %s160_s4 }
  0x2c   :  { %113 = dma.hbm_to_vmem [thread:$0]  %s109_s9, 16, %s111_s26, [#allocation18]  }
  0x2d   :  { %137 = dma.hbm_to_vmem [thread:$0]  %s133_s28, 16, %s135_s0, [#allocation21]  }
  0x2e   :  { %163 = dma.hbm_to_vmem [thread:$0]  %s159_s7, 16, %s161_s4, [#allocation24]  }
  0x2f   :  { %s12512_s25 = smov [#allocation26]   ;;  %s208_s30 = sshll.u32 %s13528_s22, 4  ;;  %s209_s30 = int_to_ptr.hbm [resolvable:$true] %s208_s30 }
  0x30   :  { %s186_s8 = sshll.u32 %s12512_s25, 4  ;;  %s13559_s3 = sld [smem:[#allocation57_spill]]  ;;  %s187_s8 = int_to_ptr.vmem [resolvable:$true] %s186_s8 }
  0x31   :  { %189 = dma.hbm_to_vmem [thread:$0]  %s185_s12, 16, %s187_s8, [#allocation27]  }
  0x32   :  { %s12513_s26 = smov [#allocation29]   ;;  %s12514_s6 = smov [#allocation8]  }
  0x33   :  { %s210_s20 = sshll.u32 %s12513_s26, 4  ;;  %s53_s0 = sshll.u32 %s12514_s6, 4  ;;  %s211_s20 = int_to_ptr.vmem [resolvable:$true] %s210_s20  ;;  %s54_s0 = int_to_ptr.vmem [resolvable:$true] %s53_s0 }
  0x34   :  { %213 = dma.hbm_to_vmem [thread:$0]  %s209_s30, 16, %s211_s20, [#allocation30]  }
  0x35   :  { %s13560_s7 = sld [smem:[#allocation59_spill]]  ;;  %s12515_s4 = smov [#allocation13]  }
  0x36   :  { %s51_s10 = sshll.u32 %s13559_s3, 4  ;;  %s13561_s12 = sld [smem:[#allocation63_spill]]  ;;  %s52_s10 = int_to_ptr.hbm [resolvable:$true] %s51_s10 }
  0x37   :  { %56 = dma.hbm_to_vmem [thread:$0]  %s52_s10, 112, %s54_s0, [#allocation9]  }
  0x38   :  { %s77_s25 = sshll.u32 %s12515_s4, 4  ;;  %s12516_s8 = smov [#allocation16]   ;;  %s78_s25 = int_to_ptr.vmem [resolvable:$true] %s77_s25 }
  0x39   :  { %s99_s5 = sshll.u32 %s12516_s8, 4  ;;  %s13562_s16 = sld [smem:[#allocation67_spill]]  ;;  %s100_s5 = int_to_ptr.vmem [resolvable:$true] %s99_s5 }
  0x3a   :  { %s145_s26 = sshll.u32 %s13520_s14, 4  ;;  %s12517_s20 = smov [#allocation19]   ;;  %s146_s26 = int_to_ptr.hbm [resolvable:$true] %s145_s26 }
  0x3b   :  { %s75_s27 = sshll.u32 %s13560_s7, 4  ;;  %s121_s6 = sshll.u32 %s12517_s20, 4  ;;  %s76_s27 = int_to_ptr.hbm [resolvable:$true] %s75_s27  ;;  %s122_s6 = int_to_ptr.vmem [resolvable:$true] %s121_s6 }
  0x3c   :  { %s97_s1 = sshll.u32 %s13561_s12, 4  ;;  %s12518_s0 = smov [#allocation22]   ;;  %s98_s1 = int_to_ptr.hbm [resolvable:$true] %s97_s1 }
  0x3d   :  { %80 = dma.hbm_to_vmem [thread:$0]  %s76_s27, 128, %s78_s25, [#allocation12]  }
  0x3e   :  { %102 = dma.hbm_to_vmem [thread:$0]  %s98_s1, 32, %s100_s5, [#allocation15]  }
  0x3f   :  { %s119_s28 = sshll.u32 %s13562_s16, 4  ;;  %s147_s11 = sshll.u32 %s12518_s0, 4  ;;  %s120_s28 = int_to_ptr.hbm [resolvable:$true] %s119_s28  ;;  %s148_s11 = int_to_ptr.vmem [resolvable:$true] %s147_s11 }
  0x40   :  { %124 = dma.hbm_to_vmem [thread:$0]  %s120_s28, 16, %s122_s6, [#allocation18]  }
  0x41   :  { %s171_s27 = sshll.u32 %s13524_s18, 4  ;;  %s194_s12 = sshll.u32 %s13527_s21, 4  ;;  %s172_s27 = int_to_ptr.hbm [resolvable:$true] %s171_s27  ;;  %s195_s12 = int_to_ptr.hbm [resolvable:$true] %s194_s12 }
  0x42   :  { %150 = dma.hbm_to_vmem [thread:$0]  %s146_s26, 16, %s148_s11, [#allocation21]  }
  0x43   :  { %s12519_s1 = smov [#allocation25]   ;;  %s12520_s4 = smov [#allocation28]  }
  0x44   :  { %s173_s14 = sshll.u32 %s12519_s1, 4  ;;  %s196_s25 = sshll.u32 %s12520_s4, 4  ;;  %s174_s14 = int_to_ptr.vmem [resolvable:$true] %s173_s14  ;;  %s197_s25 = int_to_ptr.vmem [resolvable:$true] %s196_s25 }
  0x45   :  { %176 = dma.hbm_to_vmem [thread:$0]  %s172_s27, 16, %s174_s14, [#allocation24]  }
  0x46   :  { %s12521_s8 = smov 128   ;;  %s12522_s5 = smov 8  }
  0x47   :  { %202 = dma.hbm_to_vmem [thread:$0]  %s195_s12, 256, %s197_s25, [#allocation27], %s12521_s8, %s12521_s8, %s12522_s5  }
  0x48   :  { %s218_s30 = sshll.u32 %s13529_s23, 4  ;;  %s12523_s16 = smov [#allocation31]   ;;  %s219_s30 = int_to_ptr.hbm [resolvable:$true] %s218_s30 }
  0x49   :  { %s220_s28 = sshll.u32 %s12523_s16, 4  ;;  %s232_s10 = sshll.u32 %s13530_s24, 4  ;;  %s221_s28 = int_to_ptr.vmem [resolvable:$true] %s220_s28  ;;  %s233_s10 = int_to_ptr.hbm [resolvable:$true] %s232_s10 }
  0x4a   :  { %226 = dma.hbm_to_vmem [thread:$0]  %s219_s30, 896, %s221_s28, [#allocation30], %s12521_s8, %s12521_s8, %s12522_s5  }
  0x4b   :  { %s12524_s26 = smov [#allocation32]  }
  0x4c   :  { %s234_s20 = sshll.u32 %s12524_s26, 4  ;;  %s235_s20 = int_to_ptr.vmem [resolvable:$true] %s234_s20 }
  0x4d   :  { %237 = dma.hbm_to_vmem [thread:$0]  %s233_s10, 16, %s235_s20, [#allocation33]  }
  0x4e   :  { %12477 = dma.done.wait [#allocation9], 112  }
  0x4f   :  { %12478 = vsyncadd [#allocation9], 4294967184 }
  0x50   :  { %12479 = dma.done.wait [#allocation12], 50304  }
  0x51   :  { %12480 = vsyncadd [#allocation12], 4294916992 }
  0x52   :  { %12481 = dma.done.wait [#allocation15], 96  }
  0x53   :  { %12482 = vsyncadd [#allocation15], 4294967200 }
  0x54   :  { %12483 = dma.done.wait [#allocation18], 32  }
  0x55   :  { %12484 = vsyncadd [#allocation18], 4294967264 }
  0x56   :  { %12485 = dma.done.wait [#allocation21], 32  }
  0x57   :  { %12486 = vsyncadd [#allocation21], 4294967264 }
  0x58   :  { %12487 = dma.done.wait [#allocation24], 32  }
  0x59   :  { %12488 = vsyncadd [#allocation24], 4294967264 }
  0x5a   :  { %12489 = dma.done.wait [#allocation27], 272  }
  0x5b   :  { %12490 = vsyncadd [#allocation27], 4294967024 }
  0x5c   :  { %12491 = dma.done.wait [#allocation30], 912  }
  0x5d   :  { %12492 = vsyncadd [#allocation30], 4294966384 }
  0x5e   :  { %12493 = dma.done.wait [#allocation33], 16  }
  0x5f   :  { %12494 = vsyncadd [#allocation33], 4294967280  ;;  %s13563_s6 = sld [smem:[#allocation60_spill]]  ;;  %s12525_s11 = smov [#allocation2]  }
  0x60   :  { %s316_s29 = sshll.u32 %s12525_s11, 4  ;;  %s13564_s22 = sld [smem:[#allocation62_spill]]  ;;  %s317_s29 = int_to_ptr.vmem [resolvable:$true] %s316_s29 }
  0x61   :  { %s12526_s12 = smov [#allocation3]   ;;  %s13565_s25 = sld [smem:[#allocation64_spill]] }
  0x62   :  { %s330_s1 = sshll.u32 %s12526_s12, 4  ;;  %s331_s1 = int_to_ptr.vmem [resolvable:$true] %s330_s1 }
  0x65   :  { %s314_s0 = sshll.u32 %s13563_s6, 4  ;;  %s315_s0 = int_to_ptr.hbm [resolvable:$true] %s314_s0 }
  0x66   :  { %s328_s2 = sshll.u32 %s13564_s22, 4  ;;  %s329_s2 = int_to_ptr.hbm [resolvable:$true] %s328_s2 }
  0x67   :  { %319 = dma.hbm_to_vmem [thread:$0]  %s315_s0, 32000, %s317_s29, [#allocation6]  ;;  %v345_v1 = vld [vmem:[%s13565_s25] sm:$0xff]  ;;  %v347_v2 = vld [vmem:[%s13565_s25 + $0x8] sm:$0xff]  ;;  %v349_v3 = vld [vmem:[%s13565_s25 + $0x10] sm:$0xff] }
  0x68   :  { %333 = dma.hbm_to_vmem [thread:$0]  %s329_s2, 8064, %s331_s1, [#allocation6 + $0x1]  ;;  %346 = vst [vmem:[#allocation4 + $0x30] sm:$0xff] %v345_v1  ;;  %v351_v4 = vld [vmem:[%s13565_s25 + $0x18] sm:$0xff]  ;;  %v353_v5 = vld [vmem:[%s13565_s25 + $0x20] sm:$0xff]  ;;  %v355_v6 = vld [vmem:[%s13565_s25 + $0x28] sm:$0xff] }
  0x69   :  { %348 = vst [vmem:[#allocation4] sm:$0xff] %v347_v2  ;;  %v357_v7 = vld [vmem:[%s13565_s25 + $0x30] sm:$0xff]  ;;  %v359_v8 = vld [vmem:[%s13565_s25 + $0x38] sm:$0xff]  ;;  %v361_v9 = vld [vmem:[%s13565_s25 + $0x40] sm:$0xff] }
  0x6a   :  { %350 = vst [vmem:[#allocation4 + $0x58] sm:$0xff] %v349_v3  ;;  %v363_v10 = vld [vmem:[%s13565_s25 + $0x48] sm:$0xff]  ;;  %v365_v11 = vld [vmem:[%s13565_s25 + $0x50] sm:$0xff]  ;;  %v367_v12 = vld [vmem:[%s13565_s25 + $0x58] sm:$0xff] }
  0x6b   :  { %352 = vst [vmem:[#allocation4 + $0x18] sm:$0xff] %v351_v4  ;;  %v369_v13 = vld [vmem:[%s13565_s25 + $0x60] sm:$0xff]  ;;  %v371_v14 = vld [vmem:[%s13565_s25 + $0x68] sm:$0xff]  ;;  %v373_v15 = vld [vmem:[%s13565_s25 + $0x70] sm:$0xff] }
  0x6c   :  { %354 = vst [vmem:[#allocation4 + $0x50] sm:$0xff] %v353_v5  ;;  %v375_v16 = vld [vmem:[%s13565_s25 + $0x78] sm:$0xff] }
  0x6d   :  { %356 = vst [vmem:[#allocation4 + $0x68] sm:$0xff] %v355_v6 }
  0x6e   :  { %358 = vst [vmem:[#allocation4 + $0x8] sm:$0xff] %v357_v7 }
  0x6f   :  { %360 = vst [vmem:[#allocation4 + $0x48] sm:$0xff] %v359_v8 }
  0x70   :  { %362 = vst [vmem:[#allocation4 + $0x40] sm:$0xff] %v361_v9 }
  0x71   :  { %364 = vst [vmem:[#allocation4 + $0x20] sm:$0xff] %v363_v10 }
  0x72   :  { %366 = vst [vmem:[#allocation4 + $0x10] sm:$0xff] %v365_v11 }
  0x73   :  { %368 = vst [vmem:[#allocation4 + $0x38] sm:$0xff] %v367_v12 }
  0x74   :  { %370 = vst [vmem:[#allocation4 + $0x60] sm:$0xff] %v369_v13 }
  0x75   :  { %372 = vst [vmem:[#allocation4 + $0x70] sm:$0xff] %v371_v14 }
  0x76   :  { %374 = vst [vmem:[#allocation4 + $0x78] sm:$0xff] %v373_v15 }
  0x77   :  { %376 = vst [vmem:[#allocation4 + $0x28] sm:$0xff] %v375_v16 }
  0x78   :  { %382 = vsyncadd [#allocation6 + $0x2], 2048  ;;  %s13566_s28 = sld [smem:[#allocation66_spill]] }
  0x7e   :  { %v396_v17 = vld [vmem:[%s13566_s28] sm:$0xff]  ;;  %v398_v18 = vld [vmem:[%s13566_s28 + $0x8] sm:$0xff]  ;;  %v400_v19 = vld [vmem:[%s13566_s28 + $0x10] sm:$0xff] }
  0x7f   :  { %397 = vst [vmem:[#allocation5] sm:$0xff] %v396_v17  ;;  %v402_v20 = vld [vmem:[%s13566_s28 + $0x18] sm:$0xff]  ;;  %v404_v21 = vld [vmem:[%s13566_s28 + $0x20] sm:$0xff]  ;;  %v406_v22 = vld [vmem:[%s13566_s28 + $0x28] sm:$0xff] }
  0x80   :  { %399 = vst [vmem:[#allocation5 + $0x8] sm:$0xff] %v398_v18  ;;  %v7743_v23 = vld [vmem:[%s13566_s28 + $0x30] sm:$0xf] }
  0x81   :  { %401 = vst [vmem:[#allocation5 + $0x10] sm:$0xff] %v400_v19 }
  0x82   :  { %403 = vst [vmem:[#allocation5 + $0x18] sm:$0xff] %v402_v20 }
  0x83   :  { %405 = vst [vmem:[#allocation5 + $0x20] sm:$0xff] %v404_v21 }
  0x84   :  { %407 = vst [vmem:[#allocation5 + $0x28] sm:$0xff] %v406_v22 }
  0x85   :  { %419 = vst [vmem:[#allocation5 + $0x30] sm:$0xf] %v7743_v23 }
  0x86   :  { %423 = vsyncadd [#allocation6 + $0x3], 832  ;;  %v7970_v24 = vld [vmem:[#allocation11 + $0x1c0] sm:$0xf]  ;;  %vm2817_vm0 = vcmask 130048   ;;  %s13567_s22 = sld [smem:[#allocation68_spill]] }
  0x87   :  { %v11203_v25 = vld [vmem:[#allocation11 + $0x1dc] sm:$0xf0]  ;;  %vm4070_vm1 = vcmask 1043456   ;;  %vm4066_vm2 = vcmask 850944  }
  0x88   :  { %v7971_v26 = vor.u32 %v11203_v25, %v7970_v24  ;;  %v8226_v27 = vld [vmem:[#allocation11 + $0x3c0] sm:$0xf] }
  0x89   :  { %v11267_v28 = vld [vmem:[#allocation11 + $0x3dc] sm:$0xf0] }
  0x8a   :  { %v8482_v29 = vld [vmem:[#allocation11 + $0x5c0] sm:$0xf]  ;;  %v8227_v30 = vor.u32 %v11267_v28, %v8226_v27  ;;  %2821 = vmatpush.bf16.msra.mxu0 %v7971_v26 }
  0x8b   :  { %v11331_v31 = vld [vmem:[#allocation11 + $0x5dc] sm:$0xf0] }
  0x8c   :  { %v8738_v32 = vld [vmem:[#allocation11 + $0x7c0] sm:$0xf]  ;;  %v8483_v34 = vor.u32 %v11331_v31, %v8482_v29  ;;  %2834 = vmatpush.bf16.msra.mxu1 %v8227_v30 }
  0x8d   :  { %v11395_v33 = vld [vmem:[#allocation11 + $0x7dc] sm:$0xf0] }
  0x8e   :  { %v8739_v35 = vor.u32 %v11395_v33, %v8738_v32  ;;  %v7938_v36 = vld [vmem:[#allocation11 + $0x180] sm:$0xf]  ;;  %2847 = vmatpush.bf16.msra.mxu2 %v8483_v34 }
  0x8f   :  { %v11195_v37 = vld [vmem:[#allocation11 + $0x19c] sm:$0xf0] }
  0x90   :  { %v8194_v38 = vld [vmem:[#allocation11 + $0x380] sm:$0xf]  ;;  %v7939_v39 = vor.u32 %v11195_v37, %v7938_v36  ;;  %2860 = vmatpush.bf16.msra.mxu3 %v8739_v35 }
  0x91   :  { %v11259_v40 = vld [vmem:[#allocation11 + $0x39c] sm:$0xf0] }
  0x92   :  { %v8450_v41 = vld [vmem:[#allocation11 + $0x580] sm:$0xf]  ;;  %v8195_v43 = vor.u32 %v11259_v40, %v8194_v38  ;;  %2822 = vmatpush.bf16.msra.mxu0 %v7939_v39 }
  0x93   :  { %v11323_v42 = vld [vmem:[#allocation11 + $0x59c] sm:$0xf0] }
  0x94   :  { %v8451_v44 = vor.u32 %v11323_v42, %v8450_v41  ;;  %v8706_v45 = vld [vmem:[#allocation11 + $0x780] sm:$0xf]  ;;  %2835 = vmatpush.bf16.msra.mxu1 %v8195_v43 }
  0x95   :  { %v11387_v46 = vld [vmem:[#allocation11 + $0x79c] sm:$0xf0] }
  0x96   :  { %v7906_v47 = vld [vmem:[#allocation11 + $0x140] sm:$0xf]  ;;  %v8707_v48 = vor.u32 %v11387_v46, %v8706_v45  ;;  %2848 = vmatpush.bf16.msra.mxu2 %v8451_v44 }
  0x97   :  { %v11187_v49 = vld [vmem:[#allocation11 + $0x15c] sm:$0xf0] }
  0x98   :  { %v8162_v50 = vld [vmem:[#allocation11 + $0x340] sm:$0xf]  ;;  %v7907_v52 = vor.u32 %v11187_v49, %v7906_v47  ;;  %2861 = vmatpush.bf16.msra.mxu3 %v8707_v48  ;;  %v12800_v48 = vld [vmem:[#allocation8] sm:$0x7f] }
  0x99   :  { %v11251_v51 = vld [vmem:[#allocation11 + $0x35c] sm:$0xf0] }
  0x9a   :  { %v8418_v53 = vld [vmem:[#allocation11 + $0x540] sm:$0xf]  ;;  %v8163_v56 = vor.u32 %v11251_v51, %v8162_v50  ;;  %2823 = vmatpush.bf16.msra.mxu0 %v7907_v52 }
  0x9b   :  { %v11315_v54 = vld [vmem:[#allocation11 + $0x55c] sm:$0xf0] }
  0x9c   :  { %v8674_v55 = vld [vmem:[#allocation11 + $0x740] sm:$0xf]  ;;  %v8419_v60 = vor.u32 %v11315_v54, %v8418_v53  ;;  %2836 = vmatpush.bf16.msra.mxu1 %v8163_v56 }
  0x9d   :  { %v11379_v57 = vld [vmem:[#allocation11 + $0x75c] sm:$0xf0] }
  0x9e   :  { %v7874_v58 = vld [vmem:[#allocation11 + $0x100] sm:$0xf]  ;;  %v8675_v61 = vor.u32 %v11379_v57, %v8674_v55  ;;  %2849 = vmatpush.bf16.msra.mxu2 %v8419_v60  ;;  %v820_v60 = vperm.slane %v12800_v48, 2 }
  0x9f   :  { %v11179_v59 = vld [vmem:[#allocation11 + $0x11c] sm:$0xf0] }
  0xa0   :  { %v8130_v62 = vld [vmem:[#allocation11 + $0x300] sm:$0xf]  ;;  %v7875_v4 = vor.u32 %v11179_v59, %v7874_v58  ;;  %2862 = vmatpush.bf16.msra.mxu3 %v8675_v61  ;;  %v11199_v58 = vld [vmem:[#allocation11 + $0x1c4] sm:$0xf]  ;;  %v818_v61 = vperm.slane %v12800_v48, 0 }
  0xa1   :  { %v11243_v63 = vld [vmem:[#allocation11 + $0x31c] sm:$0xf0]  ;;  %v7972_v59 = vld [vmem:[#allocation11 + $0x1e0] sm:$0xf0] }
  0xa2   :  { %v8386_v0 = vld [vmem:[#allocation11 + $0x500] sm:$0xf]  ;;  %v8131_v5 = vor.u32 %v11243_v63, %v8130_v62  ;;  %2824 = vmatpush.bf16.msra.mxu0 %v7875_v4 }
  0xa3   :  { %v11307_v1 = vld [vmem:[#allocation11 + $0x51c] sm:$0xf0] }
  0xa4   :  { %v8642_v2 = vld [vmem:[#allocation11 + $0x700] sm:$0xf]  ;;  %v8387_v8 = vor.u32 %v11307_v1, %v8386_v0  ;;  %2837 = vmatpush.bf16.msra.mxu1 %v8131_v5 }
  0xa5   :  { %v11371_v3 = vld [vmem:[#allocation11 + $0x71c] sm:$0xf0] }
  0xa6   :  { %v7842_v6 = vld [vmem:[#allocation11 + $0xc0] sm:$0xf]  ;;  %v8643_v9 = vor.u32 %v11371_v3, %v8642_v2  ;;  %2850 = vmatpush.bf16.msra.mxu2 %v8387_v8  ;;  %v11263_v2 = vld [vmem:[#allocation11 + $0x3c4] sm:$0xf] }
  0xa7   :  { %v11171_v7 = vld [vmem:[#allocation11 + $0xdc] sm:$0xf0] }
  0xa8   :  { %v8098_v10 = vld [vmem:[#allocation11 + $0x2c0] sm:$0xf]  ;;  %v7843_v16 = vor.u32 %v11171_v7, %v7842_v6  ;;  %2863 = vmatpush.bf16.msra.mxu3 %v8643_v9  ;;  %v821_v7 = vperm.slane %v12800_v48, 3  ;;  %v7975_v9 = vor.u32 %v11199_v58, %v7972_v59  ;;  %v824_v59 = vperm.slane %v12800_v48, 6 }
  0xa9   :  { %v11235_v11 = vld [vmem:[#allocation11 + $0x2dc] sm:$0xf0] }
  0xaa   :  { %v8354_v12 = vld [vmem:[#allocation11 + $0x4c0] sm:$0xf]  ;;  %v8099_v17 = vor.u32 %v11235_v11, %v8098_v10  ;;  %2825 = vmatpush.bf16.msra.mxu0 %v7843_v16  ;;  %v8228_v10 = vld [vmem:[#allocation11 + $0x3e0] sm:$0xf0]  ;;  %v12805_v16 = vpack.c.bf16 %v818_v61, %v818_v61 }
  0xab   :  { %v11299_v13 = vld [vmem:[#allocation11 + $0x4dc] sm:$0xf0] }
  0xac   :  { %v8610_v14 = vld [vmem:[#allocation11 + $0x6c0] sm:$0xf]  ;;  %v8355_v20 = vor.u32 %v11299_v13, %v8354_v12  ;;  %2838 = vmatpush.bf16.msra.mxu1 %v8099_v17  ;;  %v819_v17 = vperm.slane %v12800_v48, 1 }
  0xad   :  { %v11363_v15 = vld [vmem:[#allocation11 + $0x6dc] sm:$0xf0] }
  0xae   :  { %v7810_v18 = vld [vmem:[#allocation11 + $0x80] sm:$0xf]  ;;  %v8611_v21 = vor.u32 %v11363_v15, %v8610_v14  ;;  %2851 = vmatpush.bf16.msra.mxu2 %v8355_v20  ;;  %v11191_v14 = vld [vmem:[#allocation11 + $0x184] sm:$0xf]  ;;  %v8231_v20 = vor.u32 %v11263_v2, %v8228_v10 }
  0xaf   :  { %v11163_v19 = vld [vmem:[#allocation11 + $0x9c] sm:$0xf0]  ;;  %v7940_v15 = vld [vmem:[#allocation11 + $0x1a0] sm:$0xf0] }
  0xb0   :  { %v8066_v22 = vld [vmem:[#allocation11 + $0x280] sm:$0xf]  ;;  %v7811_v28 = vor.u32 %v11163_v19, %v7810_v18  ;;  %2864 = vmatpush.bf16.msra.mxu3 %v8611_v21  ;;  %v12808_v18 = vpack.c.bf16 %v820_v60, %v820_v60  ;;  %v12810_v21 = vpack.c.bf16 %v821_v7, %v821_v7  ;;  %v8100_v2 = vld [vmem:[#allocation11 + $0x2e0] sm:$0xf0] }
  0xb1   :  { %v11227_v23 = vld [vmem:[#allocation11 + $0x29c] sm:$0xf0] }
  0xb2   :  { %v8322_v24 = vld [vmem:[#allocation11 + $0x480] sm:$0xf]  ;;  %v8067_v29 = vor.u32 %v11227_v23, %v8066_v22  ;;  %2826 = vmatpush.bf16.msra.mxu0 %v7811_v28 }
  0xb3   :  { %v11291_v25 = vld [vmem:[#allocation11 + $0x49c] sm:$0xf0] }
  0xb4   :  { %v8578_v26 = vld [vmem:[#allocation11 + $0x680] sm:$0xf]  ;;  %v8323_v33 = vor.u32 %v11291_v25, %v8322_v24  ;;  %2839 = vmatpush.bf16.msra.mxu1 %v8067_v29  ;;  %v7943_v25 = vor.u32 %v11191_v14, %v7940_v15  ;;  %v11223_v14 = vld [vmem:[#allocation11 + $0x284] sm:$0xf] }
  0xb5   :  { %v11355_v27 = vld [vmem:[#allocation11 + $0x69c] sm:$0xf0]  ;;  %v8068_v15 = vld [vmem:[#allocation11 + $0x2a0] sm:$0xf0] }
  0xb6   :  { %v7778_v30 = vld [vmem:[#allocation11 + $0x40] sm:$0xf]  ;;  %v8579_v34 = vor.u32 %v11355_v27, %v8578_v26  ;;  %2852 = vmatpush.bf16.msra.mxu2 %v8323_v33  ;;  %v11255_v26 = vld [vmem:[#allocation11 + $0x384] sm:$0xf] }
  0xb7   :  { %v11155_v31 = vld [vmem:[#allocation11 + $0x5c] sm:$0xf0]  ;;  %v8196_v27 = vld [vmem:[#allocation11 + $0x3a0] sm:$0xf0] }
  0xb8   :  { %v8034_v32 = vld [vmem:[#allocation11 + $0x240] sm:$0xf]  ;;  %v7779_v41 = vor.u32 %v11155_v31, %v7778_v30  ;;  %2865 = vmatpush.bf16.msra.mxu3 %v8579_v34  ;;  %v11183_v30 = vld [vmem:[#allocation11 + $0x144] sm:$0xf]  ;;  %v8199_v34 = vor.u32 %v11255_v26, %v8196_v27  ;;  %v8071_v27 = vor.u32 %v11223_v14, %v8068_v15 }
  0xb9   :  { %v11219_v35 = vld [vmem:[#allocation11 + $0x25c] sm:$0xf0]  ;;  %v7908_v31 = vld [vmem:[#allocation11 + $0x160] sm:$0xf0] }
  0xba   :  { %v8290_v36 = vld [vmem:[#allocation11 + $0x440] sm:$0xf]  ;;  %v8035_v45 = vor.u32 %v11219_v35, %v8034_v32  ;;  %2827 = vmatpush.bf16.msra.mxu0 %v7779_v41  ;;  %v12813_v32 = vpack.c.bf16 %v819_v17, %v819_v17  ;;  %v11503_v15 = vld [vmem:[#allocation11 + $0xb44] sm:$0xf] }
  0xbb   :  { %v11283_v37 = vld [vmem:[#allocation11 + $0x45c] sm:$0xf0] }
  0xbc   :  { %v8546_v38 = vld [vmem:[#allocation11 + $0x640] sm:$0xf]  ;;  %v8291_v49 = vor.u32 %v11283_v37, %v8290_v36  ;;  %2840 = vmatpush.bf16.msra.mxu1 %v8035_v45 }
  0xbd   :  { %v11347_v39 = vld [vmem:[#allocation11 + $0x65c] sm:$0xf0] }
  0xbe   :  { %v7746_v40 = vld [vmem:[#allocation11] sm:$0xf]  ;;  %v8547_v50 = vor.u32 %v11347_v39, %v8546_v38  ;;  %2853 = vmatpush.bf16.msra.mxu2 %v8291_v49  ;;  %v7911_v38 = vor.u32 %v11183_v30, %v7908_v31  ;;  %v11247_v39 = vld [vmem:[#allocation11 + $0x344] sm:$0xf] }
  0xbf   :  { %v11147_v42 = vld [vmem:[#allocation11 + $0x1c] sm:$0xf0] }
  0xc0   :  { %v8002_v43 = vld [vmem:[#allocation11 + $0x200] sm:$0xf]  ;;  %v7747_v57 = vor.u32 %v11147_v42, %v7746_v40  ;;  %2866 = vmatpush.bf16.msra.mxu3 %v8547_v50  ;;  %v8164_v40 = vld [vmem:[#allocation11 + $0x360] sm:$0xf0] }
  0xc1   :  { %v11211_v44 = vld [vmem:[#allocation11 + $0x21c] sm:$0xf0] }
  0xc2   :  { %v8258_v46 = vld [vmem:[#allocation11 + $0x400] sm:$0xf]  ;;  %v8003_v62 = vor.u32 %v11211_v44, %v8002_v43  ;;  %2828 = vmatpush.bf16.msra.mxu0 %v7747_v57  ;;  %v11175_v43 = vld [vmem:[#allocation11 + $0x104] sm:$0xf] }
  0xc3   :  { %v11275_v47 = vld [vmem:[#allocation11 + $0x41c] sm:$0xf0]  ;;  %v7876_v44 = vld [vmem:[#allocation11 + $0x120] sm:$0xf0] }
  0xc4   :  { %v8514_v51 = vld [vmem:[#allocation11 + $0x600] sm:$0xf]  ;;  %v8259_v3 = vor.u32 %v11275_v47, %v8258_v46  ;;  %2841 = vmatpush.bf16.msra.mxu1 %v8003_v62  ;;  %v8167_v46 = vor.u32 %v11247_v39, %v8164_v40  ;;  %v7844_v57 = vld [vmem:[#allocation11 + $0xe0] sm:$0xf0] }
  0xc5   :  { %v8994_v52 = vld [vmem:[#allocation11 + $0x9c0] sm:$0xf]  ;;  %2829 = vmatmul.bf16.vlgmr.msra.gmra.mxu0 %v12805_v16  ;;  %v8740_v39 = vld [vmem:[#allocation11 + $0x7e0] sm:$0xf0] }
  0xc6   :  { %v11459_v53 = vld [vmem:[#allocation11 + $0x9dc] sm:$0xf0]  ;;  %2854 = vmatpush.bf16.msra.mxu2 %v8259_v3 }
  0xc7   :  { %v11339_v54 = vld [vmem:[#allocation11 + $0x61c] sm:$0xf0]  ;;  %v8995_v63 = vor.u32 %v11459_v53, %v8994_v52  ;;  %2842 = vmatmul.bf16.vlgmr.msra.gmra.mxu1 %v12813_v32  ;;  %v11239_v52 = vld [vmem:[#allocation11 + $0x304] sm:$0xf] }
  0xc8   :  { %v9250_v55 = vld [vmem:[#allocation11 + $0xbc0] sm:$0xf]  ;;  %v8515_v4 = vor.u32 %v11339_v54, %v8514_v51  ;;  %v7879_v51 = vor.u32 %v11175_v43, %v7876_v44  ;;  %v8132_v53 = vld [vmem:[#allocation11 + $0x320] sm:$0xf0]  ;;  %v822_v43 = vperm.slane %v12800_v48, 4 }
  0xc9   :  { %v11523_v56 = vld [vmem:[#allocation11 + $0xbdc] sm:$0xf0]  ;;  %2873 = vmatpush.bf16.msrb.mxu0 %v8995_v63  ;;  %2855 = vmatmul.bf16.vlgmr.msra.gmra.mxu2 %v12808_v18  ;;  %v8135_v60 = vor.u32 %v11239_v52, %v8132_v53  ;;  %v11519_v52 = vld [vmem:[#allocation11 + $0xbc4] sm:$0xf] }
  0xca   :  { %v9282_v0 = vld [vmem:[#allocation11 + $0xc00] sm:$0xf]  ;;  %v9251_v8 = vor.u32 %v11523_v56, %v9250_v55  ;;  %2867 = vmatpush.bf16.msra.mxu3 %v8515_v4  ;;  %v11167_v56 = vld [vmem:[#allocation11 + $0xc4] sm:$0xf] }
  0xcb   :  { %v11531_v1 = vld [vmem:[#allocation11 + $0xc1c] sm:$0xf0]  ;;  %v9252_v53 = vld [vmem:[#allocation11 + $0xbe0] sm:$0xf0] }
  0xcc   :  { %v8962_v5 = vld [vmem:[#allocation11 + $0x980] sm:$0xf]  ;;  %v9283_v13 = vor.u32 %v11531_v1, %v9282_v0  ;;  %2886 = vmatpush.bf16.msrb.mxu1 %v9251_v8  ;;  %v7847_v0 = vor.u32 %v11167_v56, %v7844_v57  ;;  %v11231_v1 = vld [vmem:[#allocation11 + $0x2c4] sm:$0xf]  ;;  %v12819_v8 = vpack.c.bf16 %v824_v59, %v824_v59  ;;  %v12825_v59 = vpack.c.bf16 %v822_v43, %v822_v43 }
  0xcd   :  { %v11451_v6 = vld [vmem:[#allocation11 + $0x99c] sm:$0xf0]  ;;  %2868 = vmatmul.bf16.vlgmr.msra.gmra.mxu3 %v12810_v21  ;;  %v11319_v56 = vld [vmem:[#allocation11 + $0x584] sm:$0xf] }
  0xce   :  { %v9218_v11 = vld [vmem:[#allocation11 + $0xb80] sm:$0xf]  ;;  %v8963_v19 = vor.u32 %v11451_v6, %v8962_v5  ;;  %2912 = vmatpush.bf16.msrb.mxu3 %v7975_v9  ;;  %2906 = vmatpush.bf16.msrb.mxu2 %v9283_v13  ;;  %v11159_v5 = vld [vmem:[#allocation11 + $0x84] sm:$0xf]  ;;  %v8103_v9 = vor.u32 %v11231_v1, %v8100_v2 }
  0xcf   :  { %v11515_v12 = vld [vmem:[#allocation11 + $0xb9c] sm:$0xf0]  ;;  %v7812_v6 = vld [vmem:[#allocation11 + $0xa0] sm:$0xf0] }
  0xd0   :  { %v8930_v22 = vld [vmem:[#allocation11 + $0x940] sm:$0xf]  ;;  %v9219_v24 = vor.u32 %v11515_v12, %v9218_v11  ;;  %2874 = vmatpush.bf16.msrb.mxu0 %v8963_v19  ;;  %v7815_v13 = vor.u32 %v11159_v5, %v7812_v6  ;;  %v8452_v57 = vld [vmem:[#allocation11 + $0x5a0] sm:$0xf0] }
  0xd1   :  { %v11443_v23 = vld [vmem:[#allocation11 + $0x95c] sm:$0xf0]  ;;  %v8455_v1 = vor.u32 %v11319_v56, %v8452_v57  ;;  %v11511_v2 = vld [vmem:[#allocation11 + $0xb84] sm:$0xf] }
  0xd2   :  { %v9186_v28 = vld [vmem:[#allocation11 + $0xb40] sm:$0xf]  ;;  %v8931_v33 = vor.u32 %v11443_v23, %v8930_v22  ;;  %2925 = vmatpush.bf16.msra.mxu2 %v8231_v20  ;;  %2887 = vmatpush.bf16.msrb.mxu1 %v9219_v24  ;;  %v11151_v20 = vld [vmem:[#allocation11 + $0x44] sm:$0xf] }
  0xd3   :  { %v11507_v29 = vld [vmem:[#allocation11 + $0xb5c] sm:$0xf0]  ;;  %2913 = vmatpush.bf16.msrb.mxu3 %v7943_v25  ;;  %v7780_v22 = vld [vmem:[#allocation11 + $0x60] sm:$0xf0] }
  0xd4   :  { %v8898_v35 = vld [vmem:[#allocation11 + $0x900] sm:$0xf]  ;;  %v9187_v37 = vor.u32 %v11507_v29, %v9186_v28  ;;  %2875 = vmatpush.bf16.msrb.mxu0 %v8931_v33  ;;  %v11215_v24 = vld [vmem:[#allocation11 + $0x244] sm:$0xf]  ;;  %v7783_v33 = vor.u32 %v11151_v20, %v7780_v22 }
  0xd5   :  { %v11435_v36 = vld [vmem:[#allocation11 + $0x91c] sm:$0xf0]  ;;  %v8036_v25 = vld [vmem:[#allocation11 + $0x260] sm:$0xf0] }
  0xd6   :  { %v9154_v41 = vld [vmem:[#allocation11 + $0xb00] sm:$0xf]  ;;  %v8899_v45 = vor.u32 %v11435_v36, %v8898_v35  ;;  %2926 = vmatpush.bf16.msra.mxu2 %v8199_v34  ;;  %2888 = vmatpush.bf16.msrb.mxu1 %v9187_v37  ;;  %v11143_v34 = vld [vmem:[#allocation11 + $0x4] sm:$0xf]  ;;  %v8039_v44 = vor.u32 %v11215_v24, %v8036_v25 }
  0xd7   :  { %v11499_v42 = vld [vmem:[#allocation11 + $0xb1c] sm:$0xf0]  ;;  %2914 = vmatpush.bf16.msrb.mxu3 %v7911_v38  ;;  %v11327_v35 = vld [vmem:[#allocation11 + $0x5c4] sm:$0xf] }
  0xd8   :  { %v8866_v47 = vld [vmem:[#allocation11 + $0x8c0] sm:$0xf]  ;;  %v9155_v50 = vor.u32 %v11499_v42, %v9154_v41  ;;  %2876 = vmatpush.bf16.msrb.mxu0 %v8899_v45  ;;  %v8484_v36 = vld [vmem:[#allocation11 + $0x5e0] sm:$0xf0] }
  0xd9   :  { %v11427_v49 = vld [vmem:[#allocation11 + $0x8dc] sm:$0xf0]  ;;  %9312 = vmatmul.msk.bf16.vlgmr.msrb.gmra.mxu2 %vm2817_vm0, %v12819_v8  ;;  %v7748_v37 = vld [vmem:[#allocation11 + $0x20] sm:$0xf0]  ;;  %v8487_v45 = vor.u32 %v11327_v35, %v8484_v36 }
  0xda   :  { %v9122_v54 = vld [vmem:[#allocation11 + $0xac0] sm:$0xf]  ;;  %v8867_v58 = vor.u32 %v11427_v49, %v8866_v47  ;;  %2927 = vmatpush.bf16.msra.mxu2 %v8167_v46  ;;  %2889 = vmatpush.bf16.msrb.mxu1 %v9155_v50  ;;  %v11391_v38 = vld [vmem:[#allocation11 + $0x7c4] sm:$0xf]  ;;  %v823_v47 = vperm.slane %v12800_v48, 5  ;;  %v7751_v50 = vor.u32 %v11143_v34, %v7748_v37 }
  0xdb   :  { %v11491_v55 = vld [vmem:[#allocation11 + $0xadc] sm:$0xf0]  ;;  %2915 = vmatpush.bf16.msrb.mxu3 %v7879_v51  ;;  %v11455_v41 = vld [vmem:[#allocation11 + $0x9c4] sm:$0xf] }
  0xdc   :  { %v8834_v61 = vld [vmem:[#allocation11 + $0x880] sm:$0xf]  ;;  %v9123_v63 = vor.u32 %v11491_v55, %v9122_v54  ;;  %2877 = vmatpush.bf16.msrb.mxu0 %v8867_v58  ;;  %v8996_v42 = vld [vmem:[#allocation11 + $0x9e0] sm:$0xf0]  ;;  %v8743_v54 = vor.u32 %v11391_v38, %v8740_v39 }
  0xdd   :  { %v11419_v62 = vld [vmem:[#allocation11 + $0x89c] sm:$0xf0]  ;;  %v11207_v46 = vld [vmem:[#allocation11 + $0x204] sm:$0xf]  ;;  %v8999_v55 = vor.u32 %v11455_v41, %v8996_v42 }
  0xde   :  { %v9090_v3 = vld [vmem:[#allocation11 + $0xa80] sm:$0xf]  ;;  %v8835_v7 = vor.u32 %v11419_v62, %v8834_v61  ;;  %2928 = vmatpush.bf16.msra.mxu2 %v8135_v60  ;;  %2890 = vmatpush.bf16.msrb.mxu1 %v9123_v63  ;;  %v8004_v51 = vld [vmem:[#allocation11 + $0x220] sm:$0xf0]  ;;  %v12827_v63 = vpack.c.bf16 %v823_v47, %v823_v47 }
  0xdf   :  { %v11483_v4 = vld [vmem:[#allocation11 + $0xa9c] sm:$0xf0]  ;;  %2916 = vmatpush.bf16.msrb.mxu3 %v7847_v0  ;;  %v11383_v58 = vld [vmem:[#allocation11 + $0x784] sm:$0xf]  ;;  %v8007_v48 = vor.u32 %v11207_v46, %v8004_v51  ;;  %v9255_v0 = vor.u32 %v11519_v52, %v9252_v53 }
  0xe0   :  { %v8802_v10 = vld [vmem:[#allocation11 + $0x840] sm:$0xf]  ;;  %v9091_v12 = vor.u32 %v11483_v4, %v9090_v3  ;;  %2878 = vmatpush.bf16.msrb.mxu0 %v8835_v7  ;;  %v8708_v60 = vld [vmem:[#allocation11 + $0x7a0] sm:$0xf0] }
  0xe1   :  { %v11411_v11 = vld [vmem:[#allocation11 + $0x85c] sm:$0xf0]  ;;  %v11447_v61 = vld [vmem:[#allocation11 + $0x984] sm:$0xf]  ;;  %v8711_v4 = vor.u32 %v11383_v58, %v8708_v60 }
  0xe2   :  { %v9058_v17 = vld [vmem:[#allocation11 + $0xa40] sm:$0xf]  ;;  %v8803_v23 = vor.u32 %v11411_v11, %v8802_v10  ;;  %2929 = vmatpush.bf16.msra.mxu2 %v8103_v9  ;;  %2891 = vmatpush.bf16.msrb.mxu1 %v9091_v12  ;;  %v8964_v62 = vld [vmem:[#allocation11 + $0x9a0] sm:$0xf0] }
  0xe3   :  { %v11475_v19 = vld [vmem:[#allocation11 + $0xa5c] sm:$0xf0]  ;;  %2917 = vmatpush.bf16.msrb.mxu3 %v7815_v13  ;;  %v9220_v3 = vld [vmem:[#allocation11 + $0xba0] sm:$0xf0]  ;;  %v8967_v5 = vor.u32 %v11447_v61, %v8964_v62 }
  0xe4   :  { %v8770_v26 = vld [vmem:[#allocation11 + $0x800] sm:$0xf]  ;;  %v9059_v31 = vor.u32 %v11475_v19, %v9058_v17  ;;  %2879 = vmatpush.bf16.msrb.mxu0 %v8803_v23  ;;  %v11311_v6 = vld [vmem:[#allocation11 + $0x544] sm:$0xf]  ;;  %v9223_v13 = vor.u32 %v11511_v2, %v9220_v3 }
  0xe5   :  { %v11403_v28 = vld [vmem:[#allocation11 + $0x81c] sm:$0xf0]  ;;  %v8420_v7 = vld [vmem:[#allocation11 + $0x560] sm:$0xf0] }
  0xe6   :  { %v9026_v29 = vld [vmem:[#allocation11 + $0xa00] sm:$0xf]  ;;  %v8771_v40 = vor.u32 %v11403_v28, %v8770_v26  ;;  %2930 = vmatpush.bf16.msra.mxu2 %v8071_v27  ;;  %2892 = vmatpush.bf16.msrb.mxu1 %v9059_v31  ;;  %v11375_v9 = vld [vmem:[#allocation11 + $0x744] sm:$0xf]  ;;  %v8423_v14 = vor.u32 %v11311_v6, %v8420_v7 }
  0xe7   :  { %v11467_v30 = vld [vmem:[#allocation11 + $0xa1c] sm:$0xf0]  ;;  %2918 = vmatpush.bf16.msrb.mxu3 %v7783_v33  ;;  %v8676_v10 = vld [vmem:[#allocation11 + $0x760] sm:$0xf0] }
  0xe8   :  { %v9027_v49 = vor.u32 %v11467_v30, %v9026_v29  ;;  %2880 = vmatpush.bf16.msrb.mxu0 %v8771_v40  ;;  %v11439_v11 = vld [vmem:[#allocation11 + $0x944] sm:$0xf]  ;;  %v8679_v19 = vor.u32 %v11375_v9, %v8676_v10 }
  0xe9   :  { %v8932_v12 = vld [vmem:[#allocation11 + $0x960] sm:$0xf0] }
  0xea   :  { %2931 = vmatpush.bf16.msra.mxu2 %v8039_v44  ;;  %2893 = vmatpush.bf16.msrb.mxu1 %v9027_v49  ;;  %v9188_v17 = vld [vmem:[#allocation11 + $0xb60] sm:$0xf0]  ;;  %v8935_v20 = vor.u32 %v11439_v11, %v8932_v12 }
  0xeb   :  { %2919 = vmatpush.bf16.msrb.mxu3 %v7751_v50  ;;  %2881 = vmatmul.bf16.vlgmr.msrb.gmra.mxu0 %v12825_v59  ;;  %v11303_v22 = vld [vmem:[#allocation11 + $0x504] sm:$0xf]  ;;  %v9191_v28 = vor.u32 %v11503_v15, %v9188_v17  ;;  %v7978_v17 = vld [vmem:[#allocation11 + $0x1c8] sm:$0xf] }
  0xec   :  { %2938 = vmatpush.bf16.msra.mxu0 %v8487_v45  ;;  %v8388_v23 = vld [vmem:[#allocation11 + $0x520] sm:$0xf0] }
  0xed   :  { %2894 = vmatmul.bf16.vlgmr.msrb.gmra.mxu1 %v12827_v63  ;;  %v11367_v24 = vld [vmem:[#allocation11 + $0x704] sm:$0xf]  ;;  %v8391_v29 = vor.u32 %v11303_v22, %v8388_v23  ;;  %v11268_v22 = vld [vmem:[#allocation11 + $0x3e4] sm:$0xf0] }
  0xee   :  { %2951 = vmatpush.bf16.msra.mxu1 %v8743_v54  ;;  %2932 = vmatpush.bf16.msra.mxu2 %v8007_v48  ;;  %v8644_v25 = vld [vmem:[#allocation11 + $0x720] sm:$0xf0] }
  0xef   :  { %2964 = vmatpush.bf16.msra.mxu3 %v8999_v55  ;;  %v11431_v26 = vld [vmem:[#allocation11 + $0x904] sm:$0xf]  ;;  %v8647_v33 = vor.u32 %v11367_v24, %v8644_v25 }
  0xf0   :  { %2939 = vmatpush.bf16.msra.mxu0 %v8455_v1  ;;  %v8900_v27 = vld [vmem:[#allocation11 + $0x920] sm:$0xf0]  ;;  %2920 = vmatmul.bf16.vlgmr.msrb.gmra.mxu3 %v12805_v16 }
  0xf1   :  { %2933 = vmatmul.bf16.vlgmr.msra.gmra.mxu2 %v12813_v32  ;;  %v11495_v30 = vld [vmem:[#allocation11 + $0xb04] sm:$0xf]  ;;  %v8903_v34 = vor.u32 %v11431_v26, %v8900_v27 }
  0xf2   :  { %2977 = vmatpush.bf16.msrb.mxu2 %v9255_v0  ;;  %2952 = vmatpush.bf16.msra.mxu1 %v8711_v4  ;;  %v9156_v31 = vld [vmem:[#allocation11 + $0xb20] sm:$0xf0] }
  0xf3   :  { %2965 = vmatpush.bf16.msra.mxu3 %v8967_v5  ;;  %v11295_v35 = vld [vmem:[#allocation11 + $0x4c4] sm:$0xf]  ;;  %v9159_v41 = vor.u32 %v11495_v30, %v9156_v31  ;;  %v8490_v31 = vld [vmem:[#allocation11 + $0x5c8] sm:$0xf] }
  0xf4   :  { %2940 = vmatpush.bf16.msra.mxu0 %v8423_v14  ;;  %v8356_v36 = vld [vmem:[#allocation11 + $0x4e0] sm:$0xf0] }
  0xf5   :  { %v11359_v37 = vld [vmem:[#allocation11 + $0x6c4] sm:$0xf]  ;;  %v8359_v42 = vor.u32 %v11295_v35, %v8356_v36  ;;  %v8746_v36 = vld [vmem:[#allocation11 + $0x7c8] sm:$0xf] }
  0xf6   :  { %2978 = vmatpush.bf16.msrb.mxu2 %v9223_v13  ;;  %2953 = vmatpush.bf16.msra.mxu1 %v8679_v19  ;;  %v8612_v38 = vld [vmem:[#allocation11 + $0x6e0] sm:$0xf0]  ;;  %v11204_v19 = vld [vmem:[#allocation11 + $0x1e4] sm:$0xf0] }
  0xf7   :  { %2966 = vmatpush.bf16.msra.mxu3 %v8935_v20  ;;  %v11423_v39 = vld [vmem:[#allocation11 + $0x8c4] sm:$0xf]  ;;  %v8615_v45 = vor.u32 %v11359_v37, %v8612_v38  ;;  %v8234_v20 = vld [vmem:[#allocation11 + $0x3c8] sm:$0xf] }
  0xf8   :  { %v8868_v40 = vld [vmem:[#allocation11 + $0x8e0] sm:$0xf0]  ;;  %2941 = vmatpush.bf16.msra.mxu0 %v8391_v29  ;;  %v8235_v35 = vor.u32 %v11268_v22, %v8234_v20  ;;  %v11396_v37 = vld [vmem:[#allocation11 + $0x7e4] sm:$0xf0] }
  0xf9   :  { %v11487_v43 = vld [vmem:[#allocation11 + $0xac4] sm:$0xf]  ;;  %v8871_v46 = vor.u32 %v11423_v39, %v8868_v40  ;;  %v7946_v38 = vld [vmem:[#allocation11 + $0x188] sm:$0xf] }
  0xfa   :  { %2979 = vmatpush.bf16.msrb.mxu2 %v9191_v28  ;;  %v9124_v44 = vld [vmem:[#allocation11 + $0xae0] sm:$0xf0]  ;;  %2954 = vmatpush.bf16.msra.mxu1 %v8647_v33  ;;  %v11332_v33 = vld [vmem:[#allocation11 + $0x5e4] sm:$0xf0] }
  0xfb   :  { %2967 = vmatpush.bf16.msra.mxu3 %v8903_v34  ;;  %v11287_v47 = vld [vmem:[#allocation11 + $0x484] sm:$0xf]  ;;  %v9127_v54 = vor.u32 %v11487_v43, %v9124_v44  ;;  %v7979_v34 = vor.u32 %v11204_v19, %v7978_v17  ;;  %v11196_v40 = vld [vmem:[#allocation11 + $0x1a4] sm:$0xf0]  ;;  %v8491_v44 = vor.u32 %v11332_v33, %v8490_v31 }
  0xfc   :  { %v8324_v49 = vld [vmem:[#allocation11 + $0x4a0] sm:$0xf0]  ;;  %2942 = vmatpush.bf16.msra.mxu0 %v8359_v42  ;;  %v11260_v42 = vld [vmem:[#allocation11 + $0x3a4] sm:$0xf0] }
  0xfd   :  { %v11351_v50 = vld [vmem:[#allocation11 + $0x684] sm:$0xf]  ;;  %v8327_v55 = vor.u32 %v11287_v47, %v8324_v49  ;;  %v11324_v47 = vld [vmem:[#allocation11 + $0x5a4] sm:$0xf0]  ;;  %v7947_v49 = vor.u32 %v11196_v40, %v7946_v38 }
  0xfe   :  { %v8580_v51 = vld [vmem:[#allocation11 + $0x6a0] sm:$0xf0]  ;;  %2980 = vmatpush.bf16.msrb.mxu2 %v9159_v41  ;;  %2955 = vmatpush.bf16.msra.mxu1 %v8615_v45  ;;  %v8202_v41 = vld [vmem:[#allocation11 + $0x388] sm:$0xf]  ;;  %v8747_v45 = vor.u32 %v11396_v37, %v8746_v36 }
  0xff   :  { %v11415_v52 = vld [vmem:[#allocation11 + $0x884] sm:$0xf]  ;;  %2968 = vmatpush.bf16.msra.mxu3 %v8871_v46  ;;  %v8583_v58 = vor.u32 %v11351_v50, %v8580_v51  ;;  %v8458_v46 = vld [vmem:[#allocation11 + $0x588] sm:$0xf]  ;;  %v8203_v50 = vor.u32 %v11260_v42, %v8202_v41 }
 0x100   :  { %v8836_v53 = vld [vmem:[#allocation11 + $0x8a0] sm:$0xf0]  ;;  %2943 = vmatpush.bf16.msra.mxu0 %v8327_v55  ;;  %v8714_v51 = vld [vmem:[#allocation11 + $0x788] sm:$0xf] }
 0x101   :  { %v11479_v56 = vld [vmem:[#allocation11 + $0xa84] sm:$0xf]  ;;  %v8839_v60 = vor.u32 %v11415_v52, %v8836_v53  ;;  %v11388_v52 = vld [vmem:[#allocation11 + $0x7a4] sm:$0xf0] }
 0x102   :  { %v9092_v57 = vld [vmem:[#allocation11 + $0xaa0] sm:$0xf0]  ;;  %2981 = vmatpush.bf16.msrb.mxu2 %v9127_v54  ;;  %2956 = vmatpush.bf16.msra.mxu1 %v8583_v58  ;;  %v7914_v53 = vld [vmem:[#allocation11 + $0x148] sm:$0xf]  ;;  %v8715_v58 = vor.u32 %v11388_v52, %v8714_v51 }
 0x103   :  { %v11279_v61 = vld [vmem:[#allocation11 + $0x444] sm:$0xf]  ;;  %v9095_v3 = vor.u32 %v11479_v56, %v9092_v57  ;;  %2969 = vmatpush.bf16.msra.mxu3 %v8839_v60  ;;  %v11188_v54 = vld [vmem:[#allocation11 + $0x164] sm:$0xf0]  ;;  %v8459_v57 = vor.u32 %v11324_v47, %v8458_v46 }
 0x104   :  { %v8292_v62 = vld [vmem:[#allocation11 + $0x460] sm:$0xf0]  ;;  %v8170_v55 = vld [vmem:[#allocation11 + $0x348] sm:$0xf] }
 0x105   :  { %v11343_v48 = vld [vmem:[#allocation11 + $0x644] sm:$0xf]  ;;  %v8295_v4 = vor.u32 %v11279_v61, %v8292_v62  ;;  %v11252_v56 = vld [vmem:[#allocation11 + $0x364] sm:$0xf0]  ;;  %v7915_v62 = vor.u32 %v11188_v54, %v7914_v53 }
 0x106   :  { %v8548_v0 = vld [vmem:[#allocation11 + $0x660] sm:$0xf0]  ;;  %2982 = vmatpush.bf16.msrb.mxu2 %v9095_v3  ;;  %v8426_v60 = vld [vmem:[#allocation11 + $0x548] sm:$0xf] }
 0x107   :  { %v11407_v1 = vld [vmem:[#allocation11 + $0x844] sm:$0xf]  ;;  %v8551_v9 = vor.u32 %v11343_v48, %v8548_v0  ;;  %2944 = vmatpush.bf16.msra.mxu0 %v8295_v4  ;;  %v11316_v61 = vld [vmem:[#allocation11 + $0x564] sm:$0xf0]  ;;  %v8171_v48 = vor.u32 %v11252_v56, %v8170_v55 }
 0x108   :  { %v8804_v2 = vld [vmem:[#allocation11 + $0x860] sm:$0xf0]  ;;  %v8682_v0 = vld [vmem:[#allocation11 + $0x748] sm:$0xf] }
 0x109   :  { %v11471_v5 = vld [vmem:[#allocation11 + $0xa44] sm:$0xf]  ;;  %v8807_v10 = vor.u32 %v11407_v1, %v8804_v2  ;;  %2957 = vmatpush.bf16.msra.mxu1 %v8551_v9  ;;  %v11380_v1 = vld [vmem:[#allocation11 + $0x764] sm:$0xf0] }
 0x10a   :  { %v9060_v6 = vld [vmem:[#allocation11 + $0xa60] sm:$0xf0]  ;;  %v7882_v2 = vld [vmem:[#allocation11 + $0x108] sm:$0xf] }
 0x10b   :  { %v11271_v7 = vld [vmem:[#allocation11 + $0x404] sm:$0xf]  ;;  %v9063_v23 = vor.u32 %v11471_v5, %v9060_v6  ;;  %2970 = vmatpush.bf16.msra.mxu3 %v8807_v10  ;;  %v11180_v3 = vld [vmem:[#allocation11 + $0x124] sm:$0xf0]  ;;  %v8427_v6 = vor.u32 %v11316_v61, %v8426_v60 }
 0x10c   :  { %v8260_v11 = vld [vmem:[#allocation11 + $0x420] sm:$0xf0]  ;;  %v8138_v4 = vld [vmem:[#allocation11 + $0x308] sm:$0xf] }
 0x10d   :  { %v11335_v12 = vld [vmem:[#allocation11 + $0x604] sm:$0xf]  ;;  %v8263_v24 = vor.u32 %v11271_v7, %v8260_v11  ;;  %2983 = vmatpush.bf16.msrb.mxu2 %v9063_v23  ;;  %v11244_v5 = vld [vmem:[#allocation11 + $0x324] sm:$0xf0]  ;;  %v8683_v7 = vor.u32 %v11380_v1, %v8682_v0  ;;  %v7883_v11 = vor.u32 %v11180_v3, %v7882_v2 }
 0x10e   :  { %v8516_v13 = vld [vmem:[#allocation11 + $0x620] sm:$0xf0]  ;;  %v8394_v9 = vld [vmem:[#allocation11 + $0x508] sm:$0xf] }
 0x10f   :  { %v11399_v14 = vld [vmem:[#allocation11 + $0x804] sm:$0xf]  ;;  %v8519_v28 = vor.u32 %v11335_v12, %v8516_v13  ;;  %2945 = vmatpush.bf16.msra.mxu0 %v8263_v24  ;;  %v11308_v10 = vld [vmem:[#allocation11 + $0x524] sm:$0xf0]  ;;  %v8139_v12 = vor.u32 %v11244_v5, %v8138_v4 }
 0x110   :  { %v8772_v15 = vld [vmem:[#allocation11 + $0x820] sm:$0xf0]  ;;  %v8650_v13 = vld [vmem:[#allocation11 + $0x708] sm:$0xf]  ;;  %v8395_v22 = vor.u32 %v11308_v10, %v8394_v9  ;;  %v11200_v10 = vld [vmem:[#allocation11 + $0x1cc] sm:$0xf] }
 0x111   :  { %v11463_v25 = vld [vmem:[#allocation11 + $0xa04] sm:$0xf]  ;;  %v8775_v29 = vor.u32 %v11399_v14, %v8772_v15  ;;  %2958 = vmatpush.bf16.msra.mxu1 %v8519_v28  ;;  %v11372_v14 = vld [vmem:[#allocation11 + $0x724] sm:$0xf0] }
 0x112   :  { %v11527_v26 = vld [vmem:[#allocation11 + $0xc04] sm:$0xf]  ;;  %2946 = vmatmul.bf16.vlgmr.msra.gmra.mxu0 %v12808_v18  ;;  %v7850_v15 = vld [vmem:[#allocation11 + $0xc8] sm:$0xf]  ;;  %v8651_v23 = vor.u32 %v11372_v14, %v8650_v13 }
 0x113   :  { %v9284_v27 = vld [vmem:[#allocation11 + $0xc20] sm:$0xf0]  ;;  %2971 = vmatpush.bf16.msra.mxu3 %v8775_v29  ;;  %v11172_v17 = vld [vmem:[#allocation11 + $0xe4] sm:$0xf0] }
 0x114   :  { %v9028_v30 = vld [vmem:[#allocation11 + $0xa20] sm:$0xf0]  ;;  %v9287_v39 = vor.u32 %v11527_v26, %v9284_v27  ;;  %2959 = vmatmul.bf16.vlgmr.msra.gmra.mxu1 %v12810_v21  ;;  %v8106_v19 = vld [vmem:[#allocation11 + $0x2c8] sm:$0xf]  ;;  %v7851_v26 = vor.u32 %v11172_v17, %v7850_v15 }
 0x115   :  { %v9031_v43 = vor.u32 %v11463_v25, %v9028_v30  ;;  %3003 = vmatpush.bf16.msrb.mxu1 %v7979_v34  ;;  %v11236_v20 = vld [vmem:[#allocation11 + $0x2e4] sm:$0xf0] }
 0x116   :  { %2997 = vmatpush.bf16.msrb.mxu0 %v9287_v39  ;;  %2972 = vmatmul.bf16.vlgmr.msra.gmra.mxu3 %v12825_v59  ;;  %v8362_v24 = vld [vmem:[#allocation11 + $0x4c8] sm:$0xf]  ;;  %v8107_v27 = vor.u32 %v11236_v20, %v8106_v19 }
 0x117   :  { %3016 = vmatpush.bf16.msrb.mxu3 %v8235_v35  ;;  %2984 = vmatpush.bf16.msrb.mxu2 %v9031_v43  ;;  %v11300_v25 = vld [vmem:[#allocation11 + $0x4e4] sm:$0xf0] }
 0x118   :  { %v8618_v28 = vld [vmem:[#allocation11 + $0x6c8] sm:$0xf]  ;;  %v8363_v35 = vor.u32 %v11300_v25, %v8362_v24 }
 0x119   :  { %3004 = vmatpush.bf16.msrb.mxu1 %v7947_v49  ;;  %v11364_v29 = vld [vmem:[#allocation11 + $0x6e4] sm:$0xf0] }
 0x11a   :  { %3029 = vmatpush.bf16.msra.mxu0 %v8491_v44  ;;  %2985 = vmatmul.bf16.vlgmr.msrb.gmra.mxu2 %v12827_v63  ;;  %v7818_v30 = vld [vmem:[#allocation11 + $0x88] sm:$0xf]  ;;  %v8619_v36 = vor.u32 %v11364_v29, %v8618_v28  ;;  %v8236_v28 = vld [vmem:[#allocation11 + $0x3e8] sm:$0xf0] }
 0x11b   :  { %3042 = vmatpush.bf16.msra.mxu2 %v8747_v45  ;;  %3017 = vmatpush.bf16.msrb.mxu3 %v8203_v50  ;;  %v11164_v31 = vld [vmem:[#allocation11 + $0xa4] sm:$0xf0] }
 0x11c   :  { %v8074_v33 = vld [vmem:[#allocation11 + $0x288] sm:$0xf]  ;;  %v7819_v39 = vor.u32 %v11164_v31, %v7818_v30  ;;  %v11192_v31 = vld [vmem:[#allocation11 + $0x18c] sm:$0xf] }
 0x11d   :  { %3005 = vmatpush.bf16.msrb.mxu1 %v7915_v62  ;;  %v11228_v34 = vld [vmem:[#allocation11 + $0x2a4] sm:$0xf0] }
 0x11e   :  { %3030 = vmatpush.bf16.msra.mxu0 %v8459_v57  ;;  %v8330_v37 = vld [vmem:[#allocation11 + $0x488] sm:$0xf]  ;;  %v8075_v40 = vor.u32 %v11228_v34, %v8074_v33  ;;  %v7948_v33 = vld [vmem:[#allocation11 + $0x1a8] sm:$0xf0] }
 0x11f   :  { %3043 = vmatpush.bf16.msra.mxu2 %v8715_v58  ;;  %3018 = vmatpush.bf16.msrb.mxu3 %v8171_v48  ;;  %v11292_v38 = vld [vmem:[#allocation11 + $0x4a4] sm:$0xf0] }
 0x120   :  { %v8586_v41 = vld [vmem:[#allocation11 + $0x688] sm:$0xf]  ;;  %v8331_v47 = vor.u32 %v11292_v38, %v8330_v37 }
 0x121   :  { %3006 = vmatpush.bf16.msrb.mxu1 %v7883_v11  ;;  %v11356_v42 = vld [vmem:[#allocation11 + $0x6a4] sm:$0xf0]  ;;  %v7980_v11 = vld [vmem:[#allocation11 + $0x1e8] sm:$0xf0] }
 0x122   :  { %3031 = vmatpush.bf16.msra.mxu0 %v8427_v6  ;;  %v7786_v43 = vld [vmem:[#allocation11 + $0x48] sm:$0xf]  ;;  %v8587_v49 = vor.u32 %v11356_v42, %v8586_v41  ;;  %v7983_v25 = vor.u32 %v11200_v10, %v7980_v11  ;;  %v8204_v41 = vld [vmem:[#allocation11 + $0x3a8] sm:$0xf0] }
 0x123   :  { %3044 = vmatpush.bf16.msra.mxu2 %v8683_v7  ;;  %3019 = vmatpush.bf16.msrb.mxu3 %v8139_v12  ;;  %v11156_v44 = vld [vmem:[#allocation11 + $0x64] sm:$0xf0] }
 0x124   :  { %v8042_v45 = vld [vmem:[#allocation11 + $0x248] sm:$0xf]  ;;  %9313 = vmatmul.msk.bf16.vlgmr.msrb.gmra.mxu0 %vm2817_vm0, %v12819_v8  ;;  %v7787_v53 = vor.u32 %v11156_v44, %v7786_v43  ;;  %v11184_v44 = vld [vmem:[#allocation11 + $0x14c] sm:$0xf] }
 0x125   :  { %3007 = vmatpush.bf16.msrb.mxu1 %v7851_v26  ;;  %v11220_v46 = vld [vmem:[#allocation11 + $0x264] sm:$0xf0] }
 0x126   :  { %3032 = vmatpush.bf16.msra.mxu0 %v8395_v22  ;;  %v8298_v50 = vld [vmem:[#allocation11 + $0x448] sm:$0xf]  ;;  %v8043_v54 = vor.u32 %v11220_v46, %v8042_v45  ;;  %v7916_v45 = vld [vmem:[#allocation11 + $0x168] sm:$0xf0] }
 0x127   :  { %3045 = vmatpush.bf16.msra.mxu2 %v8651_v23  ;;  %3020 = vmatpush.bf16.msrb.mxu3 %v8107_v27  ;;  %v11284_v51 = vld [vmem:[#allocation11 + $0x464] sm:$0xf0]  ;;  %v11264_v27 = vld [vmem:[#allocation11 + $0x3cc] sm:$0xf] }
 0x128   :  { %v8554_v52 = vld [vmem:[#allocation11 + $0x648] sm:$0xf]  ;;  %v8299_v1 = vor.u32 %v11284_v51, %v8298_v50  ;;  %v8239_v38 = vor.u32 %v11264_v27, %v8236_v28 }
 0x129   :  { %3008 = vmatpush.bf16.msrb.mxu1 %v7819_v39  ;;  %v11348_v55 = vld [vmem:[#allocation11 + $0x664] sm:$0xf0]  ;;  %v7951_v39 = vor.u32 %v11192_v31, %v7948_v33  ;;  %v8076_v31 = vld [vmem:[#allocation11 + $0x2a8] sm:$0xf0] }
 0x12a   :  { %3033 = vmatpush.bf16.msra.mxu0 %v8363_v35  ;;  %v7754_v56 = vld [vmem:[#allocation11 + $0x8] sm:$0xf]  ;;  %v8555_v2 = vor.u32 %v11348_v55, %v8554_v52  ;;  %v7919_v52 = vor.u32 %v11184_v44, %v7916_v45  ;;  %v11152_v33 = vld [vmem:[#allocation11 + $0x4c] sm:$0xf] }
 0x12b   :  { %3046 = vmatpush.bf16.msra.mxu2 %v8619_v36  ;;  %3021 = vmatpush.bf16.msrb.mxu3 %v8075_v40  ;;  %v11148_v57 = vld [vmem:[#allocation11 + $0x24] sm:$0xf0]  ;;  %v11256_v40 = vld [vmem:[#allocation11 + $0x38c] sm:$0xf] }
 0x12c   :  { %v8010_v58 = vld [vmem:[#allocation11 + $0x208] sm:$0xf]  ;;  %v7755_v6 = vor.u32 %v11148_v57, %v7754_v56  ;;  %v8207_v51 = vor.u32 %v11256_v40, %v8204_v41  ;;  %v11176_v57 = vld [vmem:[#allocation11 + $0x10c] sm:$0xf] }
 0x12d   :  { %v11212_v60 = vld [vmem:[#allocation11 + $0x224] sm:$0xf0]  ;;  %3009 = vmatpush.bf16.msrb.mxu1 %v7787_v53  ;;  %v11248_v53 = vld [vmem:[#allocation11 + $0x34c] sm:$0xf] }
 0x12e   :  { %v9002_v61 = vld [vmem:[#allocation11 + $0x9c8] sm:$0xf]  ;;  %3034 = vmatpush.bf16.msra.mxu0 %v8331_v47  ;;  %v8011_v7 = vor.u32 %v11212_v60, %v8010_v58  ;;  %v7884_v58 = vld [vmem:[#allocation11 + $0x128] sm:$0xf0] }
 0x12f   :  { %v11460_v62 = vld [vmem:[#allocation11 + $0x9e4] sm:$0xf0]  ;;  %3047 = vmatpush.bf16.msra.mxu2 %v8587_v49  ;;  %3022 = vmatpush.bf16.msrb.mxu3 %v8043_v54  ;;  %v8172_v54 = vld [vmem:[#allocation11 + $0x368] sm:$0xf0] }
 0x130   :  { %v9258_v48 = vld [vmem:[#allocation11 + $0xbc8] sm:$0xf]  ;;  %v9003_v12 = vor.u32 %v11460_v62, %v9002_v61  ;;  %v11328_v41 = vld [vmem:[#allocation11 + $0x5cc] sm:$0xf] }
 0x131   :  { %v11524_v0 = vld [vmem:[#allocation11 + $0xbe4] sm:$0xf0]  ;;  %3010 = vmatpush.bf16.msrb.mxu1 %v7755_v6  ;;  %v11168_v6 = vld [vmem:[#allocation11 + $0xcc] sm:$0xf] }
 0x132   :  { %v8266_v3 = vld [vmem:[#allocation11 + $0x408] sm:$0xf]  ;;  %v9259_v13 = vor.u32 %v11524_v0, %v9258_v48  ;;  %3035 = vmatpush.bf16.msra.mxu0 %v8299_v1  ;;  %v8175_v0 = vor.u32 %v11248_v53, %v8172_v54  ;;  %v7887_v1 = vor.u32 %v11176_v57, %v7884_v58  ;;  %v11392_v44 = vld [vmem:[#allocation11 + $0x7cc] sm:$0xf] }
 0x133   :  { %v11276_v4 = vld [vmem:[#allocation11 + $0x424] sm:$0xf0]  ;;  %3048 = vmatpush.bf16.msra.mxu2 %v8555_v2  ;;  %3023 = vmatpush.bf16.msrb.mxu3 %v8011_v7  ;;  %v11240_v2 = vld [vmem:[#allocation11 + $0x30c] sm:$0xf] }
 0x134   :  { %v8522_v5 = vld [vmem:[#allocation11 + $0x608] sm:$0xf]  ;;  %v8267_v23 = vor.u32 %v11276_v4, %v8266_v3  ;;  %3011 = vmatmul.bf16.vlgmr.msrb.gmra.mxu1 %v12805_v16  ;;  %v8140_v3 = vld [vmem:[#allocation11 + $0x328] sm:$0xf0] }
 0x135   :  { %v11340_v9 = vld [vmem:[#allocation11 + $0x624] sm:$0xf0]  ;;  %3055 = vmatpush.bf16.msra.mxu1 %v9003_v12  ;;  %v7852_v7 = vld [vmem:[#allocation11 + $0xe8] sm:$0xf0] }
 0x136   :  { %v8970_v14 = vld [vmem:[#allocation11 + $0x988] sm:$0xf]  ;;  %v8523_v24 = vor.u32 %v11340_v9, %v8522_v5  ;;  %3036 = vmatpush.bf16.msra.mxu0 %v8267_v23  ;;  %3024 = vmatmul.bf16.vlgmr.msrb.gmra.mxu3 %v12813_v32  ;;  %v7820_v23 = vld [vmem:[#allocation11 + $0xa8] sm:$0xf0] }
 0x137   :  { %v9290_v15 = vld [vmem:[#allocation11 + $0xc08] sm:$0xf]  ;;  %3068 = vmatpush.bf16.msra.mxu3 %v9259_v13  ;;  %v8143_v13 = vor.u32 %v11240_v2, %v8140_v3  ;;  %v8748_v45 = vld [vmem:[#allocation11 + $0x7e8] sm:$0xf0] }
 0x138   :  { %v11532_v17 = vld [vmem:[#allocation11 + $0xc24] sm:$0xf0]  ;;  %3049 = vmatpush.bf16.msra.mxu2 %v8523_v24  ;;  %v8751_v54 = vor.u32 %v11392_v44, %v8748_v45  ;;  %v9004_v57 = vld [vmem:[#allocation11 + $0x9e8] sm:$0xf0] }
 0x139   :  { %v11452_v19 = vld [vmem:[#allocation11 + $0x9a4] sm:$0xf0]  ;;  %v9291_v26 = vor.u32 %v11532_v17, %v9290_v15  ;;  %3037 = vmatmul.bf16.vlgmr.msra.gmra.mxu0 %v12808_v18  ;;  %v11232_v15 = vld [vmem:[#allocation11 + $0x2cc] sm:$0xf] }
 0x13a   :  { %v9226_v20 = vld [vmem:[#allocation11 + $0xb88] sm:$0xf]  ;;  %v8971_v29 = vor.u32 %v11452_v19, %v8970_v14  ;;  %v7855_v14 = vor.u32 %v11168_v6, %v7852_v7  ;;  %v8108_v17 = vld [vmem:[#allocation11 + $0x2e8] sm:$0xf0] }
 0x13b   :  { %v11516_v22 = vld [vmem:[#allocation11 + $0xba4] sm:$0xf0]  ;;  %3088 = vmatpush.bf16.msrb.mxu0 %v9291_v26  ;;  %3050 = vmatmul.bf16.vlgmr.msra.gmra.mxu2 %v12810_v21  ;;  %v8111_v28 = vor.u32 %v11232_v15, %v8108_v17  ;;  %v11520_v3 = vld [vmem:[#allocation11 + $0xbcc] sm:$0xf] }
 0x13c   :  { %v9227_v30 = vor.u32 %v11516_v22, %v9226_v20  ;;  %v8938_v34 = vld [vmem:[#allocation11 + $0x948] sm:$0xf]  ;;  %3094 = vmatpush.bf16.msrb.mxu2 %v7983_v25  ;;  %3056 = vmatpush.bf16.msra.mxu1 %v8971_v29  ;;  %v11160_v22 = vld [vmem:[#allocation11 + $0x8c] sm:$0xf] }
 0x13d   :  { %v11444_v35 = vld [vmem:[#allocation11 + $0x964] sm:$0xf0]  ;;  %v7823_v29 = vor.u32 %v11160_v22, %v7820_v23  ;;  %v11448_v7 = vld [vmem:[#allocation11 + $0x98c] sm:$0xf] }
 0x13e   :  { %v9194_v36 = vld [vmem:[#allocation11 + $0xb48] sm:$0xf]  ;;  %3069 = vmatpush.bf16.msra.mxu3 %v9227_v30  ;;  %v8939_v42 = vor.u32 %v11444_v35, %v8938_v34  ;;  %v11224_v30 = vld [vmem:[#allocation11 + $0x28c] sm:$0xf] }
 0x13f   :  { %v11508_v37 = vld [vmem:[#allocation11 + $0xb64] sm:$0xf0]  ;;  %3107 = vmatpush.bf16.msra.mxu0 %v8239_v38  ;;  %v11376_v15 = vld [vmem:[#allocation11 + $0x74c] sm:$0xf] }
 0x140   :  { %v9195_v43 = vor.u32 %v11508_v37, %v9194_v36  ;;  %v8906_v46 = vld [vmem:[#allocation11 + $0x908] sm:$0xf]  ;;  %3095 = vmatpush.bf16.msrb.mxu2 %v7951_v39  ;;  %3057 = vmatpush.bf16.msra.mxu1 %v8939_v42  ;;  %v7788_v36 = vld [vmem:[#allocation11 + $0x68] sm:$0xf0]  ;;  %v8079_v42 = vor.u32 %v11224_v30, %v8076_v31 }
 0x141   :  { %v11436_v47 = vld [vmem:[#allocation11 + $0x924] sm:$0xf0]  ;;  %v8684_v17 = vld [vmem:[#allocation11 + $0x768] sm:$0xf0] }
 0x142   :  { %v9162_v49 = vld [vmem:[#allocation11 + $0xb08] sm:$0xf]  ;;  %3070 = vmatpush.bf16.msra.mxu3 %v9195_v43  ;;  %v8907_v55 = vor.u32 %v11436_v47, %v8906_v46  ;;  %v8492_v43 = vld [vmem:[#allocation11 + $0x5e8] sm:$0xf0]  ;;  %v7791_v46 = vor.u32 %v11152_v33, %v7788_v36 }
 0x143   :  { %v11500_v50 = vld [vmem:[#allocation11 + $0xb24] sm:$0xf0]  ;;  %3108 = vmatpush.bf16.msra.mxu0 %v8207_v51  ;;  %v11216_v47 = vld [vmem:[#allocation11 + $0x24c] sm:$0xf]  ;;  %v8495_v53 = vor.u32 %v11328_v41, %v8492_v43 }
 0x144   :  { %v9163_v56 = vor.u32 %v11500_v50, %v9162_v49  ;;  %v8874_v60 = vld [vmem:[#allocation11 + $0x8c8] sm:$0xf]  ;;  %3096 = vmatpush.bf16.msrb.mxu2 %v7919_v52  ;;  %3058 = vmatpush.bf16.msra.mxu1 %v8907_v55  ;;  %v8044_v49 = vld [vmem:[#allocation11 + $0x268] sm:$0xf0] }
 0x145   :  { %v11428_v61 = vld [vmem:[#allocation11 + $0x8e4] sm:$0xf0]  ;;  %v11144_v52 = vld [vmem:[#allocation11 + $0xc] sm:$0xf]  ;;  %v8047_v58 = vor.u32 %v11216_v47, %v8044_v49  ;;  %v2830_v47 = vpop.f32.mrf.mxu0 }
 0x146   :  { %v9130_v62 = vld [vmem:[#allocation11 + $0xac8] sm:$0xf]  ;;  %3071 = vmatpush.bf16.msra.mxu3 %v9163_v56  ;;  %v8875_v4 = vor.u32 %v11428_v61, %v8874_v60  ;;  %v7756_v55 = vld [vmem:[#allocation11 + $0x28] sm:$0xf0] }
 0x147   :  { %v11492_v48 = vld [vmem:[#allocation11 + $0xae4] sm:$0xf0]  ;;  %3109 = vmatpush.bf16.msra.mxu0 %v8175_v0  ;;  %v11456_v56 = vld [vmem:[#allocation11 + $0x9cc] sm:$0xf]  ;;  %v7759_v2 = vor.u32 %v11144_v52, %v7756_v55 }
 0x148   :  { %v9131_v5 = vor.u32 %v11492_v48, %v9130_v62  ;;  %v8842_v9 = vld [vmem:[#allocation11 + $0x888] sm:$0xf]  ;;  %3097 = vmatpush.bf16.msrb.mxu2 %v7887_v1  ;;  %3059 = vmatpush.bf16.msra.mxu1 %v8875_v4  ;;  %v11320_v60 = vld [vmem:[#allocation11 + $0x58c] sm:$0xf] }
 0x149   :  { %v11420_v10 = vld [vmem:[#allocation11 + $0x8a4] sm:$0xf0]  ;;  %9314 = vmatmul.msk.bf16.vlgmr.msrb.gmra.mxu0 %vm2817_vm0, %v12819_v8  ;;  %v8460_v61 = vld [vmem:[#allocation11 + $0x5a8] sm:$0xf0] }
 0x14a   :  { %v9098_v11 = vld [vmem:[#allocation11 + $0xa88] sm:$0xf]  ;;  %3072 = vmatpush.bf16.msra.mxu3 %v9131_v5  ;;  %v8843_v19 = vor.u32 %v11420_v10, %v8842_v9  ;;  %v11384_v62 = vld [vmem:[#allocation11 + $0x78c] sm:$0xf]  ;;  %v9007_v5 = vor.u32 %v11456_v56, %v9004_v57  ;;  %v8463_v6 = vor.u32 %v11320_v60, %v8460_v61  ;;  %v2843_v61 = vpop.f32.mrf.mxu1 }
 0x14b   :  { %v11484_v12 = vld [vmem:[#allocation11 + $0xaa4] sm:$0xf0]  ;;  %3110 = vmatpush.bf16.msra.mxu0 %v8143_v13  ;;  %v8716_v48 = vld [vmem:[#allocation11 + $0x7a8] sm:$0xf0] }
 0x14c   :  { %v9099_v20 = vor.u32 %v11484_v12, %v9098_v11  ;;  %v8810_v24 = vld [vmem:[#allocation11 + $0x848] sm:$0xf]  ;;  %3098 = vmatpush.bf16.msrb.mxu2 %v7855_v14  ;;  %3060 = vmatpush.bf16.msra.mxu1 %v8843_v19  ;;  %v11208_v0 = vld [vmem:[#allocation11 + $0x20c] sm:$0xf]  ;;  %v8719_v9 = vor.u32 %v11384_v62, %v8716_v48 }
 0x14d   :  { %v11412_v25 = vld [vmem:[#allocation11 + $0x864] sm:$0xf0]  ;;  %v8012_v1 = vld [vmem:[#allocation11 + $0x228] sm:$0xf0] }
 0x14e   :  { %v9066_v26 = vld [vmem:[#allocation11 + $0xa48] sm:$0xf]  ;;  %3073 = vmatpush.bf16.msra.mxu3 %v9099_v20  ;;  %v8811_v34 = vor.u32 %v11412_v25, %v8810_v24  ;;  %v9260_v4 = vld [vmem:[#allocation11 + $0xbe8] sm:$0xf0]  ;;  %v8015_v10 = vor.u32 %v11208_v0, %v8012_v1  ;;  %v12847_v25 = vld [vmem:[#allocation13] sm:$0xff] }
 0x14f   :  { %v11476_v27 = vld [vmem:[#allocation11 + $0xa64] sm:$0xf0]  ;;  %3111 = vmatpush.bf16.msra.mxu0 %v8111_v28  ;;  %v8972_v11 = vld [vmem:[#allocation11 + $0x9a8] sm:$0xf0]  ;;  %v9263_v14 = vor.u32 %v11520_v3, %v9260_v4  ;;  %v2801_v36 = vperm.slane %v12847_v25, 0 }
 0x150   :  { %v9067_v35 = vor.u32 %v11476_v27, %v9066_v26  ;;  %v8778_v37 = vld [vmem:[#allocation11 + $0x808] sm:$0xf]  ;;  %3099 = vmatpush.bf16.msrb.mxu2 %v7823_v29  ;;  %3061 = vmatpush.bf16.msra.mxu1 %v8811_v34  ;;  %v11312_v12 = vld [vmem:[#allocation11 + $0x54c] sm:$0xf]  ;;  %v8975_v22 = vor.u32 %v11448_v7, %v8972_v11  ;;  %v8687_v26 = vor.u32 %v11376_v15, %v8684_v17 }
 0x151   :  { %v11404_v38 = vld [vmem:[#allocation11 + $0x824] sm:$0xf0]  ;;  %v8428_v13 = vld [vmem:[#allocation11 + $0x568] sm:$0xf0]  ;;  %v2831_v49 = vadd.f32 %v2830_v47, %v2801_v36  ;;  %v7986_v36 = vld [vmem:[#allocation11 + $0x1d0] sm:$0xf] }
 0x152   :  { %v9034_v39 = vld [vmem:[#allocation11 + $0xa08] sm:$0xf]  ;;  %3074 = vmatpush.bf16.msra.mxu3 %v9067_v35  ;;  %v8779_v50 = vor.u32 %v11404_v38, %v8778_v37  ;;  %v11512_v19 = vld [vmem:[#allocation11 + $0xb8c] sm:$0xf]  ;;  %v8431_v23 = vor.u32 %v11312_v12, %v8428_v13 }
 0x153   :  { %v11468_v40 = vld [vmem:[#allocation11 + $0xa24] sm:$0xf0]  ;;  %3112 = vmatpush.bf16.msra.mxu0 %v8079_v42  ;;  %v9228_v20 = vld [vmem:[#allocation11 + $0xba8] sm:$0xf0]  ;;  %v2844_v0 = vadd.f32 %v2843_v61, %v2831_v49 }
 0x154   :  { %v9035_v51 = vor.u32 %v11468_v40, %v9034_v39  ;;  %3100 = vmatpush.bf16.msrb.mxu2 %v7791_v46  ;;  %3062 = vmatpush.bf16.msra.mxu1 %v8779_v50  ;;  %v11440_v24 = vld [vmem:[#allocation11 + $0x94c] sm:$0xf]  ;;  %v9231_v30 = vor.u32 %v11512_v19, %v9228_v20  ;;  %v2832_v19 = vpop.f32.mrf.mxu0 }
 0x155   :  { %v8940_v27 = vld [vmem:[#allocation11 + $0x968] sm:$0xf0] }
 0x156   :  { %3075 = vmatpush.bf16.msra.mxu3 %v9035_v51  ;;  %v11304_v28 = vld [vmem:[#allocation11 + $0x50c] sm:$0xf]  ;;  %v8943_v37 = vor.u32 %v11440_v24, %v8940_v27 }
 0x157   :  { %3113 = vmatpush.bf16.msra.mxu0 %v8047_v58  ;;  %3063 = vmatmul.bf16.vlgmr.msra.gmra.mxu1 %v12825_v59  ;;  %v8396_v29 = vld [vmem:[#allocation11 + $0x528] sm:$0xf0] }
 0x158   :  { %3120 = vmatpush.bf16.msrb.mxu1 %v8495_v53  ;;  %3101 = vmatpush.bf16.msrb.mxu2 %v7759_v2  ;;  %v11368_v31 = vld [vmem:[#allocation11 + $0x70c] sm:$0xf]  ;;  %v8399_v38 = vor.u32 %v11304_v28, %v8396_v29 }
 0x159   :  { %3076 = vmatmul.bf16.vlgmr.msra.gmra.mxu3 %v12827_v63  ;;  %v8652_v33 = vld [vmem:[#allocation11 + $0x728] sm:$0xf0] }
 0x15a   :  { %3133 = vmatpush.bf16.msrb.mxu3 %v8751_v54  ;;  %v11504_v34 = vld [vmem:[#allocation11 + $0xb4c] sm:$0xf]  ;;  %v8655_v40 = vor.u32 %v11368_v31, %v8652_v33 }
 0x15b   :  { %3114 = vmatpush.bf16.msra.mxu0 %v8015_v10  ;;  %3102 = vmatmul.bf16.vlgmr.msrb.gmra.mxu2 %v12805_v16  ;;  %v9196_v35 = vld [vmem:[#allocation11 + $0xb68] sm:$0xf0] }
 0x15c   :  { %3146 = vmatpush.bf16.msra.mxu2 %v9007_v5  ;;  %3121 = vmatpush.bf16.msrb.mxu1 %v8463_v6  ;;  %v11432_v39 = vld [vmem:[#allocation11 + $0x90c] sm:$0xf]  ;;  %v9199_v44 = vor.u32 %v11504_v34, %v9196_v35  ;;  %v2856_v6 = vpop.f32.mrf.mxu2 }
 0x15d   :  { %v8908_v41 = vld [vmem:[#allocation11 + $0x928] sm:$0xf0]  ;;  %v2857_v13 = vadd.f32 %v2856_v6, %v2844_v0  ;;  %v8754_v0 = vld [vmem:[#allocation11 + $0x7d0] sm:$0xf] }
 0x15e   :  { %3134 = vmatpush.bf16.msrb.mxu3 %v8719_v9  ;;  %v11296_v42 = vld [vmem:[#allocation11 + $0x4cc] sm:$0xf]  ;;  %3115 = vmatmul.bf16.vlgmr.msra.gmra.mxu0 %v12813_v32  ;;  %v8911_v52 = vor.u32 %v11432_v39, %v8908_v41  ;;  %v2845_v39 = vpop.f32.mrf.mxu1 }
 0x15f   :  { %3159 = vmatpush.bf16.msrb.mxu0 %v9263_v14  ;;  %v8364_v43 = vld [vmem:[#allocation11 + $0x4e8] sm:$0xf0]  ;;  %v2869_v14 = vpop.f32.mrf.mxu3  ;;  %v11245_v39 = vld [vmem:[#allocation11 + $0x32c] sm:$0xf0] }
 0x160   :  { %3147 = vmatpush.bf16.msra.mxu2 %v8975_v22  ;;  %3122 = vmatpush.bf16.msrb.mxu1 %v8431_v23  ;;  %v11360_v45 = vld [vmem:[#allocation11 + $0x6cc] sm:$0xf]  ;;  %v8367_v53 = vor.u32 %v11296_v42, %v8364_v43  ;;  %v12852_v23 = vadd.f32 %v2869_v14, %v2857_v13  ;;  %v11189_v13 = vld [vmem:[#allocation11 + $0x16c] sm:$0xf0] }
 0x161   :  { %v8620_v46 = vld [vmem:[#allocation11 + $0x6e8] sm:$0xf0]  ;;  %v8722_v14 = vld [vmem:[#allocation11 + $0x790] sm:$0xf] }
 0x162   :  { %3135 = vmatpush.bf16.msrb.mxu3 %v8687_v26  ;;  %v11496_v50 = vld [vmem:[#allocation11 + $0xb0c] sm:$0xf]  ;;  %v8623_v55 = vor.u32 %v11360_v45, %v8620_v46 }
 0x163   :  { %3160 = vmatpush.bf16.msrb.mxu0 %v9231_v30  ;;  %v9164_v51 = vld [vmem:[#allocation11 + $0xb28] sm:$0xf0] }
 0x164   :  { %3148 = vmatpush.bf16.msra.mxu2 %v8943_v37  ;;  %3123 = vmatpush.bf16.msrb.mxu1 %v8399_v38  ;;  %v11424_v54 = vld [vmem:[#allocation11 + $0x8cc] sm:$0xf]  ;;  %v9167_v60 = vor.u32 %v11496_v50, %v9164_v51  ;;  %v2858_v46 = vpop.f32.mrf.mxu2  ;;  %v8242_v51 = vld [vmem:[#allocation11 + $0x3d0] sm:$0xf] }
 0x165   :  { %v8876_v56 = vld [vmem:[#allocation11 + $0x8e8] sm:$0xf0] }
 0x166   :  { %3136 = vmatpush.bf16.msrb.mxu3 %v8655_v40  ;;  %v11288_v57 = vld [vmem:[#allocation11 + $0x48c] sm:$0xf]  ;;  %v8879_v3 = vor.u32 %v11424_v54, %v8876_v56  ;;  %v11205_v40 = vld [vmem:[#allocation11 + $0x1ec] sm:$0xf0] }
 0x167   :  { %v8332_v58 = vld [vmem:[#allocation11 + $0x4a8] sm:$0xf0]  ;;  %3161 = vmatpush.bf16.msrb.mxu0 %v9199_v44  ;;  %v11333_v56 = vld [vmem:[#allocation11 + $0x5ec] sm:$0xf0] }
 0x168   :  { %v11352_v62 = vld [vmem:[#allocation11 + $0x68c] sm:$0xf]  ;;  %3149 = vmatpush.bf16.msra.mxu2 %v8911_v52  ;;  %3124 = vmatpush.bf16.msrb.mxu1 %v8367_v53  ;;  %v8335_v4 = vor.u32 %v11288_v57, %v8332_v58  ;;  %v11269_v52 = vld [vmem:[#allocation11 + $0x3ec] sm:$0xf0]  ;;  %v7987_v53 = vor.u32 %v11205_v40, %v7986_v36  ;;  %v2871_v58 = vpop.f32.mrf.mxu3 }
 0x169   :  { %v8588_v48 = vld [vmem:[#allocation11 + $0x6a8] sm:$0xf0]  ;;  %v7954_v57 = vld [vmem:[#allocation11 + $0x190] sm:$0xf] }
 0x16a   :  { %v11488_v1 = vld [vmem:[#allocation11 + $0xacc] sm:$0xf]  ;;  %3137 = vmatpush.bf16.msrb.mxu3 %v8623_v55  ;;  %v8591_v7 = vor.u32 %v11352_v62, %v8588_v48  ;;  %v8498_v55 = vld [vmem:[#allocation11 + $0x5d0] sm:$0xf] }
 0x16b   :  { %v9132_v2 = vld [vmem:[#allocation11 + $0xae8] sm:$0xf0]  ;;  %3162 = vmatpush.bf16.msrb.mxu0 %v9167_v60  ;;  %v11197_v60 = vld [vmem:[#allocation11 + $0x1ac] sm:$0xf0] }
 0x16c   :  { %v11416_v5 = vld [vmem:[#allocation11 + $0x88c] sm:$0xf]  ;;  %v9135_v12 = vor.u32 %v11488_v1, %v9132_v2  ;;  %3150 = vmatpush.bf16.msra.mxu2 %v8879_v3  ;;  %3125 = vmatpush.bf16.msrb.mxu1 %v8335_v4  ;;  %v11397_v1 = vld [vmem:[#allocation11 + $0x7ec] sm:$0xf0]  ;;  %v8243_v2 = vor.u32 %v11269_v52, %v8242_v51  ;;  %v8499_v3 = vor.u32 %v11333_v56, %v8498_v55 }
 0x16d   :  { %v8844_v9 = vld [vmem:[#allocation11 + $0x8a8] sm:$0xf0]  ;;  %v8210_v4 = vld [vmem:[#allocation11 + $0x390] sm:$0xf] }
 0x16e   :  { %v11280_v10 = vld [vmem:[#allocation11 + $0x44c] sm:$0xf]  ;;  %v8847_v24 = vor.u32 %v11416_v5, %v8844_v9  ;;  %3138 = vmatpush.bf16.msrb.mxu3 %v8591_v7  ;;  %v7955_v5 = vor.u32 %v11197_v60, %v7954_v57  ;;  %v11261_v7 = vld [vmem:[#allocation11 + $0x3ac] sm:$0xf0] }
 0x16f   :  { %v8300_v11 = vld [vmem:[#allocation11 + $0x468] sm:$0xf0]  ;;  %3163 = vmatpush.bf16.msrb.mxu0 %v9135_v12  ;;  %v8466_v9 = vld [vmem:[#allocation11 + $0x590] sm:$0xf] }
 0x170   :  { %v11344_v15 = vld [vmem:[#allocation11 + $0x64c] sm:$0xf]  ;;  %v8303_v26 = vor.u32 %v11280_v10, %v8300_v11  ;;  %3151 = vmatpush.bf16.msra.mxu2 %v8847_v24  ;;  %v11325_v10 = vld [vmem:[#allocation11 + $0x5ac] sm:$0xf0]  ;;  %v8755_v11 = vor.u32 %v11397_v1, %v8754_v0 }
 0x171   :  { %v8556_v17 = vld [vmem:[#allocation11 + $0x668] sm:$0xf0]  ;;  %v7922_v12 = vld [vmem:[#allocation11 + $0x150] sm:$0xf]  ;;  %v8467_v19 = vor.u32 %v11325_v10, %v8466_v9  ;;  %v2802_v10 = vperm.slane %v12847_v25, 1 }
 0x172   :  { %v11480_v20 = vld [vmem:[#allocation11 + $0xa8c] sm:$0xf]  ;;  %v8559_v30 = vor.u32 %v11344_v15, %v8556_v17  ;;  %3126 = vmatpush.bf16.msrb.mxu1 %v8303_v26  ;;  %v11389_v15 = vld [vmem:[#allocation11 + $0x7ac] sm:$0xf0]  ;;  %v8211_v17 = vor.u32 %v11261_v7, %v8210_v4  ;;  %v7923_v24 = vor.u32 %v11189_v13, %v7922_v12 }
 0x173   :  { %v9100_v22 = vld [vmem:[#allocation11 + $0xaa8] sm:$0xf0]  ;;  %v11253_v26 = vld [vmem:[#allocation11 + $0x36c] sm:$0xf0] }
 0x174   :  { %v11408_v27 = vld [vmem:[#allocation11 + $0x84c] sm:$0xf]  ;;  %v9103_v35 = vor.u32 %v11480_v20, %v9100_v22  ;;  %3139 = vmatpush.bf16.msrb.mxu3 %v8559_v30  ;;  %v8178_v20 = vld [vmem:[#allocation11 + $0x350] sm:$0xf]  ;;  %v2908_v22 = vpop.f32.mrf.mxu2 }
 0x175   :  { %v8812_v28 = vld [vmem:[#allocation11 + $0x868] sm:$0xf0]  ;;  %v7890_v30 = vld [vmem:[#allocation11 + $0x110] sm:$0xf] }
 0x176   :  { %v11272_v29 = vld [vmem:[#allocation11 + $0x40c] sm:$0xf]  ;;  %v8815_v43 = vor.u32 %v11408_v27, %v8812_v28  ;;  %3164 = vmatpush.bf16.msrb.mxu0 %v9103_v35  ;;  %v8434_v27 = vld [vmem:[#allocation11 + $0x550] sm:$0xf]  ;;  %v8179_v35 = vor.u32 %v11253_v26, %v8178_v20  ;;  %v2921_v26 = vpop.f32.mrf.mxu3 }
 0x177   :  { %v8268_v31 = vld [vmem:[#allocation11 + $0x428] sm:$0xf0]  ;;  %v11317_v28 = vld [vmem:[#allocation11 + $0x56c] sm:$0xf0] }
 0x178   :  { %v11336_v33 = vld [vmem:[#allocation11 + $0x60c] sm:$0xf]  ;;  %v8271_v44 = vor.u32 %v11272_v29, %v8268_v31  ;;  %3152 = vmatpush.bf16.msra.mxu2 %v8815_v43  ;;  %v8723_v29 = vor.u32 %v11389_v15, %v8722_v14  ;;  %v11181_v31 = vld [vmem:[#allocation11 + $0x12c] sm:$0xf0]  ;;  %v8435_v36 = vor.u32 %v11317_v28, %v8434_v27 }
 0x179   :  { %v8524_v34 = vld [vmem:[#allocation11 + $0x628] sm:$0xf0]  ;;  %v8402_v40 = vld [vmem:[#allocation11 + $0x510] sm:$0xf] }
 0x17a   :  { %v11528_v37 = vld [vmem:[#allocation11 + $0xc0c] sm:$0xf]  ;;  %v8527_v47 = vor.u32 %v11336_v33, %v8524_v34  ;;  %3127 = vmatpush.bf16.msrb.mxu1 %v8271_v44  ;;  %v8690_v33 = vld [vmem:[#allocation11 + $0x750] sm:$0xf] }
 0x17b   :  { %v9292_v38 = vld [vmem:[#allocation11 + $0xc28] sm:$0xf0]  ;;  %v11381_v34 = vld [vmem:[#allocation11 + $0x76c] sm:$0xf0] }
 0x17c   :  { %v11472_v41 = vld [vmem:[#allocation11 + $0xa4c] sm:$0xf]  ;;  %v9295_v50 = vor.u32 %v11528_v37, %v9292_v38  ;;  %3140 = vmatpush.bf16.msrb.mxu3 %v8527_v47  ;;  %v8146_v37 = vld [vmem:[#allocation11 + $0x310] sm:$0xf]  ;;  %v7891_v38 = vor.u32 %v11181_v31, %v7890_v30  ;;  %v8691_v43 = vor.u32 %v11381_v34, %v8690_v33  ;;  %v2895_v47 = vpop.f32.mrf.mxu1  ;;  %v2922_v33 = vadd.f32 %v2921_v26, %v2802_v10  ;;  %v8212_v26 = vld [vmem:[#allocation11 + $0x3b0] sm:$0xf0] }
 0x17d   :  { %v9068_v42 = vld [vmem:[#allocation11 + $0xa68] sm:$0xf0]  ;;  %3128 = vmatmul.bf16.vlgmr.msrb.gmra.mxu1 %v12808_v18  ;;  %v7858_v44 = vld [vmem:[#allocation11 + $0xd0] sm:$0xf]  ;;  %v8147_v51 = vor.u32 %v11245_v39, %v8146_v37 }
 0x17e   :  { %v11400_v45 = vld [vmem:[#allocation11 + $0x80c] sm:$0xf]  ;;  %v9071_v54 = vor.u32 %v11472_v41, %v9068_v42  ;;  %3179 = vmatpush.bf16.msra.mxu1 %v9295_v50  ;;  %v11309_v41 = vld [vmem:[#allocation11 + $0x52c] sm:$0xf0]  ;;  %v2882_v42 = vpop.f32.mrf.mxu0 }
 0x17f   :  { %v8780_v49 = vld [vmem:[#allocation11 + $0x828] sm:$0xf0]  ;;  %3141 = vmatmul.bf16.vlgmr.msrb.gmra.mxu3 %v12810_v21  ;;  %v2883_v46 = vadd.f32 %v2882_v42, %v12852_v23  ;;  %v11373_v50 = vld [vmem:[#allocation11 + $0x72c] sm:$0xf0]  ;;  %v8403_v52 = vor.u32 %v11309_v41, %v8402_v40 }
 0x180   :  { %v11464_v61 = vld [vmem:[#allocation11 + $0xa0c] sm:$0xf]  ;;  %v8783_v48 = vor.u32 %v11400_v45, %v8780_v49  ;;  %3185 = vmatpush.bf16.msra.mxu3 %v7987_v53  ;;  %3165 = vmatpush.bf16.msrb.mxu0 %v9071_v54  ;;  %v11173_v45 = vld [vmem:[#allocation11 + $0xec] sm:$0xf0]  ;;  %v2910_v54 = vpop.f32.mrf.mxu2 }
 0x181   :  { %v9036_v62 = vld [vmem:[#allocation11 + $0xa28] sm:$0xf0]  ;;  %v8658_v49 = vld [vmem:[#allocation11 + $0x710] sm:$0xf]  ;;  %v2896_v55 = vadd.f32 %v2895_v47, %v2883_v46  ;;  %v7859_v56 = vor.u32 %v11173_v45, %v7858_v44 }
 0x182   :  { %v9039_v6 = vor.u32 %v11464_v61, %v9036_v62  ;;  %3153 = vmatpush.bf16.msra.mxu2 %v8783_v48  ;;  %3198 = vmatpush.bf16.msrb.mxu1 %v8243_v2  ;;  %v8114_v53 = vld [vmem:[#allocation11 + $0x2d0] sm:$0xf]  ;;  %v8659_v61 = vor.u32 %v11373_v50, %v8658_v49 }
 0x183   :  { %v11237_v57 = vld [vmem:[#allocation11 + $0x2ec] sm:$0xf0]  ;;  %v12859_v23 = vadd.f32 %v2908_v22, %v2896_v55 }
 0x184   :  { %3186 = vmatpush.bf16.msra.mxu3 %v7955_v5  ;;  %3166 = vmatpush.bf16.msrb.mxu0 %v9039_v6  ;;  %v8370_v58 = vld [vmem:[#allocation11 + $0x4d0] sm:$0xf]  ;;  %v8115_v2 = vor.u32 %v11237_v57, %v8114_v53 }
 0x185   :  { %3154 = vmatmul.bf16.vlgmr.msra.gmra.mxu2 %v12825_v59  ;;  %v11301_v60 = vld [vmem:[#allocation11 + $0x4ec] sm:$0xf0] }
 0x186   :  { %3211 = vmatpush.bf16.msrb.mxu2 %v8499_v3  ;;  %3199 = vmatpush.bf16.msrb.mxu1 %v8211_v17  ;;  %v7826_v62 = vld [vmem:[#allocation11 + $0x90] sm:$0xf]  ;;  %v8371_v3 = vor.u32 %v11301_v60, %v8370_v58  ;;  %v2884_v14 = vpop.f32.mrf.mxu0 }
 0x187   :  { %3167 = vmatmul.bf16.vlgmr.msrb.gmra.mxu0 %v12827_v63  ;;  %v11165_v48 = vld [vmem:[#allocation11 + $0xac] sm:$0xf0] }
 0x188   :  { %3224 = vmatpush.bf16.msra.mxu0 %v8755_v11  ;;  %3187 = vmatpush.bf16.msra.mxu3 %v7923_v24  ;;  %v8626_v0 = vld [vmem:[#allocation11 + $0x6d0] sm:$0xf]  ;;  %v7827_v6 = vor.u32 %v11165_v48, %v7826_v62  ;;  %v2934_v27 = vpop.f32.mrf.mxu2  ;;  %v7988_v62 = vld [vmem:[#allocation11 + $0x1f0] sm:$0xf0]  ;;  %v2923_v48 = vpop.f32.mrf.mxu3 }
 0x189   :  { %v11365_v1 = vld [vmem:[#allocation11 + $0x6ec] sm:$0xf0]  ;;  %v12864_v41 = vadd.f32 %v2934_v27, %v2922_v33  ;;  %v11185_v33 = vld [vmem:[#allocation11 + $0x154] sm:$0xf] }
 0x18a   :  { %3212 = vmatpush.bf16.msrb.mxu2 %v8467_v19  ;;  %3200 = vmatpush.bf16.msrb.mxu1 %v8179_v35  ;;  %v8082_v4 = vld [vmem:[#allocation11 + $0x290] sm:$0xf]  ;;  %v8627_v11 = vor.u32 %v11365_v1, %v8626_v0  ;;  %v2897_v19 = vpop.f32.mrf.mxu1  ;;  %v11169_v48 = vld [vmem:[#allocation11 + $0xd4] sm:$0xf] }
 0x18b   :  { %v11229_v5 = vld [vmem:[#allocation11 + $0x2ac] sm:$0xf0] }
 0x18c   :  { %3225 = vmatpush.bf16.msra.mxu0 %v8723_v29  ;;  %3188 = vmatpush.bf16.msra.mxu3 %v7891_v38  ;;  %v8338_v7 = vld [vmem:[#allocation11 + $0x490] sm:$0xf]  ;;  %v8083_v20 = vor.u32 %v11229_v5, %v8082_v4  ;;  %v11265_v4 = vld [vmem:[#allocation11 + $0x3d4] sm:$0xf] }
 0x18d   :  { %v11293_v9 = vld [vmem:[#allocation11 + $0x4ac] sm:$0xf0]  ;;  %9315 = vmatmul.msk.bf16.vlgmr.msra.gmra.mxu1 %vm2817_vm0, %v12819_v8 }
 0x18e   :  { %3213 = vmatpush.bf16.msrb.mxu2 %v8435_v36  ;;  %3201 = vmatpush.bf16.msrb.mxu1 %v8147_v51  ;;  %v7794_v12 = vld [vmem:[#allocation11 + $0x50] sm:$0xf]  ;;  %v8339_v22 = vor.u32 %v11293_v9, %v8338_v7  ;;  %v8244_v7 = vld [vmem:[#allocation11 + $0x3f0] sm:$0xf0] }
 0x18f   :  { %v11157_v13 = vld [vmem:[#allocation11 + $0x6c] sm:$0xf0]  ;;  %v8247_v19 = vor.u32 %v11265_v4, %v8244_v7 }
 0x190   :  { %3226 = vmatpush.bf16.msra.mxu0 %v8691_v43  ;;  %3189 = vmatpush.bf16.msra.mxu3 %v7859_v56  ;;  %v8594_v15 = vld [vmem:[#allocation11 + $0x690] sm:$0xf]  ;;  %v7795_v28 = vor.u32 %v11157_v13, %v7794_v12  ;;  %v2936_v0 = vpop.f32.mrf.mxu2 }
 0x191   :  { %v11357_v17 = vld [vmem:[#allocation11 + $0x6ac] sm:$0xf0]  ;;  %v7860_v0 = vld [vmem:[#allocation11 + $0xf0] sm:$0xf0] }
 0x192   :  { %3214 = vmatpush.bf16.msrb.mxu2 %v8403_v52  ;;  %3202 = vmatpush.bf16.msrb.mxu1 %v8115_v2  ;;  %v8050_v24 = vld [vmem:[#allocation11 + $0x250] sm:$0xf]  ;;  %v8595_v34 = vor.u32 %v11357_v17, %v8594_v15  ;;  %v11193_v15 = vld [vmem:[#allocation11 + $0x194] sm:$0xf] }
 0x193   :  { %v11221_v29 = vld [vmem:[#allocation11 + $0x26c] sm:$0xf0]  ;;  %v7956_v17 = vld [vmem:[#allocation11 + $0x1b0] sm:$0xf0] }
 0x194   :  { %3227 = vmatpush.bf16.msra.mxu0 %v8659_v61  ;;  %3190 = vmatpush.bf16.msra.mxu3 %v7827_v6  ;;  %v8306_v30 = vld [vmem:[#allocation11 + $0x450] sm:$0xf]  ;;  %v8051_v42 = vor.u32 %v11221_v29, %v8050_v24  ;;  %v11201_v61 = vld [vmem:[#allocation11 + $0x1d4] sm:$0xf]  ;;  %v7959_v29 = vor.u32 %v11193_v15, %v7956_v17 }
 0x195   :  { %v11285_v31 = vld [vmem:[#allocation11 + $0x46c] sm:$0xf0] }
 0x196   :  { %3215 = vmatpush.bf16.msrb.mxu2 %v8371_v3  ;;  %v7762_v35 = vld [vmem:[#allocation11 + $0x10] sm:$0xf]  ;;  %3203 = vmatpush.bf16.msrb.mxu1 %v8083_v20  ;;  %v8307_v43 = vor.u32 %v11285_v31, %v8306_v30 }
 0x197   :  { %v11149_v36 = vld [vmem:[#allocation11 + $0x2c] sm:$0xf0] }
 0x198   :  { %3228 = vmatpush.bf16.msra.mxu0 %v8627_v11  ;;  %v9010_v37 = vld [vmem:[#allocation11 + $0x9d0] sm:$0xf]  ;;  %3191 = vmatpush.bf16.msra.mxu3 %v7795_v28  ;;  %v7763_v45 = vor.u32 %v11149_v36, %v7762_v35  ;;  %v7991_v11 = vor.u32 %v11201_v61, %v7988_v62  ;;  %v2960_v62 = vpop.f32.mrf.mxu1 }
 0x199   :  { %v11461_v38 = vld [vmem:[#allocation11 + $0x9ec] sm:$0xf0] }
 0x19a   :  { %v8562_v39 = vld [vmem:[#allocation11 + $0x650] sm:$0xf]  ;;  %3216 = vmatpush.bf16.msrb.mxu2 %v8339_v22  ;;  %v9011_v50 = vor.u32 %v11461_v38, %v9010_v37  ;;  %3204 = vmatpush.bf16.msrb.mxu1 %v8051_v42  ;;  %v11257_v22 = vld [vmem:[#allocation11 + $0x394] sm:$0xf] }
 0x19b   :  { %v11349_v40 = vld [vmem:[#allocation11 + $0x66c] sm:$0xf0]  ;;  %v8215_v35 = vor.u32 %v11257_v22, %v8212_v26  ;;  %v11249_v37 = vld [vmem:[#allocation11 + $0x354] sm:$0xf] }
 0x19c   :  { %v8018_v44 = vld [vmem:[#allocation11 + $0x210] sm:$0xf]  ;;  %3229 = vmatpush.bf16.msra.mxu0 %v8595_v34  ;;  %v8563_v51 = vor.u32 %v11349_v40, %v8562_v39  ;;  %3192 = vmatpush.bf16.msra.mxu3 %v7763_v45  ;;  %v7924_v34 = vld [vmem:[#allocation11 + $0x170] sm:$0xf0] }
 0x19d   :  { %v11213_v46 = vld [vmem:[#allocation11 + $0x22c] sm:$0xf0]  ;;  %v8180_v39 = vld [vmem:[#allocation11 + $0x370] sm:$0xf0] }
 0x19e   :  { %v8274_v47 = vld [vmem:[#allocation11 + $0x410] sm:$0xf]  ;;  %3217 = vmatpush.bf16.msrb.mxu2 %v8307_v43  ;;  %v8019_v58 = vor.u32 %v11213_v46, %v8018_v44  ;;  %v7927_v43 = vor.u32 %v11185_v33, %v7924_v34  ;;  %v2947_v46 = vpop.f32.mrf.mxu0  ;;  %v11225_v22 = vld [vmem:[#allocation11 + $0x294] sm:$0xf] }
 0x19f   :  { %v11277_v49 = vld [vmem:[#allocation11 + $0x42c] sm:$0xf0]  ;;  %3193 = vmatmul.bf16.vlgmr.msra.gmra.mxu3 %v12805_v16  ;;  %v11329_v34 = vld [vmem:[#allocation11 + $0x5d4] sm:$0xf] }
 0x1a0   :  { %v9266_v52 = vld [vmem:[#allocation11 + $0xbd0] sm:$0xf]  ;;  %v8275_v60 = vor.u32 %v11277_v49, %v8274_v47  ;;  %3237 = vmatpush.bf16.msrb.mxu3 %v9011_v50  ;;  %3230 = vmatpush.bf16.msra.mxu0 %v8563_v51  ;;  %v11177_v47 = vld [vmem:[#allocation11 + $0x114] sm:$0xf]  ;;  %v2948_v50 = vadd.f32 %v2947_v46, %v12864_v41  ;;  %v8183_v51 = vor.u32 %v11249_v37, %v8180_v39  ;;  %v2962_v39 = vpop.f32.mrf.mxu1 }
 0x1a1   :  { %v11525_v53 = vld [vmem:[#allocation11 + $0xbec] sm:$0xf0]  ;;  %3205 = vmatpush.bf16.msrb.mxu1 %v8019_v58  ;;  %v7892_v49 = vld [vmem:[#allocation11 + $0x130] sm:$0xf0] }
 0x1a2   :  { %v8978_v54 = vld [vmem:[#allocation11 + $0x990] sm:$0xf]  ;;  %v9267_v1 = vor.u32 %v11525_v53, %v9266_v52  ;;  %3218 = vmatpush.bf16.msrb.mxu2 %v8275_v60  ;;  %v11241_v53 = vld [vmem:[#allocation11 + $0x314] sm:$0xf]  ;;  %v7895_v58 = vor.u32 %v11177_v47, %v7892_v49  ;;  %v2961_v41 = vadd.f32 %v2960_v62, %v2948_v50 }
 0x1a3   :  { %v11453_v55 = vld [vmem:[#allocation11 + $0x9ac] sm:$0xf0]  ;;  %v11153_v37 = vld [vmem:[#allocation11 + $0x54] sm:$0xf] }
 0x1a4   :  { %v8530_v56 = vld [vmem:[#allocation11 + $0x610] sm:$0xf]  ;;  %v8979_v5 = vor.u32 %v11453_v55, %v8978_v54  ;;  %3206 = vmatmul.bf16.vlgmr.msrb.gmra.mxu1 %v12813_v32  ;;  %v8148_v55 = vld [vmem:[#allocation11 + $0x330] sm:$0xf0] }
 0x1a5   :  { %v11341_v57 = vld [vmem:[#allocation11 + $0x62c] sm:$0xf0]  ;;  %3250 = vmatpush.bf16.msra.mxu1 %v9267_v1  ;;  %3219 = vmatmul.bf16.vlgmr.msrb.gmra.mxu2 %v12808_v18  ;;  %v8151_v1 = vor.u32 %v11241_v53, %v8148_v55  ;;  %v8756_v53 = vld [vmem:[#allocation11 + $0x7f0] sm:$0xf0] }
 0x1a6   :  { %v9298_v2 = vld [vmem:[#allocation11 + $0xc10] sm:$0xf]  ;;  %v8531_v6 = vor.u32 %v11341_v57, %v8530_v56  ;;  %3238 = vmatpush.bf16.msrb.mxu3 %v8979_v5  ;;  %v8116_v5 = vld [vmem:[#allocation11 + $0x2f0] sm:$0xf0] }
 0x1a7   :  { %v11533_v3 = vld [vmem:[#allocation11 + $0xc2c] sm:$0xf0]  ;;  %v8468_v55 = vld [vmem:[#allocation11 + $0x5b0] sm:$0xf0] }
 0x1a8   :  { %v9234_v9 = vld [vmem:[#allocation11 + $0xb90] sm:$0xf]  ;;  %v9299_v14 = vor.u32 %v11533_v3, %v9298_v2  ;;  %3231 = vmatpush.bf16.msra.mxu0 %v8531_v6  ;;  %v11233_v3 = vld [vmem:[#allocation11 + $0x2d4] sm:$0xf] }
 0x1a9   :  { %v11517_v10 = vld [vmem:[#allocation11 + $0xbac] sm:$0xf0]  ;;  %v8119_v15 = vor.u32 %v11233_v3, %v8116_v5  ;;  %v11521_v5 = vld [vmem:[#allocation11 + $0xbd4] sm:$0xf] }
 0x1aa   :  { %v8946_v12 = vld [vmem:[#allocation11 + $0x950] sm:$0xf]  ;;  %v9235_v20 = vor.u32 %v11517_v10, %v9234_v9  ;;  %3270 = vmatpush.bf16.msra.mxu2 %v9299_v14  ;;  %v7863_v9 = vor.u32 %v11169_v48, %v7860_v0  ;;  %v7828_v14 = vld [vmem:[#allocation11 + $0xb0] sm:$0xf0] }
 0x1ab   :  { %v11445_v13 = vld [vmem:[#allocation11 + $0x96c] sm:$0xf0]  ;;  %3232 = vmatmul.bf16.vlgmr.msra.gmra.mxu0 %v12810_v21  ;;  %v11505_v39 = vld [vmem:[#allocation11 + $0xb54] sm:$0xf] }
 0x1ac   :  { %v8947_v24 = vor.u32 %v11445_v13, %v8946_v12  ;;  %v9202_v27 = vld [vmem:[#allocation11 + $0xb50] sm:$0xf]  ;;  %3276 = vmatpush.bf16.msrb.mxu0 %v7991_v11  ;;  %3251 = vmatpush.bf16.msra.mxu1 %v9235_v20  ;;  %v2949_v12 = vpop.f32.mrf.mxu0  ;;  %v11161_v13 = vld [vmem:[#allocation11 + $0x94] sm:$0xf]  ;;  %v2986_v20 = vpop.f32.mrf.mxu2 }
 0x1ad   :  { %v11509_v28 = vld [vmem:[#allocation11 + $0xb6c] sm:$0xf0]  ;;  %v8436_v12 = vld [vmem:[#allocation11 + $0x570] sm:$0xf0] }
 0x1ae   :  { %v8914_v30 = vld [vmem:[#allocation11 + $0x910] sm:$0xf]  ;;  %3289 = vmatpush.bf16.msrb.mxu2 %v8247_v19  ;;  %v9203_v36 = vor.u32 %v11509_v28, %v9202_v27  ;;  %3239 = vmatpush.bf16.msrb.mxu3 %v8947_v24  ;;  %v2973_v19 = vpop.f32.mrf.mxu3  ;;  %v8084_v27 = vld [vmem:[#allocation11 + $0x2b0] sm:$0xf0] }
 0x1af   :  { %v11437_v31 = vld [vmem:[#allocation11 + $0x92c] sm:$0xf0]  ;;  %v2974_v24 = vadd.f32 %v2973_v19, %v2961_v41  ;;  %v9012_v41 = vld [vmem:[#allocation11 + $0x9f0] sm:$0xf0] }
 0x1b0   :  { %v8915_v38 = vor.u32 %v11437_v31, %v8914_v30  ;;  %v9170_v40 = vld [vmem:[#allocation11 + $0xb10] sm:$0xf]  ;;  %3277 = vmatpush.bf16.msrb.mxu0 %v7959_v29  ;;  %3252 = vmatpush.bf16.msra.mxu1 %v9203_v36  ;;  %v7831_v30 = vor.u32 %v11161_v13, %v7828_v14  ;;  %v8500_v36 = vld [vmem:[#allocation11 + $0x5f0] sm:$0xf0] }
 0x1b1   :  { %v11501_v42 = vld [vmem:[#allocation11 + $0xb2c] sm:$0xf0]  ;;  %v8503_v46 = vor.u32 %v11329_v34, %v8500_v36  ;;  %v8980_v19 = vld [vmem:[#allocation11 + $0x9b0] sm:$0xf0] }
 0x1b2   :  { %v8882_v44 = vld [vmem:[#allocation11 + $0x8d0] sm:$0xf]  ;;  %3290 = vmatpush.bf16.msrb.mxu2 %v8215_v35  ;;  %v9171_v52 = vor.u32 %v11501_v42, %v9170_v40  ;;  %3240 = vmatpush.bf16.msrb.mxu3 %v8915_v38  ;;  %v2987_v35 = vadd.f32 %v2986_v20, %v2974_v24  ;;  %v7796_v38 = vld [vmem:[#allocation11 + $0x70] sm:$0xf0]  ;;  %v8087_v40 = vor.u32 %v11225_v22, %v8084_v27 }
 0x1b3   :  { %v11429_v45 = vld [vmem:[#allocation11 + $0x8ec] sm:$0xf0]  ;;  %v7799_v47 = vor.u32 %v11153_v37, %v7796_v38  ;;  %v11513_v24 = vld [vmem:[#allocation11 + $0xb94] sm:$0xf] }
 0x1b4   :  { %v8883_v54 = vor.u32 %v11429_v45, %v8882_v44  ;;  %v9138_v56 = vld [vmem:[#allocation11 + $0xad0] sm:$0xf]  ;;  %3278 = vmatpush.bf16.msrb.mxu0 %v7927_v43  ;;  %3253 = vmatpush.bf16.msra.mxu1 %v9171_v52  ;;  %v11217_v44 = vld [vmem:[#allocation11 + $0x254] sm:$0xf]  ;;  %v2999_v52 = vpop.f32.mrf.mxu0  ;;  %v2988_v48 = vpop.f32.mrf.mxu2 }
 0x1b5   :  { %v11493_v57 = vld [vmem:[#allocation11 + $0xaec] sm:$0xf0]  ;;  %9316 = vmatmul.msk.bf16.vlgmr.msra.gmra.mxu2 %vm2817_vm0, %v12819_v8  ;;  %v8052_v45 = vld [vmem:[#allocation11 + $0x270] sm:$0xf0] }
 0x1b6   :  { %v8850_v60 = vld [vmem:[#allocation11 + $0x890] sm:$0xf]  ;;  %3291 = vmatpush.bf16.msrb.mxu2 %v8183_v51  ;;  %v9139_v2 = vor.u32 %v11493_v57, %v9138_v56  ;;  %3241 = vmatpush.bf16.msrb.mxu3 %v8883_v54  ;;  %v11393_v51 = vld [vmem:[#allocation11 + $0x7d4] sm:$0xf]  ;;  %v12873_v56 = vadd.f32 %v2999_v52, %v2987_v35  ;;  %v8055_v57 = vor.u32 %v11217_v44, %v8052_v45  ;;  %v2975_v62 = vpop.f32.mrf.mxu3 }
 0x1b7   :  { %v11421_v61 = vld [vmem:[#allocation11 + $0x8ac] sm:$0xf0]  ;;  %v11321_v54 = vld [vmem:[#allocation11 + $0x594] sm:$0xf]  ;;  %v8759_v3 = vor.u32 %v11393_v51, %v8756_v53 }
 0x1b8   :  { %v8851_v4 = vor.u32 %v11421_v61, %v8850_v60  ;;  %v9106_v6 = vld [vmem:[#allocation11 + $0xa90] sm:$0xf]  ;;  %3279 = vmatpush.bf16.msrb.mxu0 %v7895_v58  ;;  %3254 = vmatpush.bf16.msra.mxu1 %v9139_v2  ;;  %v11145_v58 = vld [vmem:[#allocation11 + $0x14] sm:$0xf] }
 0x1b9   :  { %v11485_v7 = vld [vmem:[#allocation11 + $0xaac] sm:$0xf0]  ;;  %v7764_v60 = vld [vmem:[#allocation11 + $0x30] sm:$0xf0] }
 0x1ba   :  { %v8818_v10 = vld [vmem:[#allocation11 + $0x850] sm:$0xf]  ;;  %3292 = vmatpush.bf16.msrb.mxu2 %v8151_v1  ;;  %v9107_v17 = vor.u32 %v11485_v7, %v9106_v6  ;;  %3242 = vmatpush.bf16.msrb.mxu3 %v8851_v4  ;;  %v11209_v61 = vld [vmem:[#allocation11 + $0x214] sm:$0xf]  ;;  %v8471_v4 = vor.u32 %v11321_v54, %v8468_v55  ;;  %v2803_v55 = vperm.slane %v12847_v25, 2 }
 0x1bb   :  { %v11413_v11 = vld [vmem:[#allocation11 + $0x86c] sm:$0xf0]  ;;  %v8020_v1 = vld [vmem:[#allocation11 + $0x230] sm:$0xf0] }
 0x1bc   :  { %v8819_v26 = vor.u32 %v11413_v11, %v8818_v10  ;;  %v9074_v28 = vld [vmem:[#allocation11 + $0xa50] sm:$0xf]  ;;  %3280 = vmatpush.bf16.msrb.mxu0 %v7863_v9  ;;  %3255 = vmatpush.bf16.msra.mxu1 %v9107_v17  ;;  %v11457_v2 = vld [vmem:[#allocation11 + $0x9d4] sm:$0xf]  ;;  %v7767_v9 = vor.u32 %v11145_v58, %v7764_v60  ;;  %v8023_v13 = vor.u32 %v11209_v61, %v8020_v1 }
 0x1bd   :  { %v11477_v29 = vld [vmem:[#allocation11 + $0xa6c] sm:$0xf0]  ;;  %v9268_v6 = vld [vmem:[#allocation11 + $0xbf0] sm:$0xf0]  ;;  %v9015_v14 = vor.u32 %v11457_v2, %v9012_v41 }
 0x1be   :  { %v8786_v31 = vld [vmem:[#allocation11 + $0x810] sm:$0xf]  ;;  %3293 = vmatpush.bf16.msrb.mxu2 %v8119_v15  ;;  %v9075_v42 = vor.u32 %v11477_v29, %v9074_v28  ;;  %3243 = vmatpush.bf16.msrb.mxu3 %v8819_v26  ;;  %v11385_v7 = vld [vmem:[#allocation11 + $0x794] sm:$0xf]  ;;  %v9271_v15 = vor.u32 %v11521_v5, %v9268_v6  ;;  %v3001_v28 = vpop.f32.mrf.mxu0 }
 0x1bf   :  { %v11405_v33 = vld [vmem:[#allocation11 + $0x82c] sm:$0xf0]  ;;  %v8724_v10 = vld [vmem:[#allocation11 + $0x7b0] sm:$0xf0] }
 0x1c0   :  { %v8787_v43 = vor.u32 %v11405_v33, %v8786_v31  ;;  %3281 = vmatpush.bf16.msrb.mxu0 %v7831_v30  ;;  %v9042_v49 = vld [vmem:[#allocation11 + $0xa10] sm:$0xf]  ;;  %3256 = vmatpush.bf16.msra.mxu1 %v9075_v42  ;;  %v11313_v11 = vld [vmem:[#allocation11 + $0x554] sm:$0xf]  ;;  %v8727_v20 = vor.u32 %v11385_v7, %v8724_v10 }
 0x1c1   :  { %v11469_v50 = vld [vmem:[#allocation11 + $0xa2c] sm:$0xf0]  ;;  %v11449_v17 = vld [vmem:[#allocation11 + $0x994] sm:$0xf]  ;;  %v8439_v22 = vor.u32 %v11313_v11, %v8436_v12 }
 0x1c2   :  { %3294 = vmatpush.bf16.msrb.mxu2 %v8087_v40  ;;  %3244 = vmatpush.bf16.msrb.mxu3 %v8787_v43  ;;  %v9043_v0 = vor.u32 %v11469_v50, %v9042_v49  ;;  %v9236_v26 = vld [vmem:[#allocation11 + $0xbb0] sm:$0xf0]  ;;  %v8983_v33 = vor.u32 %v11449_v17, %v8980_v19 }
 0x1c3   :  { %v11377_v27 = vld [vmem:[#allocation11 + $0x754] sm:$0xf]  ;;  %v9239_v34 = vor.u32 %v11513_v24, %v9236_v26 }
 0x1c4   :  { %3282 = vmatpush.bf16.msrb.mxu0 %v7799_v47  ;;  %3257 = vmatpush.bf16.msra.mxu1 %v9043_v0  ;;  %v8692_v29 = vld [vmem:[#allocation11 + $0x770] sm:$0xf0]  ;;  %v3012_v0 = vpop.f32.mrf.mxu1 }
 0x1c5   :  { %3245 = vmatmul.bf16.vlgmr.msrb.gmra.mxu3 %v12825_v59  ;;  %v11305_v30 = vld [vmem:[#allocation11 + $0x514] sm:$0xf]  ;;  %v8695_v37 = vor.u32 %v11377_v27, %v8692_v29 }
 0x1c6   :  { %3302 = vmatpush.bf16.msra.mxu3 %v8503_v46  ;;  %3295 = vmatpush.bf16.msrb.mxu2 %v8055_v57  ;;  %v8404_v31 = vld [vmem:[#allocation11 + $0x530] sm:$0xf0]  ;;  %v3038_v58 = vpop.f32.mrf.mxu0 }
 0x1c7   :  { %3258 = vmatmul.bf16.vlgmr.msra.gmra.mxu1 %v12827_v63  ;;  %v11441_v35 = vld [vmem:[#allocation11 + $0x954] sm:$0xf]  ;;  %v8407_v38 = vor.u32 %v11305_v30, %v8404_v31 }
 0x1c8   :  { %3315 = vmatpush.bf16.msrb.mxu1 %v8759_v3  ;;  %3283 = vmatpush.bf16.msrb.mxu0 %v7767_v9  ;;  %v8948_v36 = vld [vmem:[#allocation11 + $0x970] sm:$0xf0]  ;;  %v3013_v3 = vadd.f32 %v3012_v0, %v2803_v55  ;;  %v7994_v55 = vld [vmem:[#allocation11 + $0x1d8] sm:$0xf] }
 0x1c9   :  { %v9204_v40 = vld [vmem:[#allocation11 + $0xb70] sm:$0xf0]  ;;  %v8951_v46 = vor.u32 %v11441_v35, %v8948_v36 }
 0x1ca   :  { %3303 = vmatpush.bf16.msra.mxu3 %v8471_v4  ;;  %3296 = vmatpush.bf16.msrb.mxu2 %v8023_v13  ;;  %v11369_v42 = vld [vmem:[#allocation11 + $0x714] sm:$0xf]  ;;  %v9207_v47 = vor.u32 %v11505_v39, %v9204_v40  ;;  %v3025_v13 = vpop.f32.mrf.mxu3 }
 0x1cb   :  { %v8660_v43 = vld [vmem:[#allocation11 + $0x730] sm:$0xf0]  ;;  %3284 = vmatmul.bf16.vlgmr.msrb.gmra.mxu0 %v12805_v16  ;;  %v3026_v19 = vadd.f32 %v3025_v13, %v3013_v3  ;;  %v11334_v3 = vld [vmem:[#allocation11 + $0x5f4] sm:$0xf0] }
 0x1cc   :  { %3328 = vmatpush.bf16.msra.mxu0 %v9015_v14  ;;  %3316 = vmatpush.bf16.msrb.mxu1 %v8727_v20  ;;  %v11297_v44 = vld [vmem:[#allocation11 + $0x4d4] sm:$0xf]  ;;  %v8663_v52 = vor.u32 %v11369_v42, %v8660_v43 }
 0x1cd   :  { %v8372_v45 = vld [vmem:[#allocation11 + $0x4f0] sm:$0xf0]  ;;  %3297 = vmatmul.bf16.vlgmr.msrb.gmra.mxu2 %v12813_v32 }
 0x1ce   :  { %3341 = vmatpush.bf16.msra.mxu2 %v9271_v15  ;;  %3304 = vmatpush.bf16.msra.mxu3 %v8439_v22  ;;  %v11433_v49 = vld [vmem:[#allocation11 + $0x914] sm:$0xf]  ;;  %v8375_v53 = vor.u32 %v11297_v44, %v8372_v45  ;;  %v3040_v28 = vpop.f32.mrf.mxu0 }
 0x1cf   :  { %v8916_v50 = vld [vmem:[#allocation11 + $0x930] sm:$0xf0]  ;;  %v8186_v28 = vld [vmem:[#allocation11 + $0x358] sm:$0xf] }
 0x1d0   :  { %3329 = vmatpush.bf16.msra.mxu0 %v8983_v33  ;;  %v11497_v51 = vld [vmem:[#allocation11 + $0xb14] sm:$0xf]  ;;  %3317 = vmatpush.bf16.msrb.mxu1 %v8695_v37  ;;  %v8919_v48 = vor.u32 %v11433_v49, %v8916_v50  ;;  %v3039_v33 = vadd.f32 %v3038_v58, %v3026_v19  ;;  %v3014_v37 = vpop.f32.mrf.mxu1 }
 0x1d1   :  { %v9172_v54 = vld [vmem:[#allocation11 + $0xb30] sm:$0xf0]  ;;  %v11318_v37 = vld [vmem:[#allocation11 + $0x574] sm:$0xf0] }
 0x1d2   :  { %3342 = vmatpush.bf16.msra.mxu2 %v9239_v34  ;;  %3305 = vmatpush.bf16.msra.mxu3 %v8407_v38  ;;  %v11361_v57 = vld [vmem:[#allocation11 + $0x6d4] sm:$0xf]  ;;  %v9175_v1 = vor.u32 %v11497_v51, %v9172_v54  ;;  %v3051_v38 = vpop.f32.mrf.mxu2  ;;  %v3027_v0 = vpop.f32.mrf.mxu3 }
 0x1d3   :  { %v8628_v60 = vld [vmem:[#allocation11 + $0x6f0] sm:$0xf0]  ;;  %v12880_v43 = vadd.f32 %v3051_v38, %v3039_v33  ;;  %v8698_v38 = vld [vmem:[#allocation11 + $0x758] sm:$0xf] }
 0x1d4   :  { %v11289_v61 = vld [vmem:[#allocation11 + $0x494] sm:$0xf]  ;;  %3330 = vmatpush.bf16.msra.mxu0 %v8951_v46  ;;  %3318 = vmatpush.bf16.msrb.mxu1 %v8663_v52  ;;  %v8631_v4 = vor.u32 %v11361_v57, %v8628_v60  ;;  %v8250_v52 = vld [vmem:[#allocation11 + $0x3d8] sm:$0xf] }
 0x1d5   :  { %v8340_v62 = vld [vmem:[#allocation11 + $0x4b0] sm:$0xf0]  ;;  %v11206_v57 = vld [vmem:[#allocation11 + $0x1f4] sm:$0xf0] }
 0x1d6   :  { %3343 = vmatpush.bf16.msra.mxu2 %v9207_v47  ;;  %v11425_v2 = vld [vmem:[#allocation11 + $0x8d4] sm:$0xf]  ;;  %3306 = vmatpush.bf16.msra.mxu3 %v8375_v53  ;;  %v8343_v5 = vor.u32 %v11289_v61, %v8340_v62  ;;  %v11270_v53 = vld [vmem:[#allocation11 + $0x3f4] sm:$0xf0] }
 0x1d7   :  { %v8884_v41 = vld [vmem:[#allocation11 + $0x8f0] sm:$0xf0]  ;;  %v11174_v0 = vld [vmem:[#allocation11 + $0xf4] sm:$0xf0] }
 0x1d8   :  { %v11489_v6 = vld [vmem:[#allocation11 + $0xad4] sm:$0xf]  ;;  %3331 = vmatpush.bf16.msra.mxu0 %v8919_v48  ;;  %v8887_v12 = vor.u32 %v11425_v2, %v8884_v41  ;;  %3319 = vmatpush.bf16.msrb.mxu1 %v8631_v4  ;;  %v8251_v2 = vor.u32 %v11270_v53, %v8250_v52  ;;  %v8506_v41 = vld [vmem:[#allocation11 + $0x5d8] sm:$0xf] }
 0x1d9   :  { %v9140_v7 = vld [vmem:[#allocation11 + $0xaf0] sm:$0xf0]  ;;  %v8762_v4 = vld [vmem:[#allocation11 + $0x7d8] sm:$0xf] }
 0x1da   :  { %v11353_v25 = vld [vmem:[#allocation11 + $0x694] sm:$0xf]  ;;  %3344 = vmatpush.bf16.msra.mxu2 %v9175_v1  ;;  %v9143_v14 = vor.u32 %v11489_v6, %v9140_v7  ;;  %3307 = vmatpush.bf16.msra.mxu3 %v8343_v5  ;;  %v7995_v5 = vor.u32 %v11206_v57, %v7994_v55  ;;  %v11398_v6 = vld [vmem:[#allocation11 + $0x7f4] sm:$0xf0] }
 0x1db   :  { %v8596_v9 = vld [vmem:[#allocation11 + $0x6b0] sm:$0xf0]  ;;  %v8218_v7 = vld [vmem:[#allocation11 + $0x398] sm:$0xf] }
 0x1dc   :  { %v11281_v10 = vld [vmem:[#allocation11 + $0x454] sm:$0xf]  ;;  %v8599_v20 = vor.u32 %v11353_v25, %v8596_v9  ;;  %3332 = vmatpush.bf16.msra.mxu0 %v8887_v12  ;;  %v11262_v25 = vld [vmem:[#allocation11 + $0x3b4] sm:$0xf0]  ;;  %v12882_v9 = vpop.f32.mrf.mxu0 }
 0x1dd   :  { %v8308_v11 = vld [vmem:[#allocation11 + $0x470] sm:$0xf0]  ;;  %v11198_v12 = vld [vmem:[#allocation11 + $0x1b4] sm:$0xf0]  ;;  %v8219_v19 = vor.u32 %v11262_v25, %v8218_v7 }
 0x1de   :  { %v11417_v15 = vld [vmem:[#allocation11 + $0x894] sm:$0xf]  ;;  %v8311_v22 = vor.u32 %v11281_v10, %v8308_v11  ;;  %3345 = vmatpush.bf16.msra.mxu2 %v9143_v14  ;;  %3320 = vmatpush.bf16.msrb.mxu1 %v8599_v20  ;;  %v7962_v11 = vld [vmem:[#allocation11 + $0x198] sm:$0xf]  ;;  %v8507_v14 = vor.u32 %v11334_v3, %v8506_v41 }
 0x1df   :  { %v8852_v17 = vld [vmem:[#allocation11 + $0x8b0] sm:$0xf0]  ;;  %v8474_v20 = vld [vmem:[#allocation11 + $0x598] sm:$0xf] }
 0x1e0   :  { %v11481_v24 = vld [vmem:[#allocation11 + $0xa94] sm:$0xf]  ;;  %v8855_v34 = vor.u32 %v11417_v15, %v8852_v17  ;;  %3308 = vmatpush.bf16.msra.mxu3 %v8311_v22  ;;  %v3053_v15 = vpop.f32.mrf.mxu2  ;;  %v8763_v17 = vor.u32 %v11398_v6, %v8762_v4  ;;  %v11326_v22 = vld [vmem:[#allocation11 + $0x5b4] sm:$0xf0] }
 0x1e1   :  { %v9108_v26 = vld [vmem:[#allocation11 + $0xab0] sm:$0xf0]  ;;  %v8475_v33 = vor.u32 %v11326_v22, %v8474_v20  ;;  %v11310_v55 = vld [vmem:[#allocation11 + $0x534] sm:$0xf0] }
 0x1e2   :  { %v11345_v27 = vld [vmem:[#allocation11 + $0x654] sm:$0xf]  ;;  %v9111_v39 = vor.u32 %v11481_v24, %v9108_v26  ;;  %3333 = vmatpush.bf16.msra.mxu0 %v8855_v34  ;;  %v8730_v24 = vld [vmem:[#allocation11 + $0x798] sm:$0xf]  ;;  %v7963_v26 = vor.u32 %v11198_v12, %v7962_v11 }
 0x1e3   :  { %v8564_v29 = vld [vmem:[#allocation11 + $0x670] sm:$0xf0]  ;;  %v8666_v57 = vld [vmem:[#allocation11 + $0x718] sm:$0xf] }
 0x1e4   :  { %v11273_v30 = vld [vmem:[#allocation11 + $0x414] sm:$0xf]  ;;  %v8567_v44 = vor.u32 %v11345_v27, %v8564_v29  ;;  %3346 = vmatpush.bf16.msra.mxu2 %v9111_v39  ;;  %v11390_v27 = vld [vmem:[#allocation11 + $0x7b4] sm:$0xf0] }
 0x1e5   :  { %v8276_v31 = vld [vmem:[#allocation11 + $0x430] sm:$0xf0]  ;;  %v11254_v29 = vld [vmem:[#allocation11 + $0x374] sm:$0xf0]  ;;  %v8731_v34 = vor.u32 %v11390_v27, %v8730_v24 }
 0x1e6   :  { %v11529_v35 = vld [vmem:[#allocation11 + $0xc14] sm:$0xf]  ;;  %v8279_v45 = vor.u32 %v11273_v30, %v8276_v31  ;;  %3321 = vmatpush.bf16.msrb.mxu1 %v8567_v44  ;;  %v7930_v30 = vld [vmem:[#allocation11 + $0x158] sm:$0xf] }
 0x1e7   :  { %v9300_v36 = vld [vmem:[#allocation11 + $0xc30] sm:$0xf0]  ;;  %v11190_v31 = vld [vmem:[#allocation11 + $0x174] sm:$0xf0] }
 0x1e8   :  { %v11409_v40 = vld [vmem:[#allocation11 + $0x854] sm:$0xf]  ;;  %v9303_v51 = vor.u32 %v11529_v35, %v9300_v36  ;;  %3309 = vmatpush.bf16.msra.mxu3 %v8279_v45  ;;  %v8187_v35 = vor.u32 %v11254_v29, %v8186_v28  ;;  %v8442_v36 = vld [vmem:[#allocation11 + $0x558] sm:$0xf]  ;;  %v7931_v39 = vor.u32 %v11190_v31, %v7930_v30  ;;  %v3092_v45 = vpop.f32.mrf.mxu0 }
 0x1e9   :  { %v8820_v42 = vld [vmem:[#allocation11 + $0x870] sm:$0xf0]  ;;  %v11246_v44 = vld [vmem:[#allocation11 + $0x334] sm:$0xf0] }
 0x1ea   :  { %v11473_v46 = vld [vmem:[#allocation11 + $0xa54] sm:$0xf]  ;;  %v8823_v54 = vor.u32 %v11409_v40, %v8820_v42  ;;  %v11382_v40 = vld [vmem:[#allocation11 + $0x774] sm:$0xf0] }
 0x1eb   :  { %v9076_v47 = vld [vmem:[#allocation11 + $0xa70] sm:$0xf0]  ;;  %3310 = vmatmul.bf16.vlgmr.msra.gmra.mxu3 %v12808_v18  ;;  %v8154_v42 = vld [vmem:[#allocation11 + $0x318] sm:$0xf]  ;;  %v8699_v52 = vor.u32 %v11382_v40, %v8698_v38 }
 0x1ec   :  { %v11337_v49 = vld [vmem:[#allocation11 + $0x614] sm:$0xf]  ;;  %v9079_v60 = vor.u32 %v11473_v46, %v9076_v47  ;;  %3361 = vmatpush.bf16.msrb.mxu3 %v9303_v51  ;;  %3334 = vmatpush.bf16.msra.mxu0 %v8823_v54  ;;  %v7898_v46 = vld [vmem:[#allocation11 + $0x118] sm:$0xf]  ;;  %v8155_v53 = vor.u32 %v11246_v44, %v8154_v42 }
 0x1ed   :  { %v8532_v50 = vld [vmem:[#allocation11 + $0x630] sm:$0xf0]  ;;  %v11182_v47 = vld [vmem:[#allocation11 + $0x134] sm:$0xf0] }
 0x1ee   :  { %v11401_v58 = vld [vmem:[#allocation11 + $0x814] sm:$0xf]  ;;  %v8535_v1 = vor.u32 %v11337_v49, %v8532_v50  ;;  %3347 = vmatpush.bf16.msra.mxu2 %v9079_v60  ;;  %v3064_v49 = vpop.f32.mrf.mxu1  ;;  %v8443_v50 = vor.u32 %v11318_v37, %v8442_v36  ;;  %v8410_v54 = vld [vmem:[#allocation11 + $0x518] sm:$0xf] }
 0x1ef   :  { %v8788_v61 = vld [vmem:[#allocation11 + $0x830] sm:$0xf0]  ;;  %v3065_v51 = vadd.f32 %v3064_v49, %v12880_v43  ;;  %v11374_v60 = vld [vmem:[#allocation11 + $0x734] sm:$0xf0] }
 0x1f0   :  { %v11465_v62 = vld [vmem:[#allocation11 + $0xa14] sm:$0xf]  ;;  %v8791_v10 = vor.u32 %v11401_v58, %v8788_v61  ;;  %3322 = vmatpush.bf16.msrb.mxu1 %v8535_v1  ;;  %3380 = vmatpush.bf16.msra.mxu3 %v8251_v2  ;;  %v7899_v58 = vor.u32 %v11182_v47, %v7898_v46  ;;  %v8122_v61 = vld [vmem:[#allocation11 + $0x2d8] sm:$0xf]  ;;  %v8411_v1 = vor.u32 %v11310_v55, %v8410_v54 }
 0x1f1   :  { %v9044_v48 = vld [vmem:[#allocation11 + $0xa30] sm:$0xf0]  ;;  %v8667_v2 = vor.u32 %v11374_v60, %v8666_v57  ;;  %v8378_v43 = vld [vmem:[#allocation11 + $0x4d8] sm:$0xf] }
 0x1f2   :  { %v9047_v13 = vor.u32 %v11465_v62, %v9044_v48  ;;  %3335 = vmatpush.bf16.msra.mxu0 %v8791_v10  ;;  %v11238_v62 = vld [vmem:[#allocation11 + $0x2f4] sm:$0xf0] }
 0x1f3   :  { %3323 = vmatmul.bf16.vlgmr.msrb.gmra.mxu1 %v12810_v21  ;;  %v7866_v48 = vld [vmem:[#allocation11 + $0xd8] sm:$0xf]  ;;  %v8123_v41 = vor.u32 %v11238_v62, %v8122_v61 }
 0x1f4   :  { %3367 = vmatpush.bf16.msra.mxu1 %v7995_v5  ;;  %3348 = vmatpush.bf16.msra.mxu2 %v9047_v13  ;;  %v11302_v3 = vld [vmem:[#allocation11 + $0x4f4] sm:$0xf0]  ;;  %v3077_v5 = vpop.f32.mrf.mxu3  ;;  %v7867_v6 = vor.u32 %v11174_v0, %v7866_v48 }
 0x1f5   :  { %3381 = vmatpush.bf16.msra.mxu3 %v8219_v19  ;;  %3336 = vmatmul.bf16.vlgmr.msra.gmra.mxu0 %v12825_v59  ;;  %v8634_v4 = vld [vmem:[#allocation11 + $0x6d8] sm:$0xf]  ;;  %v3078_v11 = vadd.f32 %v3077_v5, %v3065_v51  ;;  %v8379_v19 = vor.u32 %v11302_v3, %v8378_v43  ;;  %v11202_v5 = vld [vmem:[#allocation11 + $0x1dc] sm:$0xf] }
 0x1f6   :  { %3393 = vmatpush.bf16.msrb.mxu0 %v8507_v14  ;;  %v11366_v7 = vld [vmem:[#allocation11 + $0x6f4] sm:$0xf0]  ;;  %v12889_v14 = vld [vmem:[#allocation13] sm:$0xff]  ;;  %v3066_v20 = vpop.f32.mrf.mxu1 }
 0x1f7   :  { %3349 = vmatmul.bf16.vlgmr.msra.gmra.mxu2 %v12827_v63  ;;  %v8090_v25 = vld [vmem:[#allocation11 + $0x298] sm:$0xf]  ;;  %v2804_v15 = vperm.slane %v12889_v14, 3  ;;  %v12895_v22 = vadd.f32 %v12882_v9, %v3078_v11  ;;  %v8635_v24 = vor.u32 %v11366_v7, %v8634_v4  ;;  %v7996_v11 = vld [vmem:[#allocation11 + $0x1f8] sm:$0xf0] }
 0x1f8   :  { %3406 = vmatpush.bf16.msrb.mxu2 %v8763_v17  ;;  %3368 = vmatpush.bf16.msra.mxu1 %v7963_v26  ;;  %v11230_v10 = vld [vmem:[#allocation11 + $0x2b4] sm:$0xf0]  ;;  %v3116_v17 = vpop.f32.mrf.mxu0 }
 0x1f9   :  { %3382 = vmatpush.bf16.msra.mxu3 %v8187_v35  ;;  %v7834_v12 = vld [vmem:[#allocation11 + $0x98] sm:$0xf]  ;;  %v8091_v26 = vor.u32 %v11230_v10, %v8090_v25  ;;  %v3103_v35 = vpop.f32.mrf.mxu2 }
 0x1fa   :  { %3394 = vmatpush.bf16.msrb.mxu0 %v8475_v33  ;;  %v11166_v13 = vld [vmem:[#allocation11 + $0xb4] sm:$0xf0]  ;;  %v3104_v38 = vadd.f32 %v3103_v35, %v2804_v15 }
 0x1fb   :  { %9317 = vmatmul.msk.bf16.vlgmr.msrb.gmra.mxu3 %vm2817_vm0, %v12819_v8  ;;  %v8346_v27 = vld [vmem:[#allocation11 + $0x498] sm:$0xf]  ;;  %v7835_v30 = vor.u32 %v11166_v13, %v7834_v12 }
 0x1fc   :  { %3407 = vmatpush.bf16.msrb.mxu2 %v8731_v34  ;;  %3369 = vmatpush.bf16.msra.mxu1 %v7931_v39  ;;  %v11294_v28 = vld [vmem:[#allocation11 + $0x4b4] sm:$0xf0]  ;;  %v12897_v47 = vadd.f32 %v3116_v17, %v3104_v38 }
 0x1fd   :  { %3383 = vmatpush.bf16.msra.mxu3 %v8155_v53  ;;  %v8602_v29 = vld [vmem:[#allocation11 + $0x698] sm:$0xf]  ;;  %v8347_v39 = vor.u32 %v11294_v28, %v8346_v27  ;;  %v3079_v53 = vpop.f32.mrf.mxu3  ;;  %v8252_v27 = vld [vmem:[#allocation11 + $0x3f8] sm:$0xf0]  ;;  %v7999_v28 = vor.u32 %v11202_v5, %v7996_v11 }
 0x1fe   :  { %3395 = vmatpush.bf16.msrb.mxu0 %v8443_v50  ;;  %v11358_v31 = vld [vmem:[#allocation11 + $0x6b4] sm:$0xf0]  ;;  %v8156_v5 = vld [vmem:[#allocation11 + $0x338] sm:$0xf0] }
 0x1ff   :  { %v8058_v33 = vld [vmem:[#allocation11 + $0x258] sm:$0xf]  ;;  %v8603_v40 = vor.u32 %v11358_v31, %v8602_v29 }
 0x200   :  { %3408 = vmatpush.bf16.msrb.mxu2 %v8699_v52  ;;  %3370 = vmatpush.bf16.msra.mxu1 %v7899_v58  ;;  %v11222_v34 = vld [vmem:[#allocation11 + $0x274] sm:$0xf0]  ;;  %v3118_v58 = vpop.f32.mrf.mxu0 }
 0x201   :  { %3384 = vmatpush.bf16.msra.mxu3 %v8123_v41  ;;  %v7802_v36 = vld [vmem:[#allocation11 + $0x58] sm:$0xf]  ;;  %v8059_v42 = vor.u32 %v11222_v34, %v8058_v33  ;;  %v3105_v25 = vpop.f32.mrf.mxu2  ;;  %v7964_v33 = vld [vmem:[#allocation11 + $0x1b8] sm:$0xf0] }
 0x202   :  { %3396 = vmatpush.bf16.msrb.mxu0 %v8411_v1  ;;  %v11158_v37 = vld [vmem:[#allocation11 + $0x74] sm:$0xf0] }
 0x203   :  { %v8314_v9 = vld [vmem:[#allocation11 + $0x458] sm:$0xf]  ;;  %v7803_v49 = vor.u32 %v11158_v37, %v7802_v36 }
 0x204   :  { %3409 = vmatpush.bf16.msrb.mxu2 %v8667_v2  ;;  %3371 = vmatpush.bf16.msra.mxu1 %v7867_v6  ;;  %v11286_v44 = vld [vmem:[#allocation11 + $0x474] sm:$0xf0] }
 0x205   :  { %3385 = vmatpush.bf16.msra.mxu3 %v8091_v26  ;;  %v8570_v45 = vld [vmem:[#allocation11 + $0x658] sm:$0xf]  ;;  %v8315_v60 = vor.u32 %v11286_v44, %v8314_v9  ;;  %v11266_v26 = vld [vmem:[#allocation11 + $0x3dc] sm:$0xf] }
 0x206   :  { %3397 = vmatpush.bf16.msrb.mxu0 %v8379_v19  ;;  %v11350_v46 = vld [vmem:[#allocation11 + $0x674] sm:$0xf0]  ;;  %v8255_v36 = vor.u32 %v11266_v26, %v8252_v27  ;;  %v8220_v9 = vld [vmem:[#allocation11 + $0x3b8] sm:$0xf0] }
 0x207   :  { %v7770_v50 = vld [vmem:[#allocation11 + $0x18] sm:$0xf]  ;;  %v8571_v0 = vor.u32 %v11350_v46, %v8570_v45  ;;  %v11186_v44 = vld [vmem:[#allocation11 + $0x15c] sm:$0xf] }
 0x208   :  { %3410 = vmatpush.bf16.msrb.mxu2 %v8635_v24  ;;  %3372 = vmatpush.bf16.msra.mxu1 %v7835_v30  ;;  %v8026_v51 = vld [vmem:[#allocation11 + $0x218] sm:$0xf]  ;;  %v11194_v30 = vld [vmem:[#allocation11 + $0x19c] sm:$0xf] }
 0x209   :  { %v11214_v52 = vld [vmem:[#allocation11 + $0x234] sm:$0xf0]  ;;  %3386 = vmatpush.bf16.msra.mxu3 %v8059_v42  ;;  %v7932_v46 = vld [vmem:[#allocation11 + $0x178] sm:$0xf0] }
 0x20a   :  { %v11150_v54 = vld [vmem:[#allocation11 + $0x34] sm:$0xf0]  ;;  %3398 = vmatpush.bf16.msrb.mxu0 %v8347_v39  ;;  %v8027_v1 = vor.u32 %v11214_v52, %v8026_v51  ;;  %v11258_v39 = vld [vmem:[#allocation11 + $0x39c] sm:$0xf] }
 0x20b   :  { %v9274_v55 = vld [vmem:[#allocation11 + $0xbd8] sm:$0xf]  ;;  %v7771_v3 = vor.u32 %v11150_v54, %v7770_v50  ;;  %v8223_v51 = vor.u32 %v11258_v39, %v8220_v9  ;;  %v3129_v54 = vpop.f32.mrf.mxu1  ;;  %v11234_v27 = vld [vmem:[#allocation11 + $0x2dc] sm:$0xf] }
 0x20c   :  { %v11526_v57 = vld [vmem:[#allocation11 + $0xbf4] sm:$0xf0]  ;;  %3411 = vmatpush.bf16.msrb.mxu2 %v8603_v40  ;;  %3373 = vmatpush.bf16.msra.mxu1 %v7803_v49  ;;  %v7967_v40 = vor.u32 %v11194_v30, %v7964_v33  ;;  %v3130_v58 = vadd.f32 %v3129_v54, %v12897_v47  ;;  %v11170_v47 = vld [vmem:[#allocation11 + $0xdc] sm:$0xf]  ;;  %v3155_v33 = vpop.f32.mrf.mxu2 }
 0x20d   :  { %v9018_v61 = vld [vmem:[#allocation11 + $0x9d8] sm:$0xf]  ;;  %v9275_v4 = vor.u32 %v11526_v57, %v9274_v55  ;;  %3387 = vmatpush.bf16.msra.mxu3 %v8027_v1  ;;  %v11250_v55 = vld [vmem:[#allocation11 + $0x35c] sm:$0xf] }
 0x20e   :  { %v11462_v62 = vld [vmem:[#allocation11 + $0x9f4] sm:$0xf0]  ;;  %3399 = vmatpush.bf16.msrb.mxu0 %v8315_v60  ;;  %v8188_v57 = vld [vmem:[#allocation11 + $0x378] sm:$0xf0]  ;;  %v7935_v60 = vor.u32 %v11186_v44, %v7932_v46 }
 0x20f   :  { %v8282_v48 = vld [vmem:[#allocation11 + $0x418] sm:$0xf]  ;;  %v9019_v10 = vor.u32 %v11462_v62, %v9018_v61  ;;  %v11178_v62 = vld [vmem:[#allocation11 + $0x11c] sm:$0xf] }
 0x210   :  { %v11278_v2 = vld [vmem:[#allocation11 + $0x434] sm:$0xf0]  ;;  %3412 = vmatpush.bf16.msrb.mxu2 %v8571_v0  ;;  %3374 = vmatpush.bf16.msra.mxu1 %v7771_v3  ;;  %v7900_v0 = vld [vmem:[#allocation11 + $0x138] sm:$0xf0] }
 0x211   :  { %v8538_v41 = vld [vmem:[#allocation11 + $0x618] sm:$0xf]  ;;  %v8283_v15 = vor.u32 %v11278_v2, %v8282_v48  ;;  %3432 = vmatpush.bf16.msrb.mxu3 %v9275_v4  ;;  %v11242_v4 = vld [vmem:[#allocation11 + $0x31c] sm:$0xf] }
 0x212   :  { %v11342_v43 = vld [vmem:[#allocation11 + $0x634] sm:$0xf0]  ;;  %3388 = vmatmul.bf16.vlgmr.msra.gmra.mxu3 %v12813_v32  ;;  %v8092_v44 = vld [vmem:[#allocation11 + $0x2b8] sm:$0xf0] }
 0x213   :  { %v9306_v6 = vld [vmem:[#allocation11 + $0xc18] sm:$0xf]  ;;  %v8539_v20 = vor.u32 %v11342_v43, %v8538_v41  ;;  %3400 = vmatpush.bf16.msrb.mxu0 %v8283_v15  ;;  %3375 = vmatmul.bf16.vlgmr.msra.gmra.mxu1 %v12805_v16  ;;  %v8191_v41 = vor.u32 %v11250_v55, %v8188_v57  ;;  %v8159_v15 = vor.u32 %v11242_v4, %v8156_v5  ;;  %v3131_v26 = vpop.f32.mrf.mxu1 }
 0x214   :  { %v11534_v7 = vld [vmem:[#allocation11 + $0xc34] sm:$0xf0]  ;;  %3419 = vmatpush.bf16.msrb.mxu1 %v9019_v10  ;;  %v7868_v10 = vld [vmem:[#allocation11 + $0xf8] sm:$0xf0] }
 0x215   :  { %v9242_v12 = vld [vmem:[#allocation11 + $0xb98] sm:$0xf]  ;;  %v9307_v24 = vor.u32 %v11534_v7, %v9306_v6  ;;  %3413 = vmatpush.bf16.msrb.mxu2 %v8539_v20  ;;  %v7903_v6 = vor.u32 %v11178_v62, %v7900_v0  ;;  %v8764_v62 = vld [vmem:[#allocation11 + $0x7f8] sm:$0xf0] }
 0x216   :  { %v11518_v13 = vld [vmem:[#allocation11 + $0xbb4] sm:$0xf0]  ;;  %3401 = vmatmul.bf16.vlgmr.msrb.gmra.mxu0 %v12808_v18  ;;  %v11210_v26 = vld [vmem:[#allocation11 + $0x21c] sm:$0xf] }
 0x217   :  { %v8986_v17 = vld [vmem:[#allocation11 + $0x998] sm:$0xf]  ;;  %v9243_v29 = vor.u32 %v11518_v13, %v9242_v12  ;;  %3452 = vmatpush.bf16.msra.mxu0 %v9307_v24  ;;  %v3142_v13 = vpop.f32.mrf.mxu3 }
 0x218   :  { %v11454_v19 = vld [vmem:[#allocation11 + $0x9b4] sm:$0xf0]  ;;  %3414 = vmatmul.bf16.vlgmr.msrb.gmra.mxu2 %v12810_v21  ;;  %v3143_v24 = vadd.f32 %v3142_v13, %v3130_v58 }
 0x219   :  { %v8987_v31 = vor.u32 %v11454_v19, %v8986_v17  ;;  %v9210_v34 = vld [vmem:[#allocation11 + $0xb58] sm:$0xf]  ;;  %3458 = vmatpush.bf16.msra.mxu2 %v7999_v28  ;;  %3433 = vmatpush.bf16.msrb.mxu3 %v9243_v29  ;;  %v3168_v17 = vpop.f32.mrf.mxu0  ;;  %v8124_v28 = vld [vmem:[#allocation11 + $0x2f8] sm:$0xf0]  ;;  %v7871_v29 = vor.u32 %v11170_v47, %v7868_v10 }
 0x21a   :  { %v11510_v35 = vld [vmem:[#allocation11 + $0xb74] sm:$0xf0]  ;;  %v8127_v39 = vor.u32 %v11234_v27, %v8124_v28  ;;  %v11458_v10 = vld [vmem:[#allocation11 + $0x9dc] sm:$0xf] }
 0x21b   :  { %v8954_v37 = vld [vmem:[#allocation11 + $0x958] sm:$0xf]  ;;  %v9211_v42 = vor.u32 %v11510_v35, %v9210_v34  ;;  %3420 = vmatpush.bf16.msrb.mxu1 %v8987_v31  ;;  %3471 = vmatpush.bf16.msrb.mxu0 %v8255_v36  ;;  %v11162_v31 = vld [vmem:[#allocation11 + $0x9c] sm:$0xf] }
 0x21c   :  { %v11446_v38 = vld [vmem:[#allocation11 + $0x974] sm:$0xf0]  ;;  %v7836_v35 = vld [vmem:[#allocation11 + $0xb8] sm:$0xf0] }
 0x21d   :  { %v8955_v45 = vor.u32 %v11446_v38, %v8954_v37  ;;  %v9178_v49 = vld [vmem:[#allocation11 + $0xb18] sm:$0xf]  ;;  %3459 = vmatpush.bf16.msra.mxu2 %v7967_v40  ;;  %3434 = vmatpush.bf16.msrb.mxu3 %v9211_v42  ;;  %v3156_v38 = vadd.f32 %v3155_v33, %v3143_v24  ;;  %v11226_v42 = vld [vmem:[#allocation11 + $0x29c] sm:$0xf]  ;;  %v7839_v46 = vor.u32 %v11162_v31, %v7836_v35 }
 0x21e   :  { %v11502_v50 = vld [vmem:[#allocation11 + $0xb34] sm:$0xf0]  ;;  %v8095_v58 = vor.u32 %v11226_v42, %v8092_v44  ;;  %v8476_v24 = vld [vmem:[#allocation11 + $0x5b8] sm:$0xf0] }
 0x21f   :  { %v8922_v52 = vld [vmem:[#allocation11 + $0x918] sm:$0xf]  ;;  %v9179_v61 = vor.u32 %v11502_v50, %v9178_v49  ;;  %3421 = vmatpush.bf16.msrb.mxu1 %v8955_v45  ;;  %3472 = vmatpush.bf16.msrb.mxu0 %v8223_v51  ;;  %v3169_v45 = vadd.f32 %v3168_v17, %v3156_v38  ;;  %v11154_v50 = vld [vmem:[#allocation11 + $0x5c] sm:$0xf] }
 0x220   :  { %v11438_v53 = vld [vmem:[#allocation11 + $0x934] sm:$0xf0]  ;;  %v7804_v51 = vld [vmem:[#allocation11 + $0x78] sm:$0xf0] }
 0x221   :  { %v8923_v48 = vor.u32 %v11438_v53, %v8922_v52  ;;  %v9146_v1 = vld [vmem:[#allocation11 + $0xad8] sm:$0xf]  ;;  %3460 = vmatpush.bf16.msra.mxu2 %v7935_v60  ;;  %3435 = vmatpush.bf16.msrb.mxu3 %v9179_v61  ;;  %v11330_v60 = vld [vmem:[#allocation11 + $0x5dc] sm:$0xf]  ;;  %v3170_v0 = vpop.f32.mrf.mxu0  ;;  %v7807_v4 = vor.u32 %v11154_v50, %v7804_v51 }
 0x222   :  { %v11494_v2 = vld [vmem:[#allocation11 + $0xaf4] sm:$0xf0]  ;;  %v11394_v61 = vld [vmem:[#allocation11 + $0x7dc] sm:$0xf] }
 0x223   :  { %v8890_v43 = vld [vmem:[#allocation11 + $0x8d8] sm:$0xf]  ;;  %v9147_v7 = vor.u32 %v11494_v2, %v9146_v1  ;;  %3422 = vmatpush.bf16.msrb.mxu1 %v8923_v48  ;;  %3473 = vmatpush.bf16.msrb.mxu0 %v8191_v41  ;;  %v3144_v48 = vpop.f32.mrf.mxu3  ;;  %v3181_v1 = vpop.f32.mrf.mxu1  ;;  %v8508_v2 = vld [vmem:[#allocation11 + $0x5f8] sm:$0xf0]  ;;  %v8767_v47 = vor.u32 %v11394_v61, %v8764_v62 }
 0x224   :  { %v11430_v3 = vld [vmem:[#allocation11 + $0x8f4] sm:$0xf0]  ;;  %v11218_v41 = vld [vmem:[#allocation11 + $0x25c] sm:$0xf]  ;;  %v8511_v13 = vor.u32 %v11330_v60, %v8508_v2 }
 0x225   :  { %v8891_v25 = vor.u32 %v11430_v3, %v8890_v43  ;;  %v9114_v11 = vld [vmem:[#allocation11 + $0xa98] sm:$0xf]  ;;  %3461 = vmatpush.bf16.msra.mxu2 %v7903_v6  ;;  %3436 = vmatpush.bf16.msrb.mxu3 %v9147_v7  ;;  %v8060_v43 = vld [vmem:[#allocation11 + $0x278] sm:$0xf0]  ;;  %v12906_v3 = vadd.f32 %v3181_v1, %v3169_v45 }
 0x226   :  { %v11486_v12 = vld [vmem:[#allocation11 + $0xab4] sm:$0xf0]  ;;  %9318 = vmatmul.msk.bf16.vlgmr.msra.gmra.mxu0 %vm2817_vm0, %v12819_v8  ;;  %v11146_v6 = vld [vmem:[#allocation11 + $0x1c] sm:$0xf] }
 0x227   :  { %v8858_v19 = vld [vmem:[#allocation11 + $0x898] sm:$0xf]  ;;  %v9115_v30 = vor.u32 %v11486_v12, %v9114_v11  ;;  %3423 = vmatpush.bf16.msrb.mxu1 %v8891_v25  ;;  %3474 = vmatpush.bf16.msrb.mxu0 %v8159_v15  ;;  %v7772_v25 = vld [vmem:[#allocation11 + $0x38] sm:$0xf0]  ;;  %v3157_v12 = vpop.f32.mrf.mxu2  ;;  %v8063_v15 = vor.u32 %v11218_v41, %v8060_v43 }
 0x228   :  { %v11422_v20 = vld [vmem:[#allocation11 + $0x8b4] sm:$0xf0]  ;;  %v9020_v11 = vld [vmem:[#allocation11 + $0x9f8] sm:$0xf0]  ;;  %v7775_v28 = vor.u32 %v11146_v6, %v7772_v25 }
 0x229   :  { %v8859_v34 = vor.u32 %v11422_v20, %v8858_v19  ;;  %v9082_v36 = vld [vmem:[#allocation11 + $0xa58] sm:$0xf]  ;;  %3462 = vmatpush.bf16.msra.mxu2 %v7871_v29  ;;  %3437 = vmatpush.bf16.msrb.mxu3 %v9115_v30  ;;  %v11322_v17 = vld [vmem:[#allocation11 + $0x59c] sm:$0xf]  ;;  %v9023_v31 = vor.u32 %v11458_v10, %v9020_v11 }
 0x22a   :  { %v11478_v37 = vld [vmem:[#allocation11 + $0xa74] sm:$0xf0]  ;;  %v11386_v19 = vld [vmem:[#allocation11 + $0x79c] sm:$0xf]  ;;  %v8479_v35 = vor.u32 %v11322_v17, %v8476_v24 }
 0x22b   :  { %v8826_v9 = vld [vmem:[#allocation11 + $0x858] sm:$0xf]  ;;  %v9083_v49 = vor.u32 %v11478_v37, %v9082_v36  ;;  %3424 = vmatpush.bf16.msrb.mxu1 %v8859_v34  ;;  %3475 = vmatpush.bf16.msrb.mxu0 %v8127_v39  ;;  %v8732_v20 = vld [vmem:[#allocation11 + $0x7b8] sm:$0xf0]  ;;  %v3183_v44 = vpop.f32.mrf.mxu1 }
 0x22c   :  { %v11414_v40 = vld [vmem:[#allocation11 + $0x874] sm:$0xf0]  ;;  %v8028_v27 = vld [vmem:[#allocation11 + $0x238] sm:$0xf0]  ;;  %v8735_v33 = vor.u32 %v11386_v19, %v8732_v20 }
 0x22d   :  { %v8794_v52 = vld [vmem:[#allocation11 + $0x818] sm:$0xf]  ;;  %v8827_v53 = vor.u32 %v11414_v40, %v8826_v9  ;;  %3463 = vmatpush.bf16.msra.mxu2 %v7839_v46  ;;  %3438 = vmatpush.bf16.msrb.mxu3 %v9083_v49  ;;  %v11522_v29 = vld [vmem:[#allocation11 + $0xbdc] sm:$0xf]  ;;  %v8031_v36 = vor.u32 %v11210_v26, %v8028_v27  ;;  %v12914_v26 = vpop.f32.mrf.mxu0  ;;  %v12916_v27 = vpop.f32.mrf.mxu3 }
 0x22e   :  { %v11406_v54 = vld [vmem:[#allocation11 + $0x834] sm:$0xf0]  ;;  %v9276_v30 = vld [vmem:[#allocation11 + $0xbf8] sm:$0xf0] }
 0x22f   :  { %v9050_v55 = vld [vmem:[#allocation11 + $0xa18] sm:$0xf]  ;;  %3425 = vmatpush.bf16.msrb.mxu1 %v8827_v53  ;;  %v8795_v7 = vor.u32 %v11406_v54, %v8794_v52  ;;  %3476 = vmatpush.bf16.msrb.mxu0 %v8095_v58  ;;  %v11450_v34 = vld [vmem:[#allocation11 + $0x99c] sm:$0xf]  ;;  %v9279_v9 = vor.u32 %v11522_v29, %v9276_v30 }
 0x230   :  { %v11470_v57 = vld [vmem:[#allocation11 + $0xa34] sm:$0xf0]  ;;  %v8988_v37 = vld [vmem:[#allocation11 + $0x9b8] sm:$0xf0] }
 0x231   :  { %v9051_v5 = vor.u32 %v11470_v57, %v9050_v55  ;;  %3464 = vmatpush.bf16.msra.mxu2 %v7807_v4  ;;  %v11378_v38 = vld [vmem:[#allocation11 + $0x75c] sm:$0xf]  ;;  %v8991_v49 = vor.u32 %v11450_v34, %v8988_v37  ;;  %v12918_v34 = vpop.f32.mrf.mxu2 }
 0x232   :  { %v8700_v39 = vld [vmem:[#allocation11 + $0x778] sm:$0xf0] }
 0x233   :  { %3439 = vmatpush.bf16.msrb.mxu3 %v9051_v5  ;;  %3426 = vmatpush.bf16.msrb.mxu1 %v8795_v7  ;;  %v11314_v40 = vld [vmem:[#allocation11 + $0x55c] sm:$0xf]  ;;  %v8703_v50 = vor.u32 %v11378_v38, %v8700_v39  ;;  %v12912_v11 = vpop.f32.mrf.mxu1 }
 0x234   :  { %3477 = vmatpush.bf16.msrb.mxu0 %v8063_v15  ;;  %v8444_v42 = vld [vmem:[#allocation11 + $0x578] sm:$0xf0] }
 0x235   :  { %3465 = vmatpush.bf16.msra.mxu2 %v7775_v28  ;;  %v11514_v45 = vld [vmem:[#allocation11 + $0xb9c] sm:$0xf]  ;;  %v8447_v52 = vor.u32 %v11314_v40, %v8444_v42 }
 0x236   :  { %3440 = vmatmul.bf16.vlgmr.msrb.gmra.mxu3 %v12827_v63  ;;  %3427 = vmatmul.bf16.vlgmr.msrb.gmra.mxu1 %v12825_v59  ;;  %v9244_v46 = vld [vmem:[#allocation11 + $0xbb8] sm:$0xf0] }
 0x237   :  { %3497 = vmatpush.bf16.msra.mxu3 %v8767_v47  ;;  %3484 = vmatpush.bf16.msra.mxu1 %v8511_v13  ;;  %v11442_v51 = vld [vmem:[#allocation11 + $0x95c] sm:$0xf]  ;;  %v9247_v57 = vor.u32 %v11514_v45, %v9244_v46 }
 0x238   :  { %3478 = vmatpush.bf16.msrb.mxu0 %v8031_v36  ;;  %v8956_v53 = vld [vmem:[#allocation11 + $0x978] sm:$0xf0]  ;;  %3466 = vmatmul.bf16.vlgmr.msra.gmra.mxu2 %v12805_v16 }
 0x239   :  { %3510 = vmatpush.bf16.msrb.mxu2 %v9023_v31  ;;  %v11370_v54 = vld [vmem:[#allocation11 + $0x71c] sm:$0xf]  ;;  %v8959_v48 = vor.u32 %v11442_v51, %v8956_v53 }
 0x23a   :  { %v8668_v55 = vld [vmem:[#allocation11 + $0x738] sm:$0xf0] }
 0x23b   :  { %3498 = vmatpush.bf16.msra.mxu3 %v8735_v33  ;;  %3485 = vmatpush.bf16.msra.mxu1 %v8479_v35  ;;  %v11306_v58 = vld [vmem:[#allocation11 + $0x51c] sm:$0xf]  ;;  %v8671_v0 = vor.u32 %v11370_v54, %v8668_v55 }
 0x23c   :  { %3523 = vmatpush.bf16.msra.mxu0 %v9279_v9  ;;  %v8412_v60 = vld [vmem:[#allocation11 + $0x538] sm:$0xf0] }
 0x23d   :  { %v11506_v61 = vld [vmem:[#allocation11 + $0xb5c] sm:$0xf]  ;;  %3511 = vmatpush.bf16.msrb.mxu2 %v8991_v49  ;;  %v8415_v2 = vor.u32 %v11306_v58, %v8412_v60  ;;  %3479 = vmatmul.bf16.vlgmr.msrb.gmra.mxu0 %v12813_v32 }
 0x23e   :  { %v9212_v62 = vld [vmem:[#allocation11 + $0xb78] sm:$0xf0] }
 0x23f   :  { %3499 = vmatpush.bf16.msra.mxu3 %v8703_v50  ;;  %v11434_v1 = vld [vmem:[#allocation11 + $0x91c] sm:$0xf]  ;;  %3486 = vmatpush.bf16.msra.mxu1 %v8447_v52  ;;  %v9215_v5 = vor.u32 %v11506_v61, %v9212_v62  ;;  %v3209_v50 = vpop.f32.mrf.mxu1  ;;  %v3235_v61 = vpop.f32.mrf.mxu0 }
 0x240   :  { %v8924_v41 = vld [vmem:[#allocation11 + $0x938] sm:$0xf0]  ;;  %3524 = vmatpush.bf16.msra.mxu0 %v9247_v57  ;;  %v11536_v50 = vld [vmem:[%s13567_s22 + $0x8] sm:$0xff]  ;;  %v3549_v61 = vmax.f32 %v12859_v23, 0.0 }
 0x241   :  { %v11362_v43 = vld [vmem:[#allocation11 + $0x6dc] sm:$0xf]  ;;  %3512 = vmatpush.bf16.msrb.mxu2 %v8959_v48  ;;  %v8927_v25 = vor.u32 %v11434_v1, %v8924_v41  ;;  %v3196_v1 = vpop.f32.mrf.mxu3 }
 0x242   :  { %v8636_v4 = vld [vmem:[#allocation11 + $0x6f8] sm:$0xf0]  ;;  %v3550_v1 = vmax.f32 %v12873_v56, 0.0  ;;  %v11573_v56 = vld [vmem:[%s13567_s22 + $0x130] sm:$0xff] }
 0x243   :  { %v11298_v6 = vld [vmem:[#allocation11 + $0x4dc] sm:$0xf]  ;;  %3500 = vmatpush.bf16.msra.mxu3 %v8671_v0  ;;  %v8639_v10 = vor.u32 %v11362_v43, %v8636_v4  ;;  %3487 = vmatpush.bf16.msra.mxu1 %v8415_v2  ;;  %v3222_v43 = vpop.f32.mrf.mxu2 }
 0x244   :  { %v8380_v7 = vld [vmem:[#allocation11 + $0x4f8] sm:$0xf0]  ;;  %3525 = vmatpush.bf16.msra.mxu0 %v9215_v5  ;;  %v11542_v5 = vld [vmem:[%s13567_s22 + $0x38] sm:$0xff] }
 0x245   :  { %v11498_v47 = vld [vmem:[#allocation11 + $0xb1c] sm:$0xf]  ;;  %v8383_v13 = vor.u32 %v11298_v6, %v8380_v7  ;;  %3513 = vmatpush.bf16.msrb.mxu2 %v8927_v25 }
 0x246   :  { %v9180_v16 = vld [vmem:[#allocation11 + $0xb38] sm:$0xf0] }
 0x247   :  { %v11426_v12 = vld [vmem:[#allocation11 + $0x8dc] sm:$0xf]  ;;  %v9183_v32 = vor.u32 %v11498_v47, %v9180_v16  ;;  %3501 = vmatpush.bf16.msra.mxu3 %v8639_v10  ;;  %3488 = vmatpush.bf16.msra.mxu1 %v8383_v13  ;;  %v11550_v13 = vld [vmem:[%s13567_s22 + $0x78] sm:$0xff] }
 0x248   :  { %v8892_v15 = vld [vmem:[#allocation11 + $0x8f8] sm:$0xf0] }
 0x249   :  { %v11354_v17 = vld [vmem:[#allocation11 + $0x69c] sm:$0xf]  ;;  %v8895_v30 = vor.u32 %v11426_v12, %v8892_v15  ;;  %3526 = vmatpush.bf16.msra.mxu0 %v9183_v32  ;;  %v11558_v15 = vld [vmem:[%s13567_s22 + $0xb8] sm:$0xff] }
 0x24a   :  { %v8604_v19 = vld [vmem:[#allocation11 + $0x6b8] sm:$0xf0]  ;;  %v11566_v32 = vld [vmem:[%s13567_s22 + $0xf8] sm:$0xff] }
 0x24b   :  { %v11290_v20 = vld [vmem:[#allocation11 + $0x49c] sm:$0xf]  ;;  %v8607_v31 = vor.u32 %v11354_v17, %v8604_v19  ;;  %3514 = vmatpush.bf16.msrb.mxu2 %v8895_v30  ;;  %v11541_v17 = vld [vmem:[%s13567_s22 + $0x30] sm:$0xff]  ;;  %v11556_v30 = vld [vmem:[%s13567_s22 + $0xa8] sm:$0xff] }
 0x24c   :  { %v8348_v24 = vld [vmem:[#allocation11 + $0x4b8] sm:$0xf0] }
 0x24d   :  { %v11490_v28 = vld [vmem:[#allocation11 + $0xadc] sm:$0xf]  ;;  %v8351_v35 = vor.u32 %v11290_v20, %v8348_v24  ;;  %3502 = vmatpush.bf16.msra.mxu3 %v8607_v31  ;;  %v11549_v20 = vld [vmem:[%s13567_s22 + $0x70] sm:$0xff]  ;;  %v11564_v31 = vld [vmem:[%s13567_s22 + $0xe8] sm:$0xff] }
 0x24e   :  { %v9148_v29 = vld [vmem:[#allocation11 + $0xaf8] sm:$0xf0]  ;;  %v11557_v24 = vld [vmem:[%s13567_s22 + $0xb0] sm:$0xff] }
 0x24f   :  { %v11418_v33 = vld [vmem:[#allocation11 + $0x89c] sm:$0xf]  ;;  %v9151_v39 = vor.u32 %v11490_v28, %v9148_v29  ;;  %3489 = vmatpush.bf16.msra.mxu1 %v8351_v35  ;;  %v12943_v28 = vpop.f32.mrf.mxu2  ;;  %v11548_v29 = vld [vmem:[%s13567_s22 + $0x68] sm:$0xff] }
 0x250   :  { %v8860_v36 = vld [vmem:[#allocation11 + $0x8b8] sm:$0xf0] }
 0x251   :  { %v11346_v37 = vld [vmem:[#allocation11 + $0x65c] sm:$0xf]  ;;  %v8863_v45 = vor.u32 %v11418_v33, %v8860_v36  ;;  %3527 = vmatpush.bf16.msra.mxu0 %v9151_v39  ;;  %v12971_v36 = vpop.f32.mrf.mxu1 }
 0x252   :  { %v8572_v38 = vld [vmem:[#allocation11 + $0x678] sm:$0xf0] }
 0x253   :  { %v11282_v9 = vld [vmem:[#allocation11 + $0x45c] sm:$0xf]  ;;  %v8575_v46 = vor.u32 %v11346_v37, %v8572_v38  ;;  %3515 = vmatpush.bf16.msrb.mxu2 %v8863_v45  ;;  %v11538_v37 = vld [vmem:[%s13567_s22 + $0x18] sm:$0xff]  ;;  %v12976_v38 = vpop.f32.mrf.mxu3 }
 0x254   :  { %v8316_v40 = vld [vmem:[#allocation11 + $0x478] sm:$0xf0]  ;;  %v11562_v45 = vld [vmem:[%s13567_s22 + $0xd8] sm:$0xff] }
 0x255   :  { %v11482_v42 = vld [vmem:[#allocation11 + $0xa9c] sm:$0xf]  ;;  %v8319_v51 = vor.u32 %v11282_v9, %v8316_v40  ;;  %3503 = vmatpush.bf16.msra.mxu3 %v8575_v46  ;;  %v12981_v9 = vpop.f32.mrf.mxu0  ;;  %v11546_v40 = vld [vmem:[%s13567_s22 + $0x58] sm:$0xff]  ;;  %v11545_v46 = vld [vmem:[%s13567_s22 + $0x50] sm:$0xff] }
 0x256   :  { %v9116_v44 = vld [vmem:[#allocation11 + $0xab8] sm:$0xf0] }
 0x257   :  { %v11410_v49 = vld [vmem:[#allocation11 + $0x85c] sm:$0xf]  ;;  %v9119_v55 = vor.u32 %v11482_v42, %v9116_v44  ;;  %3490 = vmatpush.bf16.msra.mxu1 %v8319_v51  ;;  %v3274_v35 = vpop.f32.mrf.mxu2  ;;  %v11554_v42 = vld [vmem:[%s13567_s22 + $0x98] sm:$0xff]  ;;  %v11537_v44 = vld [vmem:[%s13567_s22 + $0x10] sm:$0xff] }
 0x258   :  { %v8828_v52 = vld [vmem:[#allocation11 + $0x878] sm:$0xf0] }
 0x259   :  { %v11338_v53 = vld [vmem:[#allocation11 + $0x61c] sm:$0xf]  ;;  %v8831_v2 = vor.u32 %v11410_v49, %v8828_v52  ;;  %3528 = vmatpush.bf16.msra.mxu0 %v9119_v55  ;;  %v11553_v49 = vld [vmem:[%s13567_s22 + $0x90] sm:$0xff]  ;;  %v3261_v51 = vpop.f32.mrf.mxu1  ;;  %v11544_v55 = vld [vmem:[%s13567_s22 + $0x48] sm:$0xff] }
 0x25a   :  { %v8540_v54 = vld [vmem:[#allocation11 + $0x638] sm:$0xf0] }
 0x25b   :  { %v11274_v57 = vld [vmem:[#allocation11 + $0x41c] sm:$0xf]  ;;  %v8543_v41 = vor.u32 %v11338_v53, %v8540_v54  ;;  %3516 = vmatpush.bf16.msrb.mxu2 %v8831_v2  ;;  %v3248_v53 = vpop.f32.mrf.mxu3 }
 0x25c   :  { %v8284_v58 = vld [vmem:[#allocation11 + $0x438] sm:$0xf0] }
 0x25d   :  { %v11474_v60 = vld [vmem:[#allocation11 + $0xa5c] sm:$0xf]  ;;  %v8287_v4 = vor.u32 %v11274_v57, %v8284_v58  ;;  %3504 = vmatpush.bf16.msra.mxu3 %v8543_v41  ;;  %v3287_v54 = vpop.f32.mrf.mxu0  ;;  %v11552_v57 = vld [vmem:[%s13567_s22 + $0x88] sm:$0xff]  ;;  %v2805_v58 = vperm.slane %v12889_v14, 4  ;;  %v11582_v41 = vld [vmem:[%s13567_s22 + $0x178] sm:$0xff] }
 0x25e   :  { %v9084_v62 = vld [vmem:[#allocation11 + $0xa78] sm:$0xf0] }
 0x25f   :  { %v11530_v48 = vld [vmem:[#allocation11 + $0xc1c] sm:$0xf]  ;;  %v9087_v47 = vor.u32 %v11474_v60, %v9084_v62  ;;  %3491 = vmatpush.bf16.msra.mxu1 %v8287_v4  ;;  %v3298_v52 = vpop.f32.mrf.mxu2  ;;  %v11574_v62 = vld [vmem:[%s13567_s22 + $0x138] sm:$0xff]  ;;  %v3195_v2 = vadd.f32 %v12916_v27, %v2805_v58  ;;  %v13037_v4 = vpack.c.bf16 %v3549_v61, %v3549_v61 }
 0x260   :  { %v9308_v0 = vld [vmem:[#allocation11 + $0xc38] sm:$0xf0]  ;;  %3505 = vmatmul.bf16.vlgmr.msra.gmra.mxu3 %v12810_v21  ;;  %v11540_v21 = vld [vmem:[%s13567_s22 + $0x28] sm:$0xff] }
 0x261   :  { %v11402_v6 = vld [vmem:[#allocation11 + $0x81c] sm:$0xf]  ;;  %v9311_v16 = vor.u32 %v11530_v48, %v9308_v0  ;;  %4074 = vmatpush.bf16.msrb.mxu3 %v11542_v5  ;;  %3529 = vmatpush.bf16.msra.mxu0 %v9087_v47  ;;  %v11560_v48 = vld [vmem:[%s13567_s22 + $0xc8] sm:$0xff]  ;;  %v3551_v5 = vmax.f32 %v12895_v22, 0.0  ;;  %v3208_v47 = vadd.f32 %v12912_v11, %v3195_v2  ;;  %v11581_v22 = vld [vmem:[%s13567_s22 + $0x170] sm:$0xff] }
 0x262   :  { %v8796_v7 = vld [vmem:[#allocation11 + $0x838] sm:$0xf0]  ;;  %3492 = vmatmul.bf16.vlgmr.msra.gmra.mxu1 %v12808_v18  ;;  %v11565_v18 = vld [vmem:[%s13567_s22 + $0xf0] sm:$0xff] }
 0x263   :  { %v11466_v25 = vld [vmem:[#allocation11 + $0xa1c] sm:$0xf]  ;;  %v8799_v12 = vor.u32 %v11402_v6, %v8796_v7  ;;  %3543 = vmatpush.bf16.msrb.mxu1 %v9311_v16  ;;  %v3552_v6 = vmax.f32 %v12906_v3, 0.0  ;;  %v13048_v7 = vpack.c.bf16 %v3550_v1, %v3550_v1  ;;  %v13054_v16 = vpack.c.bf16 %v3551_v5, %v3551_v5  ;;  %v11572_v3 = vld [vmem:[%s13567_s22 + $0x128] sm:$0xff]  ;;  %v3681_v5 = vld [vmem:[%s13567_s22 + $0x1f0] sm:$0xf] }
 0x264   :  { %v9052_v10 = vld [vmem:[#allocation11 + $0xa38] sm:$0xf0]  ;;  %v3221_v11 = vadd.f32 %v12918_v34, %v3208_v47 }
 0x265   :  { %v9055_v19 = vor.u32 %v11466_v25, %v9052_v10  ;;  %3517 = vmatpush.bf16.msrb.mxu2 %v8799_v12  ;;  %4075 = vmatpush.bf16.msrb.mxu3 %v11541_v17  ;;  %v11547_v33 = vld [vmem:[%s13567_s22 + $0x60] sm:$0xff]  ;;  %v2806_v25 = vperm.slane %v12889_v14, 5  ;;  %v13060_v10 = vpack.c.bf16 %v3552_v6, %v3552_v6  ;;  %v11580_v12 = vld [vmem:[%s13567_s22 + $0x168] sm:$0xff]  ;;  %v3940_v6 = vunpack.c.l.b16 %v3681_v5 }
 0x266   :  { %v11563_v39 = vld [vmem:[%s13567_s22 + $0xe0] sm:$0xff] }
 0x267   :  { %4087 = vmatpush.bf16.msra.mxu1 %v11550_v13  ;;  %3530 = vmatpush.bf16.msra.mxu0 %v9055_v19  ;;  %v11535_v60 = vld [vmem:[%s13567_s22] sm:$0xff]  ;;  %v3300_v43 = vpop.f32.mrf.mxu2  ;;  %v3286_v14 = vadd.f32 %v12981_v9, %v2806_v25  ;;  %v11570_v19 = vld [vmem:[%s13567_s22 + $0x118] sm:$0xff]  ;;  %v4003_v47 = vpack.c.b16 %v3940_v6, %v3940_v6 }
 0x268   :  { %3518 = vmatmul.bf16.vlgmr.msrb.gmra.mxu2 %v12825_v59  ;;  %v11539_v59 = vld [vmem:[%s13567_s22 + $0x20] sm:$0xff] }
 0x269   :  { %4100 = vmatpush.bf16.msra.mxu2 %v11558_v15  ;;  %4076 = vmatpush.bf16.msrb.mxu3 %v11540_v21  ;;  %v11543_v0 = vld [vmem:[%s13567_s22 + $0x40] sm:$0xff]  ;;  %v3234_v15 = vadd.f32 %v12914_v26, %v3221_v11  ;;  %v3299_v17 = vadd.f32 %v3298_v52, %v3286_v14  ;;  %v11578_v26 = vld [vmem:[%s13567_s22 + $0x158] sm:$0xff]  ;;  %v4072_v11 = vsel %vm4070_vm1, %v4003_v47, 0  ;;  %v11596_v14 = vld [vmem:[%s13567_s22 + $0x1e8] sm:$0xff] }
 0x26a   :  { %3531 = vmatmul.bf16.vlgmr.msra.gmra.mxu0 %v12827_v63  ;;  %v11555_v63 = vld [vmem:[%s13567_s22 + $0xa0] sm:$0xff] }
 0x26b   :  { %4113 = vmatpush.bf16.msrb.mxu0 %v11566_v32  ;;  %4088 = vmatpush.bf16.msra.mxu1 %v11549_v20  ;;  %v11551_v23 = vld [vmem:[%s13567_s22 + $0x80] sm:$0xff]  ;;  %v3247_v32 = vadd.f32 %v12976_v38, %v3234_v15 }
 0x26c   :  { %v11559_v27 = vld [vmem:[%s13567_s22 + $0xc0] sm:$0xff] }
 0x26d   :  { %4101 = vmatpush.bf16.msra.mxu2 %v11557_v24  ;;  %4077 = vmatpush.bf16.msrb.mxu3 %v11539_v59  ;;  %v11571_v13 = vld [vmem:[%s13567_s22 + $0x120] sm:$0xff]  ;;  %v11590_v59 = vld [vmem:[%s13567_s22 + $0x1b8] sm:$0xff] }
 0x26e   :  { %v11579_v34 = vld [vmem:[%s13567_s22 + $0x160] sm:$0xff]  ;;  %v3311_v20 = vpop.f32.mrf.mxu3 }
 0x26f   :  { %4114 = vmatpush.bf16.msrb.mxu0 %v11565_v18  ;;  %4089 = vmatpush.bf16.msra.mxu1 %v11548_v29  ;;  %v3312_v18 = vadd.f32 %v3311_v20, %v3299_v17  ;;  %v11569_v29 = vld [vmem:[%s13567_s22 + $0x110] sm:$0xff]  ;;  %v11587_v51 = vld [vmem:[%s13567_s22 + $0x1a0] sm:$0xff]  ;;  %v11594_v20 = vld [vmem:[%s13567_s22 + $0x1d8] sm:$0xff] }
 0x270   :  { %v3324_v21 = vpop.f32.mrf.mxu1  ;;  %v11583_v1 = vld [vmem:[%s13567_s22 + $0x180] sm:$0xff] }
 0x271   :  { %4102 = vmatpush.bf16.msra.mxu2 %v11556_v30  ;;  %4078 = vmatpush.bf16.msrb.mxu3 %v11538_v37  ;;  %v3260_v30 = vadd.f32 %v12971_v36, %v3247_v32  ;;  %v11589_v36 = vld [vmem:[%s13567_s22 + $0x1b0] sm:$0xff] }
 0x272   :  { %9319 = vmatmul.msk.bf16.vlgmr.msrb.gmra.mxu1 %vm2817_vm0, %v12819_v8  ;;  %v11561_v8 = vld [vmem:[%s13567_s22 + $0xd0] sm:$0xff]  ;;  %v3337_v24 = vpop.f32.mrf.mxu0 }
 0x273   :  { %4115 = vmatpush.bf16.msrb.mxu0 %v11564_v31  ;;  %4090 = vmatpush.bf16.msra.mxu1 %v11547_v33  ;;  %v11577_v31 = vld [vmem:[%s13567_s22 + $0x150] sm:$0xff]  ;;  %v3325_v33 = vadd.f32 %v3324_v21, %v3312_v18  ;;  %v3273_v37 = vadd.f32 %v12943_v28, %v3260_v30 }
 0x274   :  { %v11593_v18 = vld [vmem:[%s13567_s22 + $0x1d0] sm:$0xff] }
 0x275   :  { %4103 = vmatpush.bf16.msra.mxu2 %v11555_v63  ;;  %4079 = vmatpush.bf16.msrb.mxu3 %v11537_v44  ;;  %v11568_v63 = vld [vmem:[%s13567_s22 + $0x108] sm:$0xff]  ;;  %v11567_v44 = vld [vmem:[%s13567_s22 + $0x100] sm:$0xff]  ;;  %v3553_v28 = vmax.f32 %v3273_v37, 0.0 }
 0x276   :  { %v3313_v38 = vpop.f32.mrf.mxu3  ;;  %v11591_v37 = vld [vmem:[%s13567_s22 + $0x1c0] sm:$0xff] }
 0x277   :  { %4116 = vmatpush.bf16.msrb.mxu0 %v11563_v39  ;;  %4091 = vmatpush.bf16.msra.mxu1 %v11546_v40  ;;  %v11576_v40 = vld [vmem:[%s13567_s22 + $0x148] sm:$0xff]  ;;  %v13116_v52 = vpack.c.bf16 %v3553_v28, %v3553_v28 }
 0x278   :  { %v3326_v9 = vpop.f32.mrf.mxu1 }
 0x279   :  { %4104 = vmatpush.bf16.msra.mxu2 %v11554_v42  ;;  %4080 = vmatpush.bf16.msrb.mxu3 %v11536_v50  ;;  %v3338_v42 = vadd.f32 %v3337_v24, %v3325_v33 }
 0x27a   :  { %v3350_v35 = vpop.f32.mrf.mxu2  ;;  %v3339_v39 = vpop.f32.mrf.mxu0 }
 0x27b   :  { %4117 = vmatpush.bf16.msrb.mxu0 %v11562_v45  ;;  %4092 = vmatpush.bf16.msra.mxu1 %v11545_v46  ;;  %v11588_v45 = vld [vmem:[%s13567_s22 + $0x1a8] sm:$0xff]  ;;  %v11575_v46 = vld [vmem:[%s13567_s22 + $0x140] sm:$0xff] }
 0x27d   :  { %4105 = vmatpush.bf16.msra.mxu2 %v11553_v49  ;;  %4081 = vmatpush.bf16.msrb.mxu3 %v11535_v60  ;;  %v3351_v49 = vadd.f32 %v3350_v35, %v3338_v42  ;;  %v11585_v60 = vld [vmem:[%s13567_s22 + $0x190] sm:$0xff] }
 0x27f   :  { %4118 = vmatpush.bf16.msrb.mxu0 %v11561_v8  ;;  %4093 = vmatpush.bf16.msra.mxu1 %v11544_v55  ;;  %v3363_v8 = vpop.f32.mrf.mxu3 }
 0x280   :  { %4082 = vmatmul.bf16.vlgmr.msrb.gmra.mxu3 %v13037_v4  ;;  %v3364_v53 = vadd.f32 %v3363_v8, %v3351_v49 }
 0x281   :  { %4106 = vmatpush.bf16.msra.mxu2 %v11552_v57  ;;  %4126 = vmatpush.bf16.msra.mxu3 %v11574_v62  ;;  %v11586_v57 = vld [vmem:[%s13567_s22 + $0x198] sm:$0xff] }
 0x282   :  { %v3352_v50 = vpop.f32.mrf.mxu2  ;;  %v3554_v54 = vmax.f32 %v3364_v53, 0.0 }
 0x283   :  { %4119 = vmatpush.bf16.msrb.mxu0 %v11560_v48  ;;  %4094 = vmatpush.bf16.msra.mxu1 %v11543_v0  ;;  %v11584_v48 = vld [vmem:[%s13567_s22 + $0x188] sm:$0xff] }
 0x284   :  { %v13119_v55 = vpack.c.bf16 %v3554_v54, %v3554_v54 }
 0x285   :  { %4107 = vmatpush.bf16.msra.mxu2 %v11551_v23  ;;  %4127 = vmatpush.bf16.msra.mxu3 %v11573_v56  ;;  %v12010_v56 = vld [vmem:[#allocation13] sm:$0xff] }
 0x286   :  { %4095 = vmatmul.bf16.vlgmr.msra.gmra.mxu1 %v13048_v7  ;;  %v2808_v39 = vperm.slane %v12010_v56, 7 }
 0x287   :  { %4139 = vmatpush.bf16.msrb.mxu1 %v11582_v41  ;;  %4120 = vmatpush.bf16.msrb.mxu0 %v11559_v27  ;;  %v3365_v58 = vpop.f32.mrf.mxu3  ;;  %v2807_v27 = vperm.slane %v12010_v56, 6 }
 0x288   :  { %4108 = vmatmul.bf16.vlgmr.msra.gmra.mxu2 %v13054_v16 }
 0x289   :  { %4128 = vmatpush.bf16.msra.mxu3 %v11572_v3  ;;  %4152 = vmatpush.bf16.msrb.mxu2 %v11590_v59 }
 0x28a   :  { %4121 = vmatmul.bf16.vlgmr.msrb.gmra.mxu0 %v13060_v10 }
 0x28b   :  { %4140 = vmatpush.bf16.msrb.mxu1 %v11581_v22  ;;  %4166 = vmatpush.bf16.msra.mxu0 %v4072_v11 }
 0x28d   :  { %4129 = vmatpush.bf16.msra.mxu3 %v11571_v13  ;;  %4153 = vmatpush.bf16.msrb.mxu2 %v11589_v36 }
 0x28f   :  { %4141 = vmatpush.bf16.msrb.mxu1 %v11580_v12  ;;  %4167 = vmatpush.bf16.msra.mxu0 %v11596_v14 }
 0x290   :  { %v3376_v62 = vpop.f32.mrf.mxu1 }
 0x291   :  { %4130 = vmatpush.bf16.msra.mxu3 %v11570_v19  ;;  %4154 = vmatpush.bf16.msrb.mxu2 %v11588_v45  ;;  %v3377_v3 = vadd.f32 %v3376_v62, %v2807_v27 }
 0x293   :  { %4142 = vmatpush.bf16.msrb.mxu1 %v11579_v34  ;;  %v3402_v61 = vpop.f32.mrf.mxu0  ;;  %v11595_v34 = vld [vmem:[%s13567_s22 + $0x1e0] sm:$0xff] }
 0x294   :  { %4168 = vmatpush.bf16.msra.mxu0 %v11595_v34 }
 0x295   :  { %4131 = vmatpush.bf16.msra.mxu3 %v11569_v29  ;;  %4155 = vmatpush.bf16.msrb.mxu2 %v11587_v51  ;;  %v3389_v0 = vpop.f32.mrf.mxu3 }
 0x296   :  { %v3390_v12 = vadd.f32 %v3389_v0, %v3377_v3 }
 0x297   :  { %4143 = vmatpush.bf16.msrb.mxu1 %v11578_v26 }
 0x298   :  { %v3378_v41 = vpop.f32.mrf.mxu1  ;;  %v3403_v15 = vadd.f32 %v3402_v61, %v3390_v12  ;;  %4169 = vmatpush.bf16.msra.mxu0 %v11594_v20 }
 0x299   :  { %4132 = vmatpush.bf16.msra.mxu3 %v11568_v63  ;;  %4156 = vmatpush.bf16.msrb.mxu2 %v11586_v57  ;;  %v11592_v63 = vld [vmem:[%s13567_s22 + $0x1c8] sm:$0xff] }
 0x29b   :  { %4144 = vmatpush.bf16.msrb.mxu1 %v11577_v31  ;;  %v3404_v2 = vpop.f32.mrf.mxu0  ;;  %v3415_v23 = vpop.f32.mrf.mxu2 }
 0x29c   :  { %v3416_v19 = vadd.f32 %v3415_v23, %v3403_v15  ;;  %4170 = vmatpush.bf16.msra.mxu0 %v11593_v18 }
 0x29d   :  { %4133 = vmatpush.bf16.msra.mxu3 %v11567_v44  ;;  %4157 = vmatpush.bf16.msrb.mxu2 %v11585_v60  ;;  %v3391_v43 = vpop.f32.mrf.mxu3 }
 0x29f   :  { %4145 = vmatpush.bf16.msrb.mxu1 %v11576_v40 }
 0x2a0   :  { %4134 = vmatmul.bf16.vlgmr.msra.gmra.mxu3 %v13116_v52  ;;  %4171 = vmatpush.bf16.msra.mxu0 %v11592_v63 }
 0x2a1   :  { %4158 = vmatpush.bf16.msrb.mxu2 %v11584_v48 }
 0x2a3   :  { %4146 = vmatpush.bf16.msrb.mxu1 %v11575_v46  ;;  %v3454_v22 = vpop.f32.mrf.mxu0  ;;  %v3417_v25 = vpop.f32.mrf.mxu2 }
 0x2a4   :  { %4172 = vmatpush.bf16.msra.mxu0 %v11591_v37 }
 0x2a5   :  { %4159 = vmatpush.bf16.msrb.mxu2 %v11583_v1  ;;  %v3690_v1 = vld [vmem:[#allocation20] sm:$0x1] }
 0x2a6   :  { %4147 = vmatmul.bf16.vlgmr.msrb.gmra.mxu1 %v13119_v55 }
 0x2ab   :  { %v3456_v13 = vpop.f32.mrf.mxu0 }
 0x2b3   :  { %v3428_v17 = vpop.f32.mrf.mxu1 }
 0x2b4   :  { %v3429_v32 = vadd.f32 %v3428_v17, %v3416_v19 }
 0x2b9   :  { %v3441_v24 = vpop.f32.mrf.mxu3 }
 0x2ba   :  { %v3442_v21 = vadd.f32 %v3441_v24, %v3429_v32  ;;  %v3480_v26 = vpop.f32.mrf.mxu0 }
 0x2bb   :  { %v3430_v30 = vpop.f32.mrf.mxu1  ;;  %v3467_v59 = vpop.f32.mrf.mxu2 }
 0x2bc   :  { %v3455_v29 = vadd.f32 %v3454_v22, %v3442_v21  ;;  %v3468_v9 = vadd.f32 %v3467_v59, %v2808_v39 }
 0x2be   :  { %v3555_v31 = vmax.f32 %v3455_v29, 0.0  ;;  %v3481_v42 = vadd.f32 %v3480_v26, %v3468_v9 }
 0x2c0   :  { %v13150_v33 = vpack.c.bf16 %v3555_v31, %v3555_v31 }
 0x2c1   :  { %v3443_v35 = vpop.f32.mrf.mxu3 }
 0x2c2   :  { %4160 = vmatmul.bf16.vlgmr.msrb.gmra.mxu2 %v13150_v33  ;;  %v3482_v36 = vpop.f32.mrf.mxu0 }
 0x2c3   :  { %v3469_v38 = vpop.f32.mrf.mxu2 }
 0x2df   :  { %v3493_v40 = vpop.f32.mrf.mxu1 }
 0x2e0   :  { %v3494_v44 = vadd.f32 %v3493_v40, %v3481_v42 }
 0x2e3   :  { %v3506_v45 = vpop.f32.mrf.mxu3 }
 0x2e4   :  { %v3507_v46 = vadd.f32 %v3506_v45, %v3494_v44 }
 0x2e7   :  { %v3532_v28 = vpop.f32.mrf.mxu0  ;;  %v3495_v49 = vpop.f32.mrf.mxu1 }
 0x2eb   :  { %v3519_v50 = vpop.f32.mrf.mxu2  ;;  %v3508_v8 = vpop.f32.mrf.mxu3 }
 0x2ec   :  { %v3520_v51 = vadd.f32 %v3519_v50, %v3507_v46 }
 0x2ee   :  { %v3533_v54 = vadd.f32 %v3532_v28, %v3520_v51 }
 0x2ef   :  { %v3534_v53 = vpop.f32.mrf.mxu0  ;;  %v3545_v57 = vpop.f32.mrf.mxu1 }
 0x2f0   :  { %v3546_v58 = vadd.f32 %v3545_v57, %v3533_v54 }
 0x2f2   :  { %v3556_v61 = vmax.f32 %v3546_v58, 0.0 }
 0x2f3   :  { %v3521_v60 = vpop.f32.mrf.mxu2 }
 0x2f4   :  { %v13159_v62 = vpack.c.bf16 %v3556_v61, %v3556_v61 }
 0x2f6   :  { %9568 = vmatmul.msk.bf16.vlgmr.msra.gmra.mxu0 %vm4066_vm2, %v13159_v62 }
 0x2f7   :  { %v3547_v48 = vpop.f32.mrf.mxu1 }
 0x303   :  { %v4096_v0 = vpop.f32.mrf.mxu1  ;;  %v4083_v23 = vpop.f32.mrf.mxu3 }
 0x304   :  { %v4084_v41 = vadd.f32 %v4083_v23, %v3690_v1 }
 0x306   :  { %v4097_v43 = vadd.f32 %v4096_v0, %v4084_v41 }
 0x307   :  { %v4122_v2 = vpop.f32.mrf.mxu0 }
 0x30b   :  { %v4109_v5 = vpop.f32.mrf.mxu2  ;;  %v4098_v27 = vpop.f32.mrf.mxu1 }
 0x30c   :  { %v4110_v56 = vadd.f32 %v4109_v5, %v4097_v43  ;;  %v4085_v22 = vpop.f32.mrf.mxu3 }
 0x30e   :  { %v4123_v47 = vadd.f32 %v4122_v2, %v4110_v56 }
 0x30f   :  { %v4124_v6 = vpop.f32.mrf.mxu0 }
 0x313   :  { %v4111_v25 = vpop.f32.mrf.mxu2 }
 0x323   :  { %v4148_v3 = vpop.f32.mrf.mxu1  ;;  %v4135_v11 = vpop.f32.mrf.mxu3 }
 0x324   :  { %v4136_v12 = vadd.f32 %v4135_v11, %v4123_v47 }
 0x326   :  { %v4149_v14 = vadd.f32 %v4148_v3, %v4136_v12 }
 0x32b   :  { %v4150_v13 = vpop.f32.mrf.mxu1  ;;  %v4137_v15 = vpop.f32.mrf.mxu3 }
 0x345   :  { %v4161_v34 = vpop.f32.mrf.mxu2 }
 0x346   :  { %v4162_v19 = vadd.f32 %v4161_v34, %v4149_v14 }
 0x34d   :  { %v4163_v17 = vpop.f32.mrf.mxu2 }
 0x373   :  { %v4174_v32 = vpop.f32.mrf.mxu0 }
 0x374   :  { %v13163_v20 = vadd.f32 %v4174_v32, %v4162_v19 }
 0x37b   :  { %v4176_v24 = vpop.f32.mrf.mxu0 }
 0x37c   :  { %12495 = dma.done.wait [#allocation6], 32000 }
 0x37d   :  { %12496 = vsyncadd [#allocation6], 4294935296  ;;  %v9683_v21 = vld [vmem:[#allocation2 + $0xe0] sm:$0xf]  ;;  %v11627_v26 = vld [vmem:[#allocation2 + $0xec] sm:$0xf0] }
 0x37e   :  { %v9811_v18 = vld [vmem:[#allocation2 + $0x1e0] sm:$0xf]  ;;  %v9684_v29 = vor.u32 %v11627_v26, %v9683_v21  ;;  %v11659_v30 = vld [vmem:[#allocation2 + $0x1ec] sm:$0xf0]  ;;  %vm6385_vm3 = vcmask 1041408   ;;  %vm6381_vm4 = vcmask 949248  }
 0x37f   :  { %v9939_v59 = vld [vmem:[#allocation2 + $0x2e0] sm:$0xf]  ;;  %v11691_v31 = vld [vmem:[#allocation2 + $0x2ec] sm:$0xf0]  ;;  %v9812_v63 = vor.u32 %v11659_v30, %v9811_v18 }
 0x380   :  { %v9940_v35 = vor.u32 %v11691_v31, %v9939_v59  ;;  %v9667_v36 = vld [vmem:[#allocation2 + $0xc0] sm:$0xf]  ;;  %v11623_v37 = vld [vmem:[#allocation2 + $0xcc] sm:$0xf0]  ;;  %5704 = vmatpush.bf16.msrb.mxu3 %v9684_v29 }
 0x381   :  { %v9795_v38 = vld [vmem:[#allocation2 + $0x1c0] sm:$0xf]  ;;  %v9668_v39 = vor.u32 %v11623_v37, %v9667_v36  ;;  %v11655_v9 = vld [vmem:[#allocation2 + $0x1cc] sm:$0xf0]  ;;  %5717 = vmatpush.bf16.msra.mxu1 %v9812_v63 }
 0x382   :  { %v9923_v40 = vld [vmem:[#allocation2 + $0x2c0] sm:$0xf]  ;;  %v11687_v42 = vld [vmem:[#allocation2 + $0x2cc] sm:$0xf0]  ;;  %5730 = vmatpush.bf16.msra.mxu2 %v9940_v35  ;;  %v9796_v44 = vor.u32 %v11655_v9, %v9795_v38 }
 0x383   :  { %v9924_v45 = vor.u32 %v11687_v42, %v9923_v40  ;;  %v9651_v28 = vld [vmem:[#allocation2 + $0xa0] sm:$0xf]  ;;  %v11619_v46 = vld [vmem:[#allocation2 + $0xac] sm:$0xf0] }
 0x384   :  { %v9779_v49 = vld [vmem:[#allocation2 + $0x1a0] sm:$0xf]  ;;  %v11651_v50 = vld [vmem:[#allocation2 + $0x1ac] sm:$0xf0]  ;;  %5705 = vmatpush.bf16.msrb.mxu3 %v9668_v39  ;;  %v9652_v54 = vor.u32 %v11619_v46, %v9651_v28 }
 0x385   :  { %v9907_v51 = vld [vmem:[#allocation2 + $0x2a0] sm:$0xf]  ;;  %v11683_v8 = vld [vmem:[#allocation2 + $0x2ac] sm:$0xf0]  ;;  %5718 = vmatpush.bf16.msra.mxu1 %v9796_v44  ;;  %v9780_v61 = vor.u32 %v11651_v50, %v9779_v49 }
 0x386   :  { %v10067_v53 = vld [vmem:[#allocation2 + $0x3e0] sm:$0xf]  ;;  %v11615_v58 = vld [vmem:[#allocation2 + $0x8c] sm:$0xf0]  ;;  %5731 = vmatpush.bf16.msra.mxu2 %v9924_v45  ;;  %v9908_v48 = vor.u32 %v11683_v8, %v9907_v51 }
 0x387   :  { %v9635_v57 = vld [vmem:[#allocation2 + $0x80] sm:$0xf]  ;;  %v11723_v60 = vld [vmem:[#allocation2 + $0x3ec] sm:$0xf0] }
 0x388   :  { %v10068_v0 = vor.u32 %v11723_v60, %v10067_v53  ;;  %v9763_v1 = vld [vmem:[#allocation2 + $0x180] sm:$0xf]  ;;  %v11647_v2 = vld [vmem:[#allocation2 + $0x18c] sm:$0xf0]  ;;  %5706 = vmatpush.bf16.msrb.mxu3 %v9652_v54  ;;  %v9636_v27 = vor.u32 %v11615_v58, %v9635_v57 }
 0x389   :  { %v9891_v23 = vld [vmem:[#allocation2 + $0x280] sm:$0xf]  ;;  %v11679_v41 = vld [vmem:[#allocation2 + $0x28c] sm:$0xf0]  ;;  %5719 = vmatpush.bf16.msra.mxu1 %v9780_v61  ;;  %v9764_v22 = vor.u32 %v11647_v2, %v9763_v1 }
 0x38a   :  { %v10051_v43 = vld [vmem:[#allocation2 + $0x3c0] sm:$0xf]  ;;  %v11719_v5 = vld [vmem:[#allocation2 + $0x3cc] sm:$0xf0]  ;;  %5743 = vmatpush.bf16.msrb.mxu0 %v10068_v0  ;;  %5732 = vmatpush.bf16.msra.mxu2 %v9908_v48  ;;  %v9892_v25 = vor.u32 %v11679_v41, %v9891_v23 }
 0x38b   :  { %v10052_v56 = vor.u32 %v11719_v5, %v10051_v43  ;;  %v9619_v6 = vld [vmem:[#allocation2 + $0x60] sm:$0xf]  ;;  %v11611_v47 = vld [vmem:[#allocation2 + $0x6c] sm:$0xf0] }
 0x38c   :  { %v9747_v3 = vld [vmem:[#allocation2 + $0x160] sm:$0xf]  ;;  %v11715_v12 = vld [vmem:[#allocation2 + $0x3ac] sm:$0xf0]  ;;  %5707 = vmatpush.bf16.msrb.mxu3 %v9636_v27  ;;  %v9620_v17 = vor.u32 %v11611_v47, %v9619_v6 }
 0x38d   :  { %v10035_v11 = vld [vmem:[#allocation2 + $0x3a0] sm:$0xf]  ;;  %v11643_v14 = vld [vmem:[#allocation2 + $0x16c] sm:$0xf0]  ;;  %5720 = vmatpush.bf16.msra.mxu1 %v9764_v22 }
 0x38e   :  { %v9875_v13 = vld [vmem:[#allocation2 + $0x260] sm:$0xf]  ;;  %v11675_v15 = vld [vmem:[#allocation2 + $0x26c] sm:$0xf0]  ;;  %5744 = vmatpush.bf16.msrb.mxu0 %v10052_v56  ;;  %v10036_v34 = vor.u32 %v11715_v12, %v10035_v11  ;;  %5733 = vmatpush.bf16.msra.mxu2 %v9892_v25  ;;  %v9748_v24 = vor.u32 %v11643_v14, %v9747_v3 }
 0x38f   :  { %v10019_v19 = vld [vmem:[#allocation2 + $0x380] sm:$0xf]  ;;  %v11711_v32 = vld [vmem:[#allocation2 + $0x38c] sm:$0xf0]  ;;  %v9876_v21 = vor.u32 %v11675_v15, %v9875_v13 }
 0x390   :  { %v9603_v26 = vld [vmem:[#allocation2 + $0x40] sm:$0xf]  ;;  %v11607_v18 = vld [vmem:[#allocation2 + $0x4c] sm:$0xf0]  ;;  %v10020_v63 = vor.u32 %v11711_v32, %v10019_v19  ;;  %5708 = vmatpush.bf16.msrb.mxu3 %v9620_v17 }
 0x391   :  { %v9731_v29 = vld [vmem:[#allocation2 + $0x140] sm:$0xf]  ;;  %v11639_v30 = vld [vmem:[#allocation2 + $0x14c] sm:$0xf0]  ;;  %v9604_v35 = vor.u32 %v11607_v18, %v9603_v26  ;;  %5721 = vmatpush.bf16.msra.mxu1 %v9748_v24 }
 0x392   :  { %v9859_v59 = vld [vmem:[#allocation2 + $0x240] sm:$0xf]  ;;  %v11671_v31 = vld [vmem:[#allocation2 + $0x24c] sm:$0xf0]  ;;  %5745 = vmatpush.bf16.msrb.mxu0 %v10036_v34  ;;  %5734 = vmatpush.bf16.msra.mxu2 %v9876_v21  ;;  %v9732_v38 = vor.u32 %v11639_v30, %v9731_v29 }
 0x393   :  { %v10003_v36 = vld [vmem:[#allocation2 + $0x360] sm:$0xf]  ;;  %v11707_v37 = vld [vmem:[#allocation2 + $0x36c] sm:$0xf0]  ;;  %v9860_v39 = vor.u32 %v11671_v31, %v9859_v59 }
 0x394   :  { %v9587_v9 = vld [vmem:[#allocation2 + $0x20] sm:$0xf]  ;;  %v11603_v40 = vld [vmem:[#allocation2 + $0x2c] sm:$0xf0]  ;;  %v10004_v49 = vor.u32 %v11707_v37, %v10003_v36  ;;  %5709 = vmatpush.bf16.msrb.mxu3 %v9604_v35 }
 0x395   :  { %v9715_v42 = vld [vmem:[#allocation2 + $0x120] sm:$0xf]  ;;  %v11635_v44 = vld [vmem:[#allocation2 + $0x12c] sm:$0xf0]  ;;  %v9588_v50 = vor.u32 %v11603_v40, %v9587_v9  ;;  %5722 = vmatpush.bf16.msra.mxu1 %v9732_v38 }
 0x396   :  { %v9843_v45 = vld [vmem:[#allocation2 + $0x220] sm:$0xf]  ;;  %v11667_v28 = vld [vmem:[#allocation2 + $0x22c] sm:$0xf0]  ;;  %5746 = vmatpush.bf16.msrb.mxu0 %v10020_v63  ;;  %5735 = vmatpush.bf16.msra.mxu2 %v9860_v39  ;;  %v9716_v54 = vor.u32 %v11635_v44, %v9715_v42 }
 0x397   :  { %v9571_v46 = vld [vmem:[#allocation2] sm:$0xf]  ;;  %v11599_v51 = vld [vmem:[#allocation2 + $0xc] sm:$0xf0]  ;;  %v9844_v57 = vor.u32 %v11667_v28, %v9843_v45 }
 0x398   :  { %v9987_v8 = vld [vmem:[#allocation2 + $0x340] sm:$0xf]  ;;  %v11703_v53 = vld [vmem:[#allocation2 + $0x34c] sm:$0xf0]  ;;  %5710 = vmatpush.bf16.msrb.mxu3 %v9588_v50  ;;  %v9572_v5 = vor.u32 %v11599_v51, %v9571_v46 }
 0x399   :  { %v10195_v58 = vld [vmem:[#allocation2 + $0x4e0] sm:$0xf]  ;;  %v11755_v60 = vld [vmem:[#allocation2 + $0x4ec] sm:$0xf0]  ;;  %v9988_v43 = vor.u32 %v11703_v53, %v9987_v8  ;;  %5723 = vmatpush.bf16.msra.mxu1 %v9716_v54 }
 0x39a   :  { %v9699_v61 = vld [vmem:[#allocation2 + $0x100] sm:$0xf]  ;;  %v11631_v48 = vld [vmem:[#allocation2 + $0x10c] sm:$0xf0]  ;;  %5747 = vmatpush.bf16.msrb.mxu0 %v10004_v49  ;;  %5736 = vmatpush.bf16.msra.mxu2 %v9844_v57  ;;  %v10196_v47 = vor.u32 %v11755_v60, %v10195_v58 }
 0x39b   :  { %v9827_v0 = vld [vmem:[#allocation2 + $0x200] sm:$0xf]  ;;  %v11663_v1 = vld [vmem:[#allocation2 + $0x20c] sm:$0xf0]  ;;  %v9700_v22 = vor.u32 %v11631_v48, %v9699_v61 }
 0x39c   :  { %v10323_v2 = vld [vmem:[#allocation2 + $0x5e0] sm:$0xf]  ;;  %v11787_v23 = vld [vmem:[#allocation2 + $0x5ec] sm:$0xf0]  ;;  %v9828_v3 = vor.u32 %v11663_v1, %v9827_v0  ;;  %5711 = vmatpush.bf16.msrb.mxu3 %v9572_v5 }
 0x39d   :  { %v10451_v41 = vld [vmem:[#allocation2 + $0x6e0] sm:$0xf]  ;;  %v11819_v56 = vld [vmem:[#allocation2 + $0x6ec] sm:$0xf0]  ;;  %v10324_v11 = vor.u32 %v11787_v23, %v10323_v2  ;;  %5724 = vmatpush.bf16.msra.mxu1 %v9700_v22 }
 0x39e   :  { %v9971_v27 = vld [vmem:[#allocation2 + $0x320] sm:$0xf]  ;;  %v11699_v6 = vld [vmem:[#allocation2 + $0x32c] sm:$0xf0]  ;;  %v10452_v15 = vor.u32 %v11819_v56, %v10451_v41  ;;  %5748 = vmatpush.bf16.msrb.mxu0 %v9988_v43  ;;  %5737 = vmatpush.bf16.msra.mxu2 %v9828_v3 }
 0x39f   :  { %v13165_v25 = vld [vmem:[#allocation2 + $0x7c0] sm:$0xff]  ;;  %v11751_v14 = vld [vmem:[#allocation2 + $0x4cc] sm:$0xf0]  ;;  %v9972_v32 = vor.u32 %v11699_v6, %v9971_v27  ;;  %5712 = vmatmul.bf16.vlgmr.msrb.gmra.mxu3 %v13037_v4 }
 0x3a0   :  { %v10179_v12 = vld [vmem:[#allocation2 + $0x4c0] sm:$0xf]  ;;  %v5179_v13 = vunpack.c.l.b16 %v13165_v25  ;;  %v11783_v17 = vld [vmem:[#allocation2 + $0x5cc] sm:$0xf0]  ;;  %5756 = vmatpush.bf16.msra.mxu3 %v10196_v47  ;;  %5725 = vmatmul.bf16.vlgmr.msra.gmra.mxu1 %v13048_v7 }
 0x3a1   :  { %v10307_v34 = vld [vmem:[#allocation2 + $0x5c0] sm:$0xf]  ;;  %v11815_v24 = vld [vmem:[#allocation2 + $0x6cc] sm:$0xf0]  ;;  %v10180_v18 = vor.u32 %v11751_v14, %v10179_v12  ;;  %5769 = vmatpush.bf16.msrb.mxu1 %v10324_v11  ;;  %5738 = vmatmul.bf16.vlgmr.msra.gmra.mxu2 %v13054_v16 }
 0x3a2   :  { %v10435_v19 = vld [vmem:[#allocation2 + $0x6c0] sm:$0xf]  ;;  %v11695_v26 = vld [vmem:[#allocation2 + $0x30c] sm:$0xf0]  ;;  %v5431_v29 = vpack.c.b16 %v5179_v13, %v5179_v13  ;;  %v10308_v30 = vor.u32 %v11783_v17, %v10307_v34  ;;  %5782 = vmatpush.bf16.msrb.mxu2 %v10452_v15  ;;  %5749 = vmatpush.bf16.msrb.mxu0 %v9972_v32 }
 0x3a3   :  { %v9955_v21 = vld [vmem:[#allocation2 + $0x300] sm:$0xf]  ;;  %v11747_v31 = vld [vmem:[#allocation2 + $0x4ac] sm:$0xf0]  ;;  %v10436_v63 = vor.u32 %v11815_v24, %v10435_v19 }
 0x3a4   :  { %v10163_v59 = vld [vmem:[#allocation2 + $0x4a0] sm:$0xf]  ;;  %v11779_v36 = vld [vmem:[#allocation2 + $0x5ac] sm:$0xf0]  ;;  %v9956_v37 = vor.u32 %v11695_v26, %v9955_v21  ;;  %5757 = vmatpush.bf16.msra.mxu3 %v10180_v18  ;;  %v5693_v40 = vsel %vm4070_vm1, %v5431_v29, 0 }
 0x3a5   :  { %v10291_v35 = vld [vmem:[#allocation2 + $0x5a0] sm:$0xf]  ;;  %v11811_v39 = vld [vmem:[#allocation2 + $0x6ac] sm:$0xf0]  ;;  %v10164_v9 = vor.u32 %v11747_v31, %v10163_v59  ;;  %5770 = vmatpush.bf16.msrb.mxu1 %v10308_v30 }
 0x3a6   :  { %v10419_v38 = vld [vmem:[#allocation2 + $0x6a0] sm:$0xf]  ;;  %v11843_v44 = vld [vmem:[#allocation2 + $0x7ac] sm:$0xf0]  ;;  %v10292_v45 = vor.u32 %v11779_v36, %v10291_v35  ;;  %5783 = vmatpush.bf16.msrb.mxu2 %v10436_v63  ;;  %5750 = vmatpush.bf16.msrb.mxu0 %v9956_v37 }
 0x3a7   :  { %v10547_v42 = vld [vmem:[#allocation2 + $0x7a0] sm:$0xf]  ;;  %v11743_v46 = vld [vmem:[#allocation2 + $0x48c] sm:$0xf0]  ;;  %v10420_v49 = vor.u32 %v11811_v39, %v10419_v38 }
 0x3a8   :  { %v10147_v28 = vld [vmem:[#allocation2 + $0x480] sm:$0xf]  ;;  %v11775_v51 = vld [vmem:[#allocation2 + $0x58c] sm:$0xf0]  ;;  %v10548_v54 = vor.u32 %v11843_v44, %v10547_v42  ;;  %5758 = vmatpush.bf16.msra.mxu3 %v10164_v9  ;;  %v9685_v42 = vld [vmem:[#allocation2 + $0xf0] sm:$0xf0] }
 0x3a9   :  { %v10275_v50 = vld [vmem:[#allocation2 + $0x580] sm:$0xf]  ;;  %v11807_v53 = vld [vmem:[#allocation2 + $0x68c] sm:$0xf0]  ;;  %v10148_v57 = vor.u32 %v11743_v46, %v10147_v28  ;;  %5771 = vmatpush.bf16.msrb.mxu1 %v10292_v45  ;;  %5751 = vmatmul.bf16.vlgmr.msrb.gmra.mxu0 %v13060_v10 }
 0x3aa   :  { %5796 = vmatpush.bf16.msra.mxu0 %v5693_v40  ;;  %v10403_v8 = vld [vmem:[#allocation2 + $0x680] sm:$0xf]  ;;  %v11839_v60 = vld [vmem:[#allocation2 + $0x78c] sm:$0xf0]  ;;  %v10276_v61 = vor.u32 %v11775_v51, %v10275_v50  ;;  %5784 = vmatpush.bf16.msrb.mxu2 %v10420_v49  ;;  %v11625_v40 = vld [vmem:[#allocation2 + $0xe4] sm:$0xf] }
 0x3ab   :  { %v10531_v58 = vld [vmem:[#allocation2 + $0x780] sm:$0xf]  ;;  %v11739_v0 = vld [vmem:[#allocation2 + $0x46c] sm:$0xf0]  ;;  %v10404_v1 = vor.u32 %v11807_v53, %v10403_v8  ;;  %v11657_v50 = vld [vmem:[#allocation2 + $0x1e4] sm:$0xf] }
 0x3ac   :  { %v10131_v48 = vld [vmem:[#allocation2 + $0x460] sm:$0xf]  ;;  %v11771_v23 = vld [vmem:[#allocation2 + $0x56c] sm:$0xf0]  ;;  %v10532_v5 = vor.u32 %v11839_v60, %v10531_v58  ;;  %5759 = vmatpush.bf16.msra.mxu3 %v10148_v57  ;;  %v9813_v51 = vld [vmem:[#allocation2 + $0x1f0] sm:$0xf0] }
 0x3ad   :  { %v10259_v2 = vld [vmem:[#allocation2 + $0x560] sm:$0xf]  ;;  %v11803_v43 = vld [vmem:[#allocation2 + $0x66c] sm:$0xf0]  ;;  %v10132_v56 = vor.u32 %v11739_v0, %v10131_v48  ;;  %5772 = vmatpush.bf16.msrb.mxu1 %v10276_v61  ;;  %v11689_v8 = vld [vmem:[#allocation2 + $0x2e4] sm:$0xf]  ;;  %v9688_v61 = vor.u32 %v11625_v40, %v9685_v42 }
 0x3ae   :  { %5797 = vmatpush.bf16.msra.mxu0 %v10548_v54  ;;  %v10387_v41 = vld [vmem:[#allocation2 + $0x660] sm:$0xf]  ;;  %v11835_v6 = vld [vmem:[#allocation2 + $0x76c] sm:$0xf0]  ;;  %v10260_v47 = vor.u32 %v11771_v23, %v10259_v2  ;;  %5785 = vmatpush.bf16.msrb.mxu2 %v10404_v1  ;;  %v9941_v57 = vld [vmem:[#allocation2 + $0x2f0] sm:$0xf0]  ;;  %v9816_v23 = vor.u32 %v11657_v50, %v9813_v51 }
 0x3af   :  { %v10515_v27 = vld [vmem:[#allocation2 + $0x760] sm:$0xf]  ;;  %v11735_v3 = vld [vmem:[#allocation2 + $0x44c] sm:$0xf0]  ;;  %v10388_v11 = vor.u32 %v11803_v43, %v10387_v41  ;;  %v11721_v0 = vld [vmem:[#allocation2 + $0x3e4] sm:$0xf] }
 0x3b0   :  { %v10115_v22 = vld [vmem:[#allocation2 + $0x440] sm:$0xf]  ;;  %v11767_v14 = vld [vmem:[#allocation2 + $0x54c] sm:$0xf0]  ;;  %v10516_v34 = vor.u32 %v11835_v6, %v10515_v27  ;;  %5760 = vmatpush.bf16.msra.mxu3 %v10132_v56  ;;  %v10069_v1 = vld [vmem:[#allocation2 + $0x3f0] sm:$0xf0] }
 0x3b1   :  { %v10243_v12 = vld [vmem:[#allocation2 + $0x540] sm:$0xf]  ;;  %v11799_v15 = vld [vmem:[#allocation2 + $0x64c] sm:$0xf0]  ;;  %v10116_v17 = vor.u32 %v11735_v3, %v10115_v22  ;;  %5773 = vmatpush.bf16.msrb.mxu1 %v10260_v47  ;;  %v11621_v41 = vld [vmem:[#allocation2 + $0xc4] sm:$0xf]  ;;  %v10072_v3 = vor.u32 %v11721_v0, %v10069_v1 }
 0x3b2   :  { %5798 = vmatpush.bf16.msra.mxu0 %v10532_v5  ;;  %v10371_v13 = vld [vmem:[#allocation2 + $0x640] sm:$0xf]  ;;  %v11831_v32 = vld [vmem:[#allocation2 + $0x74c] sm:$0xf0]  ;;  %v10244_v24 = vor.u32 %v11767_v14, %v10243_v12  ;;  %5786 = vmatpush.bf16.msrb.mxu2 %v10388_v11  ;;  %v9669_v43 = vld [vmem:[#allocation2 + $0xd0] sm:$0xf0]  ;;  %v9944_v5 = vor.u32 %v11689_v8, %v9941_v57 }
 0x3b3   :  { %v10499_v19 = vld [vmem:[#allocation2 + $0x740] sm:$0xf]  ;;  %v11731_v26 = vld [vmem:[#allocation2 + $0x42c] sm:$0xf0]  ;;  %v10372_v18 = vor.u32 %v11799_v15, %v10371_v13  ;;  %v11653_v56 = vld [vmem:[#allocation2 + $0x1c4] sm:$0xf]  ;;  %v9672_v11 = vor.u32 %v11621_v41, %v9669_v43 }
 0x3b4   :  { %v10099_v21 = vld [vmem:[#allocation2 + $0x420] sm:$0xf]  ;;  %v11763_v30 = vld [vmem:[#allocation2 + $0x52c] sm:$0xf0]  ;;  %v10500_v35 = vor.u32 %v11831_v32, %v10499_v19  ;;  %5761 = vmatpush.bf16.msra.mxu3 %v10116_v17  ;;  %v9797_v27 = vld [vmem:[#allocation2 + $0x1d0] sm:$0xf0] }
 0x3b5   :  { %v10227_v29 = vld [vmem:[#allocation2 + $0x520] sm:$0xf]  ;;  %v11795_v31 = vld [vmem:[#allocation2 + $0x62c] sm:$0xf0]  ;;  %v10100_v36 = vor.u32 %v11731_v26, %v10099_v21  ;;  %5774 = vmatpush.bf16.msrb.mxu1 %v10244_v24  ;;  %v11685_v47 = vld [vmem:[#allocation2 + $0x2c4] sm:$0xf]  ;;  %v9800_v13 = vor.u32 %v11653_v56, %v9797_v27 }
 0x3b6   :  { %5799 = vmatpush.bf16.msra.mxu0 %v10516_v34  ;;  %v10355_v59 = vld [vmem:[#allocation2 + $0x620] sm:$0xf]  ;;  %v11727_v37 = vld [vmem:[#allocation2 + $0x40c] sm:$0xf0]  ;;  %v10228_v9 = vor.u32 %v11763_v30, %v10227_v29  ;;  %5787 = vmatpush.bf16.msrb.mxu2 %v10372_v18  ;;  %v9925_v22 = vld [vmem:[#allocation2 + $0x2d0] sm:$0xf0] }
 0x3b7   :  { %v10083_v63 = vld [vmem:[#allocation2 + $0x400] sm:$0xf]  ;;  %v11827_v39 = vld [vmem:[#allocation2 + $0x72c] sm:$0xf0]  ;;  %v10356_v45 = vor.u32 %v11795_v31, %v10355_v59  ;;  %v11717_v12 = vld [vmem:[#allocation2 + $0x3c4] sm:$0xf]  ;;  %v9928_v17 = vor.u32 %v11685_v47, %v9925_v22 }
 0x3b8   :  { %v10483_v38 = vld [vmem:[#allocation2 + $0x720] sm:$0xf]  ;;  %v11759_v28 = vld [vmem:[#allocation2 + $0x50c] sm:$0xf0]  ;;  %5762 = vmatpush.bf16.msra.mxu3 %v10100_v36  ;;  %v10084_v54 = vor.u32 %v11727_v37, %v10083_v63  ;;  %v10053_v14 = vld [vmem:[#allocation2 + $0x3d0] sm:$0xf0] }
 0x3b9   :  { %v10211_v44 = vld [vmem:[#allocation2 + $0x500] sm:$0xf]  ;;  %v11791_v49 = vld [vmem:[#allocation2 + $0x60c] sm:$0xf0]  ;;  %v10484_v53 = vor.u32 %v11827_v39, %v10483_v38  ;;  %5775 = vmatpush.bf16.msrb.mxu1 %v10228_v9  ;;  %v11617_v15 = vld [vmem:[#allocation2 + $0xa4] sm:$0xf]  ;;  %v10056_v26 = vor.u32 %v11717_v12, %v10053_v14 }
 0x3ba   :  { %v10339_v46 = vld [vmem:[#allocation2 + $0x600] sm:$0xf]  ;;  %5800 = vmatpush.bf16.msra.mxu0 %v10500_v35  ;;  %v11823_v60 = vld [vmem:[#allocation2 + $0x70c] sm:$0xf0]  ;;  %v10212_v48 = vor.u32 %v11759_v28, %v10211_v44  ;;  %5788 = vmatpush.bf16.msrb.mxu2 %v10356_v45  ;;  %v9653_v34 = vld [vmem:[#allocation2 + $0xb0] sm:$0xf0] }
 0x3bb   :  { %v10467_v58 = vld [vmem:[#allocation2 + $0x700] sm:$0xf]  ;;  %v10340_v2 = vor.u32 %v11791_v49, %v10339_v46  ;;  %v11649_v19 = vld [vmem:[#allocation2 + $0x1a4] sm:$0xf]  ;;  %v9781_v32 = vld [vmem:[#allocation2 + $0x1b0] sm:$0xf0]  ;;  %v9656_v18 = vor.u32 %v11617_v15, %v9653_v34 }
 0x3bc   :  { %v10468_v6 = vor.u32 %v11823_v60, %v10467_v58  ;;  %5763 = vmatpush.bf16.msra.mxu3 %v10084_v54  ;;  %v11681_v24 = vld [vmem:[#allocation2 + $0x2a4] sm:$0xf]  ;;  %v9909_v21 = vld [vmem:[#allocation2 + $0x2b0] sm:$0xf0]  ;;  %v9784_v59 = vor.u32 %v11649_v19, %v9781_v32 }
 0x3bd   :  { %5776 = vmatpush.bf16.msrb.mxu1 %v10212_v48  ;;  %v11713_v29 = vld [vmem:[#allocation2 + $0x3a4] sm:$0xf]  ;;  %v10037_v30 = vld [vmem:[#allocation2 + $0x3b0] sm:$0xf0]  ;;  %v9912_v35 = vor.u32 %v11681_v24, %v9909_v21 }
 0x3be   :  { %5801 = vmatpush.bf16.msra.mxu0 %v10484_v53  ;;  %5789 = vmatpush.bf16.msrb.mxu2 %v10340_v2  ;;  %v11613_v31 = vld [vmem:[#allocation2 + $0x84] sm:$0xf]  ;;  %v9637_v63 = vld [vmem:[#allocation2 + $0x90] sm:$0xf0]  ;;  %v10040_v9 = vor.u32 %v11713_v29, %v10037_v30 }
 0x3bf   :  { %5764 = vmatmul.bf16.vlgmr.msra.gmra.mxu3 %v13116_v52  ;;  %v11645_v36 = vld [vmem:[#allocation2 + $0x184] sm:$0xf]  ;;  %v9765_v37 = vld [vmem:[#allocation2 + $0x190] sm:$0xf0]  ;;  %v9640_v40 = vor.u32 %v11613_v31, %v9637_v63 }
 0x3c0   :  { %5808 = vmatpush.bf16.msrb.mxu3 %v9688_v61  ;;  %5777 = vmatmul.bf16.vlgmr.msrb.gmra.mxu1 %v13119_v55  ;;  %v11677_v38 = vld [vmem:[#allocation2 + $0x284] sm:$0xf]  ;;  %v9893_v39 = vld [vmem:[#allocation2 + $0x290] sm:$0xf0]  ;;  %v9768_v45 = vor.u32 %v11645_v36, %v9765_v37 }
 0x3c1   :  { %5821 = vmatpush.bf16.msra.mxu1 %v9816_v23  ;;  %5790 = vmatmul.bf16.vlgmr.msrb.gmra.mxu2 %v13150_v33  ;;  %v11709_v42 = vld [vmem:[#allocation2 + $0x384] sm:$0xf]  ;;  %v10021_v44 = vld [vmem:[#allocation2 + $0x390] sm:$0xf0]  ;;  %v9896_v49 = vor.u32 %v11677_v38, %v9893_v39 }
 0x3c2   :  { %5834 = vmatpush.bf16.msra.mxu2 %v9944_v5  ;;  %5802 = vmatpush.bf16.msra.mxu0 %v10468_v6  ;;  %v11609_v28 = vld [vmem:[#allocation2 + $0x64] sm:$0xf]  ;;  %v9621_v46 = vld [vmem:[#allocation2 + $0x70] sm:$0xf0]  ;;  %v10024_v54 = vor.u32 %v11709_v42, %v10021_v44 }
 0x3c3   :  { %v11641_v50 = vld [vmem:[#allocation2 + $0x164] sm:$0xf]  ;;  %v9749_v51 = vld [vmem:[#allocation2 + $0x170] sm:$0xf0]  ;;  %v9624_v57 = vor.u32 %v11609_v28, %v9621_v46 }
 0x3c4   :  { %5809 = vmatpush.bf16.msrb.mxu3 %v9672_v11  ;;  %v11673_v8 = vld [vmem:[#allocation2 + $0x264] sm:$0xf]  ;;  %v9877_v53 = vld [vmem:[#allocation2 + $0x270] sm:$0xf0]  ;;  %v9752_v61 = vor.u32 %v11641_v50, %v9749_v51 }
 0x3c5   :  { %5822 = vmatpush.bf16.msra.mxu1 %v9800_v13  ;;  %10561 = vmatmul.msk.bf16.vlgmr.msra.gmra.mxu0 %vm4066_vm2, %v13159_v62  ;;  %v11705_v58 = vld [vmem:[#allocation2 + $0x364] sm:$0xf]  ;;  %v10005_v60 = vld [vmem:[#allocation2 + $0x370] sm:$0xf0]  ;;  %v9880_v1 = vor.u32 %v11673_v8, %v9877_v53 }
 0x3c6   :  { %5847 = vmatpush.bf16.msrb.mxu0 %v10072_v3  ;;  %5835 = vmatpush.bf16.msra.mxu2 %v9928_v17  ;;  %v11605_v48 = vld [vmem:[#allocation2 + $0x44] sm:$0xf]  ;;  %v9605_v0 = vld [vmem:[#allocation2 + $0x50] sm:$0xf0]  ;;  %v10008_v5 = vor.u32 %v11705_v58, %v10005_v60 }
 0x3c7   :  { %v11637_v2 = vld [vmem:[#allocation2 + $0x144] sm:$0xf]  ;;  %v9733_v23 = vld [vmem:[#allocation2 + $0x150] sm:$0xf0]  ;;  %v9608_v56 = vor.u32 %v11605_v48, %v9605_v0 }
 0x3c8   :  { %5810 = vmatpush.bf16.msrb.mxu3 %v9656_v18  ;;  %v11669_v41 = vld [vmem:[#allocation2 + $0x244] sm:$0xf]  ;;  %v9861_v43 = vld [vmem:[#allocation2 + $0x250] sm:$0xf0]  ;;  %v9736_v47 = vor.u32 %v11637_v2, %v9733_v23 }
 0x3c9   :  { %5823 = vmatpush.bf16.msra.mxu1 %v9784_v59  ;;  %v11701_v27 = vld [vmem:[#allocation2 + $0x344] sm:$0xf]  ;;  %v9989_v6 = vld [vmem:[#allocation2 + $0x350] sm:$0xf0]  ;;  %v9864_v11 = vor.u32 %v11669_v41, %v9861_v43 }
 0x3ca   :  { %5848 = vmatpush.bf16.msrb.mxu0 %v10056_v26  ;;  %5836 = vmatpush.bf16.msra.mxu2 %v9912_v35  ;;  %v11601_v22 = vld [vmem:[#allocation2 + $0x24] sm:$0xf]  ;;  %v9589_v3 = vld [vmem:[#allocation2 + $0x30] sm:$0xf0]  ;;  %v9992_v17 = vor.u32 %v11701_v27, %v9989_v6  ;;  %v5180_v26 = vunpack.c.h.b16 %v13165_v25 }
 0x3cb   :  { %v11633_v12 = vld [vmem:[#allocation2 + $0x124] sm:$0xf]  ;;  %v9717_v14 = vld [vmem:[#allocation2 + $0x130] sm:$0xf0]  ;;  %v9592_v19 = vor.u32 %v11601_v22, %v9589_v3 }
 0x3cc   :  { %5811 = vmatpush.bf16.msrb.mxu3 %v9640_v40  ;;  %v11665_v13 = vld [vmem:[#allocation2 + $0x224] sm:$0xf]  ;;  %v9845_v15 = vld [vmem:[#allocation2 + $0x230] sm:$0xf0]  ;;  %v9720_v18 = vor.u32 %v11633_v12, %v9717_v14  ;;  %v5432_v46 = vpack.c.b16 %v5180_v26, %v5180_v26 }
 0x3cd   :  { %5824 = vmatpush.bf16.msra.mxu1 %v9768_v45  ;;  %v11597_v34 = vld [vmem:[#allocation2 + $0x4] sm:$0xf]  ;;  %v9573_v32 = vld [vmem:[#allocation2 + $0x10] sm:$0xf0]  ;;  %v9848_v31 = vor.u32 %v11665_v13, %v9845_v15 }
 0x3ce   :  { %5849 = vmatpush.bf16.msrb.mxu0 %v10040_v9  ;;  %5837 = vmatpush.bf16.msra.mxu2 %v9896_v49  ;;  %v11697_v24 = vld [vmem:[#allocation2 + $0x324] sm:$0xf]  ;;  %v9973_v21 = vld [vmem:[#allocation2 + $0x330] sm:$0xf0]  ;;  %v9576_v40 = vor.u32 %v11597_v34, %v9573_v32  ;;  %v5696_v0 = vsel %vm4070_vm1, %v5432_v46, 0 }
 0x3cf   :  { %v11753_v29 = vld [vmem:[#allocation2 + $0x4e4] sm:$0xf]  ;;  %v10197_v30 = vld [vmem:[#allocation2 + $0x4f0] sm:$0xf0]  ;;  %v9976_v9 = vor.u32 %v11697_v24, %v9973_v21 }
 0x3d0   :  { %5812 = vmatpush.bf16.msrb.mxu3 %v9624_v57  ;;  %v11629_v59 = vld [vmem:[#allocation2 + $0x104] sm:$0xf]  ;;  %v9701_v63 = vld [vmem:[#allocation2 + $0x110] sm:$0xf0]  ;;  %v10200_v45 = vor.u32 %v11753_v29, %v10197_v30 }
 0x3d1   :  { %5825 = vmatpush.bf16.msra.mxu1 %v9752_v61  ;;  %v11661_v35 = vld [vmem:[#allocation2 + $0x204] sm:$0xf]  ;;  %v9829_v36 = vld [vmem:[#allocation2 + $0x210] sm:$0xf0]  ;;  %v9704_v28 = vor.u32 %v11629_v59, %v9701_v63 }
 0x3d2   :  { %5850 = vmatpush.bf16.msrb.mxu0 %v10024_v54  ;;  %5838 = vmatpush.bf16.msra.mxu2 %v9880_v1  ;;  %v11785_v37 = vld [vmem:[#allocation2 + $0x5e4] sm:$0xf]  ;;  %v10325_v38 = vld [vmem:[#allocation2 + $0x5f0] sm:$0xf0]  ;;  %v9832_v49 = vor.u32 %v11661_v35, %v9829_v36 }
 0x3d3   :  { %v11817_v39 = vld [vmem:[#allocation2 + $0x6e4] sm:$0xf]  ;;  %v10453_v42 = vld [vmem:[#allocation2 + $0x6f0] sm:$0xf0]  ;;  %v10328_v50 = vor.u32 %v11785_v37, %v10325_v38 }
 0x3d4   :  { %5813 = vmatpush.bf16.msrb.mxu3 %v9608_v56  ;;  %v11693_v44 = vld [vmem:[#allocation2 + $0x304] sm:$0xf]  ;;  %v9957_v25 = vld [vmem:[#allocation2 + $0x310] sm:$0xf0]  ;;  %v10456_v53 = vor.u32 %v11817_v39, %v10453_v42 }
 0x3d5   :  { %5826 = vmatpush.bf16.msra.mxu1 %v9736_v47  ;;  %v11749_v51 = vld [vmem:[#allocation2 + $0x4c4] sm:$0xf]  ;;  %v10181_v8 = vld [vmem:[#allocation2 + $0x4d0] sm:$0xf0]  ;;  %v9960_v58 = vor.u32 %v11693_v44, %v9957_v25 }
 0x3d6   :  { %5851 = vmatpush.bf16.msrb.mxu0 %v10008_v5  ;;  %5839 = vmatpush.bf16.msra.mxu2 %v9864_v11  ;;  %v11781_v54 = vld [vmem:[#allocation2 + $0x5c4] sm:$0xf]  ;;  %v10309_v57 = vld [vmem:[#allocation2 + $0x5d0] sm:$0xf0]  ;;  %v10184_v48 = vor.u32 %v11749_v51, %v10181_v8 }
 0x3d7   :  { %v11813_v60 = vld [vmem:[#allocation2 + $0x6c4] sm:$0xf]  ;;  %v10437_v61 = vld [vmem:[#allocation2 + $0x6d0] sm:$0xf0]  ;;  %v10312_v23 = vor.u32 %v11781_v54, %v10309_v57 }
 0x3d8   :  { %5814 = vmatpush.bf16.msrb.mxu3 %v9592_v19  ;;  %v11841_v1 = vld [vmem:[#allocation2 + $0x7a4] sm:$0xf]  ;;  %v10549_v2 = vld [vmem:[#allocation2 + $0x7b0] sm:$0xf0]  ;;  %v10440_v5 = vor.u32 %v11813_v60, %v10437_v61 }
 0x3d9   :  { %5827 = vmatpush.bf16.msra.mxu1 %v9720_v18  ;;  %v11745_v41 = vld [vmem:[#allocation2 + $0x4a4] sm:$0xf]  ;;  %v10165_v43 = vld [vmem:[#allocation2 + $0x4b0] sm:$0xf0]  ;;  %v10552_v22 = vor.u32 %v11841_v1, %v10549_v2 }
 0x3da   :  { %5852 = vmatpush.bf16.msrb.mxu0 %v9992_v17  ;;  %5840 = vmatpush.bf16.msra.mxu2 %v9848_v31  ;;  %v11777_v56 = vld [vmem:[#allocation2 + $0x5a4] sm:$0xf]  ;;  %v10293_v27 = vld [vmem:[#allocation2 + $0x5b0] sm:$0xf0]  ;;  %v10168_v3 = vor.u32 %v11745_v41, %v10165_v43 }
 0x3db   :  { %v11809_v6 = vld [vmem:[#allocation2 + $0x6a4] sm:$0xf]  ;;  %v10421_v47 = vld [vmem:[#allocation2 + $0x6b0] sm:$0xf0]  ;;  %v10296_v14 = vor.u32 %v11777_v56, %v10293_v27  ;;  %v9691_v27 = vld [vmem:[#allocation2 + $0xe8] sm:$0xf] }
 0x3dc   :  { %5815 = vmatpush.bf16.msrb.mxu3 %v9576_v40  ;;  %v11837_v11 = vld [vmem:[#allocation2 + $0x784] sm:$0xf]  ;;  %v10533_v12 = vld [vmem:[#allocation2 + $0x790] sm:$0xf0]  ;;  %v10424_v34 = vor.u32 %v11809_v6, %v10421_v47 }
 0x3dd   :  { %5828 = vmatpush.bf16.msra.mxu1 %v9704_v28  ;;  %v11741_v13 = vld [vmem:[#allocation2 + $0x484] sm:$0xf]  ;;  %v10149_v15 = vld [vmem:[#allocation2 + $0x490] sm:$0xf0]  ;;  %v10536_v21 = vor.u32 %v11837_v11, %v10533_v12  ;;  %v10075_v11 = vld [vmem:[#allocation2 + $0x3e8] sm:$0xf] }
 0x3de   :  { %5853 = vmatpush.bf16.msrb.mxu0 %v9976_v9  ;;  %5841 = vmatpush.bf16.msra.mxu2 %v9832_v49  ;;  %v11773_v17 = vld [vmem:[#allocation2 + $0x584] sm:$0xf]  ;;  %v10277_v19 = vld [vmem:[#allocation2 + $0x590] sm:$0xf0]  ;;  %v10152_v26 = vor.u32 %v11741_v13, %v10149_v15  ;;  %v11724_v12 = vld [vmem:[#allocation2 + $0x3f4] sm:$0xf0] }
 0x3df   :  { %5816 = vmatmul.bf16.vlgmr.msrb.gmra.mxu3 %v13037_v4  ;;  %v11805_v32 = vld [vmem:[#allocation2 + $0x684] sm:$0xf]  ;;  %v10405_v24 = vld [vmem:[#allocation2 + $0x690] sm:$0xf0]  ;;  %v10280_v30 = vor.u32 %v11773_v17, %v10277_v19  ;;  %v9819_v19 = vld [vmem:[#allocation2 + $0x1e8] sm:$0xf] }
 0x3e0   :  { %5860 = vmatpush.bf16.msra.mxu3 %v10200_v45  ;;  %5829 = vmatmul.bf16.vlgmr.msra.gmra.mxu1 %v13048_v7  ;;  %v11833_v18 = vld [vmem:[#allocation2 + $0x764] sm:$0xf]  ;;  %v10517_v29 = vld [vmem:[#allocation2 + $0x770] sm:$0xf0]  ;;  %v10408_v63 = vor.u32 %v11805_v32, %v10405_v24  ;;  %v11660_v32 = vld [vmem:[#allocation2 + $0x1f4] sm:$0xf0] }
 0x3e1   :  { %5873 = vmatpush.bf16.msrb.mxu1 %v10328_v50  ;;  %5842 = vmatmul.bf16.vlgmr.msra.gmra.mxu2 %v13054_v16  ;;  %v11737_v59 = vld [vmem:[#allocation2 + $0x464] sm:$0xf]  ;;  %v10133_v31 = vld [vmem:[#allocation2 + $0x470] sm:$0xf0]  ;;  %v10520_v39 = vor.u32 %v11833_v18, %v10517_v29  ;;  %v11692_v18 = vld [vmem:[#allocation2 + $0x2f4] sm:$0xf0]  ;;  %v10076_v29 = vor.u32 %v11724_v12, %v10075_v11 }
 0x3e2   :  { %5886 = vmatpush.bf16.msrb.mxu2 %v10456_v53  ;;  %5854 = vmatpush.bf16.msrb.mxu0 %v9960_v58  ;;  %v11769_v35 = vld [vmem:[#allocation2 + $0x564] sm:$0xf]  ;;  %v10261_v36 = vld [vmem:[#allocation2 + $0x570] sm:$0xf0]  ;;  %v10136_v9 = vor.u32 %v11737_v59, %v10133_v31  ;;  %v10059_v31 = vld [vmem:[#allocation2 + $0x3c8] sm:$0xf] }
 0x3e3   :  { %v11801_v37 = vld [vmem:[#allocation2 + $0x664] sm:$0xf]  ;;  %v10389_v38 = vld [vmem:[#allocation2 + $0x670] sm:$0xf0]  ;;  %v10264_v44 = vor.u32 %v11769_v35, %v10261_v36  ;;  %v9820_v36 = vor.u32 %v11660_v32, %v9819_v19  ;;  %v9627_v12 = vld [vmem:[#allocation2 + $0x68] sm:$0xf] }
 0x3e4   :  { %5861 = vmatpush.bf16.msra.mxu3 %v10184_v48  ;;  %v11829_v40 = vld [vmem:[#allocation2 + $0x744] sm:$0xf]  ;;  %v10501_v42 = vld [vmem:[#allocation2 + $0x750] sm:$0xf0]  ;;  %v10392_v28 = vor.u32 %v11801_v37, %v10389_v38  ;;  %v9675_v37 = vld [vmem:[#allocation2 + $0xc8] sm:$0xf] }
 0x3e5   :  { %5874 = vmatpush.bf16.msrb.mxu1 %v10312_v23  ;;  %5855 = vmatmul.bf16.vlgmr.msrb.gmra.mxu0 %v13060_v10  ;;  %v11733_v25 = vld [vmem:[#allocation2 + $0x444] sm:$0xf]  ;;  %v10117_v45 = vld [vmem:[#allocation2 + $0x450] sm:$0xf0]  ;;  %v10504_v8 = vor.u32 %v11829_v40, %v10501_v42  ;;  %v11624_v38 = vld [vmem:[#allocation2 + $0xd4] sm:$0xf0] }
 0x3e6   :  { %5900 = vmatpush.bf16.msra.mxu0 %v5696_v0  ;;  %5887 = vmatpush.bf16.msrb.mxu2 %v10440_v5  ;;  %v11765_v46 = vld [vmem:[#allocation2 + $0x544] sm:$0xf]  ;;  %v10245_v49 = vld [vmem:[#allocation2 + $0x550] sm:$0xf0]  ;;  %v10120_v53 = vor.u32 %v11733_v25, %v10117_v45  ;;  %v11656_v40 = vld [vmem:[#allocation2 + $0x1d4] sm:$0xf0]  ;;  %v9676_v45 = vor.u32 %v11624_v38, %v9675_v37 }
 0x3e7   :  { %v11797_v50 = vld [vmem:[#allocation2 + $0x644] sm:$0xf]  ;;  %v10373_v51 = vld [vmem:[#allocation2 + $0x650] sm:$0xf0]  ;;  %v10248_v58 = vor.u32 %v11765_v46, %v10245_v49  ;;  %v9931_v42 = vld [vmem:[#allocation2 + $0x2c8] sm:$0xf] }
 0x3e8   :  { %5862 = vmatpush.bf16.msra.mxu3 %v10168_v3  ;;  %v11825_v54 = vld [vmem:[#allocation2 + $0x724] sm:$0xf]  ;;  %v10485_v57 = vld [vmem:[#allocation2 + $0x730] sm:$0xf0]  ;;  %v10376_v48 = vor.u32 %v11797_v50, %v10373_v51  ;;  %v11628_v3 = vld [vmem:[#allocation2 + $0xf4] sm:$0xf0] }
 0x3e9   :  { %5875 = vmatpush.bf16.msrb.mxu1 %v10296_v14  ;;  %v11729_v60 = vld [vmem:[#allocation2 + $0x424] sm:$0xf]  ;;  %v10101_v61 = vld [vmem:[#allocation2 + $0x430] sm:$0xf0]  ;;  %v10488_v5 = vor.u32 %v11825_v54, %v10485_v57  ;;  %v11716_v46 = vld [vmem:[#allocation2 + $0x3b4] sm:$0xf0] }
 0x3ea   :  { %5901 = vmatpush.bf16.msra.mxu0 %v10552_v22  ;;  %5888 = vmatpush.bf16.msrb.mxu2 %v10424_v34  ;;  %v11761_v0 = vld [vmem:[#allocation2 + $0x524] sm:$0xf]  ;;  %v10229_v1 = vld [vmem:[#allocation2 + $0x530] sm:$0xf0]  ;;  %v10104_v56 = vor.u32 %v11729_v60, %v10101_v61  ;;  %v9659_v50 = vld [vmem:[#allocation2 + $0xa8] sm:$0xf] }
 0x3eb   :  { %v11793_v2 = vld [vmem:[#allocation2 + $0x624] sm:$0xf]  ;;  %v10357_v23 = vld [vmem:[#allocation2 + $0x630] sm:$0xf0]  ;;  %v10232_v22 = vor.u32 %v11761_v0, %v10229_v1  ;;  %v11620_v51 = vld [vmem:[#allocation2 + $0xb4] sm:$0xf0] }
 0x3ec   :  { %5863 = vmatpush.bf16.msra.mxu3 %v10152_v26  ;;  %v11725_v41 = vld [vmem:[#allocation2 + $0x404] sm:$0xf]  ;;  %v10085_v43 = vld [vmem:[#allocation2 + $0x410] sm:$0xf0]  ;;  %v10360_v14 = vor.u32 %v11793_v2, %v10357_v23  ;;  %v9947_v26 = vld [vmem:[#allocation2 + $0x2e8] sm:$0xf]  ;;  %v9660_v61 = vor.u32 %v11620_v51, %v9659_v50 }
 0x3ed   :  { %5876 = vmatpush.bf16.msrb.mxu1 %v10280_v30  ;;  %v11821_v6 = vld [vmem:[#allocation2 + $0x704] sm:$0xf]  ;;  %v10469_v47 = vld [vmem:[#allocation2 + $0x710] sm:$0xf0]  ;;  %v9692_v30 = vor.u32 %v11628_v3, %v9691_v27  ;;  %v11652_v54 = vld [vmem:[#allocation2 + $0x1b4] sm:$0xf0] }
 0x3ee   :  { %5902 = vmatpush.bf16.msra.mxu0 %v10536_v21  ;;  %5889 = vmatpush.bf16.msrb.mxu2 %v10408_v63  ;;  %v11757_v13 = vld [vmem:[#allocation2 + $0x504] sm:$0xf]  ;;  %v10213_v15 = vld [vmem:[#allocation2 + $0x510] sm:$0xf0]  ;;  %v10472_v24 = vor.u32 %v11821_v6, %v10469_v47  ;;  %v10088_v21 = vor.u32 %v11725_v41, %v10085_v43  ;;  %v11720_v63 = vld [vmem:[#allocation2 + $0x3d4] sm:$0xf0] }
 0x3ef   :  { %v11789_v34 = vld [vmem:[#allocation2 + $0x604] sm:$0xf]  ;;  %v10341_v17 = vld [vmem:[#allocation2 + $0x610] sm:$0xf0]  ;;  %v10216_v59 = vor.u32 %v11757_v13, %v10213_v15  ;;  %v10060_v25 = vor.u32 %v11720_v63, %v10059_v31  ;;  %v9915_v57 = vld [vmem:[#allocation2 + $0x2a8] sm:$0xf] }
 0x3f0   :  { %5864 = vmatpush.bf16.msra.mxu3 %v10136_v9  ;;  %v10344_v35 = vor.u32 %v11789_v34, %v10341_v17  ;;  %v9803_v9 = vld [vmem:[#allocation2 + $0x1c8] sm:$0xf]  ;;  %v11712_v0 = vld [vmem:[#allocation2 + $0x394] sm:$0xf0] }
 0x3f1   :  { %5877 = vmatpush.bf16.msrb.mxu1 %v10264_v44  ;;  %v11688_v44 = vld [vmem:[#allocation2 + $0x2d4] sm:$0xf0]  ;;  %v9804_v49 = vor.u32 %v11656_v40, %v9803_v9  ;;  %v9643_v2 = vld [vmem:[#allocation2 + $0x88] sm:$0xf] }
 0x3f2   :  { %5903 = vmatpush.bf16.msra.mxu0 %v10520_v39  ;;  %5890 = vmatpush.bf16.msrb.mxu2 %v10392_v28  ;;  %v9948_v39 = vor.u32 %v11692_v18, %v9947_v26  ;;  %v10043_v28 = vld [vmem:[#allocation2 + $0x3a8] sm:$0xf]  ;;  %v11616_v23 = vld [vmem:[#allocation2 + $0x94] sm:$0xf0] }
 0x3f3   :  { %v10044_v60 = vor.u32 %v11716_v46, %v10043_v28  ;;  %v9771_v43 = vld [vmem:[#allocation2 + $0x188] sm:$0xf]  ;;  %v11680_v27 = vld [vmem:[#allocation2 + $0x294] sm:$0xf0]  ;;  %v9644_v47 = vor.u32 %v11616_v23, %v9643_v2 }
 0x3f4   :  { %5865 = vmatpush.bf16.msra.mxu3 %v10120_v53  ;;  %v9787_v53 = vld [vmem:[#allocation2 + $0x1a8] sm:$0xf]  ;;  %v11708_v3 = vld [vmem:[#allocation2 + $0x374] sm:$0xf0] }
 0x3f5   :  { %5878 = vmatpush.bf16.msrb.mxu1 %v10248_v58  ;;  %v11684_v58 = vld [vmem:[#allocation2 + $0x2b4] sm:$0xf0]  ;;  %v9788_v1 = vor.u32 %v11652_v54, %v9787_v53  ;;  %v9755_v15 = vld [vmem:[#allocation2 + $0x168] sm:$0xf] }
 0x3f6   :  { %5904 = vmatpush.bf16.msra.mxu0 %v10504_v8  ;;  %5891 = vmatpush.bf16.msrb.mxu2 %v10376_v48  ;;  %v9932_v8 = vor.u32 %v11688_v44, %v9931_v42  ;;  %v10027_v48 = vld [vmem:[#allocation2 + $0x388] sm:$0xf]  ;;  %v9916_v41 = vor.u32 %v11684_v58, %v9915_v57  ;;  %v11644_v34 = vld [vmem:[#allocation2 + $0x174] sm:$0xf0] }
 0x3f7   :  { %v10028_v6 = vor.u32 %v11712_v0, %v10027_v48  ;;  %v9883_v17 = vld [vmem:[#allocation2 + $0x268] sm:$0xf]  ;;  %v11676_v19 = vld [vmem:[#allocation2 + $0x274] sm:$0xf0]  ;;  %v9756_v18 = vor.u32 %v11644_v34, %v9755_v15 }
 0x3f8   :  { %5866 = vmatpush.bf16.msra.mxu3 %v10104_v56  ;;  %v9899_v56 = vld [vmem:[#allocation2 + $0x288] sm:$0xf]  ;;  %v11704_v26 = vld [vmem:[#allocation2 + $0x354] sm:$0xf0] }
 0x3f9   :  { %5879 = vmatpush.bf16.msrb.mxu1 %v10232_v22  ;;  %v10011_v22 = vld [vmem:[#allocation2 + $0x368] sm:$0xf]  ;;  %v9900_v13 = vor.u32 %v11680_v27, %v9899_v56  ;;  %v11640_v63 = vld [vmem:[#allocation2 + $0x154] sm:$0xf0] }
 0x3fa   :  { %5905 = vmatpush.bf16.msra.mxu0 %v10488_v5  ;;  %5892 = vmatpush.bf16.msrb.mxu2 %v10360_v14  ;;  %v11648_v5 = vld [vmem:[#allocation2 + $0x194] sm:$0xf0]  ;;  %v10012_v32 = vor.u32 %v11708_v3, %v10011_v22  ;;  %v9739_v31 = vld [vmem:[#allocation2 + $0x148] sm:$0xf] }
 0x3fb   :  { %v9772_v11 = vor.u32 %v11648_v5, %v9771_v43  ;;  %v11612_v14 = vld [vmem:[#allocation2 + $0x74] sm:$0xf0]  ;;  %v9979_v9 = vld [vmem:[#allocation2 + $0x328] sm:$0xf]  ;;  %v9740_v42 = vor.u32 %v11640_v63, %v9739_v31 }
 0x3fc   :  { %5867 = vmatpush.bf16.msra.mxu3 %v10088_v21  ;;  %v9995_v21 = vld [vmem:[#allocation2 + $0x348] sm:$0xf]  ;;  %v11672_v37 = vld [vmem:[#allocation2 + $0x254] sm:$0xf0] }
 0x3fd   :  { %5880 = vmatpush.bf16.msrb.mxu1 %v10216_v59  ;;  %v9884_v59 = vor.u32 %v11676_v19, %v9883_v17  ;;  %v9996_v38 = vor.u32 %v11704_v26, %v9995_v21  ;;  %v11700_v40 = vld [vmem:[#allocation2 + $0x334] sm:$0xf0]  ;;  %v9595_v44 = vld [vmem:[#allocation2 + $0x28] sm:$0xf] }
 0x3fe   :  { %5906 = vmatpush.bf16.msra.mxu0 %v10472_v24  ;;  %5893 = vmatpush.bf16.msrb.mxu2 %v10344_v35  ;;  %v9628_v24 = vor.u32 %v11612_v14, %v9627_v12  ;;  %v13189_v35 = vld [vmem:[#allocation2 + $0x7c8] sm:$0xff]  ;;  %v11668_v51 = vld [vmem:[#allocation2 + $0x234] sm:$0xf0] }
 0x3ff   :  { %5868 = vmatmul.bf16.vlgmr.msra.gmra.mxu3 %v13116_v52  ;;  %v9723_v46 = vld [vmem:[#allocation2 + $0x128] sm:$0xf]  ;;  %v11696_v58 = vld [vmem:[#allocation2 + $0x314] sm:$0xf0] }
 0x400   :  { %5912 = vmatpush.bf16.msrb.mxu3 %v9692_v30  ;;  %5881 = vmatmul.bf16.vlgmr.msrb.gmra.mxu1 %v13119_v55  ;;  %v11608_v30 = vld [vmem:[#allocation2 + $0x54] sm:$0xf0]  ;;  %v9851_v50 = vld [vmem:[#allocation2 + $0x228] sm:$0xf] }
 0x401   :  { %5925 = vmatpush.bf16.msra.mxu1 %v9820_v36  ;;  %5894 = vmatmul.bf16.vlgmr.msrb.gmra.mxu2 %v13150_v33  ;;  %v9867_v36 = vld [vmem:[#allocation2 + $0x248] sm:$0xf]  ;;  %v11756_v0 = vld [vmem:[#allocation2 + $0x4f4] sm:$0xf0]  ;;  %v9852_v2 = vor.u32 %v11668_v51, %v9851_v50 }
 0x402   :  { %5951 = vmatpush.bf16.msrb.mxu0 %v10076_v29  ;;  %5938 = vmatpush.bf16.msra.mxu2 %v9948_v39  ;;  %v9611_v29 = vld [vmem:[#allocation2 + $0x48] sm:$0xf]  ;;  %v9868_v28 = vor.u32 %v11672_v37, %v9867_v36  ;;  %v11664_v5 = vld [vmem:[#allocation2 + $0x214] sm:$0xf0] }
 0x403   :  { %10562 = vmatmul.msk.bf16.vlgmr.msra.gmra.mxu0 %vm4066_vm2, %v13159_v62  ;;  %v9612_v39 = vor.u32 %v11608_v30, %v9611_v29  ;;  %v9579_v54 = vld [vmem:[#allocation2 + $0x8] sm:$0xf]  ;;  %v11788_v27 = vld [vmem:[#allocation2 + $0x5f4] sm:$0xf0] }
 0x404   :  { %5913 = vmatpush.bf16.msrb.mxu3 %v9676_v45  ;;  %v5181_v45 = vunpack.c.l.b16 %v13189_v35  ;;  %v9963_v57 = vld [vmem:[#allocation2 + $0x308] sm:$0xf]  ;;  %v11820_v3 = vld [vmem:[#allocation2 + $0x6f4] sm:$0xf0] }
 0x405   :  { %5926 = vmatpush.bf16.msra.mxu1 %v9804_v49  ;;  %v11636_v49 = vld [vmem:[#allocation2 + $0x134] sm:$0xf0]  ;;  %v10203_v48 = vld [vmem:[#allocation2 + $0x4e8] sm:$0xf] }
 0x406   :  { %5952 = vmatpush.bf16.msrb.mxu0 %v10060_v25  ;;  %5939 = vmatpush.bf16.msra.mxu2 %v9932_v8  ;;  %v11604_v25 = vld [vmem:[#allocation2 + $0x34] sm:$0xf0]  ;;  %v9980_v8 = vor.u32 %v11700_v40, %v9979_v9  ;;  %v9707_v23 = vld [vmem:[#allocation2 + $0x108] sm:$0xf] }
 0x407   :  { %v9596_v53 = vor.u32 %v11604_v25, %v9595_v44  ;;  %v9835_v43 = vld [vmem:[#allocation2 + $0x208] sm:$0xf]  ;;  %v11844_v15 = vld [vmem:[#allocation2 + $0x7b4] sm:$0xf0] }
 0x408   :  { %5914 = vmatpush.bf16.msrb.mxu3 %v9660_v61  ;;  %v11600_v61 = vld [vmem:[#allocation2 + $0x14] sm:$0xf0]  ;;  %v10331_v56 = vld [vmem:[#allocation2 + $0x5e8] sm:$0xf]  ;;  %v9836_v34 = vor.u32 %v11664_v5, %v9835_v43 }
 0x409   :  { %5927 = vmatpush.bf16.msra.mxu1 %v9788_v1  ;;  %v5433_v1 = vpack.c.b16 %v5181_v45, %v5181_v45  ;;  %v10459_v22 = vld [vmem:[#allocation2 + $0x6e8] sm:$0xf]  ;;  %v10332_v17 = vor.u32 %v11788_v27, %v10331_v56  ;;  %v11784_v26 = vld [vmem:[#allocation2 + $0x5d4] sm:$0xf0] }
 0x40a   :  { %5953 = vmatpush.bf16.msrb.mxu0 %v10044_v60  ;;  %5940 = vmatpush.bf16.msra.mxu2 %v9916_v41  ;;  %v9724_v60 = vor.u32 %v11636_v49, %v9723_v46  ;;  %v11632_v41 = vld [vmem:[#allocation2 + $0x114] sm:$0xf0]  ;;  %v10187_v19 = vld [vmem:[#allocation2 + $0x4c8] sm:$0xf] }
 0x40b   :  { %v9708_v12 = vor.u32 %v11632_v41, %v9707_v23  ;;  %v5699_v14 = vsel %vm4070_vm1, %v5433_v1, 0  ;;  %v10315_v21 = vld [vmem:[#allocation2 + $0x5c8] sm:$0xf]  ;;  %v11816_v29 = vld [vmem:[#allocation2 + $0x6d4] sm:$0xf0] }
 0x40c   :  { %5915 = vmatpush.bf16.msrb.mxu3 %v9644_v47  ;;  %v9580_v47 = vor.u32 %v11600_v61, %v9579_v54  ;;  %v10539_v31 = vld [vmem:[#allocation2 + $0x788] sm:$0xf]  ;;  %v11840_v63 = vld [vmem:[#allocation2 + $0x794] sm:$0xf0]  ;;  %v10316_v36 = vor.u32 %v11784_v26, %v10315_v21 }
 0x40d   :  { %5928 = vmatpush.bf16.msra.mxu1 %v9772_v11  ;;  %v10204_v11 = vor.u32 %v11756_v0, %v10203_v48  ;;  %v10171_v37 = vld [vmem:[#allocation2 + $0x4a8] sm:$0xf]  ;;  %v11780_v40 = vld [vmem:[#allocation2 + $0x5b4] sm:$0xf0]  ;;  %v10540_v25 = vor.u32 %v11840_v63, %v10539_v31 }
 0x40e   :  { %5954 = vmatpush.bf16.msrb.mxu0 %v10028_v6  ;;  %5941 = vmatpush.bf16.msra.mxu2 %v9900_v13  ;;  %v9964_v6 = vor.u32 %v11696_v58, %v9963_v57  ;;  %v10555_v13 = vld [vmem:[#allocation2 + $0x7a8] sm:$0xf]  ;;  %v11812_v44 = vld [vmem:[#allocation2 + $0x6b4] sm:$0xf0] }
 0x40f   :  { %v10556_v30 = vor.u32 %v11844_v15, %v10555_v13  ;;  %v10299_v9 = vld [vmem:[#allocation2 + $0x5a8] sm:$0xf]  ;;  %v11836_v46 = vld [vmem:[#allocation2 + $0x774] sm:$0xf0] }
 0x410   :  { %5916 = vmatpush.bf16.msrb.mxu3 %v9628_v24  ;;  %v10460_v24 = vor.u32 %v11820_v3, %v10459_v22  ;;  %v10300_v49 = vor.u32 %v11780_v40, %v10299_v9  ;;  %v10155_v50 = vld [vmem:[#allocation2 + $0x488] sm:$0xf]  ;;  %v11744_v51 = vld [vmem:[#allocation2 + $0x494] sm:$0xf0] }
 0x411   :  { %5929 = vmatpush.bf16.msra.mxu1 %v9756_v18  ;;  %v10443_v18 = vld [vmem:[#allocation2 + $0x6c8] sm:$0xf]  ;;  %v11776_v54 = vld [vmem:[#allocation2 + $0x594] sm:$0xf0]  ;;  %v10156_v61 = vor.u32 %v11744_v51, %v10155_v50 }
 0x412   :  { %5955 = vmatpush.bf16.msrb.mxu0 %v10012_v32  ;;  %5942 = vmatpush.bf16.msra.mxu2 %v9884_v59  ;;  %v11752_v32 = vld [vmem:[#allocation2 + $0x4d4] sm:$0xf0]  ;;  %v10411_v57 = vld [vmem:[#allocation2 + $0x688] sm:$0xf] }
 0x413   :  { %v10188_v59 = vor.u32 %v11752_v32, %v10187_v19  ;;  %v11808_v58 = vld [vmem:[#allocation2 + $0x694] sm:$0xf0]  ;;  %v10507_v48 = vld [vmem:[#allocation2 + $0x748] sm:$0xf] }
 0x414   :  { %5917 = vmatpush.bf16.msrb.mxu3 %v9612_v39  ;;  %v10444_v39 = vor.u32 %v11816_v29, %v10443_v18  ;;  %v11832_v0 = vld [vmem:[#allocation2 + $0x754] sm:$0xf0]  ;;  %v10412_v41 = vor.u32 %v11808_v58, %v10411_v57  ;;  %v10267_v43 = vld [vmem:[#allocation2 + $0x568] sm:$0xf]  ;;  %v9693_v58 = vld [vmem:[#allocation2 + $0xf8] sm:$0xf0] }
 0x415   :  { %5930 = vmatpush.bf16.msra.mxu1 %v9740_v42  ;;  %v10427_v42 = vld [vmem:[#allocation2 + $0x6a8] sm:$0xf]  ;;  %v11740_v23 = vld [vmem:[#allocation2 + $0x474] sm:$0xf0] }
 0x416   :  { %5956 = vmatpush.bf16.msrb.mxu0 %v9996_v38  ;;  %5943 = vmatpush.bf16.msra.mxu2 %v9868_v28  ;;  %v11748_v38 = vld [vmem:[#allocation2 + $0x4b4] sm:$0xf0]  ;;  %v10523_v28 = vld [vmem:[#allocation2 + $0x768] sm:$0xf] }
 0x417   :  { %v10172_v45 = vor.u32 %v11748_v38, %v10171_v37  ;;  %v11772_v5 = vld [vmem:[#allocation2 + $0x574] sm:$0xf0]  ;;  %v10395_v56 = vld [vmem:[#allocation2 + $0x668] sm:$0xf]  ;;  %v9821_v37 = vld [vmem:[#allocation2 + $0x1f8] sm:$0xf0] }
 0x418   :  { %5918 = vmatpush.bf16.msrb.mxu3 %v9596_v53  ;;  %v10283_v53 = vld [vmem:[#allocation2 + $0x588] sm:$0xf]  ;;  %v11804_v27 = vld [vmem:[#allocation2 + $0x674] sm:$0xf0] }
 0x419   :  { %5931 = vmatpush.bf16.msra.mxu1 %v9724_v60  ;;  %v10524_v60 = vor.u32 %v11836_v46, %v10523_v28  ;;  %v10284_v1 = vor.u32 %v11776_v54, %v10283_v53  ;;  %v10491_v22 = vld [vmem:[#allocation2 + $0x728] sm:$0xf]  ;;  %v11828_v3 = vld [vmem:[#allocation2 + $0x734] sm:$0xf0] }
 0x41a   :  { %5957 = vmatpush.bf16.msrb.mxu0 %v9980_v8  ;;  %5944 = vmatpush.bf16.msra.mxu2 %v9852_v2  ;;  %v10428_v8 = vor.u32 %v11812_v44, %v10427_v42  ;;  %v10139_v2 = vld [vmem:[#allocation2 + $0x468] sm:$0xf]  ;;  %v11736_v15 = vld [vmem:[#allocation2 + $0x454] sm:$0xf0]  ;;  %v10492_v21 = vor.u32 %v11828_v3, %v10491_v22 }
 0x41b   :  { %v10123_v13 = vld [vmem:[#allocation2 + $0x448] sm:$0xf]  ;;  %v11768_v19 = vld [vmem:[#allocation2 + $0x554] sm:$0xf0] }
 0x41c   :  { %5919 = vmatpush.bf16.msrb.mxu3 %v9580_v47  ;;  %v10140_v47 = vor.u32 %v11740_v23, %v10139_v2  ;;  %v10379_v32 = vld [vmem:[#allocation2 + $0x648] sm:$0xf]  ;;  %v10124_v18 = vor.u32 %v11736_v15, %v10123_v13  ;;  %v11732_v63 = vld [vmem:[#allocation2 + $0x434] sm:$0xf0]  ;;  %v9789_v13 = vld [vmem:[#allocation2 + $0x1b8] sm:$0xf0] }
 0x41d   :  { %5932 = vmatpush.bf16.msra.mxu1 %v9708_v12  ;;  %v5726_v12 = vpop.f32.mrf.mxu1  ;;  %v10107_v29 = vld [vmem:[#allocation2 + $0x428] sm:$0xf]  ;;  %v11764_v9 = vld [vmem:[#allocation2 + $0x534] sm:$0xf0] }
 0x41e   :  { %5958 = vmatpush.bf16.msrb.mxu0 %v9964_v6  ;;  %5945 = vmatpush.bf16.msra.mxu2 %v9836_v34  ;;  %v10508_v6 = vor.u32 %v11832_v0, %v10507_v48  ;;  %v10396_v34 = vor.u32 %v11804_v27, %v10395_v56  ;;  %v10363_v44 = vld [vmem:[#allocation2 + $0x628] sm:$0xf]  ;;  %v11728_v51 = vld [vmem:[#allocation2 + $0x414] sm:$0xf0] }
 0x41f   :  { %5920 = vmatmul.bf16.vlgmr.msrb.gmra.mxu3 %v13037_v4  ;;  %v10091_v50 = vld [vmem:[#allocation2 + $0x408] sm:$0xf]  ;;  %v11760_v2 = vld [vmem:[#allocation2 + $0x514] sm:$0xf0] }
 0x420   :  { %5964 = vmatpush.bf16.msra.mxu3 %v10204_v11  ;;  %5933 = vmatmul.bf16.vlgmr.msra.gmra.mxu1 %v13048_v7  ;;  %v13197_v11 = vld [vmem:[#allocation14] sm:$0xf]  ;;  %v10347_v23 = vld [vmem:[#allocation2 + $0x608] sm:$0xf]  ;;  %v10092_v27 = vor.u32 %v11728_v51, %v10091_v50  ;;  %v9757_v51 = vld [vmem:[#allocation2 + $0x178] sm:$0xf0] }
 0x421   :  { %5977 = vmatpush.bf16.msrb.mxu1 %v10332_v17  ;;  %5946 = vmatmul.bf16.vlgmr.msra.gmra.mxu2 %v13054_v16  ;;  %v10251_v17 = vld [vmem:[#allocation2 + $0x548] sm:$0xf]  ;;  %v5684_v26 = vperm.slane %v13197_v11, 0  ;;  %v11642_v50 = vld [vmem:[#allocation2 + $0x16c] sm:$0xf] }
 0x422   :  { %6004 = vmatpush.bf16.msra.mxu0 %v5699_v14  ;;  %5990 = vmatpush.bf16.msrb.mxu2 %v10460_v24  ;;  %v10268_v14 = vor.u32 %v11772_v5, %v10267_v43  ;;  %v11800_v24 = vld [vmem:[#allocation2 + $0x654] sm:$0xf0]  ;;  %v10252_v31 = vor.u32 %v11768_v19, %v10251_v17  ;;  %v5713_v40 = vpop.f32.mrf.mxu3  ;;  %v11690_v43 = vld [vmem:[#allocation2 + $0x2ec] sm:$0xf]  ;;  %v9949_v5 = vld [vmem:[#allocation2 + $0x2f8] sm:$0xf0] }
 0x423   :  { %5959 = vmatmul.bf16.vlgmr.msrb.gmra.mxu0 %v13060_v10  ;;  %v10380_v38 = vor.u32 %v11800_v24, %v10379_v32  ;;  %v5714_v28 = vadd.f32 %v5713_v40, %v5684_v26  ;;  %v9952_v17 = vor.u32 %v11690_v43, %v9949_v5  ;;  %v11622_v19 = vld [vmem:[#allocation2 + $0xcc] sm:$0xf]  ;;  %v9677_v32 = vld [vmem:[#allocation2 + $0xd8] sm:$0xf0] }
 0x424   :  { %5965 = vmatpush.bf16.msra.mxu3 %v10188_v59  ;;  %v11824_v59 = vld [vmem:[#allocation2 + $0x714] sm:$0xf0]  ;;  %v5739_v46 = vpop.f32.mrf.mxu2  ;;  %v9661_v40 = vld [vmem:[#allocation2 + $0xb8] sm:$0xf0]  ;;  %v11610_v43 = vld [vmem:[#allocation2 + $0x6c] sm:$0xf] }
 0x425   :  { %5978 = vmatpush.bf16.msrb.mxu1 %v10316_v36  ;;  %v11658_v36 = vld [vmem:[#allocation2 + $0x1ec] sm:$0xf]  ;;  %v5728_v54 = vpop.f32.mrf.mxu1  ;;  %v5727_v48 = vadd.f32 %v5726_v12, %v5714_v28  ;;  %v10045_v28 = vld [vmem:[#allocation2 + $0x3b8] sm:$0xf0] }
 0x426   :  { %6005 = vmatpush.bf16.msra.mxu0 %v10556_v30  ;;  %5991 = vmatpush.bf16.msrb.mxu2 %v10444_v39  ;;  %v10475_v30 = vld [vmem:[#allocation2 + $0x708] sm:$0xf]  ;;  %v5752_v42 = vpop.f32.mrf.mxu0  ;;  %v9824_v53 = vor.u32 %v11658_v36, %v9821_v37  ;;  %v11650_v12 = vld [vmem:[#allocation2 + $0x1ac] sm:$0xf]  ;;  %v9680_v36 = vor.u32 %v11622_v19, %v9677_v32  ;;  %v9645_v54 = vld [vmem:[#allocation2 + $0x98] sm:$0xf0] }
 0x427   :  { %v10235_v39 = vld [vmem:[#allocation2 + $0x528] sm:$0xf]  ;;  %v5740_v56 = vadd.f32 %v5739_v46, %v5727_v48  ;;  %v11646_v37 = vld [vmem:[#allocation2 + $0x18c] sm:$0xf]  ;;  %v10029_v48 = vld [vmem:[#allocation2 + $0x398] sm:$0xf0] }
 0x428   :  { %5966 = vmatpush.bf16.msra.mxu3 %v10172_v45  ;;  %v10476_v45 = vor.u32 %v11824_v59, %v10475_v30  ;;  %v10236_v57 = vor.u32 %v11764_v9, %v10235_v39  ;;  %v11718_v59 = vld [vmem:[#allocation2 + $0x3cc] sm:$0xf]  ;;  %v9629_v5 = vld [vmem:[#allocation2 + $0x78] sm:$0xf0] }
 0x429   :  { %5979 = vmatpush.bf16.msrb.mxu1 %v10300_v49  ;;  %v10108_v49 = vor.u32 %v11732_v63, %v10107_v29  ;;  %v13200_v15 = vadd.f32 %v5752_v42, %v5740_v56  ;;  %v9933_v29 = vld [vmem:[#allocation2 + $0x2d8] sm:$0xf0]  ;;  %v9792_v63 = vor.u32 %v11650_v12, %v9789_v13  ;;  %v11618_v9 = vld [vmem:[#allocation2 + $0xac] sm:$0xf] }
 0x42a   :  { %6006 = vmatpush.bf16.msra.mxu0 %v10540_v25  ;;  %5992 = vmatpush.bf16.msrb.mxu2 %v10428_v8  ;;  %v11796_v25 = vld [vmem:[#allocation2 + $0x634] sm:$0xf0]  ;;  %v11626_v8 = vld [vmem:[#allocation2 + $0xec] sm:$0xf]  ;;  %v5715_v24 = vpop.f32.mrf.mxu3  ;;  %v9725_v13 = vld [vmem:[#allocation2 + $0x138] sm:$0xf0] }
 0x42b   :  { %v10364_v0 = vor.u32 %v11796_v25, %v10363_v44  ;;  %v9696_v3 = vor.u32 %v11626_v8, %v9693_v58  ;;  %v11682_v44 = vld [vmem:[#allocation2 + $0x2ac] sm:$0xf]  ;;  %v9917_v25 = vld [vmem:[#allocation2 + $0x2b8] sm:$0xf0] }
 0x42c   :  { %5967 = vmatpush.bf16.msra.mxu3 %v10156_v61  ;;  %v9805_v61 = vld [vmem:[#allocation2 + $0x1d8] sm:$0xf0]  ;;  %v5741_v30 = vpop.f32.mrf.mxu2  ;;  %v9920_v8 = vor.u32 %v11682_v44, %v9917_v25  ;;  %v11678_v58 = vld [vmem:[#allocation2 + $0x28c] sm:$0xf] }
 0x42d   :  { %5980 = vmatpush.bf16.msrb.mxu1 %v10284_v1  ;;  %v10219_v1 = vld [vmem:[#allocation2 + $0x508] sm:$0xf]  ;;  %v11634_v12 = vld [vmem:[#allocation2 + $0x12c] sm:$0xf]  ;;  %v9613_v19 = vld [vmem:[#allocation2 + $0x58] sm:$0xf0] }
 0x42e   :  { %6007 = vmatpush.bf16.msra.mxu0 %v10524_v60  ;;  %5993 = vmatpush.bf16.msrb.mxu2 %v10412_v41  ;;  %v11654_v60 = vld [vmem:[#allocation2 + $0x1cc] sm:$0xf]  ;;  %v11792_v41 = vld [vmem:[#allocation2 + $0x614] sm:$0xf0]  ;;  %v9728_v30 = vor.u32 %v11634_v12, %v9725_v13 }
 0x42f   :  { %v9808_v22 = vor.u32 %v11654_v60, %v9805_v61  ;;  %v9901_v60 = vld [vmem:[#allocation2 + $0x298] sm:$0xf0]  ;;  %v11710_v61 = vld [vmem:[#allocation2 + $0x38c] sm:$0xf] }
 0x430   :  { %5968 = vmatpush.bf16.msra.mxu3 %v10140_v47  ;;  %v10077_v47 = vld [vmem:[#allocation2 + $0x3f8] sm:$0xf0]  ;;  %v10032_v56 = vor.u32 %v11710_v61, %v10029_v48  ;;  %v11670_v24 = vld [vmem:[#allocation2 + $0x24c] sm:$0xf] }
 0x431   :  { %5981 = vmatpush.bf16.msrb.mxu1 %v10268_v14  ;;  %v10220_v14 = vor.u32 %v11760_v2, %v10219_v1  ;;  %v11638_v2 = vld [vmem:[#allocation2 + $0x14c] sm:$0xf] }
 0x432   :  { %6008 = vmatpush.bf16.msra.mxu0 %v10508_v6  ;;  %5994 = vmatpush.bf16.msrb.mxu2 %v10396_v34  ;;  %v11722_v6 = vld [vmem:[#allocation2 + $0x3ec] sm:$0xf]  ;;  %v10348_v34 = vor.u32 %v11792_v41, %v10347_v23  ;;  %v9741_v23 = vld [vmem:[#allocation2 + $0x158] sm:$0xf0]  ;;  %v9904_v41 = vor.u32 %v11678_v58, %v9901_v60  ;;  %v5182_v60 = vunpack.c.h.b16 %v13189_v35 }
 0x433   :  { %v10080_v26 = vor.u32 %v11722_v6, %v10077_v47  ;;  %v9885_v6 = vld [vmem:[#allocation2 + $0x278] sm:$0xf0]  ;;  %v11706_v47 = vld [vmem:[#allocation2 + $0x36c] sm:$0xf] }
 0x434   :  { %5969 = vmatpush.bf16.msra.mxu3 %v10124_v18  ;;  %v11686_v18 = vld [vmem:[#allocation2 + $0x2cc] sm:$0xf] }
 0x435   :  { %5982 = vmatpush.bf16.msrb.mxu1 %v10252_v31  ;;  %v10061_v31 = vld [vmem:[#allocation2 + $0x3d8] sm:$0xf0]  ;;  %v9936_v39 = vor.u32 %v11686_v18, %v9933_v29  ;;  %v11702_v18 = vld [vmem:[#allocation2 + $0x34c] sm:$0xf] }
 0x436   :  { %6009 = vmatpush.bf16.msra.mxu0 %v10492_v21  ;;  %5995 = vmatpush.bf16.msrb.mxu2 %v10380_v38  ;;  %v5754_v21 = vpop.f32.mrf.mxu0  ;;  %v9773_v38 = vld [vmem:[#allocation2 + $0x198] sm:$0xf0]  ;;  %v10064_v42 = vor.u32 %v11718_v59, %v10061_v31  ;;  %v11666_v25 = vld [vmem:[#allocation2 + $0x22c] sm:$0xf] }
 0x437   :  { %v9776_v46 = vor.u32 %v11646_v37, %v9773_v38  ;;  %v9869_v21 = vld [vmem:[#allocation2 + $0x258] sm:$0xf0] }
 0x438   :  { %5970 = vmatpush.bf16.msra.mxu3 %v10108_v49  ;;  %v9664_v49 = vor.u32 %v11618_v9, %v9661_v40  ;;  %v9997_v29 = vld [vmem:[#allocation2 + $0x358] sm:$0xf0]  ;;  %v9872_v38 = vor.u32 %v11670_v24, %v9869_v21  ;;  %v11786_v9 = vld [vmem:[#allocation2 + $0x5ec] sm:$0xf] }
 0x439   :  { %5983 = vmatpush.bf16.msrb.mxu1 %v10236_v57  ;;  %v9709_v37 = vld [vmem:[#allocation2 + $0x118] sm:$0xf0]  ;;  %v11750_v21 = vld [vmem:[#allocation2 + $0x4cc] sm:$0xf] }
 0x43a   :  { %6010 = vmatpush.bf16.msra.mxu0 %v10476_v45  ;;  %5996 = vmatpush.bf16.msrb.mxu2 %v10364_v0  ;;  %v11714_v45 = vld [vmem:[#allocation2 + $0x3ac] sm:$0xf]  ;;  %v9760_v0 = vor.u32 %v11642_v50, %v9757_v51  ;;  %v10333_v40 = vld [vmem:[#allocation2 + $0x5f8] sm:$0xf0] }
 0x43b   :  { %v10048_v57 = vor.u32 %v11714_v45, %v10045_v28  ;;  %v9853_v45 = vld [vmem:[#allocation2 + $0x238] sm:$0xf0]  ;;  %v10336_v58 = vor.u32 %v11786_v9, %v10333_v40 }
 0x43c   :  { %5971 = vmatpush.bf16.msra.mxu3 %v10092_v27  ;;  %v11674_v27 = vld [vmem:[#allocation2 + $0x26c] sm:$0xf]  ;;  %v9856_v48 = vor.u32 %v11666_v25, %v9853_v45  ;;  %v10285_v9 = vld [vmem:[#allocation2 + $0x598] sm:$0xf0] }
 0x43d   :  { %10563 = vmatmul.msk.bf16.vlgmr.msra.gmra.mxu0 %vm4066_vm2, %v13159_v62  ;;  %5984 = vmatpush.bf16.msrb.mxu1 %v10220_v14  ;;  %v9632_v14 = vor.u32 %v11610_v43, %v9629_v5  ;;  %v5778_v59 = vpop.f32.mrf.mxu1  ;;  %v11694_v43 = vld [vmem:[#allocation2 + $0x30c] sm:$0xf]  ;;  %v10429_v45 = vld [vmem:[#allocation2 + $0x6b8] sm:$0xf0] }
 0x43e   :  { %6029 = vmatpush.bf16.msrb.mxu0 %v9824_v53  ;;  %5997 = vmatpush.bf16.msrb.mxu2 %v10348_v34  ;;  %v11614_v53 = vld [vmem:[#allocation2 + $0x8c] sm:$0xf]  ;;  %v9888_v34 = vor.u32 %v11674_v27, %v9885_v6  ;;  %v9965_v27 = vld [vmem:[#allocation2 + $0x318] sm:$0xf0] }
 0x43f   :  { %5972 = vmatmul.bf16.vlgmr.msra.gmra.mxu3 %v13116_v52  ;;  %v9648_v1 = vor.u32 %v11614_v53, %v9645_v54  ;;  %v11598_v53 = vld [vmem:[#allocation2 + $0xc] sm:$0xf]  ;;  %v9581_v54 = vld [vmem:[#allocation2 + $0x18] sm:$0xf0] }
 0x440   :  { %6016 = vmatpush.bf16.msrb.mxu3 %v9696_v3  ;;  %5985 = vmatmul.bf16.vlgmr.msrb.gmra.mxu1 %v13119_v55  ;;  %v9744_v3 = vor.u32 %v11638_v2, %v9741_v23  ;;  %v10317_v2 = vld [vmem:[#allocation2 + $0x5d8] sm:$0xf0]  ;;  %v11662_v23 = vld [vmem:[#allocation2 + $0x20c] sm:$0xf]  ;;  %v9584_v35 = vor.u32 %v11598_v53, %v9581_v54 }
 0x441   :  { %6042 = vmatpush.bf16.msra.mxu1 %v9952_v17  ;;  %5998 = vmatmul.bf16.vlgmr.msrb.gmra.mxu2 %v13150_v33  ;;  %v11606_v17 = vld [vmem:[#allocation2 + $0x4c] sm:$0xf] }
 0x442   :  { %6030 = vmatpush.bf16.msrb.mxu0 %v9808_v22  ;;  %6055 = vmatpush.bf16.msra.mxu2 %v10080_v26  ;;  %v10013_v22 = vld [vmem:[#allocation2 + $0x378] sm:$0xf0]  ;;  %v5804_v26 = vpop.f32.mrf.mxu0  ;;  %v9616_v31 = vor.u32 %v11606_v17, %v9613_v19  ;;  %v5765_v44 = vpop.f32.mrf.mxu3  ;;  %v11818_v6 = vld [vmem:[#allocation2 + $0x6ec] sm:$0xf] }
 0x443   :  { %v10016_v32 = vor.u32 %v11706_v47, %v10013_v22  ;;  %v5766_v28 = vadd.f32 %v5765_v44, %v13200_v15  ;;  %v10461_v47 = vld [vmem:[#allocation2 + $0x6f8] sm:$0xf0]  ;;  %v11778_v17 = vld [vmem:[#allocation2 + $0x5ac] sm:$0xf] }
 0x444   :  { %6017 = vmatpush.bf16.msrb.mxu3 %v9680_v36  ;;  %v11630_v36 = vld [vmem:[#allocation2 + $0x10c] sm:$0xf]  ;;  %v5791_v50 = vpop.f32.mrf.mxu2  ;;  %v10301_v19 = vld [vmem:[#allocation2 + $0x5b8] sm:$0xf0]  ;;  %v10464_v24 = vor.u32 %v11818_v6, %v10461_v47 }
 0x445   :  { %6043 = vmatpush.bf16.msra.mxu1 %v9936_v39  ;;  %v9597_v39 = vld [vmem:[#allocation2 + $0x38] sm:$0xf0]  ;;  %v9712_v51 = vor.u32 %v11630_v36, %v9709_v37  ;;  %v5779_v61 = vadd.f32 %v5778_v59, %v5766_v28  ;;  %v5780_v22 = vpop.f32.mrf.mxu1  ;;  %v10304_v37 = vor.u32 %v11778_v17, %v10301_v19  ;;  %v11810_v25 = vld [vmem:[#allocation2 + $0x6ac] sm:$0xf] }
 0x446   :  { %6031 = vmatpush.bf16.msrb.mxu0 %v9792_v63  ;;  %6056 = vmatpush.bf16.msra.mxu2 %v10064_v42  ;;  %v11602_v63 = vld [vmem:[#allocation2 + $0x2c] sm:$0xf]  ;;  %v10000_v42 = vor.u32 %v11702_v18, %v9997_v29  ;;  %v10189_v18 = vld [vmem:[#allocation2 + $0x4d8] sm:$0xf0]  ;;  %v10432_v53 = vor.u32 %v11810_v25, %v10429_v45 }
 0x447   :  { %v10445_v59 = vld [vmem:[#allocation2 + $0x6d8] sm:$0xf0]  ;;  %v11838_v28 = vld [vmem:[#allocation2 + $0x78c] sm:$0xf] }
 0x448   :  { %6018 = vmatpush.bf16.msrb.mxu3 %v9664_v49  ;;  %v9981_v49 = vld [vmem:[#allocation2 + $0x338] sm:$0xf0]  ;;  %v11742_v54 = vld [vmem:[#allocation2 + $0x48c] sm:$0xf] }
 0x449   :  { %6044 = vmatpush.bf16.msra.mxu1 %v9920_v8  ;;  %v9600_v8 = vor.u32 %v11602_v63, %v9597_v39  ;;  %v10557_v36 = vld [vmem:[#allocation2 + $0x7b8] sm:$0xf0]  ;;  %v11774_v39 = vld [vmem:[#allocation2 + $0x58c] sm:$0xf] }
 0x44a   :  { %6032 = vmatpush.bf16.msrb.mxu0 %v9776_v46  ;;  %6057 = vmatpush.bf16.msra.mxu2 %v10048_v57  ;;  %v11698_v46 = vld [vmem:[#allocation2 + $0x32c] sm:$0xf]  ;;  %v5806_v5 = vpop.f32.mrf.mxu0  ;;  %v5767_v29 = vpop.f32.mrf.mxu3  ;;  %v10381_v19 = vld [vmem:[#allocation2 + $0x658] sm:$0xf0] }
 0x44b   :  { %v11754_v57 = vld [vmem:[#allocation2 + $0x4ec] sm:$0xf]  ;;  %v9984_v15 = vor.u32 %v11698_v46, %v9981_v49  ;;  %v10541_v46 = vld [vmem:[#allocation2 + $0x798] sm:$0xf0]  ;;  %v10288_v49 = vor.u32 %v11774_v39, %v10285_v9 }
 0x44c   :  { %6019 = vmatpush.bf16.msrb.mxu3 %v9648_v1  ;;  %v11782_v1 = vld [vmem:[#allocation2 + $0x5cc] sm:$0xf]  ;;  %v10397_v5 = vld [vmem:[#allocation2 + $0x678] sm:$0xf0] }
 0x44d   :  { %6045 = vmatpush.bf16.msra.mxu1 %v9904_v41  ;;  %v9837_v41 = vld [vmem:[#allocation2 + $0x218] sm:$0xf0]  ;;  %v11762_v22 = vld [vmem:[#allocation2 + $0x52c] sm:$0xf] }
 0x44e   :  { %6033 = vmatpush.bf16.msrb.mxu0 %v9760_v0  ;;  %6058 = vmatpush.bf16.msra.mxu2 %v10032_v56  ;;  %v10205_v0 = vld [vmem:[#allocation2 + $0x4f8] sm:$0xf0]  ;;  %v5792_v56 = vadd.f32 %v5791_v50, %v5779_v61  ;;  %v11834_v61 = vld [vmem:[#allocation2 + $0x76c] sm:$0xf] }
 0x44f   :  { %v10208_v13 = vor.u32 %v11754_v57, %v10205_v0  ;;  %v10157_v57 = vld [vmem:[#allocation2 + $0x498] sm:$0xf0]  ;;  %v11798_v17 = vld [vmem:[#allocation2 + $0x64c] sm:$0xf] }
 0x450   :  { %6020 = vmatpush.bf16.msrb.mxu3 %v9632_v14  ;;  %v10320_v14 = vor.u32 %v11782_v1, %v10317_v2  ;;  %v13209_v12 = vadd.f32 %v5804_v26, %v5792_v56  ;;  %v11842_v26 = vld [vmem:[#allocation2 + $0x7ac] sm:$0xf]  ;;  %v10253_v2 = vld [vmem:[#allocation2 + $0x558] sm:$0xf0] }
 0x451   :  { %6046 = vmatpush.bf16.msra.mxu1 %v9888_v34  ;;  %v9840_v34 = vor.u32 %v11662_v23, %v9837_v41  ;;  %v10560_v44 = vor.u32 %v11842_v26, %v10557_v36  ;;  %v11766_v1 = vld [vmem:[#allocation2 + $0x54c] sm:$0xf]  ;;  %v10141_v23 = vld [vmem:[#allocation2 + $0x478] sm:$0xf0] }
 0x452   :  { %6034 = vmatpush.bf16.msrb.mxu0 %v9744_v3  ;;  %6059 = vmatpush.bf16.msra.mxu2 %v10016_v32  ;;  %v5434_v3 = vpack.c.b16 %v5182_v60, %v5182_v60  ;;  %v9968_v32 = vor.u32 %v11694_v43, %v9965_v27  ;;  %v10413_v60 = vld [vmem:[#allocation2 + $0x698] sm:$0xf0]  ;;  %v11802_v43 = vld [vmem:[#allocation2 + $0x66c] sm:$0xf]  ;;  %v10256_v6 = vor.u32 %v11766_v1, %v10253_v2 }
 0x453   :  { %v11830_v56 = vld [vmem:[#allocation2 + $0x74c] sm:$0xf]  ;;  %v10509_v27 = vld [vmem:[#allocation2 + $0x758] sm:$0xf0] }
 0x454   :  { %6021 = vmatpush.bf16.msrb.mxu3 %v9616_v31  ;;  %v5793_v31 = vpop.f32.mrf.mxu2  ;;  %v5702_v63 = vsel %vm4070_vm1, %v5434_v3, 0  ;;  %v10400_v3 = vor.u32 %v11802_v43, %v10397_v5  ;;  %v11730_v26 = vld [vmem:[#allocation2 + $0x42c] sm:$0xf]  ;;  %v10109_v36 = vld [vmem:[#allocation2 + $0x438] sm:$0xf0] }
 0x455   :  { %6047 = vmatpush.bf16.msra.mxu1 %v9872_v38  ;;  %v10192_v38 = vor.u32 %v11750_v21, %v10189_v18  ;;  %v10493_v21 = vld [vmem:[#allocation2 + $0x738] sm:$0xf0]  ;;  %v10112_v25 = vor.u32 %v11730_v26, %v10109_v36  ;;  %v11858_v2 = vld [vmem:[%s13519_s13 + $0x68] sm:$0xff] }
 0x456   :  { %6035 = vmatpush.bf16.msrb.mxu0 %v9728_v30  ;;  %6060 = vmatpush.bf16.msra.mxu2 %v10000_v42  ;;  %v11814_v30 = vld [vmem:[#allocation2 + $0x6cc] sm:$0xf]  ;;  %v10221_v31 = vld [vmem:[#allocation2 + $0x518] sm:$0xf0] }
 0x457   :  { %v10448_v40 = vor.u32 %v11814_v30, %v10445_v59  ;;  %v11746_v42 = vld [vmem:[#allocation2 + $0x4ac] sm:$0xf]  ;;  %v10365_v39 = vld [vmem:[#allocation2 + $0x638] sm:$0xf0] }
 0x458   :  { %6022 = vmatpush.bf16.msrb.mxu3 %v9600_v8  ;;  %v10269_v8 = vld [vmem:[#allocation2 + $0x578] sm:$0xf0]  ;;  %v11758_v59 = vld [vmem:[#allocation2 + $0x50c] sm:$0xf] }
 0x459   :  { %6048 = vmatpush.bf16.msra.mxu1 %v9856_v48  ;;  %v10525_v48 = vld [vmem:[#allocation2 + $0x778] sm:$0xf0] }
 0x45a   :  { %6036 = vmatpush.bf16.msrb.mxu0 %v9712_v51  ;;  %6061 = vmatpush.bf16.msra.mxu2 %v9984_v15  ;;  %v11770_v51 = vld [vmem:[#allocation2 + $0x56c] sm:$0xf]  ;;  %v10528_v41 = vor.u32 %v11834_v61, %v10525_v48  ;;  %v5685_v61 = vperm.slane %v13197_v11, 1  ;;  %v11859_v48 = vld [vmem:[%s13519_s13 + $0x70] sm:$0xff]  ;;  %v11864_v36 = vld [vmem:[%s13519_s13 + $0x98] sm:$0xff] }
 0x45b   :  { %v10272_v0 = vor.u32 %v11770_v51, %v10269_v8  ;;  %v11738_v15 = vld [vmem:[#allocation2 + $0x46c] sm:$0xf]  ;;  %v11860_v51 = vld [vmem:[%s13519_s13 + $0x78] sm:$0xff] }
 0x45c   :  { %6023 = vmatpush.bf16.msrb.mxu3 %v9584_v35  ;;  %v10144_v47 = vor.u32 %v11738_v15, %v10141_v23  ;;  %v10237_v35 = vld [vmem:[#allocation2 + $0x538] sm:$0xf0]  ;;  %v11790_v8 = vld [vmem:[#allocation2 + $0x60c] sm:$0xf]  ;;  %v11857_v15 = vld [vmem:[%s13519_s13 + $0x60] sm:$0xff] }
 0x45d   :  { %6037 = vmatmul.bf16.vlgmr.msrb.gmra.mxu0 %v13048_v7  ;;  %6049 = vmatpush.bf16.msra.mxu1 %v9840_v34  ;;  %v10173_v7 = vld [vmem:[#allocation2 + $0x4b8] sm:$0xf0]  ;;  %v10512_v34 = vor.u32 %v11830_v56, %v10509_v27  ;;  %v10240_v18 = vor.u32 %v11762_v22, %v10237_v35  ;;  %v5830_v29 = vpop.f32.mrf.mxu1  ;;  %v11855_v56 = vld [vmem:[%s13519_s13 + $0x50] sm:$0xff] }
 0x45e   :  { %6081 = vmatpush.bf16.msra.mxu0 %v10336_v58  ;;  %6062 = vmatpush.bf16.msra.mxu2 %v9968_v32  ;;  %v10176_v50 = vor.u32 %v11746_v42, %v10173_v7  ;;  %v11806_v58 = vld [vmem:[#allocation2 + $0x68c] sm:$0xf]  ;;  %v10477_v42 = vld [vmem:[#allocation2 + $0x718] sm:$0xf0]  ;;  %v10224_v7 = vor.u32 %v11758_v59, %v10221_v31  ;;  %v11867_v22 = vld [vmem:[%s13519_s13 + $0xb0] sm:$0xff]  ;;  %v6120_v59 = vmax.f32 %v13209_v12, 0.0 }
 0x45f   :  { %6024 = vmatmul.bf16.vlgmr.msrb.gmra.mxu3 %v13037_v4  ;;  %v10544_v4 = vor.u32 %v11838_v28, %v10541_v46  ;;  %v11726_v28 = vld [vmem:[#allocation2 + $0x40c] sm:$0xf]  ;;  %v10093_v46 = vld [vmem:[#allocation2 + $0x418] sm:$0xf0] }
 0x460   :  { %6068 = vmatpush.bf16.msra.mxu3 %v10208_v13  ;;  %6050 = vmatmul.bf16.vlgmr.msra.gmra.mxu1 %v13054_v16  ;;  %v10160_v16 = vor.u32 %v11742_v54, %v10157_v57  ;;  %v10125_v13 = vld [vmem:[#allocation2 + $0x458] sm:$0xf0]  ;;  %v10096_v57 = vor.u32 %v11726_v28, %v10093_v46  ;;  %v5686_v46 = vperm.slane %v13197_v11, 2 }
 0x461   :  { %6094 = vmatpush.bf16.msrb.mxu1 %v10464_v24  ;;  %6063 = vmatmul.bf16.vlgmr.msra.gmra.mxu2 %v13060_v10  ;;  %v10416_v10 = vor.u32 %v11806_v58, %v10413_v60  ;;  %v11826_v24 = vld [vmem:[#allocation2 + $0x72c] sm:$0xf] }
 0x462   :  { %6082 = vmatpush.bf16.msra.mxu0 %v10320_v14  ;;  %6108 = vmatpush.bf16.msrb.mxu2 %v5702_v63  ;;  %v11734_v14 = vld [vmem:[#allocation2 + $0x44c] sm:$0xf]  ;;  %v13216_v32 = vpop.f32.mrf.mxu0  ;;  %v10384_v63 = vor.u32 %v11798_v17, %v10381_v19  ;;  %v5817_v9 = vpop.f32.mrf.mxu3 }
 0x463   :  { %v10128_v30 = vor.u32 %v11734_v14, %v10125_v13  ;;  %v5818_v1 = vadd.f32 %v5817_v9, %v5685_v61  ;;  %v11866_v19 = vld [vmem:[%s13519_s13 + $0xa8] sm:$0xff]  ;;  %v11863_v9 = vld [vmem:[%s13519_s13 + $0x90] sm:$0xff] }
 0x464   :  { %6069 = vmatpush.bf16.msra.mxu3 %v10192_v38  ;;  %v11794_v38 = vld [vmem:[#allocation2 + $0x62c] sm:$0xf] }
 0x465   :  { %6095 = vmatpush.bf16.msrb.mxu1 %v10448_v40  ;;  %v11822_v40 = vld [vmem:[#allocation2 + $0x70c] sm:$0xf]  ;;  %v10368_v45 = vor.u32 %v11794_v38, %v10365_v39  ;;  %v5832_v54 = vpop.f32.mrf.mxu1  ;;  %v13291_v38 = vpack.c.bf16 %v6120_v59, %v6120_v59 }
 0x466   :  { %6083 = vmatpush.bf16.msra.mxu0 %v10304_v37  ;;  %6109 = vmatpush.bf16.msrb.mxu2 %v10560_v44  ;;  %v10496_v37 = vor.u32 %v11826_v24, %v10493_v21  ;;  %v5843_v44 = vpop.f32.mrf.mxu2  ;;  %v11853_v24 = vld [vmem:[%s13519_s13 + $0x40] sm:$0xff] }
 0x468   :  { %6070 = vmatpush.bf16.msra.mxu3 %v10176_v50 }
 0x469   :  { %6096 = vmatpush.bf16.msrb.mxu1 %v10432_v53  ;;  %v10349_v53 = vld [vmem:[#allocation2 + $0x618] sm:$0xf0] }
 0x46a   :  { %6084 = vmatpush.bf16.msra.mxu0 %v10288_v49  ;;  %6110 = vmatpush.bf16.msrb.mxu2 %v10544_v4  ;;  %v10480_v49 = vor.u32 %v11822_v40, %v10477_v42  ;;  %v5858_v50 = vpop.f32.mrf.mxu0  ;;  %v11852_v4 = vld [vmem:[%s13519_s13 + $0x38] sm:$0xff]  ;;  %v10352_v58 = vor.u32 %v11790_v8, %v10349_v53  ;;  %v5819_v60 = vpop.f32.mrf.mxu3  ;;  %v11862_v42 = vld [vmem:[%s13519_s13 + $0x88] sm:$0xff] }
 0x46c   :  { %6071 = vmatpush.bf16.msra.mxu3 %v10160_v16  ;;  %v11868_v16 = vld [vmem:[%s13519_s13 + $0xb8] sm:$0xff] }
 0x46d   :  { %6097 = vmatpush.bf16.msrb.mxu1 %v10416_v10  ;;  %v5831_v10 = vadd.f32 %v5830_v29, %v5818_v1 }
 0x46e   :  { %6085 = vmatpush.bf16.msra.mxu0 %v10272_v0  ;;  %6111 = vmatpush.bf16.msrb.mxu2 %v10528_v41  ;;  %v5845_v0 = vpop.f32.mrf.mxu2  ;;  %v11848_v41 = vld [vmem:[%s13519_s13 + $0x18] sm:$0xff] }
 0x46f   :  { %v5844_v23 = vadd.f32 %v5843_v44, %v5831_v10 }
 0x470   :  { %6072 = vmatpush.bf16.msra.mxu3 %v10144_v47 }
 0x471   :  { %6098 = vmatpush.bf16.msrb.mxu1 %v10400_v3  ;;  %v5857_v5 = vadd.f32 %v13216_v32, %v5844_v23  ;;  %v11854_v3 = vld [vmem:[%s13519_s13 + $0x48] sm:$0xff] }
 0x472   :  { %6086 = vmatpush.bf16.msra.mxu0 %v10256_v6  ;;  %6112 = vmatpush.bf16.msrb.mxu2 %v10512_v34  ;;  %v11847_v6 = vld [vmem:[%s13519_s13 + $0x10] sm:$0xff]  ;;  %v11846_v34 = vld [vmem:[%s13519_s13 + $0x8] sm:$0xff] }
 0x474   :  { %6073 = vmatpush.bf16.msra.mxu3 %v10128_v30  ;;  %v11845_v30 = vld [vmem:[%s13519_s13] sm:$0xff] }
 0x475   :  { %6099 = vmatpush.bf16.msrb.mxu1 %v10384_v63 }
 0x476   :  { %6087 = vmatpush.bf16.msra.mxu0 %v10240_v18  ;;  %6113 = vmatpush.bf16.msrb.mxu2 %v10496_v37  ;;  %v11865_v18 = vld [vmem:[%s13519_s13 + $0xa0] sm:$0xff] }
 0x478   :  { %6074 = vmatpush.bf16.msra.mxu3 %v10112_v25 }
 0x479   :  { %6100 = vmatpush.bf16.msrb.mxu1 %v10368_v45  ;;  %v11861_v45 = vld [vmem:[%s13519_s13 + $0x80] sm:$0xff] }
 0x47a   :  { %6088 = vmatpush.bf16.msra.mxu0 %v10224_v7  ;;  %6114 = vmatpush.bf16.msrb.mxu2 %v10480_v49 }
 0x47c   :  { %6075 = vmatpush.bf16.msra.mxu3 %v10096_v57 }
 0x47d   :  { %6089 = vmatmul.bf16.vlgmr.msra.gmra.mxu0 %v13119_v55  ;;  %10564 = vmatmul.msk.bf16.vlgmr.msrb.gmra.mxu2 %vm4066_vm2, %v13159_v62  ;;  %v11851_v55 = vld [vmem:[%s13519_s13 + $0x30] sm:$0xff]  ;;  %v11850_v62 = vld [vmem:[%s13519_s13 + $0x28] sm:$0xff]  ;;  %v5882_v43 = vpop.f32.mrf.mxu1 }
 0x47e   :  { %6402 = vmatpush.bf16.msra.mxu2 %v11860_v51  ;;  %6101 = vmatpush.bf16.msrb.mxu1 %v10352_v58 }
 0x47f   :  { %6415 = vmatpush.bf16.msrb.mxu0 %v11868_v16  ;;  %6076 = vmatmul.bf16.vlgmr.msra.gmra.mxu3 %v13116_v52  ;;  %v11849_v52 = vld [vmem:[%s13519_s13 + $0x20] sm:$0xff] }
 0x480   :  { %6389 = vmatpush.bf16.msrb.mxu3 %v11852_v4  ;;  %v5908_v27 = vpop.f32.mrf.mxu0 }
 0x481   :  { %6102 = vmatmul.bf16.vlgmr.msrb.gmra.mxu1 %v13150_v33  ;;  %v11856_v33 = vld [vmem:[%s13519_s13 + $0x58] sm:$0xff] }
 0x482   :  { %6403 = vmatpush.bf16.msra.mxu2 %v11859_v48  ;;  %v5869_v47 = vpop.f32.mrf.mxu3  ;;  %v6186_v48 = vld [vmem:[%s13519_s13 + $0xf8] sm:$0x3] }
 0x483   :  { %v5870_v35 = vadd.f32 %v5869_v47, %v5857_v5  ;;  %6416 = vmatpush.bf16.msrb.mxu0 %v11867_v22  ;;  %v11873_v5 = vld [vmem:[%s13519_s13 + $0xe0] sm:$0xff]  ;;  %v11871_v22 = vld [vmem:[%s13519_s13 + $0xd0] sm:$0xff] }
 0x484   :  { %6390 = vmatpush.bf16.msrb.mxu3 %v11851_v55  ;;  %v5895_v14 = vpop.f32.mrf.mxu2  ;;  %v6317_v55 = vunpack.c.l.b16 %v6186_v48 }
 0x485   :  { %v5883_v13 = vadd.f32 %v5882_v43, %v5870_v35  ;;  %v5884_v17 = vpop.f32.mrf.mxu1  ;;  %v11874_v43 = vld [vmem:[%s13519_s13 + $0xe8] sm:$0xff] }
 0x486   :  { %6404 = vmatpush.bf16.msra.mxu2 %v11858_v2  ;;  %v6349_v2 = vpack.c.b16 %v6317_v55, %v6317_v55 }
 0x487   :  { %v5896_v32 = vadd.f32 %v5895_v14, %v5883_v13  ;;  %6417 = vmatpush.bf16.msrb.mxu0 %v11866_v19 }
 0x488   :  { %6391 = vmatpush.bf16.msrb.mxu3 %v11850_v62  ;;  %v5910_v21 = vpop.f32.mrf.mxu0  ;;  %v6387_v10 = vsel %vm6385_vm3, %v6349_v2, 0 }
 0x489   :  { %v5909_v29 = vadd.f32 %v5908_v27, %v5896_v32  ;;  %6428 = vmatpush.bf16.msra.mxu1 %v6387_v10  ;;  %v11872_v27 = vld [vmem:[%s13519_s13 + $0xd8] sm:$0xff]  ;;  %v5687_v32 = vperm.slane %v13197_v11, 3 }
 0x48a   :  { %6405 = vmatpush.bf16.msra.mxu2 %v11857_v15  ;;  %v5871_v31 = vpop.f32.mrf.mxu3  ;;  %v6191_v11 = vld [vmem:[#allocation22] sm:$0x1] }
 0x48b   :  { %v6121_v63 = vmax.f32 %v5909_v29, 0.0  ;;  %6418 = vmatpush.bf16.msrb.mxu0 %v11865_v18 }
 0x48c   :  { %6392 = vmatpush.bf16.msrb.mxu3 %v11849_v52  ;;  %v5897_v26 = vpop.f32.mrf.mxu2  ;;  %v11875_v52 = vld [vmem:[%s13519_s13 + $0xf0] sm:$0xff] }
 0x48d   :  { %v13289_v37 = vpack.c.bf16 %v6121_v63, %v6121_v63  ;;  %6429 = vmatpush.bf16.msra.mxu1 %v11875_v52 }
 0x48e   :  { %6406 = vmatpush.bf16.msra.mxu2 %v11856_v33 }
 0x48f   :  { %6419 = vmatpush.bf16.msrb.mxu0 %v11864_v36 }
 0x490   :  { %6393 = vmatpush.bf16.msrb.mxu3 %v11848_v41 }
 0x491   :  { %6430 = vmatpush.bf16.msra.mxu1 %v11874_v43 }
 0x492   :  { %6407 = vmatpush.bf16.msra.mxu2 %v11855_v56 }
 0x493   :  { %6420 = vmatpush.bf16.msrb.mxu0 %v11863_v9 }
 0x494   :  { %6394 = vmatpush.bf16.msrb.mxu3 %v11847_v6 }
 0x495   :  { %6431 = vmatpush.bf16.msra.mxu1 %v11873_v5 }
 0x496   :  { %6408 = vmatpush.bf16.msra.mxu2 %v11854_v3  ;;  %v11870_v3 = vld [vmem:[%s13519_s13 + $0xc8] sm:$0xff] }
 0x497   :  { %6421 = vmatpush.bf16.msrb.mxu0 %v11862_v42 }
 0x498   :  { %6395 = vmatpush.bf16.msrb.mxu3 %v11846_v34  ;;  %v11869_v34 = vld [vmem:[%s13519_s13 + $0xc0] sm:$0xff] }
 0x499   :  { %6432 = vmatpush.bf16.msra.mxu1 %v11872_v27 }
 0x49a   :  { %6409 = vmatpush.bf16.msra.mxu2 %v11853_v24 }
 0x49b   :  { %6422 = vmatpush.bf16.msrb.mxu0 %v11861_v45 }
 0x49c   :  { %6396 = vmatpush.bf16.msrb.mxu3 %v11845_v30 }
 0x49d   :  { %6410 = vmatmul.bf16.vlgmr.msra.gmra.mxu2 %v13289_v37  ;;  %v5934_v12 = vpop.f32.mrf.mxu1  ;;  %6433 = vmatpush.bf16.msra.mxu1 %v11871_v22 }
 0x49f   :  { %6397 = vmatmul.bf16.vlgmr.msrb.gmra.mxu3 %v13291_v38 }
 0x4a0   :  { %v5960_v39 = vpop.f32.mrf.mxu0 }
 0x4a1   :  { %6434 = vmatpush.bf16.msra.mxu1 %v11870_v3 }
 0x4a2   :  { %v5921_v40 = vpop.f32.mrf.mxu3 }
 0x4a3   :  { %v5922_v50 = vadd.f32 %v5921_v40, %v5686_v46 }
 0x4a4   :  { %v5947_v7 = vpop.f32.mrf.mxu2 }
 0x4a5   :  { %v5936_v44 = vpop.f32.mrf.mxu1  ;;  %v5935_v51 = vadd.f32 %v5934_v12, %v5922_v50  ;;  %6435 = vmatpush.bf16.msra.mxu1 %v11869_v34 }
 0x4a7   :  { %v5948_v53 = vadd.f32 %v5947_v7, %v5935_v51 }
 0x4a8   :  { %v5962_v25 = vpop.f32.mrf.mxu0 }
 0x4a9   :  { %v5961_v57 = vadd.f32 %v5960_v39, %v5948_v53 }
 0x4aa   :  { %v5923_v28 = vpop.f32.mrf.mxu3 }
 0x4ac   :  { %v5949_v49 = vpop.f32.mrf.mxu2 }
 0x4ba   :  { %v6012_v8 = vpop.f32.mrf.mxu0 }
 0x4bd   :  { %v5986_v54 = vpop.f32.mrf.mxu1 }
 0x4c2   :  { %v6014_v4 = vpop.f32.mrf.mxu0  ;;  %v5973_v58 = vpop.f32.mrf.mxu3 }
 0x4c3   :  { %v5974_v60 = vadd.f32 %v5973_v58, %v5961_v57 }
 0x4c4   :  { %v5999_v61 = vpop.f32.mrf.mxu2 }
 0x4c5   :  { %v5987_v0 = vadd.f32 %v5986_v54, %v5974_v60  ;;  %v5988_v16 = vpop.f32.mrf.mxu1 }
 0x4c7   :  { %v6000_v1 = vadd.f32 %v5999_v61, %v5987_v0 }
 0x4c9   :  { %v6013_v62 = vadd.f32 %v6012_v8, %v6000_v1 }
 0x4ca   :  { %v5975_v15 = vpop.f32.mrf.mxu3 }
 0x4cb   :  { %v6122_v23 = vmax.f32 %v6013_v62, 0.0 }
 0x4cc   :  { %v6001_v33 = vpop.f32.mrf.mxu2 }
 0x4cd   :  { %v13312_v41 = vpack.c.bf16 %v6122_v23, %v6122_v23 }
 0x4cf   :  { %6423 = vmatmul.bf16.vlgmr.msrb.gmra.mxu0 %v13312_v41 }
 0x4da   :  { %v6038_v56 = vpop.f32.mrf.mxu0 }
 0x4dd   :  { %v6051_v6 = vpop.f32.mrf.mxu1 }
 0x4e2   :  { %v6040_v47 = vpop.f32.mrf.mxu0  ;;  %v6025_v35 = vpop.f32.mrf.mxu3 }
 0x4e3   :  { %v6026_v24 = vadd.f32 %v6025_v35, %v5687_v32 }
 0x4e4   :  { %v6064_v14 = vpop.f32.mrf.mxu2 }
 0x4e5   :  { %v6053_v13 = vpop.f32.mrf.mxu1  ;;  %v6039_v18 = vadd.f32 %v6038_v56, %v6026_v24 }
 0x4e7   :  { %v6052_v29 = vadd.f32 %v6051_v6, %v6039_v18 }
 0x4e9   :  { %v6065_v63 = vadd.f32 %v6064_v14, %v6052_v29 }
 0x4ea   :  { %v6027_v17 = vpop.f32.mrf.mxu3 }
 0x4ec   :  { %v6066_v19 = vpop.f32.mrf.mxu2 }
 0x4fa   :  { %v6090_v21 = vpop.f32.mrf.mxu0 }
 0x4fe   :  { %v6103_v30 = vpop.f32.mrf.mxu1 }
 0x500   :  { %v6116_v31 = vpop.f32.mrf.mxu2 }
 0x502   :  { %v6092_v59 = vpop.f32.mrf.mxu0  ;;  %v6077_v26 = vpop.f32.mrf.mxu3 }
 0x503   :  { %v6078_v36 = vadd.f32 %v6077_v26, %v6065_v63 }
 0x505   :  { %v6091_v12 = vadd.f32 %v6090_v21, %v6078_v36 }
 0x506   :  { %v6105_v39 = vpop.f32.mrf.mxu1 }
 0x507   :  { %v6104_v9 = vadd.f32 %v6103_v30, %v6091_v12 }
 0x508   :  { %v6118_v40 = vpop.f32.mrf.mxu2 }
 0x509   :  { %v6117_v42 = vadd.f32 %v6116_v31, %v6104_v9 }
 0x50a   :  { %v6079_v7 = vpop.f32.mrf.mxu3 }
 0x50b   :  { %v6123_v44 = vmax.f32 %v6117_v42, 0.0 }
 0x50d   :  { %v13334_v25 = vpack.c.bf16 %v6123_v44, %v6123_v44 }
 0x50f   :  { %10689 = vmatmul.msk.bf16.vlgmr.msra.gmra.mxu1 %vm6381_vm4, %v13334_v25 }
 0x520   :  { %v6411_v45 = vpop.f32.mrf.mxu2 }
 0x522   :  { %v6398_v28 = vpop.f32.mrf.mxu3 }
 0x523   :  { %v6399_v46 = vadd.f32 %v6398_v28, %v6191_v11 }
 0x525   :  { %v6412_v49 = vadd.f32 %v6411_v45, %v6399_v46 }
 0x528   :  { %v6413_v50 = vpop.f32.mrf.mxu2 }
 0x52a   :  { %v6400_v51 = vpop.f32.mrf.mxu3 }
 0x54c   :  { %v6424_v8 = vpop.f32.mrf.mxu0 }
 0x54d   :  { %v6425_v54 = vadd.f32 %v6424_v8, %v6412_v49 }
 0x554   :  { %v6426_v53 = vpop.f32.mrf.mxu0 }
 0x58c   :  { %v6437_v57 = vpop.f32.mrf.mxu1 }
 0x58d   :  { %v13338_v4 = vadd.f32 %v6437_v57, %v6425_v54 }
 0x594   :  { %v6439_v58 = vpop.f32.mrf.mxu1 }
 0x595   :  { %12497 = dma.done.wait [#allocation6 + $0x1], 8064 }
 0x596   :  { %12498 = vsyncadd [#allocation6 + $0x1], 4294959232  ;;  %v10748_v60 = vld [vmem:[#allocation3 + $0x70] sm:$0xf]  ;;  %v11891_v61 = vld [vmem:[#allocation3 + $0x74] sm:$0xf0] }
 0x597   :  { %v10812_v48 = vld [vmem:[#allocation3 + $0xf0] sm:$0xf]  ;;  %v10749_v0 = vor.u32 %v11891_v61, %v10748_v60  ;;  %v11907_v16 = vld [vmem:[#allocation3 + $0xf4] sm:$0xf0]  ;;  %v10740_v10 = vld [vmem:[#allocation3 + $0x60] sm:$0xf] }
 0x598   :  { %v10876_v55 = vld [vmem:[#allocation3 + $0x170] sm:$0xf]  ;;  %v11923_v1 = vld [vmem:[#allocation3 + $0x174] sm:$0xf0]  ;;  %v10813_v2 = vor.u32 %v11907_v16, %v10812_v48  ;;  %v11889_v15 = vld [vmem:[#allocation3 + $0x64] sm:$0xf0] }
 0x599   :  { %v10877_v62 = vor.u32 %v11923_v1, %v10876_v55  ;;  %v10804_v52 = vld [vmem:[#allocation3 + $0xe0] sm:$0xf]  ;;  %6835 = vmatpush.bf16.msra.mxu3 %v10749_v0  ;;  %v10741_v23 = vor.u32 %v11889_v15, %v10740_v10  ;;  %v11905_v33 = vld [vmem:[#allocation3 + $0xe4] sm:$0xf0]  ;;  %v13340_v43 = vld [vmem:[#allocation3 + $0x1f0] sm:$0x33] }
 0x59a   :  { %v10868_v5 = vld [vmem:[#allocation3 + $0x160] sm:$0xf]  ;;  %6848 = vmatpush.bf16.msrb.mxu2 %v10813_v2  ;;  %v10805_v56 = vor.u32 %v11905_v33, %v10804_v52  ;;  %v6696_v27 = vunpack.c.l.b16 %v13340_v43  ;;  %v11921_v6 = vld [vmem:[#allocation3 + $0x164] sm:$0xf0]  ;;  %v10732_v47 = vld [vmem:[#allocation3 + $0x50] sm:$0xf] }
 0x59b   :  { %6861 = vmatpush.bf16.msra.mxu0 %v10877_v62  ;;  %v11887_v22 = vld [vmem:[#allocation3 + $0x54] sm:$0xf0]  ;;  %v10869_v35 = vor.u32 %v11921_v6, %v10868_v5  ;;  %v10796_v3 = vld [vmem:[#allocation3 + $0xd0] sm:$0xf]  ;;  %v10932_v13 = vld [vmem:[#allocation3 + $0x1e0] sm:$0xf] }
 0x59c   :  { %v11903_v14 = vld [vmem:[#allocation3 + $0xd4] sm:$0xf0]  ;;  %v6760_v34 = vpack.c.b16 %v6696_v27, %v6696_v27  ;;  %v11937_v17 = vld [vmem:[#allocation3 + $0x1e4] sm:$0xf0]  ;;  %v10860_v19 = vld [vmem:[#allocation3 + $0x150] sm:$0xf]  ;;  %v10733_v24 = vor.u32 %v11887_v22, %v10732_v47 }
 0x59d   :  { %v11919_v32 = vld [vmem:[#allocation3 + $0x154] sm:$0xf0]  ;;  %6836 = vmatpush.bf16.msra.mxu3 %v10741_v23  ;;  %v10724_v21 = vld [vmem:[#allocation3 + $0x40] sm:$0xf]  ;;  %v10797_v29 = vor.u32 %v11903_v14, %v10796_v3  ;;  %v11885_v59 = vld [vmem:[#allocation3 + $0x44] sm:$0xf0]  ;;  %v10933_v63 = vor.u32 %v11937_v17, %v10932_v13 }
 0x59e   :  { %6849 = vmatpush.bf16.msrb.mxu2 %v10805_v56  ;;  %v6830_v18 = vsel %vm6385_vm3, %v6760_v34, 0  ;;  %v10861_v30 = vor.u32 %v11919_v32, %v10860_v19  ;;  %v10788_v31 = vld [vmem:[#allocation3 + $0xc0] sm:$0xf]  ;;  %v11901_v26 = vld [vmem:[#allocation3 + $0xc4] sm:$0xf0]  ;;  %v10725_v40 = vor.u32 %v11885_v59, %v10724_v21  ;;  %vm7075_vm5 = vcmask 1044480  }
 0x59f   :  { %6862 = vmatpush.bf16.msra.mxu0 %v10869_v35  ;;  %6874 = vmatpush.bf16.msrb.mxu1 %v6830_v18  ;;  %v10852_v36 = vld [vmem:[#allocation3 + $0x140] sm:$0xf]  ;;  %v11917_v12 = vld [vmem:[#allocation3 + $0x144] sm:$0xf0]  ;;  %v10924_v39 = vld [vmem:[#allocation3 + $0x1d0] sm:$0xf]  ;;  %v10789_v42 = vor.u32 %v11901_v26, %v10788_v31 }
 0x5a0   :  { %v11935_v9 = vld [vmem:[#allocation3 + $0x1d4] sm:$0xf0]  ;;  %v10853_v7 = vor.u32 %v11917_v12, %v10852_v36  ;;  %v10716_v44 = vld [vmem:[#allocation3 + $0x30] sm:$0xf]  ;;  %v10916_v51 = vld [vmem:[#allocation3 + $0x1c0] sm:$0xf]  ;;  %v6697_v36 = vunpack.c.h.b16 %v13340_v43 }
 0x5a1   :  { %6837 = vmatpush.bf16.msra.mxu3 %v10733_v24  ;;  %v11883_v11 = vld [vmem:[#allocation3 + $0x34] sm:$0xf0]  ;;  %v10780_v45 = vld [vmem:[#allocation3 + $0xb0] sm:$0xf]  ;;  %v10925_v28 = vor.u32 %v11935_v9, %v10924_v39  ;;  %v11933_v8 = vld [vmem:[#allocation3 + $0x1c4] sm:$0xf0] }
 0x5a2   :  { %6850 = vmatpush.bf16.msrb.mxu2 %v10797_v29  ;;  %v11899_v46 = vld [vmem:[#allocation3 + $0xb4] sm:$0xf0]  ;;  %v10844_v49 = vld [vmem:[#allocation3 + $0x130] sm:$0xf]  ;;  %v10717_v53 = vor.u32 %v11883_v11, %v10716_v44  ;;  %v10708_v58 = vld [vmem:[#allocation3 + $0x20] sm:$0xf]  ;;  %v10917_v48 = vor.u32 %v11933_v8, %v10916_v51  ;;  %v6761_v8 = vpack.c.b16 %v6697_v36, %v6697_v36 }
 0x5a3   :  { %6863 = vmatpush.bf16.msra.mxu0 %v10861_v30  ;;  %6875 = vmatpush.bf16.msrb.mxu1 %v10933_v63  ;;  %v11915_v50 = vld [vmem:[#allocation3 + $0x134] sm:$0xf0]  ;;  %v10781_v54 = vor.u32 %v11899_v46, %v10780_v45  ;;  %v11881_v60 = vld [vmem:[#allocation3 + $0x24] sm:$0xf0]  ;;  %v10772_v61 = vld [vmem:[#allocation3 + $0xa0] sm:$0xf] }
 0x5a4   :  { %v10845_v57 = vor.u32 %v11915_v50, %v10844_v49  ;;  %v11897_v0 = vld [vmem:[#allocation3 + $0xa4] sm:$0xf0]  ;;  %v10836_v16 = vld [vmem:[#allocation3 + $0x120] sm:$0xf]  ;;  %v10908_v1 = vld [vmem:[#allocation3 + $0x1b0] sm:$0xf]  ;;  %v10709_v62 = vor.u32 %v11881_v60, %v10708_v58 }
 0x5a5   :  { %6838 = vmatpush.bf16.msra.mxu3 %v10725_v40  ;;  %v11913_v55 = vld [vmem:[#allocation3 + $0x124] sm:$0xf0]  ;;  %v11931_v2 = vld [vmem:[#allocation3 + $0x1b4] sm:$0xf0]  ;;  %v10773_v10 = vor.u32 %v11897_v0, %v10772_v61  ;;  %v10700_v52 = vld [vmem:[#allocation3 + $0x10] sm:$0xf] }
 0x5a6   :  { %6851 = vmatpush.bf16.msrb.mxu2 %v10789_v42  ;;  %v10837_v15 = vor.u32 %v11913_v55, %v10836_v16  ;;  %v11879_v23 = vld [vmem:[#allocation3 + $0x14] sm:$0xf0]  ;;  %v10764_v33 = vld [vmem:[#allocation3 + $0x90] sm:$0xf]  ;;  %v10909_v5 = vor.u32 %v11931_v2, %v10908_v1  ;;  %v10900_v47 = vld [vmem:[#allocation3 + $0x1a0] sm:$0xf] }
 0x5a7   :  { %6864 = vmatpush.bf16.msra.mxu0 %v10853_v7  ;;  %6876 = vmatpush.bf16.msrb.mxu1 %v10925_v28  ;;  %v11895_v56 = vld [vmem:[#allocation3 + $0x94] sm:$0xf0]  ;;  %v10828_v27 = vld [vmem:[#allocation3 + $0x110] sm:$0xf]  ;;  %v11929_v22 = vld [vmem:[#allocation3 + $0x1a4] sm:$0xf0]  ;;  %v10701_v35 = vor.u32 %v11879_v23, %v10700_v52 }
 0x5a8   :  { %v11911_v6 = vld [vmem:[#allocation3 + $0x114] sm:$0xf0]  ;;  %v10692_v3 = vld [vmem:[#allocation3] sm:$0xf]  ;;  %v10765_v14 = vor.u32 %v11895_v56, %v10764_v33  ;;  %v11877_v34 = vld [vmem:[#allocation3 + $0x4] sm:$0xf0]  ;;  %v10901_v32 = vor.u32 %v11929_v22, %v10900_v47 }
 0x5a9   :  { %6839 = vmatpush.bf16.msra.mxu3 %v10717_v53  ;;  %v10829_v13 = vor.u32 %v11911_v6, %v10828_v27  ;;  %v10756_v17 = vld [vmem:[#allocation3 + $0x80] sm:$0xf]  ;;  %v11893_v19 = vld [vmem:[#allocation3 + $0x84] sm:$0xf0]  ;;  %v10892_v24 = vld [vmem:[#allocation3 + $0x190] sm:$0xf]  ;;  %v10693_v31 = vor.u32 %v11877_v34, %v10692_v3 }
 0x5aa   :  { %6852 = vmatpush.bf16.msrb.mxu2 %v10781_v54  ;;  %v11890_v21 = vld [vmem:[#allocation3 + $0x74] sm:$0xf]  ;;  %v10750_v18 = vld [vmem:[#allocation3 + $0x78] sm:$0xf0]  ;;  %v11927_v29 = vld [vmem:[#allocation3 + $0x194] sm:$0xf0]  ;;  %v10757_v12 = vor.u32 %v11893_v19, %v10756_v17 }
 0x5ab   :  { %6865 = vmatpush.bf16.msra.mxu0 %v10845_v57  ;;  %6877 = vmatpush.bf16.msrb.mxu1 %v10917_v48  ;;  %v11906_v30 = vld [vmem:[#allocation3 + $0xf4] sm:$0xf]  ;;  %v10814_v59 = vld [vmem:[#allocation3 + $0xf8] sm:$0xf0]  ;;  %v10820_v63 = vld [vmem:[#allocation3 + $0x100] sm:$0xf]  ;;  %v10753_v39 = vor.u32 %v11890_v21, %v10750_v18  ;;  %v10893_v42 = vor.u32 %v11927_v29, %v10892_v24 }
 0x5ac   :  { %v11909_v26 = vld [vmem:[#allocation3 + $0x104] sm:$0xf0]  ;;  %v11922_v9 = vld [vmem:[#allocation3 + $0x174] sm:$0xf]  ;;  %v10878_v40 = vld [vmem:[#allocation3 + $0x178] sm:$0xf0]  ;;  %v10817_v7 = vor.u32 %v11906_v30, %v10814_v59 }
 0x5ad   :  { %6840 = vmatpush.bf16.msra.mxu3 %v10709_v62  ;;  %v10884_v44 = vld [vmem:[#allocation3 + $0x180] sm:$0xf]  ;;  %v11888_v11 = vld [vmem:[#allocation3 + $0x64] sm:$0xf]  ;;  %v10742_v45 = vld [vmem:[#allocation3 + $0x68] sm:$0xf0]  ;;  %v10821_v28 = vor.u32 %v11909_v26, %v10820_v63  ;;  %v10881_v51 = vor.u32 %v11922_v9, %v10878_v40 }
 0x5ae   :  { %6853 = vmatpush.bf16.msrb.mxu2 %v10773_v10  ;;  %v11925_v46 = vld [vmem:[#allocation3 + $0x184] sm:$0xf0]  ;;  %v11904_v49 = vld [vmem:[#allocation3 + $0xe4] sm:$0xf]  ;;  %v10806_v50 = vld [vmem:[#allocation3 + $0xe8] sm:$0xf0]  ;;  %v10745_v43 = vor.u32 %v11888_v11, %v10742_v45 }
 0x5af   :  { %6866 = vmatpush.bf16.msra.mxu0 %v10837_v15  ;;  %6878 = vmatpush.bf16.msrb.mxu1 %v10909_v5  ;;  %v11920_v53 = vld [vmem:[#allocation3 + $0x164] sm:$0xf]  ;;  %v10870_v54 = vld [vmem:[#allocation3 + $0x168] sm:$0xf0]  ;;  %v10885_v57 = vor.u32 %v11925_v46, %v10884_v44  ;;  %v10809_v58 = vor.u32 %v11904_v49, %v10806_v50  ;;  %v11886_v60 = vld [vmem:[#allocation3 + $0x54] sm:$0xf] }
 0x5b0   :  { %v10734_v61 = vld [vmem:[#allocation3 + $0x58] sm:$0xf0]  ;;  %v11902_v48 = vld [vmem:[#allocation3 + $0xd4] sm:$0xf]  ;;  %v6833_v16 = vsel %vm6385_vm3, %v6761_v8, 0  ;;  %v10873_v55 = vor.u32 %v11920_v53, %v10870_v54  ;;  %vm7071_vm6 = vcmask 998400  }
 0x5b1   :  { %6841 = vmatpush.bf16.msra.mxu3 %v10701_v35  ;;  %v10798_v0 = vld [vmem:[#allocation3 + $0xd8] sm:$0xf0]  ;;  %v11936_v1 = vld [vmem:[#allocation3 + $0x1e4] sm:$0xf]  ;;  %v10934_v2 = vld [vmem:[#allocation3 + $0x1e8] sm:$0xf0]  ;;  %v10737_v62 = vor.u32 %v11886_v60, %v10734_v61 }
 0x5b2   :  { %6854 = vmatpush.bf16.msrb.mxu2 %v10765_v14  ;;  %v11918_v10 = vld [vmem:[#allocation3 + $0x154] sm:$0xf]  ;;  %v10862_v15 = vld [vmem:[#allocation3 + $0x158] sm:$0xf0]  ;;  %v10801_v52 = vor.u32 %v11902_v48, %v10798_v0  ;;  %v11884_v23 = vld [vmem:[#allocation3 + $0x44] sm:$0xf]  ;;  %v10937_v5 = vor.u32 %v11936_v1, %v10934_v2 }
 0x5b3   :  { %6867 = vmatpush.bf16.msra.mxu0 %v10829_v13  ;;  %6879 = vmatpush.bf16.msrb.mxu1 %v10901_v32  ;;  %v10726_v33 = vld [vmem:[#allocation3 + $0x48] sm:$0xf0]  ;;  %v11900_v56 = vld [vmem:[#allocation3 + $0xc4] sm:$0xf]  ;;  %v10865_v6 = vor.u32 %v11918_v10, %v10862_v15  ;;  %v11934_v47 = vld [vmem:[#allocation3 + $0x1d4] sm:$0xf] }
 0x5b4   :  { %v10790_v27 = vld [vmem:[#allocation3 + $0xc8] sm:$0xf0]  ;;  %v10926_v22 = vld [vmem:[#allocation3 + $0x1d8] sm:$0xf0]  ;;  %v10729_v35 = vor.u32 %v11884_v23, %v10726_v33  ;;  %v11916_v3 = vld [vmem:[#allocation3 + $0x144] sm:$0xf] }
 0x5b5   :  { %6842 = vmatpush.bf16.msra.mxu3 %v10693_v31  ;;  %v10854_v14 = vld [vmem:[#allocation3 + $0x148] sm:$0xf0]  ;;  %v10793_v13 = vor.u32 %v11900_v56, %v10790_v27  ;;  %v11882_v34 = vld [vmem:[#allocation3 + $0x34] sm:$0xf]  ;;  %v10718_v17 = vld [vmem:[#allocation3 + $0x38] sm:$0xf0]  ;;  %v10929_v19 = vor.u32 %v11934_v47, %v10926_v22 }
 0x5b6   :  { %6855 = vmatpush.bf16.msrb.mxu2 %v10757_v12  ;;  %v11898_v32 = vld [vmem:[#allocation3 + $0xb4] sm:$0xf]  ;;  %v10782_v24 = vld [vmem:[#allocation3 + $0xb8] sm:$0xf0]  ;;  %v10857_v21 = vor.u32 %v11916_v3, %v10854_v14  ;;  %v11932_v18 = vld [vmem:[#allocation3 + $0x1c4] sm:$0xf]  ;;  %v10721_v30 = vor.u32 %v11882_v34, %v10718_v17 }
 0x5b7   :  { %6880 = vmatpush.bf16.msrb.mxu1 %v10893_v42  ;;  %6868 = vmatpush.bf16.msra.mxu0 %v10821_v28  ;;  %v10918_v29 = vld [vmem:[#allocation3 + $0x1c8] sm:$0xf0]  ;;  %v11914_v59 = vld [vmem:[#allocation3 + $0x134] sm:$0xf]  ;;  %v10846_v31 = vld [vmem:[#allocation3 + $0x138] sm:$0xf0]  ;;  %v10785_v63 = vor.u32 %v11898_v32, %v10782_v24 }
 0x5b8   :  { %6843 = vmatmul.bf16.vlgmr.msra.gmra.mxu3 %v13291_v38  ;;  %v11880_v26 = vld [vmem:[#allocation3 + $0x24] sm:$0xf]  ;;  %v10710_v36 = vld [vmem:[#allocation3 + $0x28] sm:$0xf0]  ;;  %v10921_v12 = vor.u32 %v11932_v18, %v10918_v29  ;;  %v10849_v40 = vor.u32 %v11914_v59, %v10846_v31  ;;  %v11930_v42 = vld [vmem:[#allocation3 + $0x1b4] sm:$0xf] }
 0x5b9   :  { %6887 = vmatpush.bf16.msrb.mxu3 %v10753_v39  ;;  %6856 = vmatmul.bf16.vlgmr.msrb.gmra.mxu2 %v13289_v37  ;;  %v11896_v39 = vld [vmem:[#allocation3 + $0xa4] sm:$0xf]  ;;  %v10774_v9 = vld [vmem:[#allocation3 + $0xa8] sm:$0xf0]  ;;  %v10713_v44 = vor.u32 %v11880_v26, %v10710_v36  ;;  %v11878_v46 = vld [vmem:[#allocation3 + $0x14] sm:$0xf] }
 0x5ba   :  { %6900 = vmatpush.bf16.msra.mxu2 %v10817_v7  ;;  %6869 = vmatmul.bf16.vlgmr.msra.gmra.mxu0 %v13312_v41  ;;  %v10910_v7 = vld [vmem:[#allocation3 + $0x1b8] sm:$0xf0]  ;;  %v11912_v11 = vld [vmem:[#allocation3 + $0x124] sm:$0xf]  ;;  %v10838_v45 = vld [vmem:[#allocation3 + $0x128] sm:$0xf0]  ;;  %v10777_v28 = vor.u32 %v11896_v39, %v10774_v9 }
 0x5bb   :  { %6913 = vmatpush.bf16.msrb.mxu0 %v10881_v51  ;;  %6881 = vmatpush.bf16.msrb.mxu1 %v10885_v57  ;;  %v10702_v49 = vld [vmem:[#allocation3 + $0x18] sm:$0xf0]  ;;  %v10913_v50 = vor.u32 %v11930_v42, %v10910_v7  ;;  %v11894_v51 = vld [vmem:[#allocation3 + $0x94] sm:$0xf]  ;;  %v11928_v53 = vld [vmem:[#allocation3 + $0x1a4] sm:$0xf] }
 0x5bc   :  { %v10766_v8 = vld [vmem:[#allocation3 + $0x98] sm:$0xf0]  ;;  %v10902_v54 = vld [vmem:[#allocation3 + $0x1a8] sm:$0xf0]  ;;  %v10705_v57 = vor.u32 %v11878_v46, %v10702_v49  ;;  %v11876_v48 = vld [vmem:[#allocation3 + $0x4] sm:$0xf] }
 0x5bd   :  { %6888 = vmatpush.bf16.msrb.mxu3 %v10745_v43  ;;  %v10841_v43 = vor.u32 %v11912_v11, %v10838_v45  ;;  %v10830_v60 = vld [vmem:[#allocation3 + $0x118] sm:$0xf0]  ;;  %v10769_v61 = vor.u32 %v11894_v51, %v10766_v8  ;;  %v10694_v0 = vld [vmem:[#allocation3 + $0x8] sm:$0xf0]  ;;  %v11944_v22 = vld [vmem:[%s13521_s15 + $0x30] sm:$0xff] }
 0x5be   :  { %6901 = vmatpush.bf16.msra.mxu2 %v10809_v58  ;;  %10938 = vmatmul.msk.bf16.vlgmr.msrb.gmra.mxu1 %vm6381_vm4, %v13334_v25  ;;  %v11910_v58 = vld [vmem:[#allocation3 + $0x114] sm:$0xf]  ;;  %v10758_v1 = vld [vmem:[#allocation3 + $0x88] sm:$0xf0]  ;;  %v10894_v10 = vld [vmem:[#allocation3 + $0x198] sm:$0xf0]  ;;  %v10697_v15 = vor.u32 %v11876_v48, %v10694_v0 }
 0x5bf   :  { %6926 = vmatpush.bf16.msra.mxu1 %v6833_v16  ;;  %6914 = vmatpush.bf16.msrb.mxu0 %v10873_v55  ;;  %v10905_v16 = vor.u32 %v11928_v53, %v10902_v54  ;;  %v11892_v55 = vld [vmem:[#allocation3 + $0x84] sm:$0xf]  ;;  %v10833_v2 = vor.u32 %v11910_v58, %v10830_v60  ;;  %v10822_v23 = vld [vmem:[#allocation3 + $0x108] sm:$0xf0]  ;;  %v11943_v3 = vld [vmem:[%s13521_s15 + $0x28] sm:$0xff] }
 0x5c0   :  { %v10761_v33 = vor.u32 %v11892_v55, %v10758_v1  ;;  %v10886_v47 = vld [vmem:[#allocation3 + $0x188] sm:$0xf0]  ;;  %v11942_v14 = vld [vmem:[%s13521_s15 + $0x20] sm:$0xff]  ;;  %v11939_v34 = vld [vmem:[%s13521_s15 + $0x8] sm:$0xff] }
 0x5c1   :  { %6889 = vmatpush.bf16.msrb.mxu3 %v10737_v62  ;;  %v11926_v62 = vld [vmem:[#allocation3 + $0x194] sm:$0xf]  ;;  %v11952_v32 = vld [vmem:[%s13521_s15 + $0x70] sm:$0xff]  ;;  %v11951_v24 = vld [vmem:[%s13521_s15 + $0x68] sm:$0xff] }
 0x5c2   :  { %6902 = vmatpush.bf16.msra.mxu2 %v10801_v52  ;;  %v11908_v52 = vld [vmem:[#allocation3 + $0x104] sm:$0xf]  ;;  %v10897_v56 = vor.u32 %v11926_v62, %v10894_v10  ;;  %v6508_v18 = vld [vmem:[#allocation16] sm:$0x3]  ;;  %v11949_v29 = vld [vmem:[%s13521_s15 + $0x58] sm:$0xff] }
 0x5c3   :  { %6927 = vmatpush.bf16.msra.mxu1 %v10937_v5  ;;  %6915 = vmatpush.bf16.msrb.mxu0 %v10865_v6  ;;  %v11945_v5 = vld [vmem:[%s13521_s15 + $0x38] sm:$0xff]  ;;  %v10825_v27 = vor.u32 %v11908_v52, %v10822_v23  ;;  %v11924_v6 = vld [vmem:[#allocation3 + $0x184] sm:$0xf]  ;;  %v11947_v9 = vld [vmem:[%s13521_s15 + $0x48] sm:$0xff]  ;;  %v6826_v51 = vperm.slane %v6508_v18, 1 }
 0x5c4   :  { %v11948_v31 = vld [vmem:[%s13521_s15 + $0x50] sm:$0xff]  ;;  %v6975_v10 = vld [vmem:[#allocation23] sm:$0x1] }
 0x5c5   :  { %6890 = vmatpush.bf16.msrb.mxu3 %v10729_v35  ;;  %v10889_v35 = vor.u32 %v11924_v6, %v10886_v47 }
 0x5c6   :  { %6903 = vmatpush.bf16.msra.mxu2 %v10793_v13 }
 0x5c7   :  { %6928 = vmatpush.bf16.msra.mxu1 %v10929_v19  ;;  %6916 = vmatpush.bf16.msrb.mxu0 %v10857_v21  ;;  %v11938_v19 = vld [vmem:[%s13521_s15] sm:$0xff] }
 0x5c8   :  { %v11950_v21 = vld [vmem:[%s13521_s15 + $0x60] sm:$0xff] }
 0x5c9   :  { %6891 = vmatpush.bf16.msrb.mxu3 %v10721_v30  ;;  %v6825_v30 = vperm.slane %v6508_v18, 0 }
 0x5ca   :  { %6904 = vmatpush.bf16.msra.mxu2 %v10785_v63 }
 0x5cb   :  { %6929 = vmatpush.bf16.msra.mxu1 %v10921_v12  ;;  %6917 = vmatpush.bf16.msrb.mxu0 %v10849_v40 }
 0x5cd   :  { %6892 = vmatpush.bf16.msrb.mxu3 %v10713_v44  ;;  %v11946_v44 = vld [vmem:[%s13521_s15 + $0x40] sm:$0xff] }
 0x5ce   :  { %6905 = vmatpush.bf16.msra.mxu2 %v10777_v28 }
 0x5cf   :  { %6930 = vmatpush.bf16.msra.mxu1 %v10913_v50  ;;  %6918 = vmatpush.bf16.msrb.mxu0 %v10841_v43 }
 0x5d1   :  { %6893 = vmatpush.bf16.msrb.mxu3 %v10705_v57 }
 0x5d2   :  { %6906 = vmatpush.bf16.msra.mxu2 %v10769_v61 }
 0x5d3   :  { %6931 = vmatpush.bf16.msra.mxu1 %v10905_v16  ;;  %6919 = vmatpush.bf16.msrb.mxu0 %v10833_v2 }
 0x5d5   :  { %6894 = vmatpush.bf16.msrb.mxu3 %v10697_v15 }
 0x5d6   :  { %6907 = vmatpush.bf16.msra.mxu2 %v10761_v33 }
 0x5d7   :  { %6932 = vmatpush.bf16.msra.mxu1 %v10897_v56  ;;  %6920 = vmatpush.bf16.msrb.mxu0 %v10825_v27 }
 0x5d8   :  { %6895 = vmatmul.bf16.vlgmr.msrb.gmra.mxu3 %v13291_v38  ;;  %v11940_v38 = vld [vmem:[%s13521_s15 + $0x10] sm:$0xff] }
 0x5d9   :  { %7079 = vmatpush.bf16.msra.mxu3 %v11945_v5  ;;  %6908 = vmatmul.bf16.vlgmr.msra.gmra.mxu2 %v13289_v37  ;;  %v11941_v37 = vld [vmem:[%s13521_s15 + $0x18] sm:$0xff] }
 0x5da   :  { %6921 = vmatmul.bf16.vlgmr.msrb.gmra.mxu0 %v13312_v41  ;;  %v11002_v41 = vld [vmem:[%s13521_s15 + $0x78] sm:$0xf] }
 0x5db   :  { %6933 = vmatpush.bf16.msra.mxu1 %v10889_v35 }
 0x5dd   :  { %7080 = vmatpush.bf16.msra.mxu3 %v11944_v22 }
 0x5de   :  { %10939 = vmatmul.msk.bf16.vlgmr.msra.gmra.mxu1 %vm6381_vm4, %v13334_v25  ;;  %v11953_v25 = vld [vmem:[%s13521_s15 + $0x78] sm:$0x10] }
 0x5df   :  { %v11003_v13 = vor.u32 %v11953_v25, %v11002_v41 }
 0x5e1   :  { %7081 = vmatpush.bf16.msra.mxu3 %v11943_v3  ;;  %v7077_v17 = vsel %vm7075_vm5, %v11003_v13, 0 }
 0x5e2   :  { %7092 = vmatpush.bf16.msrb.mxu2 %v7077_v17 }
 0x5e5   :  { %7082 = vmatpush.bf16.msra.mxu3 %v11942_v14 }
 0x5e6   :  { %7093 = vmatpush.bf16.msrb.mxu2 %v11952_v32 }
 0x5e9   :  { %7083 = vmatpush.bf16.msra.mxu3 %v11941_v37 }
 0x5ea   :  { %7094 = vmatpush.bf16.msrb.mxu2 %v11951_v24 }
 0x5ed   :  { %7084 = vmatpush.bf16.msra.mxu3 %v11940_v38 }
 0x5ee   :  { %7095 = vmatpush.bf16.msrb.mxu2 %v11950_v21 }
 0x5f1   :  { %7085 = vmatpush.bf16.msra.mxu3 %v11939_v34 }
 0x5f2   :  { %7096 = vmatpush.bf16.msrb.mxu2 %v11949_v29 }
 0x5f5   :  { %7086 = vmatpush.bf16.msra.mxu3 %v11938_v19 }
 0x5f6   :  { %7097 = vmatpush.bf16.msrb.mxu2 %v11948_v31 }
 0x5fa   :  { %7098 = vmatpush.bf16.msrb.mxu2 %v11947_v9 }
 0x5fe   :  { %7099 = vmatpush.bf16.msrb.mxu2 %v11946_v44 }
 0x637   :  { %v6870_v59 = vpop.f32.mrf.mxu0 }
 0x63b   :  { %v6844_v63 = vpop.f32.mrf.mxu3  ;;  %v6883_v26 = vpop.f32.mrf.mxu1 }
 0x63c   :  { %v6845_v36 = vadd.f32 %v6844_v63, %v6825_v30  ;;  %v6857_v12 = vpop.f32.mrf.mxu2 }
 0x63e   :  { %v6858_v39 = vadd.f32 %v6857_v12, %v6845_v36 }
 0x63f   :  { %v6872_v42 = vpop.f32.mrf.mxu0 }
 0x640   :  { %v6871_v40 = vadd.f32 %v6870_v59, %v6858_v39 }
 0x642   :  { %v6884_v7 = vadd.f32 %v6883_v26, %v6871_v40 }
 0x643   :  { %v6846_v11 = vpop.f32.mrf.mxu3  ;;  %v6885_v45 = vpop.f32.mrf.mxu1 }
 0x644   :  { %v6939_v28 = vmax.f32 %v6884_v7, 0.0  ;;  %v6859_v46 = vpop.f32.mrf.mxu2 }
 0x646   :  { %v13408_v49 = vpack.c.bf16 %v6939_v28, %v6939_v28 }
 0x648   :  { %7087 = vmatmul.bf16.vlgmr.msra.gmra.mxu3 %v13408_v49 }
 0x657   :  { %v6922_v50 = vpop.f32.mrf.mxu0 }
 0x65b   :  { %v6935_v8 = vpop.f32.mrf.mxu1  ;;  %v6896_v43 = vpop.f32.mrf.mxu3 }
 0x65c   :  { %v6897_v53 = vadd.f32 %v6896_v43, %v6826_v51  ;;  %v6909_v54 = vpop.f32.mrf.mxu2 }
 0x65e   :  { %v6910_v57 = vadd.f32 %v6909_v54, %v6897_v53 }
 0x65f   :  { %v6924_v60 = vpop.f32.mrf.mxu0 }
 0x660   :  { %v6923_v58 = vadd.f32 %v6922_v50, %v6910_v57 }
 0x662   :  { %v6936_v61 = vadd.f32 %v6935_v8, %v6923_v58 }
 0x663   :  { %v6937_v48 = vpop.f32.mrf.mxu1  ;;  %v6898_v0 = vpop.f32.mrf.mxu3 }
 0x664   :  { %v6940_v16 = vmax.f32 %v6936_v61, 0.0  ;;  %v6911_v55 = vpop.f32.mrf.mxu2 }
 0x666   :  { %v6974_v1 = vpack.c.bf16 %v6940_v16, %v6940_v16 }
 0x668   :  { %11004 = vmatmul.msk.bf16.vlgmr.msrb.gmra.mxu2 %vm7071_vm6, %v6974_v1 }
 0x6cb   :  { %v7088_v2 = vpop.f32.mrf.mxu3 }
 0x6cc   :  { %v7089_v15 = vadd.f32 %v7088_v2, %v6975_v10 }
 0x6d3   :  { %v7090_v62 = vpop.f32.mrf.mxu3 }
 0x6eb   :  { %v7101_v52 = vpop.f32.mrf.mxu2 }
 0x6ec   :  { %v13412_v23 = vadd.f32 %v7101_v52, %v7089_v15 }
 0x6f3   :  { %v7103_v33 = vpop.f32.mrf.mxu2 }
 0x6f4   :  { %12499 = dma.done.wait [#allocation6 + $0x2], 2048 }
 0x6f5   :  { %12500 = vsyncadd [#allocation6 + $0x2], 4294965248  ;;  %v11961_v5 = vld [vmem:[#allocation4 + $0x48] sm:$0xff]  ;;  %v11968_v35 = vld [vmem:[#allocation4 + $0x78] sm:$0xff]  ;;  %vm7321_vm7 = vcmask 818176  }
 0x6f6   :  { %v11067_v56 = vld [vmem:[#allocation4 + $0x28] sm:$0xf]  ;;  %v11969_v27 = vld [vmem:[#allocation4 + $0x28] sm:$0x10]  ;;  %7240 = vmatpush.bf16.msra.mxu0 %v11961_v5  ;;  %v11967_v38 = vld [vmem:[#allocation4 + $0x70] sm:$0xff] }
 0x6f7   :  { %v11068_v6 = vor.u32 %v11969_v27, %v11067_v56  ;;  %v11960_v47 = vld [vmem:[#allocation4 + $0x8] sm:$0xff]  ;;  %v11958_v25 = vld [vmem:[#allocation4 + $0x50] sm:$0xff]  ;;  %v11975_v34 = vld [vmem:[%s13523_s17 + $0x28] sm:$0xff] }
 0x6f8   :  { %v7279_v3 = vld [vmem:[%s13523_s17 + $0x30] sm:$0x3]  ;;  %v11966_v17 = vld [vmem:[#allocation4 + $0x60] sm:$0xff]  ;;  %v11957_v19 = vld [vmem:[#allocation4 + $0x18] sm:$0xff] }
 0x6f9   :  { %v7238_v22 = vsel %vm7075_vm5, %v11068_v6, 0  ;;  %v11959_v14 = vld [vmem:[#allocation4 + $0x68] sm:$0xff]  ;;  %v7307_v37 = vunpack.c.l.b16 %v7279_v3  ;;  %v11974_v32 = vld [vmem:[%s13523_s17 + $0x20] sm:$0xff]  ;;  %v11973_v18 = vld [vmem:[%s13523_s17 + $0x18] sm:$0xff] }
 0x6fa   :  { %7253 = vmatpush.bf16.msrb.mxu1 %v7238_v22  ;;  %7241 = vmatpush.bf16.msra.mxu0 %v11960_v47  ;;  %v11965_v24 = vld [vmem:[#allocation4 + $0x38] sm:$0xff]  ;;  %v11964_v29 = vld [vmem:[#allocation4 + $0x10] sm:$0xff]  ;;  %v11955_v30 = vld [vmem:[#allocation4] sm:$0xff] }
 0x6fb   :  { %v7314_v41 = vpack.c.b16 %v7307_v37, %v7307_v37  ;;  %v11956_v21 = vld [vmem:[#allocation4 + $0x58] sm:$0xff]  ;;  %v11972_v59 = vld [vmem:[%s13523_s17 + $0x10] sm:$0xff]  ;;  %v11963_v31 = vld [vmem:[#allocation4 + $0x20] sm:$0xff] }
 0x6fc   :  { %v11954_v63 = vld [vmem:[#allocation4 + $0x30] sm:$0xff]  ;;  %v11962_v26 = vld [vmem:[#allocation4 + $0x40] sm:$0xff]  ;;  %v11970_v12 = vld [vmem:[%s13523_s17] sm:$0xff] }
 0x6fd   :  { %v7326_v13 = vsel %vm6385_vm3, %v7314_v41, 0  ;;  %v11971_v36 = vld [vmem:[%s13523_s17 + $0x8] sm:$0xff]  ;;  %v7141_v39 = vld [vmem:[#allocation17] sm:$0x1]  ;;  %v7281_v46 = vld [vmem:[#allocation25] sm:$0x1] }
 0x6fe   :  { %7254 = vmatpush.bf16.msrb.mxu1 %v11968_v35  ;;  %7242 = vmatpush.bf16.msra.mxu0 %v11959_v14 }
 0x6ff   :  { %7329 = vmatpush.bf16.msrb.mxu3 %v7326_v13 }
 0x702   :  { %7255 = vmatpush.bf16.msrb.mxu1 %v11967_v38  ;;  %7243 = vmatpush.bf16.msra.mxu0 %v11958_v25 }
 0x703   :  { %7330 = vmatpush.bf16.msrb.mxu3 %v11975_v34 }
 0x706   :  { %7256 = vmatpush.bf16.msrb.mxu1 %v11966_v17  ;;  %7244 = vmatpush.bf16.msra.mxu0 %v11957_v19 }
 0x707   :  { %7331 = vmatpush.bf16.msrb.mxu3 %v11974_v32 }
 0x70a   :  { %7257 = vmatpush.bf16.msrb.mxu1 %v11965_v24  ;;  %7245 = vmatpush.bf16.msra.mxu0 %v11956_v21 }
 0x70b   :  { %7332 = vmatpush.bf16.msrb.mxu3 %v11973_v18 }
 0x70e   :  { %7258 = vmatpush.bf16.msrb.mxu1 %v11964_v29  ;;  %7246 = vmatpush.bf16.msra.mxu0 %v11955_v30 }
 0x70f   :  { %7333 = vmatpush.bf16.msrb.mxu3 %v11972_v59 }
 0x712   :  { %7259 = vmatpush.bf16.msrb.mxu1 %v11963_v31  ;;  %7247 = vmatpush.bf16.msra.mxu0 %v11954_v63 }
 0x713   :  { %7334 = vmatpush.bf16.msrb.mxu3 %v11971_v36 }
 0x715   :  { %7248 = vmatmul.bf16.vlgmr.msra.gmra.mxu0 %v13408_v49 }
 0x716   :  { %7260 = vmatpush.bf16.msrb.mxu1 %v11962_v26 }
 0x717   :  { %7335 = vmatpush.bf16.msrb.mxu3 %v11970_v12 }
 0x719   :  { %11069 = vmatmul.msk.bf16.vlgmr.msrb.gmra.mxu1 %vm7071_vm6, %v6974_v1 }
 0x792   :  { %v7249_v9 = vpop.f32.mrf.mxu0 }
 0x793   :  { %v7250_v40 = vadd.f32 %v7249_v9, %v7141_v39 }
 0x796   :  { %v7262_v42 = vpop.f32.mrf.mxu1 }
 0x797   :  { %v7263_v7 = vadd.f32 %v7262_v42, %v7250_v40 }
 0x799   :  { %v7266_v44 = vmax.f32 %v7263_v7, 0.0 }
 0x79a   :  { %v7251_v45 = vpop.f32.mrf.mxu0 }
 0x79b   :  { %v7280_v11 = vpack.c.bf16 %v7266_v44, %v7266_v44 }
 0x79d   :  { %11094 = vmatmul.msk.bf16.vlgmr.msrb.gmra.mxu3 %vm7321_vm7, %v7280_v11 }
 0x79e   :  { %v7264_v28 = vpop.f32.mrf.mxu1 }
 0x820   :  { %v7337_v49 = vpop.f32.mrf.mxu3 }
 0x821   :  { %v13440_v50 = vadd.f32 %v7337_v49, %v7281_v46 }
 0x828   :  { %v7339_v51 = vpop.f32.mrf.mxu3 }
 0x829   :  { %12501 = dma.done.wait [#allocation6 + $0x3], 832 }
 0x82a   :  { %12502 = vsyncadd [#allocation6 + $0x3], 4294966464  ;;  %v7357_v8 = vld [vmem:[#allocation5 + $0x30] sm:$0x3]  ;;  %vm7449_vm8 = vcmask 1040384   ;;  %v11981_v61 = vld [vmem:[#allocation5 + $0x28] sm:$0xff] }
 0x82b   :  { %v7384_v43 = vunpack.c.l.b16 %v7357_v8  ;;  %v7421_v53 = vld [vmem:[%s13525_s19 + $0x18] sm:$0x1]  ;;  %v11984_v0 = vld [vmem:[%s13525_s19 + $0x10] sm:$0xff]  ;;  %v11980_v16 = vld [vmem:[#allocation5 + $0x20] sm:$0xff]  ;;  %vm7445_vm9 = vcmask 408576   ;;  %v7467_v38 = vrot.slane %v13338_v4, 7 }
 0x82c   :  { %v7437_v57 = vunpack.c.l.b16 %v7421_v53  ;;  %v11979_v55 = vld [vmem:[#allocation5 + $0x18] sm:$0xff]  ;;  %v11978_v1 = vld [vmem:[#allocation5 + $0x10] sm:$0xff]  ;;  %v11977_v2 = vld [vmem:[#allocation5 + $0x8] sm:$0xff]  ;;  %v7470_v41 = vrot.slane %v13412_v23, 6  ;;  %v7473_v34 = vrot.slane %v13440_v50, 5  ;;  %vm7480_vm10 = vcmask 1042432  }
 0x82d   :  { %v7391_v54 = vpack.c.b16 %v7384_v43, %v7384_v43  ;;  %v11976_v62 = vld [vmem:[#allocation5] sm:$0xff]  ;;  %v11982_v15 = vld [vmem:[%s13525_s19] sm:$0xff]  ;;  %v7358_v52 = vld [vmem:[#allocation19] sm:$0x1]  ;;  %v7478_v25 = vsel %vm7449_vm8, %v13163_v20, %v7467_v38  ;;  %vm7489_vm11 = vcmask 80896   ;;  %s13568_s1 = sld [smem:[#allocation70_spill]] }
 0x82e   :  { %v7441_v60 = vpack.c.b16 %v7437_v57, %v7437_v57  ;;  %v11983_v10 = vld [vmem:[%s13525_s19 + $0x8] sm:$0xff]  ;;  %v7523_v35 = vld [vmem:[#allocation31 + $0x30] sm:$0x3]  ;;  %v7522_v3 = vld [vmem:[#allocation31 + $0x28] sm:$0xff]  ;;  %v7479_v17 = vsel %vm6385_vm3, %v7478_v25, %v7470_v41  ;;  %vm7592_vm12 = vcmask 4096   ;;  %s13569_s26 = sld [smem:[#allocation72_spill]] }
 0x82f   :  { %v7399_v58 = vsel %vm6385_vm3, %v7391_v54, 0  ;;  %v7484_v47 = vld [vmem:[#allocation28 + $0x8] sm:$0x3]  ;;  %v7483_v22 = vld [vmem:[#allocation28] sm:$0xff]  ;;  %11135 = vmatpush.msk.msra.mxu3 %vm6385_vm3, %v7523_v35  ;;  %v7521_v14 = vld [vmem:[#allocation31 + $0x20] sm:$0xff]  ;;  %v7481_v24 = vsel %vm7480_vm10, %v7479_v17, %v7473_v34  ;;  %vm7665_vm6 = vcmask 77824  }
 0x830   :  { %7402 = vmatpush.bf16.msra.mxu2 %v7399_v58  ;;  %v7451_v48 = vsel %vm7449_vm8, %v7441_v60, 0  ;;  %11133 = vmatpush.msk.msra.mxu1 %vm6385_vm3, %v7484_v47  ;;  %v7520_v37 = vld [vmem:[#allocation31 + $0x18] sm:$0xff]  ;;  %v7423_v13 = vld [vmem:[#allocation26] sm:$0x1]  ;;  %v7519_v23 = vld [vmem:[#allocation31 + $0x10] sm:$0xff]  ;;  %s12528_s20 = smov [#allocation34]  }
 0x831   :  { %7457 = vmatpush.bf16.msrb.mxu0 %v7451_v48  ;;  %7544 = vmatpush.msra.mxu3 %v7522_v3  ;;  %v7518_v20 = vld [vmem:[#allocation31 + $0x8] sm:$0xff]  ;;  %v7517_v29 = vld [vmem:[#allocation31] sm:$0xff]  ;;  %v12012_v26 = vld [vmem:[#allocation29] ss:$0 sm:$0xff]  ;;  %s7680_s23 = sshll.u32 %s12528_s20, 4  ;;  %s13570_s22 = sld [smem:[#allocation71_spill]]  ;;  %s7681_s23 = int_to_ptr.vmem [resolvable:$true] %s7680_s23 }
 0x832   :  { %7511 = vmatpush.msra.mxu1 %v7483_v22  ;;  %v12013_v7 = vld [vmem:[#allocation32] ss:$0 sm:$0xff]  ;;  %v12014_v28 = vld [vmem:[#allocation7] ss:$0 sm:$0xff] }
 0x833   :  { %7545 = vmatpush.msra.mxu3 %v7521_v14  ;;  %v7561_v30 = vld [vmem:[%s13568_s1 + $0x30] sm:$0x3]  ;;  %v7560_v59 = vld [vmem:[%s13568_s1 + $0x28] sm:$0xff]  ;;  %v7559_v31 = vld [vmem:[%s13568_s1 + $0x20] sm:$0xff] }
 0x834   :  { %7403 = vmatpush.bf16.msra.mxu2 %v11981_v61  ;;  %11137 = vmatpush.msk.msrb.mxu1 %vm6385_vm3, %v7561_v30  ;;  %v7558_v63 = vld [vmem:[%s13568_s1 + $0x18] sm:$0xff]  ;;  %v7557_v9 = vld [vmem:[%s13568_s1 + $0x10] sm:$0xff]  ;;  %v7556_v40 = vld [vmem:[%s13568_s1 + $0x8] sm:$0xff] }
 0x835   :  { %7458 = vmatpush.bf16.msrb.mxu0 %v11984_v0  ;;  %7546 = vmatpush.msra.mxu3 %v7520_v37  ;;  %v7555_v42 = vld [vmem:[%s13568_s1] sm:$0xff] }
 0x836   :  { %7582 = vmatpush.msrb.mxu1 %v7560_v59 }
 0x837   :  { %7547 = vmatpush.msra.mxu3 %v7519_v23  ;;  %s7682_s17 = sshll.u32 %s13570_s22, 4  ;;  %s7683_s17 = int_to_ptr.hbm [resolvable:$true] %s7682_s17 }
 0x838   :  { %7404 = vmatpush.bf16.msra.mxu2 %v11980_v16  ;;  %7583 = vmatpush.msrb.mxu1 %v7559_v31 }
 0x839   :  { %7459 = vmatpush.bf16.msrb.mxu0 %v11983_v10  ;;  %7548 = vmatpush.msra.mxu3 %v7518_v20 }
 0x83a   :  { %7584 = vmatpush.msrb.mxu1 %v7558_v63 }
 0x83b   :  { %7549 = vmatpush.msra.mxu3 %v7517_v29 }
 0x83c   :  { %7405 = vmatpush.bf16.msra.mxu2 %v11979_v55  ;;  %7585 = vmatpush.msrb.mxu1 %v7557_v9 }
 0x83d   :  { %7460 = vmatpush.bf16.msrb.mxu0 %v11982_v15 }
 0x83e   :  { %7586 = vmatpush.msrb.mxu1 %v7556_v40 }
 0x840   :  { %7406 = vmatpush.bf16.msra.mxu2 %v11978_v1  ;;  %7587 = vmatpush.msrb.mxu1 %v7555_v42 }
 0x844   :  { %7407 = vmatpush.bf16.msra.mxu2 %v11977_v2 }
 0x848   :  { %7408 = vmatpush.bf16.msra.mxu2 %v11976_v62  ;;  %v12527_v62 = vmov 0  }
 0x849   :  { %12011 = vset.pattern.permute.xlu0 %v12527_v62 }
 0x84b   :  { %11119 = vmatmul.msk.bf16.vlgmr.msra.gmra.mxu2 %vm7321_vm7, %v7280_v11  ;;  %vm7673_vm7 = vcmask 73728  }
 0x8ce   :  { %v7410_v33 = vpop.f32.mrf.mxu2 }
 0x8cf   :  { %v7411_v5 = vadd.f32 %v7410_v33, %v7358_v52 }
 0x8d1   :  { %v7414_v56 = vmax.f32 %v7411_v5, 0.0 }
 0x8d3   :  { %v7422_v27 = vpack.c.bf16 %v7414_v56, %v7414_v56 }
 0x8d5   :  { %11132 = vmatmul.msk.bf16.vlgmr.msrb.gmra.mxu0 %vm7445_vm9, %v7422_v27 }
 0x8d6   :  { %v7412_v6 = vpop.f32.mrf.mxu2 }
 0x952   :  { %v7462_v19 = vpop.f32.mrf.mxu0 }
 0x953   :  { %v7463_v32 = vadd.f32 %v7462_v19, %v7423_v13 }
 0x955   :  { %v7476_v21 = vrot.slane %v7463_v32, 4 }
 0x957   :  { %v13467_v18 = vsel %vm4070_vm1, %v7481_v24, %v7476_v21 }
 0x958   :  { %11134 = vmatmul.msk.f32.vlgmr.msra.gmra.mxu1 %vm7489_vm11, %v13467_v18 }
 0x95a   :  { %v7464_v4 = vpop.f32.mrf.mxu0 }
 0x9d5   :  { %v7513_v36 = vpop.f32.mrf.mxu1 }
 0x9d6   :  { %v7514_v12 = vadd.f32 %v12012_v26, %v7513_v36 }
 0x9d8   :  { %v7516_v39 = vmax.f32 %v7514_v12, 0.0 }
 0x9da   :  { %11136 = vmatmul.msk.f32.vlgmr.msra.gmra.mxu3 %vm7445_vm9, %v7516_v39 }
 0xa5d   :  { %v7551_v44 = vpop.f32.mrf.mxu3 }
 0xa5e   :  { %v7552_v11 = vadd.f32 %v12013_v7, %v7551_v44 }
 0xa60   :  { %v7554_v45 = vmax.f32 %v7552_v11, 0.0 }
 0xa62   :  { %11138 = vmatmul.msk.f32.vlgmr.msrb.gmra.mxu1 %vm7445_vm9, %v7554_v45 }
 0xadf   :  { %v7589_v46 = vpop.f32.mrf.mxu1 }
 0xae0   :  { %v7590_v49 = vadd.f32 %v12014_v28, %v7589_v46 }
 0xae2   :  { %v7593_v50 = vsel %vm7592_vm12, %v7590_v49, inf  ;;  %v7600_v51 = vsel %vm7592_vm12, %v7590_v49, -inf }
 0xae3   :  { %v7594_v8 = vrot.slane %v7593_v50, 4  ;;  %v7601_v43 = vrot.slane %v7600_v51, 4 }
 0xae5   :  { %v7595_v53 = vmin.f32 %v7593_v50, %v7594_v8  ;;  %v7602_v54 = vmax.f32 %v7600_v51, %v7601_v43 }
 0xae7   :  { %v7596_v57 = vrot.slane %v7595_v53, 2  ;;  %v7603_v58 = vrot.slane %v7602_v54, 2 }
 0xae9   :  { %v7597_v60 = vmin.f32 %v7595_v53, %v7596_v57  ;;  %v7604_v61 = vmax.f32 %v7602_v54, %v7603_v58 }
 0xaeb   :  { %v7598_v48 = vrot.slane %v7597_v60, 1  ;;  %v7605_v0 = vrot.slane %v7604_v61, 1 }
 0xaed   :  { %v7599_v16 = vmin.f32 %v7597_v60, %v7598_v48  ;;  %v7606_v55 = vmax.f32 %v7604_v61, %v7605_v0 }
 0xaef   :  { %v7607_v1 = vsub.f32 %v7606_v55, %v7599_v16  ;;  %v7610_v47 = vsub.f32 %v7590_v49, %v7599_v16 }
 0xaf1   :  { %vm7608_vm13 = vcmp.eq.f32.partialorder %v7607_v1, 0.0 }
 0xaf2   :  { %v7609_v2 = vsel %vm7608_vm13, 1.0, %v7607_v1 }
 0xaf3   :  { %12015 = vrcp.f32 %v7609_v2  ;;  %v7622_v33 = vand.u32 2147483648, %v7609_v2  ;;  %v7620_v56 = vand.u32 2147483647, %v7609_v2  ;;  %vm7616_vm15 = vweird.f32 %v7609_v2 }
 0xaf5   :  { %v7623_v6 = vor.u32 1.1754944e-38, %v7622_v33  ;;  %vm7621_vm1 = vcmp.eq.f32.partialorder %v7620_v56, 8.507059e+37 }
 0xaf9   :  { %v12016_v10 = vpop.eup %12015 }
 0xafa   :  { %v7612_v15 = vmul.f32 %v12016_v10, %v7609_v2  ;;  %vm7617_vm14 = vweird.f32 %v12016_v10 }
 0xafb   :  { %vm7618_vm0 = vmor %vm7616_vm15, %vm7617_vm14 }
 0xafc   :  { %v7613_v52 = vsub.f32 1.0, %v7612_v15 }
 0xafe   :  { %v7614_v5 = vmul.f32 %v12016_v10, %v7613_v52 }
 0xb00   :  { %v7615_v27 = vadd.f32 %v12016_v10, %v7614_v5 }
 0xb02   :  { %v7619_v22 = vsel %vm7618_vm0, %v12016_v10, %v7615_v27 }
 0xb03   :  { %v7624_v35 = vsel %vm7621_vm1, %v7623_v6, %v7619_v22 }
 0xb04   :  { %v7625_v3 = vmul.f32 %v7624_v35, %v7610_v47 }
 0xb06   :  { %v7626_v14 = vsel %vm7592_vm12, %v7625_v3, -inf }
 0xb07   :  { %v7627_v37 = vrot.slane %v7626_v14, 4 }
 0xb09   :  { %v7628_v38 = vmax.f32 %v7626_v14, %v7627_v37 }
 0xb0b   :  { %v7629_v41 = vrot.slane %v7628_v38, 2 }
 0xb0d   :  { %v7630_v25 = vmax.f32 %v7628_v38, %v7629_v41 }
 0xb0f   :  { %v7631_v13 = vrot.slane %v7630_v25, 1 }
 0xb11   :  { %v7632_v34 = vmax.f32 %v7630_v25, %v7631_v13 }
 0xb13   :  { %v7633_v17 = vsub.f32 %v7625_v3, %v7632_v34 }
 0xb15   :  { %v7634_v19 = vmul.f32 1.442695, %v7633_v17 }
 0xb17   :  { %12017 = vpow2.f32 %v7634_v19 }
 0xb1d   :  { %v12018_v32 = vpop.eup %12017 }
 0xb1e   :  { %v7636_v24 = vsel %vm7592_vm12, %v12018_v32, 0.0 }
 0xb1f   :  { %v7637_v21 = vrot.slane %v7636_v24, 4 }
 0xb21   :  { %v7638_v4 = vadd.f32 %v7637_v21, %v7636_v24 }
 0xb23   :  { %v7639_v23 = vrot.slane %v7638_v4, 2 }
 0xb25   :  { %v7640_v20 = vadd.f32 %v7639_v23, %v7638_v4 }
 0xb27   :  { %v7641_v29 = vrot.slane %v7640_v20, 1 }
 0xb29   :  { %v7642_v30 = vadd.f32 %v7641_v29, %v7640_v20 }
 0xb2b   :  { %12019 = vrcp.f32 %v7642_v30  ;;  %v7654_v26 = vand.u32 2147483648, %v7642_v30  ;;  %v7652_v12 = vand.u32 2147483647, %v7642_v30  ;;  %vm7648_vm3 = vweird.f32 %v7642_v30 }
 0xb2d   :  { %v7655_v9 = vor.u32 1.1754944e-38, %v7654_v26  ;;  %vm7653_vm5 = vcmp.eq.f32.partialorder %v7652_v12, 8.507059e+37 }
 0xb31   :  { %v12020_v59 = vpop.eup %12019 }
 0xb32   :  { %v7644_v31 = vmul.f32 %v12020_v59, %v7642_v30  ;;  %vm7649_vm2 = vweird.f32 %v12020_v59 }
 0xb33   :  { %vm7650_vm4 = vmor %vm7648_vm3, %vm7649_vm2 }
 0xb34   :  { %v7645_v63 = vsub.f32 1.0, %v7644_v31 }
 0xb36   :  { %v7646_v36 = vmul.f32 %v12020_v59, %v7645_v63 }
 0xb38   :  { %v7647_v39 = vadd.f32 %v12020_v59, %v7646_v36 }
 0xb3a   :  { %v7651_v40 = vsel %vm7650_vm4, %v12020_v59, %v7647_v39 }
 0xb3b   :  { %v7656_v42 = vsel %vm7653_vm5, %v7655_v9, %v7651_v40 }
 0xb3c   :  { %v7657_v7 = vmul.f32 %v12018_v32, %v7656_v42 }
 0xb3e   :  { %7661 = vperm.xlu0 %12011, %v7657_v7   ;;  %7658 = vst.msk [vmem:[%s13569_s26] sm:$0x1f] %vm7592_vm12, %v7657_v7 }
 0xbb0   :  { %v7662_v44 = vpop.permute.xlu0 %7661 }
 0xbb1   :  { %v7664_v11 = vmul.f32 %v7662_v44, %v13467_v18 }
 0xbb3   :  { %v7666_v45 = vsel %vm7665_vm6, %v7664_v11, 0.0 }
 0xbb4   :  { %v7667_v28 = vrot.slane %v7666_v45, 4 }
 0xbb6   :  { %v7668_v46 = vadd.f32 %v7667_v28, %v7666_v45 }
 0xbb8   :  { %v7669_v49 = vrot.slane %v7668_v46, 2 }
 0xbba   :  { %v7670_v50 = vadd.f32 %v7669_v49, %v7668_v46 }
 0xbbc   :  { %v7671_v51 = vrot.slane %v7670_v50, 1 }
 0xbbe   :  { %v7672_v8 = vadd.f32 %v7671_v51, %v7670_v50 }
 0xbc0   :  { %7674 = vst.msk [vmem:[#allocation34] sm:$0x1] %vm7673_vm7, %v7672_v8 }
 0xbc1   :  { %7685 = dma.vmem_to_hbm [thread:$0]  %s7681_s23, 16, %s7683_s17, [#allocation10]  }
 0xbc2   :  { %12503 = dma.done.wait [#allocation10], 16  }
 0xbc3   :  { %12504 = vsyncadd [#allocation10], 4294967280 }
 0xbc4   :  { %7694 = vsyncpa [#allocation9], 1 }
 0xbc5   :  { %7695 = vsyncpa [#allocation12], 1 }
 0xbc6   :  { %7696 = vsyncpa [#allocation15], 1 }
 0xbc7   :  { %7697 = vsyncpa [#allocation18], 1 }
 0xbc8   :  { %7698 = vsyncpa [#allocation21], 1 }
 0xbc9   :  { %7699 = vsyncpa [#allocation24], 1 }
 0xbca   :  { %7700 = vsyncpa [#allocation27], 1 }
 0xbcb   :  { %7701 = vsyncpa [#allocation30], 1 }
 0xbcc   :  { %7702 = vsyncpa [#allocation33], 1 }
 0xbcd   :  { %7703 = vsyncpa [#allocation10], 1 }
 0xbce   :  { %7704 = vsyncmov [#allocation6] }
 0xbd1   :  { %s7705_s6 = vpop.sfrf %7704 }
 0xbd2   :  { %p11139_p0 = scmp.ne.s32.totalorder %s7705_s6, 0 }
 0xbd4   :  { %7709 = shalt.err (%p11139_p0)  }
 0xbd5   :  { %7711 = vsyncmov [#allocation6 + $0x1] }
 0xbd8   :  { %s7712_s0 = vpop.sfrf %7711 }
 0xbd9   :  { %p11140_p1 = scmp.ne.s32.totalorder %s7712_s0, 0 }
 0xbdb   :  { %7716 = shalt.err (%p11140_p1)  }
 0xbdc   :  { %7718 = vsyncmov [#allocation6 + $0x2] }
 0xbdf   :  { %s7719_s11 = vpop.sfrf %7718 }
 0xbe0   :  { %p11141_p2 = scmp.ne.s32.totalorder %s7719_s11, 0 }
 0xbe2   :  { %7723 = shalt.err (%p11141_p2)  }
 0xbe3   :  { %7725 = vsyncmov [#allocation6 + $0x3] }
 0xbe6   :  { %s7726_s29 = vpop.sfrf %7725 }
 0xbe7   :  { %p11142_p3 = scmp.ne.s32.totalorder %s7726_s29, 0 }
 0xbe9   :  { %7730 = shalt.err (%p11142_p3)  }

</bundles_post_ra>
